<compile_context>
chip_gen: v7x
topology: tpu7x:2x2x1
jax: 0.10.0
libtpu: 0.0.40
codegen_flags: <defaults>
</compile_context>

<pallas_src>
import functools
import numpy as np
import jax
import jax.numpy as jnp
from jax.experimental import pallas as pl
from jax.experimental.pallas import tpu as pltpu

F32 = jnp.float32
BF16 = jnp.bfloat16


def _elu(v):
    # exp only evaluated on the non-positive branch values -> no spurious inf.
    return jnp.where(v > 0, v, jnp.exp(jnp.minimum(v, 0.0)) - 1.0)


def _vmem_limit_bytes():
    # ~3/4 of physical VMEM, capped at 96 MiB (v5e/v6e: 128 MiB -> 96 MiB;
    # v7x: 64 MiB -> 48 MiB).  Fallback 48 MiB is safe on every generation.
    try:
        cap = pltpu.get_tpu_info().vmem_capacity_bytes
        return int(min(cap * 3 // 4, 96 * 1024 * 1024))
    except Exception:
        return 48 * 1024 * 1024


# --------------------------------------------------------------------------
# Kernel 1: GCNConv (+ folded BN1) + ELU, source-tiled accumulation, fused
#           pre-mix of the SAGE linears (h1 @ W2_l, h1 @ W2_r + b2).
# --------------------------------------------------------------------------
def gcn_premix_kernel(adj_ref, xw1_ref, b1_ref, w2l_ref, w2r_ref, b2_ref,
                      h1wl_ref, h1wr_ref, acc_ref):
    k = pl.program_id(1)

    @pl.when(k == 0)
    def _():
        acc_ref[...] = jnp.zeros(acc_ref.shape, F32)

    # adj_ref: [T, Ts] bf16, xw1_ref: [Ts, Hp] bf16 (x @ W1 pre-projected).
    acc_ref[...] += jnp.dot(adj_ref[...], xw1_ref[...],
                            preferred_element_type=F32)

    @pl.when(k == pl.num_programs(1) - 1)
    def _():
        h1 = _elu(acc_ref[...] + b1_ref[...]).astype(BF16)          # [T, Hp]
        h1wl_ref[...] = jnp.dot(h1, w2l_ref[...],
                                preferred_element_type=F32).astype(BF16)
        h1wr_ref[...] = (jnp.dot(h1, w2r_ref[...],
                                 preferred_element_type=F32) + b2_ref[...])


# --------------------------------------------------------------------------
# Kernel 2: SAGEConv(mean) (+ folded BN2) + ELU, source-tiled aggregation of
#           the pre-mixed h1@W2_l, fused batched GAT projection + scores.
# --------------------------------------------------------------------------
def sage_gat_project_kernel(adj_ref, h1wl_ref, h1wr_ref, wall_ref, v_ref,
                            xh_ref, score_ref, acc_ref):
    k = pl.program_id(1)

    @pl.when(k == 0)
    def _():
        acc_ref[...] = jnp.zeros(acc_ref.shape, F32)

    acc_ref[...] += jnp.dot(adj_ref[...], h1wl_ref[...],
                            preferred_element_type=F32)

    @pl.when(k == pl.num_programs(1) - 1)
    def _():
        h2 = _elu(acc_ref[...] + h1wr_ref[...]).astype(BF16)        # [T, Hp]
        # Batched 3-head value projection (BN3 scale and 1/heads folded in).
        xh_ref[...] = jnp.dot(h2, wall_ref[...],
                              preferred_element_type=F32).astype(BF16)
        # All six attention scores at once: cols [0..2]=src_h, [3..5]=dst_h.
        score_ref[...] = jnp.dot(h2, v_ref[...], preferred_element_type=F32)


# --------------------------------------------------------------------------
# Kernel 3: GAT attention (3 heads, concat=False) (+ folded BN3) + ELU as a
#           flash-style online softmax over source-node column tiles.
# --------------------------------------------------------------------------
def gat_attention_kernel(mask_ref, sdst_ref, asrc_ref, xh_ref, b3_ref, out_ref,
                         m_sc, l_sc, acc_sc, *, num_heads):
    k = pl.program_id(1)
    hp = out_ref.shape[-1]

    @pl.when(k == 0)
    def _():
        m_sc[...] = jnp.full(m_sc.shape, -1e30, F32)
        l_sc[...] = jnp.zeros(l_sc.shape, F32)
        acc_sc[...] = jnp.zeros(acc_sc.shape, F32)

    maskf = mask_ref[...].astype(F32)                    # [T, Tc] 0/1 (int8 in HBM)
    for h in range(num_heads):                           # unrolled at trace time
        a_dst = sdst_ref[:, num_heads + h:num_heads + h + 1]   # [T, 1]
        a_src = asrc_ref[h:h + 1, :]                            # [1, Tc]
        e = a_dst + a_src
        e = jnp.maximum(e, 0.2 * e)                      # leaky_relu(0.2)
        m_old = m_sc[h]
        m_new = jnp.maximum(m_old, jnp.max(e, axis=-1, keepdims=True))
        corr = jnp.exp(m_old - m_new)
        p = jnp.exp(e - m_new) * maskf                   # masked probs -> exactly 0
        l_sc[h] = corr * l_sc[h] + jnp.sum(p, axis=-1, keepdims=True)
        acc_sc[h] = corr * acc_sc[h] + jnp.dot(
            p.astype(BF16), xh_ref[:, h * hp:(h + 1) * hp],
            preferred_element_type=F32)
        m_sc[h] = m_new

    @pl.when(k == pl.num_programs(1) - 1)
    def _():
        res = jnp.zeros(out_ref.shape, F32)
        for h in range(num_heads):
            res = res + acc_sc[h] * pl.reciprocal(l_sc[h], approx=True)
        out_ref[...] = _elu(res + b3_ref[...]).astype(out_ref.dtype)


# --------------------------------------------------------------------------
# Kernel 4: global_mean_pool (node-chunk accumulated) -> cosine sim to
#           prototypes -> softmax -> prototype mixture -> classifier/decoder.
# --------------------------------------------------------------------------
def prototype_head_kernel(pool_ref, h3_ref, proto_ref, proto_t_ref, pnorm_ref,
                          wcls_ref, bcls_ref, wd1_ref, bd1_ref, wd2_ref, bd2_ref,
                          logits_ref, pemb_ref, assign_ref, recon_ref, pooled_acc):
    i = pl.program_id(0)

    @pl.when(i == 0)
    def _():
        pooled_acc[...] = jnp.zeros(pooled_acc.shape, F32)

    pooled_acc[...] += jnp.dot(pool_ref[...], h3_ref[...].astype(F32),
                               preferred_element_type=F32)          # [G, Hp]

    @pl.when(i == pl.num_programs(0) - 1)
    def _():
        pooled = pooled_acc[...]
        eps = jnp.float32(1e-8)
        xnorm = jnp.maximum(
            jnp.sqrt(jnp.sum(pooled * pooled, axis=-1, keepdims=True)), eps)
        sims = jnp.dot(pooled, proto_t_ref[...], preferred_element_type=F32)
        sims = sims / (xnorm * pnorm_ref[...])                      # cosine sim
        sims = sims - jnp.max(sims, axis=-1, keepdims=True)
        es = jnp.exp(sims)
        assign = es / jnp.sum(es, axis=-1, keepdims=True)           # exact divide
        pemb = jnp.dot(assign, proto_ref[...], preferred_element_type=F32)
        logits_ref[...] = jnp.dot(pemb, wcls_ref[...],
                                  preferred_element_type=F32) + bcls_ref[...]
        hd = jnp.maximum(jnp.dot(pooled, wd1_ref[...],
                                 preferred_element_type=F32) + bd1_ref[...], 0.0)
        recon_ref[...] = jnp.dot(hd, wd2_ref[...],
                                 preferred_element_type=F32) + bd2_ref[...]
        pemb_ref[...] = pemb
        assign_ref[...] = assign


# --------------------------------------------------------------------------
# Forward wrapper.
# --------------------------------------------------------------------------
@functools.partial(jax.jit,
                   static_argnames=("hidden_dim", "tile_n", "tile_src", "num_heads"))
def enhanced_gcn_forward(x, adj_gcn, adj_mean, mask, pool, params,
                         *, hidden_dim, tile_n, tile_src, num_heads=3):
    n, _ = x.shape
    g = pool.shape[0]
    hp = params["w1"].shape[1]
    spad = params["v_att"].shape[1]
    c = params["w_cls"].shape[1]
    p_ = params["prototypes"].shape[0]
    h2dim = params["w_d1"].shape[1]
    fdim = params["w_d2"].shape[1]

    assert n % tile_n == 0 and n % tile_src == 0
    assert tile_n % 32 == 0 and tile_src % 128 == 0   # int8 mask / lane-dense strips
    assert hp % 128 == 0

    grid2 = (n // tile_n, n // tile_src)
    vmem_limit = _vmem_limit_bytes()
    cp2 = pltpu.CompilerParams(dimension_semantics=("parallel", "arbitrary"),
                               vmem_limit_bytes=vmem_limit)
    cp1 = pltpu.CompilerParams(dimension_semantics=("arbitrary",),
                               vmem_limit_bytes=vmem_limit)

    # Pre-project node features once (tiny [N,F]x[F,Hp] matmul) so kernel 1 is
    # a single lane-dense bf16 MXU pass per block (review: layer-1 reorder).
    xw1 = jnp.dot(x, params["w1"]).astype(BF16)

    adj_blk = lambda: pl.BlockSpec((tile_n, tile_src), lambda i, k: (i, k))
    dst_blk = lambda last: pl.BlockSpec((tile_n, last), lambda i, k: (i, 0))
    src_blk = lambda last: pl.BlockSpec((tile_src, last), lambda i, k: (k, 0))
    full2 = lambda shape: pl.BlockSpec(shape, lambda i, k, _nd=len(shape): (0,) * _nd)
    full1 = lambda shape: pl.BlockSpec(shape, lambda i, _nd=len(shape): (0,) * _nd)

    # ---- layer 1: GCNConv + BN1(folded) + ELU, fused SAGE pre-mix ----
    h1wl, h1wr = pl.pallas_call(
        gcn_premix_kernel,
        grid=grid2,
        in_specs=[adj_blk(), src_blk(hp), full2((1, hp)),
                  full2((hp, hp)), full2((hp, hp)), full2((1, hp))],
        out_specs=[dst_blk(hp), dst_blk(hp)],
        out_shape=(jax.ShapeDtypeStruct((n, hp), BF16),
                   jax.ShapeDtypeStruct((n, hp), F32)),
        scratch_shapes=[pltpu.VMEM((tile_n, hp), F32)],
        compiler_params=cp2,
    )(adj_gcn, xw1, params["b1"], params["w2_l"], params["w2_r"], params["b2"])

    # ---- layer 2: SAGEConv(mean) + BN2(folded) + ELU, fused GAT projection ----
    xh_all, scores = pl.pallas_call(
        sage_gat_project_kernel,
        grid=grid2,
        in_specs=[adj_blk(), src_blk(hp), dst_blk(hp),
                  full2((hp, num_heads * hp)), full2((hp, spad))],
        out_specs=[dst_blk(num_heads * hp), dst_blk(spad)],
        out_shape=(jax.ShapeDtypeStruct((n, num_heads * hp), BF16),
                   jax.ShapeDtypeStruct((n, spad), F32)),
        scratch_shapes=[pltpu.VMEM((tile_n, hp), F32)],
        compiler_params=cp2,
    )(adj_mean, h1wl, h1wr, params["w_gat_all"], params["v_att"])

    # Tiny O(N) relayout of the per-source scores to a lane-major row layout
    # (needed as a [1, Tc] broadcast inside the attention kernel).
    a_src_t = jnp.zeros((8, n), F32).at[:num_heads, :].set(
        jnp.transpose(scores[:, :num_heads]))

    # ---- layer 3: GAT attention (flash-style over source tiles) ----
    h3 = pl.pallas_call(
        functools.partial(gat_attention_kernel, num_heads=num_heads),
        grid=grid2,
        in_specs=[adj_blk(),                                   # int8 mask blocks
                  dst_blk(spad),
                  pl.BlockSpec((8, tile_src), lambda i, k: (0, k)),
                  src_blk(num_heads * hp),
                  full2((1, hp))],
        out_specs=dst_blk(hp),
        out_shape=jax.ShapeDtypeStruct((n, hp), BF16),
        scratch_shapes=[pltpu.VMEM((num_heads, tile_n, 1), F32),
                        pltpu.VMEM((num_heads, tile_n, 1), F32),
                        pltpu.VMEM((num_heads, tile_n, hp), F32)],
        compiler_params=cp2,
    )(mask, scores, a_src_t, xh_all, params["b3"])

    # ---- graph-level head: chunk-accumulated mean pool + prototypes ----
    logits, pemb, assign, recon = pl.pallas_call(
        prototype_head_kernel,
        grid=(n // tile_n,),
        in_specs=[pl.BlockSpec((g, tile_n), lambda i: (0, i)),
                  pl.BlockSpec((tile_n, hp), lambda i: (i, 0)),
                  full1((p_, hp)), full1((hp, p_)), full1((1, p_)),
                  full1((hp, c)), full1((1, c)),
                  full1((hp, h2dim)), full1((1, h2dim)),
                  full1((h2dim, fdim)), full1((1, fdim))],
        out_specs=[full1((g, c)), full1((g, hp)), full1((g, p_)), full1((g, fdim))],
        out_shape=(jax.ShapeDtypeStruct((g, c), F32),
                   jax.ShapeDtypeStruct((g, hp), F32),
                   jax.ShapeDtypeStruct((g, p_), F32),
                   jax.ShapeDtypeStruct((g, fdim), F32)),
        scratch_shapes=[pltpu.VMEM((g, hp), F32)],
        compiler_params=cp1,
    )(pool, h3, params["prototypes"], params["prototypes_t"], params["proto_norm"],
      params["w_cls"], params["b_cls"], params["w_d1"], params["b_d1"],
      params["w_d2"], params["b_d2"])

    return logits, pemb[:, :hidden_dim], assign, recon


# --------------------------------------------------------------------------
# Host-side setup: dense graph operators + BN-folded / hidden-padded params.
# --------------------------------------------------------------------------
def build_graph(nodes_per_graph, num_graphs):
    n = nodes_per_graph * num_graphs
    A = np.zeros((n, n), np.float32)
    for gi in range(num_graphs):
        off = gi * nodes_per_graph
        for i in range(nodes_per_graph):
            a = off + i
            b = off + (i + 1) % nodes_per_graph
            A[a, b] = 1.0
            A[b, a] = 1.0                      # undirected ring; A[dst, src]
    A_sl = A + np.eye(n, dtype=np.float32)

    deg = A_sl.sum(axis=1)
    dinv = 1.0 / np.sqrt(deg)
    adj_gcn = dinv[:, None] * A_sl * dinv[None, :]   # GCN sym-norm, self loops

    indeg = np.maximum(A.sum(axis=1), 1.0)
    adj_mean = A / indeg[:, None]                     # SAGE mean aggregation

    pool = np.zeros((num_graphs, n), np.float32)
    batch = np.repeat(np.arange(num_graphs), nodes_per_graph)
    for gi in range(num_graphs):
        m = batch == gi
        pool[gi, m] = 1.0 / m.sum()

    return adj_gcn, adj_mean, A_sl, pool


def fold_bn(gamma, beta, mean, var, eps=1e-5):
    s = gamma / np.sqrt(var + eps)
    t = beta - mean * s
    return s.astype(np.float32), t.astype(np.float32)


def build_params(key, num_features, hidden, hidden_pad, num_classes,
                 num_prototypes, num_heads=3, score_pad=128):
    H, HP, F = hidden, hidden_pad, num_features
    ks = jax.random.split(key, 10)

    def rnd(k, shape, scale=0.2):
        return np.asarray(jax.random.normal(k, shape, dtype=jnp.float32)) * scale

    # raw parameters (shapes mirror the PyTorch module, weights stored [in, out])
    w_gcn = rnd(ks[0], (F, H));     b_gcn = rnd(ks[1], (H,), 0.1)
    w_sage_l = rnd(ks[2], (H, H));  b_sage = rnd(ks[3], (H,), 0.1)
    w_sage_r = rnd(ks[4], (H, H))
    w_gat = rnd(ks[5], (num_heads, H, H))
    att = rnd(ks[6], (2, num_heads, H))                  # [src/dst, head, H]
    b_gat = rnd(ks[7], (H,), 0.1)
    prototypes = np.asarray(jax.random.normal(ks[8], (num_prototypes, H),
                                              dtype=jnp.float32))   # torch.randn
    kc = jax.random.split(ks[9], 6)
    w_cls = rnd(kc[0], (H, num_classes)); b_cls = rnd(kc[1], (num_classes,), 0.1)
    w_d1 = rnd(kc[2], (H, 2 * H));        b_d1 = rnd(kc[3], (2 * H,), 0.1)
    w_d2 = rnd(kc[4], (2 * H, F));        b_d2 = rnd(kc[5], (F,), 0.1)

    # BatchNorm1d eval stats: gamma=1, beta=0, running_mean=0, running_var=1.
    ones, zeros = np.ones((H,), np.float32), np.zeros((H,), np.float32)
    s1, t1 = fold_bn(ones, zeros, zeros, ones)
    s2, t2 = fold_bn(ones, zeros, zeros, ones)
    s3, t3 = fold_bn(ones, zeros, zeros, ones)

    # ---- fold BN into the preceding linear; pad hidden 32 -> 128 (lane dense) ----
    w1 = np.zeros((F, HP), np.float32); w1[:, :H] = w_gcn * s1[None, :]
    b1 = np.zeros((1, HP), np.float32); b1[0, :H] = b_gcn * s1 + t1

    w2_l = np.zeros((HP, HP), np.float32); w2_l[:H, :H] = w_sage_l * s2[None, :]
    w2_r = np.zeros((HP, HP), np.float32); w2_r[:H, :H] = w_sage_r * s2[None, :]
    b2 = np.zeros((1, HP), np.float32); b2[0, :H] = b_sage * s2 + t2

    # Batched GAT heads: BN3 scale AND the 1/num_heads averaging fold into the
    # value projection; the attention-score vectors use the unscaled W.
    w_gat_all = np.zeros((HP, num_heads * HP), np.float32)
    v_att = np.zeros((HP, score_pad), np.float32)
    for h in range(num_heads):
        w_gat_all[:H, h * HP:h * HP + H] = w_gat[h] * (s3[None, :] / num_heads)
        v_att[:H, h] = w_gat[h] @ att[0, h]                  # src scores
        v_att[:H, num_heads + h] = w_gat[h] @ att[1, h]      # dst scores
    b3 = np.zeros((1, HP), np.float32); b3[0, :H] = b_gat * s3 + t3

    protos = np.zeros((num_prototypes, HP), np.float32); protos[:, :H] = prototypes
    protos_t = np.ascontiguousarray(protos.T)
    proto_norm = np.maximum(np.linalg.norm(prototypes, axis=1), 1e-8)
    proto_norm = proto_norm.reshape(1, -1).astype(np.float32)

    wc = np.zeros((HP, num_classes), np.float32); wc[:H] = w_cls
    wd1 = np.zeros((HP, 2 * H), np.float32); wd1[:H] = w_d1

    params = dict(
        w1=jnp.asarray(w1, F32), b1=jnp.asarray(b1, F32),
        w2_l=jnp.asarray(w2_l, BF16), w2_r=jnp.asarray(w2_r, BF16),
        b2=jnp.asarray(b2, F32),
        w_gat_all=jnp.asarray(w_gat_all, BF16), v_att=jnp.asarray(v_att, BF16),
        b3=jnp.asarray(b3, F32),
        prototypes=jnp.asarray(protos, F32), prototypes_t=jnp.asarray(protos_t, F32),
        proto_norm=jnp.asarray(proto_norm, F32),
        w_cls=jnp.asarray(wc, F32), b_cls=jnp.asarray(b_cls.reshape(1, -1), F32),
        w_d1=jnp.asarray(wd1, F32), b_d1=jnp.asarray(b_d1.reshape(1, -1), F32),
        w_d2=jnp.asarray(w_d2, F32), b_d2=jnp.asarray(b_d2.reshape(1, -1), F32),
    )
    raw = dict(w_gcn=w_gcn, b_gcn=b_gcn, w_sage_l=w_sage_l, b_sage=b_sage,
               w_sage_r=w_sage_r, w_gat=w_gat, att_src=att[0], att_dst=att[1],
               b_gat=b_gat, prototypes=prototypes, w_cls=w_cls, b_cls=b_cls,
               w_d1=w_d1, b_d1=b_d1, w_d2=w_d2, b_d2=b_d2)
    return params, raw


# --------------------------------------------------------------------------
# Pure-JAX f32 reference of the same forward (dense-graph emulation) for
# correctness validation of the kernels (bf16 path => loose tolerance).
# --------------------------------------------------------------------------
def reference_forward(x, A_selfloop, adj_gcn, adj_mean, pool, raw, num_heads=3):
    bn = lambda v: v / np.float32(np.sqrt(1.0 + 1e-5))
    h1 = jax.nn.elu(bn(adj_gcn @ (x @ raw["w_gcn"]) + raw["b_gcn"]))
    h2 = jax.nn.elu(bn(adj_mean @ h1 @ raw["w_sage_l"] + raw["b_sage"]
                       + h1 @ raw["w_sage_r"]))
    mask = A_selfloop > 0
    heads = []
    for h in range(num_heads):
        xw = h2 @ raw["w_gat"][h]
        src = xw @ raw["att_src"][h]
        dst = xw @ raw["att_dst"][h]
        e = jax.nn.leaky_relu(dst[:, None] + src[None, :], 0.2)
        e = jnp.where(mask, e, -1e9)
        alpha = jax.nn.softmax(e, axis=-1)
        heads.append(alpha @ xw)
    h3 = jax.nn.elu(bn(sum(heads) / num_heads + raw["b_gat"]))
    pooled = pool @ h3
    pn = jnp.maximum(jnp.linalg.norm(raw["prototypes"], axis=1), 1e-8)
    xn = jnp.maximum(jnp.linalg.norm(pooled, axis=1), 1e-8)
    sims = (pooled @ raw["prototypes"].T) / (xn[:, None] * pn[None, :])
    assign = jax.nn.softmax(sims, axis=-1)
    pemb = assign @ raw["prototypes"]
    logits = pemb @ raw["w_cls"] + raw["b_cls"]
    hd = jax.nn.relu(pooled @ raw["w_d1"] + raw["b_d1"])
    recon = hd @ raw["w_d2"] + raw["b_d2"]
    return logits, pemb, assign, recon


if __name__ == "__main__":
    NUM_FEATURES = 8
    HIDDEN = 32
    HIDDEN_PAD = 128          # lane-dense hidden width used inside the kernels
    NUM_CLASSES = 4
    NUM_PROTOTYPES = 5
    NODES_PER_GRAPH = 128
    NUM_GRAPHS = 2
    N = NODES_PER_GRAPH * NUM_GRAPHS
    TILE_N = 128              # destination-row tile (use 256+ at production N)
    TILE_SRC = 128            # source-column tile  (use 512 at production N)

    key = jax.random.PRNGKey(0)
    kx, kp = jax.random.split(key)
    x = jax.random.normal(kx, (N, NUM_FEATURES), dtype=jnp.float32)

    adj_gcn, adj_mean, A_sl, pool = build_graph(NODES_PER_GRAPH, NUM_GRAPHS)
    params, raw = build_params(kp, NUM_FEATURES, HIDDEN, HIDDEN_PAD,
                               NUM_CLASSES, NUM_PROTOTYPES)

    logits, proto_emb, assignments, recon = enhanced_gcn_forward(
        x,
        jnp.asarray(adj_gcn, BF16),
        jnp.asarray(adj_mean, BF16),
        jnp.asarray((A_sl > 0).astype(np.int8)),      # int8 attention mask
        jnp.asarray(pool, F32),
        params,
        hidden_dim=HIDDEN, tile_n=TILE_N, tile_src=TILE_SRC)
    jax.block_until_ready((logits, proto_emb, assignments, recon))

    assert logits.shape == (NUM_GRAPHS, NUM_CLASSES)
    assert proto_emb.shape == (NUM_GRAPHS, HIDDEN)
    assert assignments.shape == (NUM_GRAPHS, NUM_PROTOTYPES)
    assert recon.shape == (NUM_GRAPHS, NUM_FEATURES)
    for t in (logits, proto_emb, assignments, recon):
        assert bool(jnp.all(jnp.isfinite(t)))
    assert bool(jnp.allclose(jnp.sum(assignments, axis=-1), 1.0, atol=1e-4))

    # Validate against the pure-JAX f32 reference (bf16 kernel path -> ~1e-2 drift).
    ref = reference_forward(x, jnp.asarray(A_sl), jnp.asarray(adj_gcn),
                            jnp.asarray(adj_mean), jnp.asarray(pool), raw)
    for got, want in zip((logits, proto_emb, assignments, recon), ref):
        np.testing.assert_allclose(np.asarray(got), np.asarray(want),
                                   rtol=5e-2, atol=5e-2)

    print("KERNEL_OK")
</pallas_src>

<mosaic_0001>
module attributes {stable_mosaic.version = 11 : i64} {
  func.func @sage_gat_project_kernel(%arg0: i32, %arg1: i32, %arg2: memref<128x128xbf16, #tpu.memory_space<vmem>>, %arg3: memref<128x128xbf16, #tpu.memory_space<vmem>>, %arg4: memref<128x128xf32, #tpu.memory_space<vmem>>, %arg5: memref<128x384xbf16, #tpu.memory_space<vmem>>, %arg6: memref<128x128xbf16, #tpu.memory_space<vmem>>, %arg7: memref<128x384xbf16, #tpu.memory_space<vmem>>, %arg8: memref<128x128xf32, #tpu.memory_space<vmem>>, %arg9: memref<128x128xf32, #tpu.memory_space<vmem>>) attributes {dimension_semantics = [#tpu.dimension_semantics<parallel>, #tpu.dimension_semantics<arbitrary>], iteration_bounds = array<i64: 2, 2>, scalar_prefetch = 0 : i64, scratch_operands = 1 : i64, tpu.core_type = #tpu.core_type<tc>, window_params = [{transform_indices = @transform_0, window_bounds = array<i64: 128, 128>}, {transform_indices = @transform_1, window_bounds = array<i64: 128, 128>}, {transform_indices = @transform_2, window_bounds = array<i64: 128, 128>}, {pipeline_mode = #tpu.pipeline_mode<synchronous>, transform_indices = @transform_3, window_bounds = array<i64: 128, 384>}, {pipeline_mode = #tpu.pipeline_mode<synchronous>, transform_indices = @transform_4, window_bounds = array<i64: 128, 128>}, {transform_indices = @transform_5, window_bounds = array<i64: 128, 384>}, {transform_indices = @transform_6, window_bounds = array<i64: 128, 128>}]} {
    %c0_i32 = arith.constant 0 : i32
    %0 = arith.cmpi eq, %arg1, %c0_i32 : i32
    %1 = arith.extui %0 : i1 to i32
    %c0_i32_0 = arith.constant 0 : i32
    %2 = arith.cmpi ne, %1, %c0_i32_0 : i32
    scf.if %2 {
      %cst_9 = arith.constant 0.000000e+00 : f32
      %12 = vector.broadcast %cst_9 : f32 to vector<128x128xf32>
      %c0_10 = arith.constant 0 : index
      %c0_11 = arith.constant 0 : index
      %13 = vector.load %arg9[%c0_10, %c0_11] : memref<128x128xf32, #tpu.memory_space<vmem>>, vector<128x128xf32>
      tpu.vector_store %arg9[%c0_10, %c0_11], %12 {strides = array<i32>} : memref<128x128xf32, #tpu.memory_space<vmem>>, vector<128x128xf32>,
    } else {
    }
    %c0 = arith.constant 0 : index
    %c0_1 = arith.constant 0 : index
    %3 = vector.load %arg9[%c0, %c0_1] : memref<128x128xf32, #tpu.memory_space<vmem>>, vector<128x128xf32>
    %c0_2 = arith.constant 0 : index
    %c0_3 = arith.constant 0 : index
    %4 = vector.load %arg2[%c0_2, %c0_3] : memref<128x128xbf16, #tpu.memory_space<vmem>>, vector<128x128xbf16>
    %c0_4 = arith.constant 0 : index
    %c0_5 = arith.constant 0 : index
    %5 = vector.load %arg3[%c0_4, %c0_5] : memref<128x128xbf16, #tpu.memory_space<vmem>>, vector<128x128xbf16>
    %cst = arith.constant dense<0.000000e+00> : vector<128x128xf32>
    %6 = tpu.matmul %4, %5, %cst {dimension_numbers = #tpu.dot_dimension_numbers<[1], [0], [0], [1], [0, 0, 1, 1], [], []>} : vector<128x128xbf16>, vector<128x128xbf16>, vector<128x128xf32> -> vector<128x128xf32>
    %7 = arith.addf %3, %6 : vector<128x128xf32>
    %c0_6 = arith.constant 0 : index
    %c0_7 = arith.constant 0 : index
    %8 = vector.load %arg9[%c0_6, %c0_7] : memref<128x128xf32, #tpu.memory_space<vmem>>, vector<128x128xf32>
    tpu.vector_store %arg9[%c0_6, %c0_7], %7 {strides = array<i32>} : memref<128x128xf32, #tpu.memory_space<vmem>>, vector<128x128xf32>,
    %c1_i32 = arith.constant 1 : i32
    %9 = arith.cmpi eq, %arg1, %c1_i32 : i32
    %10 = arith.extui %9 : i1 to i32
    %c0_i32_8 = arith.constant 0 : i32
    %11 = arith.cmpi ne, %10, %c0_i32_8 : i32
    scf.if %11 {
      %c0_9 = arith.constant 0 : index
      %c0_10 = arith.constant 0 : index
      %12 = vector.load %arg9[%c0_9, %c0_10] : memref<128x128xf32, #tpu.memory_space<vmem>>, vector<128x128xf32>
      %c0_11 = arith.constant 0 : index
      %c0_12 = arith.constant 0 : index
      %13 = vector.load %arg4[%c0_11, %c0_12] : memref<128x128xf32, #tpu.memory_space<vmem>>, vector<128x128xf32>
      %14 = arith.addf %12, %13 : vector<128x128xf32>
      %cst_13 = arith.constant 0.000000e+00 : f32
      %15 = vector.broadcast %cst_13 : f32 to vector<128x128xf32>
      %16 = arith.cmpf ogt, %14, %15 : vector<128x128xf32>
      %cst_14 = arith.constant 0.000000e+00 : f32
      %17 = vector.broadcast %cst_14 : f32 to vector<128x128xf32>
      %18 = arith.minimumf %14, %17 : vector<128x128xf32>
      %19 = math.exp %18 : vector<128x128xf32>
      %cst_15 = arith.constant 1.000000e+00 : f32
      %20 = vector.broadcast %cst_15 : f32 to vector<128x128xf32>
      %21 = arith.subf %19, %20 : vector<128x128xf32>
      %22 = arith.select %16, %14, %21 : vector<128x128xi1>, vector<128x128xf32>
      %23 = arith.truncf %22 : vector<128x128xf32> to vector<128x128xbf16>
      %c0_16 = arith.constant 0 : index
      %c0_17 = arith.constant 0 : index
      %24 = vector.load %arg5[%c0_16, %c0_17] : memref<128x384xbf16, #tpu.memory_space<vmem>>, vector<128x384xbf16>
      %cst_18 = arith.constant dense<0.000000e+00> : vector<128x384xf32>
      %25 = tpu.matmul %23, %24, %cst_18 {dimension_numbers = #tpu.dot_dimension_numbers<[1], [0], [0], [1], [0, 0, 1, 1], [], []>} : vector<128x128xbf16>, vector<128x384xbf16>, vector<128x384xf32> -> vector<128x384xf32>
      %26 = arith.truncf %25 : vector<128x384xf32> to vector<128x384xbf16>
      %c0_19 = arith.constant 0 : index
      %c0_20 = arith.constant 0 : index
      %27 = vector.load %arg7[%c0_19, %c0_20] : memref<128x384xbf16, #tpu.memory_space<vmem>>, vector<128x384xbf16>
      tpu.vector_store %arg7[%c0_19, %c0_20], %26 {strides = array<i32>} : memref<128x384xbf16, #tpu.memory_space<vmem>>, vector<128x384xbf16>,
      %c0_21 = arith.constant 0 : index
      %c0_22 = arith.constant 0 : index
      %28 = vector.load %arg6[%c0_21, %c0_22] : memref<128x128xbf16, #tpu.memory_space<vmem>>, vector<128x128xbf16>
      %cst_23 = arith.constant dense<0.000000e+00> : vector<128x128xf32>
      %29 = tpu.matmul %23, %28, %cst_23 {dimension_numbers = #tpu.dot_dimension_numbers<[1], [0], [0], [1], [0, 0, 1, 1], [], []>} : vector<128x128xbf16>, vector<128x128xbf16>, vector<128x128xf32> -> vector<128x128xf32>
      %c0_24 = arith.constant 0 : index
      %c0_25 = arith.constant 0 : index
      %30 = vector.load %arg8[%c0_24, %c0_25] : memref<128x128xf32, #tpu.memory_space<vmem>>, vector<128x128xf32>
      tpu.vector_store %arg8[%c0_24, %c0_25], %29 {strides = array<i32>} : memref<128x128xf32, #tpu.memory_space<vmem>>, vector<128x128xf32>,
    } else {
    }
    return
  }
  func.func @transform_0(%arg0: i32, %arg1: i32) -> (i32, i32) {
    %c0_i32 = arith.constant 0 : i32
    return %arg0, %arg1 : i32, i32
  }
  func.func @transform_1(%arg0: i32, %arg1: i32) -> (i32, i32) {
    %c0_i32 = arith.constant 0 : i32
    %c0_i32_0 = arith.constant 0 : i32
    return %arg1, %c0_i32 : i32, i32
  }
  func.func @transform_2(%arg0: i32, %arg1: i32) -> (i32, i32) {
    %c0_i32 = arith.constant 0 : i32
    %c0_i32_0 = arith.constant 0 : i32
    return %arg0, %c0_i32 : i32, i32
  }
  func.func @transform_3(%arg0: i32, %arg1: i32) -> (i32, i32) {
    %c0_i32 = arith.constant 0 : i32
    %c0_i32_0 = arith.constant 0 : i32
    %c0_i32_1 = arith.constant 0 : i32
    return %c0_i32, %c0_i32_0 : i32, i32
  }
  func.func @transform_4(%arg0: i32, %arg1: i32) -> (i32, i32) {
    %c0_i32 = arith.constant 0 : i32
    %c0_i32_0 = arith.constant 0 : i32
    %c0_i32_1 = arith.constant 0 : i32
    return %c0_i32, %c0_i32_0 : i32, i32
  }
  func.func @transform_5(%arg0: i32, %arg1: i32) -> (i32, i32) {
    %c0_i32 = arith.constant 0 : i32
    %c0_i32_0 = arith.constant 0 : i32
    return %arg0, %c0_i32 : i32, i32
  }
  func.func @transform_6(%arg0: i32, %arg1: i32) -> (i32, i32) {
    %c0_i32 = arith.constant 0 : i32
    %c0_i32_0 = arith.constant 0 : i32
    return %arg0, %c0_i32 : i32, i32
  }
}

module attributes {stable_mosaic.version = 11 : i64} {
  func.func @gcn_premix_kernel(%arg0: i32, %arg1: i32, %arg2: memref<128x128xbf16, #tpu.memory_space<vmem>>, %arg3: memref<128x128xbf16, #tpu.memory_space<vmem>>, %arg4: memref<1x128xf32, #tpu.memory_space<vmem>>, %arg5: memref<128x128xbf16, #tpu.memory_space<vmem>>, %arg6: memref<128x128xbf16, #tpu.memory_space<vmem>>, %arg7: memref<1x128xf32, #tpu.memory_space<vmem>>, %arg8: memref<128x128xbf16, #tpu.memory_space<vmem>>, %arg9: memref<128x128xf32, #tpu.memory_space<vmem>>, %arg10: memref<128x128xf32, #tpu.memory_space<vmem>>) attributes {dimension_semantics = [#tpu.dimension_semantics<parallel>, #tpu.dimension_semantics<arbitrary>], iteration_bounds = array<i64: 2, 2>, scalar_prefetch = 0 : i64, scratch_operands = 1 : i64, tpu.core_type = #tpu.core_type<tc>, window_params = [{transform_indices = @transform_0, window_bounds = array<i64: 128, 128>}, {transform_indices = @transform_1, window_bounds = array<i64: 128, 128>}, {pipeline_mode = #tpu.pipeline_mode<synchronous>, transform_indices = @transform_2, window_bounds = array<i64: 1, 128>}, {pipeline_mode = #tpu.pipeline_mode<synchronous>, transform_indices = @transform_3, window_bounds = array<i64: 128, 128>}, {pipeline_mode = #tpu.pipeline_mode<synchronous>, transform_indices = @transform_4, window_bounds = array<i64: 128, 128>}, {pipeline_mode = #tpu.pipeline_mode<synchronous>, transform_indices = @transform_5, window_bounds = array<i64: 1, 128>}, {transform_indices = @transform_6, window_bounds = array<i64: 128, 128>}, {transform_indices = @transform_7, window_bounds = array<i64: 128, 128>}]} {
    %c0_i32 = arith.constant 0 : i32
    %0 = arith.cmpi eq, %arg1, %c0_i32 : i32
    %1 = arith.extui %0 : i1 to i32
    %c0_i32_0 = arith.constant 0 : i32
    %2 = arith.cmpi ne, %1, %c0_i32_0 : i32
    scf.if %2 {
      %cst_9 = arith.constant 0.000000e+00 : f32
      %12 = vector.broadcast %cst_9 : f32 to vector<128x128xf32>
      %c0_10 = arith.constant 0 : index
      %c0_11 = arith.constant 0 : index
      %13 = vector.load %arg10[%c0_10, %c0_11] : memref<128x128xf32, #tpu.memory_space<vmem>>, vector<128x128xf32>
      tpu.vector_store %arg10[%c0_10, %c0_11], %12 {strides = array<i32>} : memref<128x128xf32, #tpu.memory_space<vmem>>, vector<128x128xf32>,
    } else {
    }
    %c0 = arith.constant 0 : index
    %c0_1 = arith.constant 0 : index
    %3 = vector.load %arg10[%c0, %c0_1] : memref<128x128xf32, #tpu.memory_space<vmem>>, vector<128x128xf32>
    %c0_2 = arith.constant 0 : index
    %c0_3 = arith.constant 0 : index
    %4 = vector.load %arg2[%c0_2, %c0_3] : memref<128x128xbf16, #tpu.memory_space<vmem>>, vector<128x128xbf16>
    %c0_4 = arith.constant 0 : index
    %c0_5 = arith.constant 0 : index
    %5 = vector.load %arg3[%c0_4, %c0_5] : memref<128x128xbf16, #tpu.memory_space<vmem>>, vector<128x128xbf16>
    %cst = arith.constant dense<0.000000e+00> : vector<128x128xf32>
    %6 = tpu.matmul %4, %5, %cst {dimension_numbers = #tpu.dot_dimension_numbers<[1], [0], [0], [1], [0, 0, 1, 1], [], []>} : vector<128x128xbf16>, vector<128x128xbf16>, vector<128x128xf32> -> vector<128x128xf32>
    %7 = arith.addf %3, %6 : vector<128x128xf32>
    %c0_6 = arith.constant 0 : index
    %c0_7 = arith.constant 0 : index
    %8 = vector.load %arg10[%c0_6, %c0_7] : memref<128x128xf32, #tpu.memory_space<vmem>>, vector<128x128xf32>
    tpu.vector_store %arg10[%c0_6, %c0_7], %7 {strides = array<i32>} : memref<128x128xf32, #tpu.memory_space<vmem>>, vector<128x128xf32>,
    %c1_i32 = arith.constant 1 : i32
    %9 = arith.cmpi eq, %arg1, %c1_i32 : i32
    %10 = arith.extui %9 : i1 to i32
    %c0_i32_8 = arith.constant 0 : i32
    %11 = arith.cmpi ne, %10, %c0_i32_8 : i32
    scf.if %11 {
      %c0_9 = arith.constant 0 : index
      %c0_10 = arith.constant 0 : index
      %12 = vector.load %arg10[%c0_9, %c0_10] : memref<128x128xf32, #tpu.memory_space<vmem>>, vector<128x128xf32>
      %c0_11 = arith.constant 0 : index
      %c0_12 = arith.constant 0 : index
      %13 = vector.load %arg4[%c0_11, %c0_12] : memref<1x128xf32, #tpu.memory_space<vmem>>, vector<1x128xf32>
      %14 = vector.broadcast %13 : vector<1x128xf32> to vector<128x128xf32>
      %15 = arith.addf %12, %14 : vector<128x128xf32>
      %cst_13 = arith.constant 0.000000e+00 : f32
      %16 = vector.broadcast %cst_13 : f32 to vector<128x128xf32>
      %17 = arith.cmpf ogt, %15, %16 : vector<128x128xf32>
      %cst_14 = arith.constant 0.000000e+00 : f32
      %18 = vector.broadcast %cst_14 : f32 to vector<128x128xf32>
      %19 = arith.minimumf %15, %18 : vector<128x128xf32>
      %20 = math.exp %19 : vector<128x128xf32>
      %cst_15 = arith.constant 1.000000e+00 : f32
      %21 = vector.broadcast %cst_15 : f32 to vector<128x128xf32>
      %22 = arith.subf %20, %21 : vector<128x128xf32>
      %23 = arith.select %17, %15, %22 : vector<128x128xi1>, vector<128x128xf32>
      %24 = arith.truncf %23 : vector<128x128xf32> to vector<128x128xbf16>
      %c0_16 = arith.constant 0 : index
      %c0_17 = arith.constant 0 : index
      %25 = vector.load %arg5[%c0_16, %c0_17] : memref<128x128xbf16, #tpu.memory_space<vmem>>, vector<128x128xbf16>
      %cst_18 = arith.constant dense<0.000000e+00> : vector<128x128xf32>
      %26 = tpu.matmul %24, %25, %cst_18 {dimension_numbers = #tpu.dot_dimension_numbers<[1], [0], [0], [1], [0, 0, 1, 1], [], []>} : vector<128x128xbf16>, vector<128x128xbf16>, vector<128x128xf32> -> vector<128x128xf32>
      %27 = arith.truncf %26 : vector<128x128xf32> to vector<128x128xbf16>
      %c0_19 = arith.constant 0 : index
      %c0_20 = arith.constant 0 : index
      %28 = vector.load %arg8[%c0_19, %c0_20] : memref<128x128xbf16, #tpu.memory_space<vmem>>, vector<128x128xbf16>
      tpu.vector_store %arg8[%c0_19, %c0_20], %27 {strides = array<i32>} : memref<128x128xbf16, #tpu.memory_space<vmem>>, vector<128x128xbf16>,
      %c0_21 = arith.constant 0 : index
      %c0_22 = arith.constant 0 : index
      %29 = vector.load %arg6[%c0_21, %c0_22] : memref<128x128xbf16, #tpu.memory_space<vmem>>, vector<128x128xbf16>
      %cst_23 = arith.constant dense<0.000000e+00> : vector<128x128xf32>
      %30 = tpu.matmul %24, %29, %cst_23 {dimension_numbers = #tpu.dot_dimension_numbers<[1], [0], [0], [1], [0, 0, 1, 1], [], []>} : vector<128x128xbf16>, vector<128x128xbf16>, vector<128x128xf32> -> vector<128x128xf32>
      %c0_24 = arith.constant 0 : index
      %c0_25 = arith.constant 0 : index
      %31 = vector.load %arg7[%c0_24, %c0_25] : memref<1x128xf32, #tpu.memory_space<vmem>>, vector<1x128xf32>
      %32 = vector.broadcast %31 : vector<1x128xf32> to vector<128x128xf32>
      %33 = arith.addf %30, %32 : vector<128x128xf32>
      %c0_26 = arith.constant 0 : index
      %c0_27 = arith.constant 0 : index
      %34 = vector.load %arg9[%c0_26, %c0_27] : memref<128x128xf32, #tpu.memory_space<vmem>>, vector<128x128xf32>
      tpu.vector_store %arg9[%c0_26, %c0_27], %33 {strides = array<i32>} : memref<128x128xf32, #tpu.memory_space<vmem>>, vector<128x128xf32>,
    } else {
    }
    return
  }
  func.func @transform_0(%arg0: i32, %arg1: i32) -> (i32, i32) {
    %c0_i32 = arith.constant 0 : i32
    return %arg0, %arg1 : i32, i32
  }
  func.func @transform_1(%arg0: i32, %arg1: i32) -> (i32, i32) {
    %c0_i32 = arith.constant 0 : i32
    %c0_i32_0 = arith.constant 0 : i32
    return %arg1, %c0_i32 : i32, i32
  }
  func.func @transform_2(%arg0: i32, %arg1: i32) -> (i32, i32) {
    %c0_i32 = arith.constant 0 : i32
    %c0_i32_0 = arith.constant 0 : i32
    %c0_i32_1 = arith.constant 0 : i32
    return %c0_i32, %c0_i32_0 : i32, i32
  }
  func.func @transform_3(%arg0: i32, %arg1: i32) -> (i32, i32) {
    %c0_i32 = arith.constant 0 : i32
    %c0_i32_0 = arith.constant 0 : i32
    %c0_i32_1 = arith.constant 0 : i32
    return %c0_i32, %c0_i32_0 : i32, i32
  }
  func.func @transform_4(%arg0: i32, %arg1: i32) -> (i32, i32) {
    %c0_i32 = arith.constant 0 : i32
    %c0_i32_0 = arith.constant 0 : i32
    %c0_i32_1 = arith.constant 0 : i32
    return %c0_i32, %c0_i32_0 : i32, i32
  }
  func.func @transform_5(%arg0: i32, %arg1: i32) -> (i32, i32) {
    %c0_i32 = arith.constant 0 : i32
    %c0_i32_0 = arith.constant 0 : i32
    %c0_i32_1 = arith.constant 0 : i32
    return %c0_i32, %c0_i32_0 : i32, i32
  }
  func.func @transform_6(%arg0: i32, %arg1: i32) -> (i32, i32) {
    %c0_i32 = arith.constant 0 : i32
    %c0_i32_0 = arith.constant 0 : i32
    return %arg0, %c0_i32 : i32, i32
  }
  func.func @transform_7(%arg0: i32, %arg1: i32) -> (i32, i32) {
    %c0_i32 = arith.constant 0 : i32
    %c0_i32_0 = arith.constant 0 : i32
    return %arg0, %c0_i32 : i32, i32
  }
}

module attributes {stable_mosaic.version = 11 : i64} {
  func.func @gat_attention_kernel(%arg0: i32, %arg1: i32, %arg2: memref<128x128xi8, #tpu.memory_space<vmem>>, %arg3: memref<128x128xf32, #tpu.memory_space<vmem>>, %arg4: memref<8x128xf32, #tpu.memory_space<vmem>>, %arg5: memref<128x384xbf16, #tpu.memory_space<vmem>>, %arg6: memref<1x128xf32, #tpu.memory_space<vmem>>, %arg7: memref<128x128xbf16, #tpu.memory_space<vmem>>, %arg8: memref<3x128x1xf32, #tpu.memory_space<vmem>>, %arg9: memref<3x128x1xf32, #tpu.memory_space<vmem>>, %arg10: memref<3x128x128xf32, #tpu.memory_space<vmem>>) attributes {dimension_semantics = [#tpu.dimension_semantics<parallel>, #tpu.dimension_semantics<arbitrary>], iteration_bounds = array<i64: 2, 2>, scalar_prefetch = 0 : i64, scratch_operands = 3 : i64, tpu.core_type = #tpu.core_type<tc>, window_params = [{transform_indices = @transform_0, window_bounds = array<i64: 128, 128>}, {transform_indices = @transform_1, window_bounds = array<i64: 128, 128>}, {transform_indices = @transform_2, window_bounds = array<i64: 8, 128>}, {transform_indices = @transform_3, window_bounds = array<i64: 128, 384>}, {pipeline_mode = #tpu.pipeline_mode<synchronous>, transform_indices = @transform_4, window_bounds = array<i64: 1, 128>}, {transform_indices = @transform_5, window_bounds = array<i64: 128, 128>}]} {
    %c0_i32 = arith.constant 0 : i32
    %0 = arith.cmpi eq, %arg1, %c0_i32 : i32
    %1 = arith.extui %0 : i1 to i32
    %c0_i32_0 = arith.constant 0 : i32
    %2 = arith.cmpi ne, %1, %c0_i32_0 : i32
    scf.if %2 {
      %cst_79 = arith.constant -1.000000e+30 : f32
      %134 = vector.broadcast %cst_79 : f32 to vector<3x128x1xf32>
      %c0_80 = arith.constant 0 : index
      %c0_81 = arith.constant 0 : index
      %c0_82 = arith.constant 0 : index
      %135 = vector.load %arg8[%c0_80, %c0_81, %c0_82] : memref<3x128x1xf32, #tpu.memory_space<vmem>>, vector<3x128x1xf32>
      tpu.vector_store %arg8[%c0_80, %c0_81, %c0_82], %134 {strides = array<i32>} : memref<3x128x1xf32, #tpu.memory_space<vmem>>, vector<3x128x1xf32>,
      %cst_83 = arith.constant 0.000000e+00 : f32
      %136 = vector.broadcast %cst_83 : f32 to vector<3x128x1xf32>
      %c0_84 = arith.constant 0 : index
      %c0_85 = arith.constant 0 : index
      %c0_86 = arith.constant 0 : index
      %137 = vector.load %arg9[%c0_84, %c0_85, %c0_86] : memref<3x128x1xf32, #tpu.memory_space<vmem>>, vector<3x128x1xf32>
      tpu.vector_store %arg9[%c0_84, %c0_85, %c0_86], %136 {strides = array<i32>} : memref<3x128x1xf32, #tpu.memory_space<vmem>>, vector<3x128x1xf32>,
      %cst_87 = arith.constant 0.000000e+00 : f32
      %138 = vector.broadcast %cst_87 : f32 to vector<3x128x128xf32>
      %c0_88 = arith.constant 0 : index
      %c0_89 = arith.constant 0 : index
      %c0_90 = arith.constant 0 : index
      %139 = vector.load %arg10[%c0_88, %c0_89, %c0_90] : memref<3x128x128xf32, #tpu.memory_space<vmem>>, vector<3x128x128xf32>
      tpu.vector_store %arg10[%c0_88, %c0_89, %c0_90], %138 {strides = array<i32>} : memref<3x128x128xf32, #tpu.memory_space<vmem>>, vector<3x128x128xf32>,
    } else {
    }
    %c0 = arith.constant 0 : index
    %c0_1 = arith.constant 0 : index
    %3 = vector.load %arg2[%c0, %c0_1] : memref<128x128xi8, #tpu.memory_space<vmem>>, vector<128x128xi8>
    %4 = arith.sitofp %3 : vector<128x128xi8> to vector<128x128xf32>
    %c0_2 = arith.constant 0 : index
    %c3 = arith.constant 3 : index
    %5 = vector.load %arg3[%c0_2, %c3] : memref<128x128xf32, #tpu.memory_space<vmem>>, vector<128x1xf32>
    %c0_3 = arith.constant 0 : index
    %c0_4 = arith.constant 0 : index
    %6 = vector.load %arg4[%c0_3, %c0_4] : memref<8x128xf32, #tpu.memory_space<vmem>>, vector<1x128xf32>
    %7 = vector.broadcast %5 : vector<128x1xf32> to vector<128x128xf32>
    %8 = vector.broadcast %6 : vector<1x128xf32> to vector<128x128xf32>
    %9 = arith.addf %7, %8 : vector<128x128xf32>
    %cst = arith.constant 2.000000e-01 : f32
    %10 = vector.broadcast %cst : f32 to vector<128x128xf32>
    %11 = arith.mulf %10, %9 : vector<128x128xf32>
    %12 = arith.maximumf %9, %11 : vector<128x128xf32>
    %c0_5 = arith.constant 0 : index
    %c0_6 = arith.constant 0 : index
    %c0_7 = arith.constant 0 : index
    %13 = vector.load %arg8[%c0_5, %c0_6, %c0_7] : memref<3x128x1xf32, #tpu.memory_space<vmem>>, vector<1x128x1xf32>
    %14 = vector.shape_cast %13 : vector<1x128x1xf32> to vector<128x1xf32>
    %cst_8 = arith.constant dense<0xFF800000> : vector<128xf32>
    %15 = vector.multi_reduction <maximumf>, %12, %cst_8 [1] : vector<128x128xf32> to vector<128xf32>
    %16 = vector.shape_cast %15 : vector<128xf32> to vector<128x1xf32>
    %17 = arith.maximumf %14, %16 : vector<128x1xf32>
    %18 = arith.subf %14, %17 : vector<128x1xf32>
    %19 = math.exp %18 : vector<128x1xf32>
    %20 = vector.broadcast %17 : vector<128x1xf32> to vector<128x128xf32>
    %21 = arith.subf %12, %20 : vector<128x128xf32>
    %22 = math.exp %21 : vector<128x128xf32>
    %23 = arith.mulf %22, %4 : vector<128x128xf32>
    %c0_9 = arith.constant 0 : index
    %c0_10 = arith.constant 0 : index
    %c0_11 = arith.constant 0 : index
    %24 = vector.load %arg9[%c0_9, %c0_10, %c0_11] : memref<3x128x1xf32, #tpu.memory_space<vmem>>, vector<1x128x1xf32>
    %25 = vector.shape_cast %24 : vector<1x128x1xf32> to vector<128x1xf32>
    %26 = arith.mulf %19, %25 : vector<128x1xf32>
    %cst_12 = arith.constant dense<0.000000e+00> : vector<128xf32>
    %27 = vector.multi_reduction <add>, %23, %cst_12 [1] : vector<128x128xf32> to vector<128xf32>
    %28 = vector.shape_cast %27 : vector<128xf32> to vector<128x1xf32>
    %29 = arith.addf %26, %28 : vector<128x1xf32>
    %c0_13 = arith.constant 0 : index
    %c0_14 = arith.constant 0 : index
    %c0_15 = arith.constant 0 : index
    %30 = vector.load %arg9[%c0_13, %c0_14, %c0_15] : memref<3x128x1xf32, #tpu.memory_space<vmem>>, vector<1x128x1xf32>
    %31 = vector.shape_cast %30 : vector<1x128x1xf32> to vector<128x1xf32>
    %32 = vector.shape_cast %29 : vector<128x1xf32> to vector<1x128x1xf32>
    tpu.vector_store %arg9[%c0_13, %c0_14, %c0_15], %32 {strides = array<i32>} : memref<3x128x1xf32, #tpu.memory_space<vmem>>, vector<1x128x1xf32>,
    %c0_16 = arith.constant 0 : index
    %c0_17 = arith.constant 0 : index
    %c0_18 = arith.constant 0 : index
    %33 = vector.load %arg10[%c0_16, %c0_17, %c0_18] : memref<3x128x128xf32, #tpu.memory_space<vmem>>, vector<1x128x128xf32>
    %34 = vector.shape_cast %33 : vector<1x128x128xf32> to vector<128x128xf32>
    %35 = vector.broadcast %19 : vector<128x1xf32> to vector<128x128xf32>
    %36 = arith.mulf %35, %34 : vector<128x128xf32>
    %37 = arith.truncf %23 : vector<128x128xf32> to vector<128x128xbf16>
    %c0_19 = arith.constant 0 : index
    %c0_20 = arith.constant 0 : index
    %38 = vector.load %arg5[%c0_19, %c0_20] : memref<128x384xbf16, #tpu.memory_space<vmem>>, vector<128x128xbf16>
    %cst_21 = arith.constant dense<0.000000e+00> : vector<128x128xf32>
    %39 = tpu.matmul %37, %38, %cst_21 {dimension_numbers = #tpu.dot_dimension_numbers<[1], [0], [0], [1], [0, 0, 1, 1], [], []>} : vector<128x128xbf16>, vector<128x128xbf16>, vector<128x128xf32> -> vector<128x128xf32>
    %40 = arith.addf %36, %39 : vector<128x128xf32>
    %c0_22 = arith.constant 0 : index
    %c0_23 = arith.constant 0 : index
    %c0_24 = arith.constant 0 : index
    %41 = vector.load %arg10[%c0_22, %c0_23, %c0_24] : memref<3x128x128xf32, #tpu.memory_space<vmem>>, vector<1x128x128xf32>
    %42 = vector.shape_cast %41 : vector<1x128x128xf32> to vector<128x128xf32>
    %43 = vector.shape_cast %40 : vector<128x128xf32> to vector<1x128x128xf32>
    tpu.vector_store %arg10[%c0_22, %c0_23, %c0_24], %43 {strides = array<i32>} : memref<3x128x128xf32, #tpu.memory_space<vmem>>, vector<1x128x128xf32>,
    %c0_25 = arith.constant 0 : index
    %c0_26 = arith.constant 0 : index
    %c0_27 = arith.constant 0 : index
    %44 = vector.load %arg8[%c0_25, %c0_26, %c0_27] : memref<3x128x1xf32, #tpu.memory_space<vmem>>, vector<1x128x1xf32>
    %45 = vector.shape_cast %44 : vector<1x128x1xf32> to vector<128x1xf32>
    %46 = vector.shape_cast %17 : vector<128x1xf32> to vector<1x128x1xf32>
    tpu.vector_store %arg8[%c0_25, %c0_26, %c0_27], %46 {strides = array<i32>} : memref<3x128x1xf32, #tpu.memory_space<vmem>>, vector<1x128x1xf32>,
    %c0_28 = arith.constant 0 : index
    %c4 = arith.constant 4 : index
    %47 = vector.load %arg3[%c0_28, %c4] : memref<128x128xf32, #tpu.memory_space<vmem>>, vector<128x1xf32>
    %c1 = arith.constant 1 : index
    %c0_29 = arith.constant 0 : index
    %48 = vector.load %arg4[%c1, %c0_29] : memref<8x128xf32, #tpu.memory_space<vmem>>, vector<1x128xf32>
    %49 = vector.broadcast %47 : vector<128x1xf32> to vector<128x128xf32>
    %50 = vector.broadcast %48 : vector<1x128xf32> to vector<128x128xf32>
    %51 = arith.addf %49, %50 : vector<128x128xf32>
    %cst_30 = arith.constant 2.000000e-01 : f32
    %52 = vector.broadcast %cst_30 : f32 to vector<128x128xf32>
    %53 = arith.mulf %52, %51 : vector<128x128xf32>
    %54 = arith.maximumf %51, %53 : vector<128x128xf32>
    %c1_31 = arith.constant 1 : index
    %c0_32 = arith.constant 0 : index
    %c0_33 = arith.constant 0 : index
    %55 = vector.load %arg8[%c1_31, %c0_32, %c0_33] : memref<3x128x1xf32, #tpu.memory_space<vmem>>, vector<1x128x1xf32>
    %56 = vector.shape_cast %55 : vector<1x128x1xf32> to vector<128x1xf32>
    %cst_34 = arith.constant dense<0xFF800000> : vector<128xf32>
    %57 = vector.multi_reduction <maximumf>, %54, %cst_34 [1] : vector<128x128xf32> to vector<128xf32>
    %58 = vector.shape_cast %57 : vector<128xf32> to vector<128x1xf32>
    %59 = arith.maximumf %56, %58 : vector<128x1xf32>
    %60 = arith.subf %56, %59 : vector<128x1xf32>
    %61 = math.exp %60 : vector<128x1xf32>
    %62 = vector.broadcast %59 : vector<128x1xf32> to vector<128x128xf32>
    %63 = arith.subf %54, %62 : vector<128x128xf32>
    %64 = math.exp %63 : vector<128x128xf32>
    %65 = arith.mulf %64, %4 : vector<128x128xf32>
    %c1_35 = arith.constant 1 : index
    %c0_36 = arith.constant 0 : index
    %c0_37 = arith.constant 0 : index
    %66 = vector.load %arg9[%c1_35, %c0_36, %c0_37] : memref<3x128x1xf32, #tpu.memory_space<vmem>>, vector<1x128x1xf32>
    %67 = vector.shape_cast %66 : vector<1x128x1xf32> to vector<128x1xf32>
    %68 = arith.mulf %61, %67 : vector<128x1xf32>
    %cst_38 = arith.constant dense<0.000000e+00> : vector<128xf32>
    %69 = vector.multi_reduction <add>, %65, %cst_38 [1] : vector<128x128xf32> to vector<128xf32>
    %70 = vector.shape_cast %69 : vector<128xf32> to vector<128x1xf32>
    %71 = arith.addf %68, %70 : vector<128x1xf32>
    %c1_39 = arith.constant 1 : index
    %c0_40 = arith.constant 0 : index
    %c0_41 = arith.constant 0 : index
    %72 = vector.load %arg9[%c1_39, %c0_40, %c0_41] : memref<3x128x1xf32, #tpu.memory_space<vmem>>, vector<1x128x1xf32>
    %73 = vector.shape_cast %72 : vector<1x128x1xf32> to vector<128x1xf32>
    %74 = vector.shape_cast %71 : vector<128x1xf32> to vector<1x128x1xf32>
    tpu.vector_store %arg9[%c1_39, %c0_40, %c0_41], %74 {strides = array<i32>} : memref<3x128x1xf32, #tpu.memory_space<vmem>>, vector<1x128x1xf32>,
    %c1_42 = arith.constant 1 : index
    %c0_43 = arith.constant 0 : index
    %c0_44 = arith.constant 0 : index
    %75 = vector.load %arg10[%c1_42, %c0_43, %c0_44] : memref<3x128x128xf32, #tpu.memory_space<vmem>>, vector<1x128x128xf32>
    %76 = vector.shape_cast %75 : vector<1x128x128xf32> to vector<128x128xf32>
    %77 = vector.broadcast %61 : vector<128x1xf32> to vector<128x128xf32>
    %78 = arith.mulf %77, %76 : vector<128x128xf32>
    %79 = arith.truncf %65 : vector<128x128xf32> to vector<128x128xbf16>
    %c0_45 = arith.constant 0 : index
    %c128 = arith.constant 128 : index
    %80 = vector.load %arg5[%c0_45, %c128] : memref<128x384xbf16, #tpu.memory_space<vmem>>, vector<128x128xbf16>
    %cst_46 = arith.constant dense<0.000000e+00> : vector<128x128xf32>
    %81 = tpu.matmul %79, %80, %cst_46 {dimension_numbers = #tpu.dot_dimension_numbers<[1], [0], [0], [1], [0, 0, 1, 1], [], []>} : vector<128x128xbf16>, vector<128x128xbf16>, vector<128x128xf32> -> vector<128x128xf32>
    %82 = arith.addf %78, %81 : vector<128x128xf32>
    %c1_47 = arith.constant 1 : index
    %c0_48 = arith.constant 0 : index
    %c0_49 = arith.constant 0 : index
    %83 = vector.load %arg10[%c1_47, %c0_48, %c0_49] : memref<3x128x128xf32, #tpu.memory_space<vmem>>, vector<1x128x128xf32>
    %84 = vector.shape_cast %83 : vector<1x128x128xf32> to vector<128x128xf32>
    %85 = vector.shape_cast %82 : vector<128x128xf32> to vector<1x128x128xf32>
    tpu.vector_store %arg10[%c1_47, %c0_48, %c0_49], %85 {strides = array<i32>} : memref<3x128x128xf32, #tpu.memory_space<vmem>>, vector<1x128x128xf32>,
    %c1_50 = arith.constant 1 : index
    %c0_51 = arith.constant 0 : index
    %c0_52 = arith.constant 0 : index
    %86 = vector.load %arg8[%c1_50, %c0_51, %c0_52] : memref<3x128x1xf32, #tpu.memory_space<vmem>>, vector<1x128x1xf32>
    %87 = vector.shape_cast %86 : vector<1x128x1xf32> to vector<128x1xf32>
    %88 = vector.shape_cast %59 : vector<128x1xf32> to vector<1x128x1xf32>
    tpu.vector_store %arg8[%c1_50, %c0_51, %c0_52], %88 {strides = array<i32>} : memref<3x128x1xf32, #tpu.memory_space<vmem>>, vector<1x128x1xf32>,
    %c0_53 = arith.constant 0 : index
    %c5 = arith.constant 5 : index
    %89 = vector.load %arg3[%c0_53, %c5] : memref<128x128xf32, #tpu.memory_space<vmem>>, vector<128x1xf32>
    %c2 = arith.constant 2 : index
    %c0_54 = arith.constant 0 : index
    %90 = vector.load %arg4[%c2, %c0_54] : memref<8x128xf32, #tpu.memory_space<vmem>>, vector<1x128xf32>
    %91 = vector.broadcast %89 : vector<128x1xf32> to vector<128x128xf32>
    %92 = vector.broadcast %90 : vector<1x128xf32> to vector<128x128xf32>
    %93 = arith.addf %91, %92 : vector<128x128xf32>
    %cst_55 = arith.constant 2.000000e-01 : f32
    %94 = vector.broadcast %cst_55 : f32 to vector<128x128xf32>
    %95 = arith.mulf %94, %93 : vector<128x128xf32>
    %96 = arith.maximumf %93, %95 : vector<128x128xf32>
    %c2_56 = arith.constant 2 : index
    %c0_57 = arith.constant 0 : index
    %c0_58 = arith.constant 0 : index
    %97 = vector.load %arg8[%c2_56, %c0_57, %c0_58] : memref<3x128x1xf32, #tpu.memory_space<vmem>>, vector<1x128x1xf32>
    %98 = vector.shape_cast %97 : vector<1x128x1xf32> to vector<128x1xf32>
    %cst_59 = arith.constant dense<0xFF800000> : vector<128xf32>
    %99 = vector.multi_reduction <maximumf>, %96, %cst_59 [1] : vector<128x128xf32> to vector<128xf32>
    %100 = vector.shape_cast %99 : vector<128xf32> to vector<128x1xf32>
    %101 = arith.maximumf %98, %100 : vector<128x1xf32>
    %102 = arith.subf %98, %101 : vector<128x1xf32>
    %103 = math.exp %102 : vector<128x1xf32>
    %104 = vector.broadcast %101 : vector<128x1xf32> to vector<128x128xf32>
    %105 = arith.subf %96, %104 : vector<128x128xf32>
    %106 = math.exp %105 : vector<128x128xf32>
    %107 = arith.mulf %106, %4 : vector<128x128xf32>
    %c2_60 = arith.constant 2 : index
    %c0_61 = arith.constant 0 : index
    %c0_62 = arith.constant 0 : index
    %108 = vector.load %arg9[%c2_60, %c0_61, %c0_62] : memref<3x128x1xf32, #tpu.memory_space<vmem>>, vector<1x128x1xf32>
    %109 = vector.shape_cast %108 : vector<1x128x1xf32> to vector<128x1xf32>
    %110 = arith.mulf %103, %109 : vector<128x1xf32>
    %cst_63 = arith.constant dense<0.000000e+00> : vector<128xf32>
    %111 = vector.multi_reduction <add>, %107, %cst_63 [1] : vector<128x128xf32> to vector<128xf32>
    %112 = vector.shape_cast %111 : vector<128xf32> to vector<128x1xf32>
    %113 = arith.addf %110, %112 : vector<128x1xf32>
    %c2_64 = arith.constant 2 : index
    %c0_65 = arith.constant 0 : index
    %c0_66 = arith.constant 0 : index
    %114 = vector.load %arg9[%c2_64, %c0_65, %c0_66] : memref<3x128x1xf32, #tpu.memory_space<vmem>>, vector<1x128x1xf32>
    %115 = vector.shape_cast %114 : vector<1x128x1xf32> to vector<128x1xf32>
    %116 = vector.shape_cast %113 : vector<128x1xf32> to vector<1x128x1xf32>
    tpu.vector_store %arg9[%c2_64, %c0_65, %c0_66], %116 {strides = array<i32>} : memref<3x128x1xf32, #tpu.memory_space<vmem>>, vector<1x128x1xf32>,
    %c2_67 = arith.constant 2 : index
    %c0_68 = arith.constant 0 : index
    %c0_69 = arith.constant 0 : index
    %117 = vector.load %arg10[%c2_67, %c0_68, %c0_69] : memref<3x128x128xf32, #tpu.memory_space<vmem>>, vector<1x128x128xf32>
    %118 = vector.shape_cast %117 : vector<1x128x128xf32> to vector<128x128xf32>
    %119 = vector.broadcast %103 : vector<128x1xf32> to vector<128x128xf32>
    %120 = arith.mulf %119, %118 : vector<128x128xf32>
    %121 = arith.truncf %107 : vector<128x128xf32> to vector<128x128xbf16>
    %c0_70 = arith.constant 0 : index
    %c256 = arith.constant 256 : index
    %122 = vector.load %arg5[%c0_70, %c256] : memref<128x384xbf16, #tpu.memory_space<vmem>>, vector<128x128xbf16>
    %cst_71 = arith.constant dense<0.000000e+00> : vector<128x128xf32>
    %123 = tpu.matmul %121, %122, %cst_71 {dimension_numbers = #tpu.dot_dimension_numbers<[1], [0], [0], [1], [0, 0, 1, 1], [], []>} : vector<128x128xbf16>, vector<128x128xbf16>, vector<128x128xf32> -> vector<128x128xf32>
    %124 = arith.addf %120, %123 : vector<128x128xf32>
    %c2_72 = arith.constant 2 : index
    %c0_73 = arith.constant 0 : index
    %c0_74 = arith.constant 0 : index
    %125 = vector.load %arg10[%c2_72, %c0_73, %c0_74] : memref<3x128x128xf32, #tpu.memory_space<vmem>>, vector<1x128x128xf32>
    %126 = vector.shape_cast %125 : vector<1x128x128xf32> to vector<128x128xf32>
    %127 = vector.shape_cast %124 : vector<128x128xf32> to vector<1x128x128xf32>
    tpu.vector_store %arg10[%c2_72, %c0_73, %c0_74], %127 {strides = array<i32>} : memref<3x128x128xf32, #tpu.memory_space<vmem>>, vector<1x128x128xf32>,
    %c2_75 = arith.constant 2 : index
    %c0_76 = arith.constant 0 : index
    %c0_77 = arith.constant 0 : index
    %128 = vector.load %arg8[%c2_75, %c0_76, %c0_77] : memref<3x128x1xf32, #tpu.memory_space<vmem>>, vector<1x128x1xf32>
    %129 = vector.shape_cast %128 : vector<1x128x1xf32> to vector<128x1xf32>
    %130 = vector.shape_cast %101 : vector<128x1xf32> to vector<1x128x1xf32>
    tpu.vector_store %arg8[%c2_75, %c0_76, %c0_77], %130 {strides = array<i32>} : memref<3x128x1xf32, #tpu.memory_space<vmem>>, vector<1x128x1xf32>,
    %c1_i32 = arith.constant 1 : i32
    %131 = arith.cmpi eq, %arg1, %c1_i32 : i32
    %132 = arith.extui %131 : i1 to i32
    %c0_i32_78 = arith.constant 0 : i32
    %133 = arith.cmpi ne, %132, %c0_i32_78 : i32
    scf.if %133 {
      %cst_79 = arith.constant 0.000000e+00 : f32
      %134 = vector.broadcast %cst_79 : f32 to vector<128x128xf32>
      %c0_80 = arith.constant 0 : index
      %c0_81 = arith.constant 0 : index
      %c0_82 = arith.constant 0 : index
      %135 = vector.load %arg10[%c0_80, %c0_81, %c0_82] : memref<3x128x128xf32, #tpu.memory_space<vmem>>, vector<1x128x128xf32>
      %136 = vector.shape_cast %135 : vector<1x128x128xf32> to vector<128x128xf32>
      %c0_83 = arith.constant 0 : index
      %c0_84 = arith.constant 0 : index
      %c0_85 = arith.constant 0 : index
      %137 = vector.load %arg9[%c0_83, %c0_84, %c0_85] : memref<3x128x1xf32, #tpu.memory_space<vmem>>, vector<1x128x1xf32>
      %138 = vector.shape_cast %137 : vector<1x128x1xf32> to vector<128x1xf32>
      %139 = tpu.reciprocal %138 {approx = true} : vector<128x1xf32> -> vector<128x1xf32>
      %140 = vector.broadcast %139 : vector<128x1xf32> to vector<128x128xf32>
      %141 = arith.mulf %136, %140 : vector<128x128xf32>
      %142 = arith.addf %134, %141 : vector<128x128xf32>
      %c1_86 = arith.constant 1 : index
      %c0_87 = arith.constant 0 : index
      %c0_88 = arith.constant 0 : index
      %143 = vector.load %arg10[%c1_86, %c0_87, %c0_88] : memref<3x128x128xf32, #tpu.memory_space<vmem>>, vector<1x128x128xf32>
      %144 = vector.shape_cast %143 : vector<1x128x128xf32> to vector<128x128xf32>
      %c1_89 = arith.constant 1 : index
      %c0_90 = arith.constant 0 : index
      %c0_91 = arith.constant 0 : index
      %145 = vector.load %arg9[%c1_89, %c0_90, %c0_91] : memref<3x128x1xf32, #tpu.memory_space<vmem>>, vector<1x128x1xf32>
      %146 = vector.shape_cast %145 : vector<1x128x1xf32> to vector<128x1xf32>
      %147 = tpu.reciprocal %146 {approx = true} : vector<128x1xf32> -> vector<128x1xf32>
      %148 = vector.broadcast %147 : vector<128x1xf32> to vector<128x128xf32>
      %149 = arith.mulf %144, %148 : vector<128x128xf32>
      %150 = arith.addf %142, %149 : vector<128x128xf32>
      %c2_92 = arith.constant 2 : index
      %c0_93 = arith.constant 0 : index
      %c0_94 = arith.constant 0 : index
      %151 = vector.load %arg10[%c2_92, %c0_93, %c0_94] : memref<3x128x128xf32, #tpu.memory_space<vmem>>, vector<1x128x128xf32>
      %152 = vector.shape_cast %151 : vector<1x128x128xf32> to vector<128x128xf32>
      %c2_95 = arith.constant 2 : index
      %c0_96 = arith.constant 0 : index
      %c0_97 = arith.constant 0 : index
      %153 = vector.load %arg9[%c2_95, %c0_96, %c0_97] : memref<3x128x1xf32, #tpu.memory_space<vmem>>, vector<1x128x1xf32>
      %154 = vector.shape_cast %153 : vector<1x128x1xf32> to vector<128x1xf32>
      %155 = tpu.reciprocal %154 {approx = true} : vector<128x1xf32> -> vector<128x1xf32>
      %156 = vector.broadcast %155 : vector<128x1xf32> to vector<128x128xf32>
      %157 = arith.mulf %152, %156 : vector<128x128xf32>
      %158 = arith.addf %150, %157 : vector<128x128xf32>
      %c0_98 = arith.constant 0 : index
      %c0_99 = arith.constant 0 : index
      %159 = vector.load %arg6[%c0_98, %c0_99] : memref<1x128xf32, #tpu.memory_space<vmem>>, vector<1x128xf32>
      %160 = vector.broadcast %159 : vector<1x128xf32> to vector<128x128xf32>
      %161 = arith.addf %158, %160 : vector<128x128xf32>
      %cst_100 = arith.constant 0.000000e+00 : f32
      %162 = vector.broadcast %cst_100 : f32 to vector<128x128xf32>
      %163 = arith.cmpf ogt, %161, %162 : vector<128x128xf32>
      %cst_101 = arith.constant 0.000000e+00 : f32
      %164 = vector.broadcast %cst_101 : f32 to vector<128x128xf32>
      %165 = arith.minimumf %161, %164 : vector<128x128xf32>
      %166 = math.exp %165 : vector<128x128xf32>
      %cst_102 = arith.constant 1.000000e+00 : f32
      %167 = vector.broadcast %cst_102 : f32 to vector<128x128xf32>
      %168 = arith.subf %166, %167 : vector<128x128xf32>
      %169 = arith.select %163, %161, %168 : vector<128x128xi1>, vector<128x128xf32>
      %170 = arith.truncf %169 : vector<128x128xf32> to vector<128x128xbf16>
      %c0_103 = arith.constant 0 : index
      %c0_104 = arith.constant 0 : index
      %171 = vector.load %arg7[%c0_103, %c0_104] : memref<128x128xbf16, #tpu.memory_space<vmem>>, vector<128x128xbf16>
      tpu.vector_store %arg7[%c0_103, %c0_104], %170 {strides = array<i32>} : memref<128x128xbf16, #tpu.memory_space<vmem>>, vector<128x128xbf16>,
    } else {
    }
    return
  }
  func.func @transform_0(%arg0: i32, %arg1: i32) -> (i32, i32) {
    %c0_i32 = arith.constant 0 : i32
    return %arg0, %arg1 : i32, i32
  }
  func.func @transform_1(%arg0: i32, %arg1: i32) -> (i32, i32) {
    %c0_i32 = arith.constant 0 : i32
    %c0_i32_0 = arith.constant 0 : i32
    return %arg0, %c0_i32 : i32, i32
  }
  func.func @transform_2(%arg0: i32, %arg1: i32) -> (i32, i32) {
    %c0_i32 = arith.constant 0 : i32
    %c0_i32_0 = arith.constant 0 : i32
    return %c0_i32, %arg1 : i32, i32
  }
  func.func @transform_3(%arg0: i32, %arg1: i32) -> (i32, i32) {
    %c0_i32 = arith.constant 0 : i32
    %c0_i32_0 = arith.constant 0 : i32
    return %arg1, %c0_i32 : i32, i32
  }
  func.func @transform_4(%arg0: i32, %arg1: i32) -> (i32, i32) {
    %c0_i32 = arith.constant 0 : i32
    %c0_i32_0 = arith.constant 0 : i32
    %c0_i32_1 = arith.constant 0 : i32
    return %c0_i32, %c0_i32_0 : i32, i32
  }
  func.func @transform_5(%arg0: i32, %arg1: i32) -> (i32, i32) {
    %c0_i32 = arith.constant 0 : i32
    %c0_i32_0 = arith.constant 0 : i32
    return %arg0, %c0_i32 : i32, i32
  }
}

module attributes {stable_mosaic.version = 11 : i64} {
  func.func @prototype_head_kernel(%arg0: i32, %arg1: memref<2x128xf32, #tpu.memory_space<vmem>>, %arg2: memref<128x128xbf16, #tpu.memory_space<vmem>>, %arg3: memref<5x128xf32, #tpu.memory_space<vmem>>, %arg4: memref<128x5xf32, #tpu.memory_space<vmem>>, %arg5: memref<1x5xf32, #tpu.memory_space<vmem>>, %arg6: memref<128x4xf32, #tpu.memory_space<vmem>>, %arg7: memref<1x4xf32, #tpu.memory_space<vmem>>, %arg8: memref<128x64xf32, #tpu.memory_space<vmem>>, %arg9: memref<1x64xf32, #tpu.memory_space<vmem>>, %arg10: memref<64x8xf32, #tpu.memory_space<vmem>>, %arg11: memref<1x8xf32, #tpu.memory_space<vmem>>, %arg12: memref<2x4xf32, #tpu.memory_space<vmem>>, %arg13: memref<2x128xf32, #tpu.memory_space<vmem>>, %arg14: memref<2x5xf32, #tpu.memory_space<vmem>>, %arg15: memref<2x8xf32, #tpu.memory_space<vmem>>, %arg16: memref<2x128xf32, #tpu.memory_space<vmem>>) attributes {dimension_semantics = [#tpu.dimension_semantics<arbitrary>], iteration_bounds = array<i64: 2>, scalar_prefetch = 0 : i64, scratch_operands = 1 : i64, tpu.core_type = #tpu.core_type<tc>, window_params = [{transform_indices = @transform_0, window_bounds = array<i64: 2, 128>}, {transform_indices = @transform_1, window_bounds = array<i64: 128, 128>}, {pipeline_mode = #tpu.pipeline_mode<synchronous>, transform_indices = @transform_2, window_bounds = array<i64: 5, 128>}, {pipeline_mode = #tpu.pipeline_mode<synchronous>, transform_indices = @transform_3, window_bounds = array<i64: 128, 5>}, {pipeline_mode = #tpu.pipeline_mode<synchronous>, transform_indices = @transform_4, window_bounds = array<i64: 1, 5>}, {pipeline_mode = #tpu.pipeline_mode<synchronous>, transform_indices = @transform_5, window_bounds = array<i64: 128, 4>}, {pipeline_mode = #tpu.pipeline_mode<synchronous>, transform_indices = @transform_6, window_bounds = array<i64: 1, 4>}, {pipeline_mode = #tpu.pipeline_mode<synchronous>, transform_indices = @transform_7, window_bounds = array<i64: 128, 64>}, {pipeline_mode = #tpu.pipeline_mode<synchronous>, transform_indices = @transform_8, window_bounds = array<i64: 1, 64>}, {pipeline_mode = #tpu.pipeline_mode<synchronous>, transform_indices = @transform_9, window_bounds = array<i64: 64, 8>}, {pipeline_mode = #tpu.pipeline_mode<synchronous>, transform_indices = @transform_10, window_bounds = array<i64: 1, 8>}, {pipeline_mode = #tpu.pipeline_mode<synchronous>, transform_indices = @transform_11, window_bounds = array<i64: 2, 4>}, {pipeline_mode = #tpu.pipeline_mode<synchronous>, transform_indices = @transform_12, window_bounds = array<i64: 2, 128>}, {pipeline_mode = #tpu.pipeline_mode<synchronous>, transform_indices = @transform_13, window_bounds = array<i64: 2, 5>}, {pipeline_mode = #tpu.pipeline_mode<synchronous>, transform_indices = @transform_14, window_bounds = array<i64: 2, 8>}]} {
    %c0_i32 = arith.constant 0 : i32
    %0 = arith.cmpi eq, %arg0, %c0_i32 : i32
    %1 = arith.extui %0 : i1 to i32
    %c0_i32_0 = arith.constant 0 : i32
    %2 = arith.cmpi ne, %1, %c0_i32_0 : i32
    scf.if %2 {
      %cst_9 = arith.constant 0.000000e+00 : f32
      %13 = vector.broadcast %cst_9 : f32 to vector<2x128xf32>
      %c0_10 = arith.constant 0 : index
      %c0_11 = arith.constant 0 : index
      %14 = vector.load %arg16[%c0_10, %c0_11] : memref<2x128xf32, #tpu.memory_space<vmem>>, vector<2x128xf32>
      tpu.vector_store %arg16[%c0_10, %c0_11], %13 {strides = array<i32>} : memref<2x128xf32, #tpu.memory_space<vmem>>, vector<2x128xf32>,
    } else {
    }
    %c0 = arith.constant 0 : index
    %c0_1 = arith.constant 0 : index
    %3 = vector.load %arg16[%c0, %c0_1] : memref<2x128xf32, #tpu.memory_space<vmem>>, vector<2x128xf32>
    %c0_2 = arith.constant 0 : index
    %c0_3 = arith.constant 0 : index
    %4 = vector.load %arg1[%c0_2, %c0_3] : memref<2x128xf32, #tpu.memory_space<vmem>>, vector<2x128xf32>
    %c0_4 = arith.constant 0 : index
    %c0_5 = arith.constant 0 : index
    %5 = vector.load %arg2[%c0_4, %c0_5] : memref<128x128xbf16, #tpu.memory_space<vmem>>, vector<128x128xbf16>
    %6 = arith.extf %5 : vector<128x128xbf16> to vector<128x128xf32>
    %cst = arith.constant dense<0.000000e+00> : vector<2x128xf32>
    %7 = tpu.matmul %4, %6, %cst {dimension_numbers = #tpu.dot_dimension_numbers<[1], [0], [0], [1], [0, 0, 1, 1], [], []>} : vector<2x128xf32>, vector<128x128xf32>, vector<2x128xf32> -> vector<2x128xf32>
    %8 = arith.addf %3, %7 : vector<2x128xf32>
    %c0_6 = arith.constant 0 : index
    %c0_7 = arith.constant 0 : index
    %9 = vector.load %arg16[%c0_6, %c0_7] : memref<2x128xf32, #tpu.memory_space<vmem>>, vector<2x128xf32>
    tpu.vector_store %arg16[%c0_6, %c0_7], %8 {strides = array<i32>} : memref<2x128xf32, #tpu.memory_space<vmem>>, vector<2x128xf32>,
    %c1_i32 = arith.constant 1 : i32
    %10 = arith.cmpi eq, %arg0, %c1_i32 : i32
    %11 = arith.extui %10 : i1 to i32
    %c0_i32_8 = arith.constant 0 : i32
    %12 = arith.cmpi ne, %11, %c0_i32_8 : i32
    scf.if %12 {
      %c0_9 = arith.constant 0 : index
      %c0_10 = arith.constant 0 : index
      %13 = vector.load %arg16[%c0_9, %c0_10] : memref<2x128xf32, #tpu.memory_space<vmem>>, vector<2x128xf32>
      %14 = arith.mulf %13, %13 : vector<2x128xf32>
      %cst_11 = arith.constant dense<0.000000e+00> : vector<2xf32>
      %15 = vector.multi_reduction <add>, %14, %cst_11 [1] : vector<2x128xf32> to vector<2xf32>
      %16 = vector.shape_cast %15 : vector<2xf32> to vector<2x1xf32>
      %17 = math.sqrt %16 : vector<2x1xf32>
      %cst_12 = arith.constant 9.99999993E-9 : f32
      %18 = vector.broadcast %cst_12 : f32 to vector<2x1xf32>
      %19 = arith.maximumf %17, %18 : vector<2x1xf32>
      %c0_13 = arith.constant 0 : index
      %c0_14 = arith.constant 0 : index
      %20 = vector.load %arg4[%c0_13, %c0_14] : memref<128x5xf32, #tpu.memory_space<vmem>>, vector<128x5xf32>
      %cst_15 = arith.constant dense<0.000000e+00> : vector<2x5xf32>
      %21 = tpu.matmul %13, %20, %cst_15 {dimension_numbers = #tpu.dot_dimension_numbers<[1], [0], [0], [1], [0, 0, 1, 1], [], []>} : vector<2x128xf32>, vector<128x5xf32>, vector<2x5xf32> -> vector<2x5xf32>
      %c0_16 = arith.constant 0 : index
      %c0_17 = arith.constant 0 : index
      %22 = vector.load %arg5[%c0_16, %c0_17] : memref<1x5xf32, #tpu.memory_space<vmem>>, vector<1x5xf32>
      %23 = vector.broadcast %19 : vector<2x1xf32> to vector<2x5xf32>
      %24 = vector.broadcast %22 : vector<1x5xf32> to vector<2x5xf32>
      %25 = arith.mulf %23, %24 : vector<2x5xf32>
      %26 = arith.divf %21, %25 : vector<2x5xf32>
      %cst_18 = arith.constant dense<0xFF800000> : vector<2xf32>
      %27 = vector.multi_reduction <maximumf>, %26, %cst_18 [1] : vector<2x5xf32> to vector<2xf32>
      %28 = vector.shape_cast %27 : vector<2xf32> to vector<2x1xf32>
      %29 = vector.broadcast %28 : vector<2x1xf32> to vector<2x5xf32>
      %30 = arith.subf %26, %29 : vector<2x5xf32>
      %31 = math.exp %30 : vector<2x5xf32>
      %cst_19 = arith.constant dense<0.000000e+00> : vector<2xf32>
      %32 = vector.multi_reduction <add>, %31, %cst_19 [1] : vector<2x5xf32> to vector<2xf32>
      %33 = vector.shape_cast %32 : vector<2xf32> to vector<2x1xf32>
      %34 = vector.broadcast %33 : vector<2x1xf32> to vector<2x5xf32>
      %35 = arith.divf %31, %34 : vector<2x5xf32>
      %c0_20 = arith.constant 0 : index
      %c0_21 = arith.constant 0 : index
      %36 = vector.load %arg3[%c0_20, %c0_21] : memref<5x128xf32, #tpu.memory_space<vmem>>, vector<5x128xf32>
      %cst_22 = arith.constant dense<0.000000e+00> : vector<2x128xf32>
      %37 = tpu.matmul %35, %36, %cst_22 {dimension_numbers = #tpu.dot_dimension_numbers<[1], [0], [0], [1], [0, 0, 1, 1], [], []>} : vector<2x5xf32>, vector<5x128xf32>, vector<2x128xf32> -> vector<2x128xf32>
      %c0_23 = arith.constant 0 : index
      %c0_24 = arith.constant 0 : index
      %38 = vector.load %arg6[%c0_23, %c0_24] : memref<128x4xf32, #tpu.memory_space<vmem>>, vector<128x4xf32>
      %cst_25 = arith.constant dense<0.000000e+00> : vector<2x4xf32>
      %39 = tpu.matmul %37, %38, %cst_25 {dimension_numbers = #tpu.dot_dimension_numbers<[1], [0], [0], [1], [0, 0, 1, 1], [], []>} : vector<2x128xf32>, vector<128x4xf32>, vector<2x4xf32> -> vector<2x4xf32>
      %c0_26 = arith.constant 0 : index
      %c0_27 = arith.constant 0 : index
      %40 = vector.load %arg7[%c0_26, %c0_27] : memref<1x4xf32, #tpu.memory_space<vmem>>, vector<1x4xf32>
      %41 = vector.broadcast %40 : vector<1x4xf32> to vector<2x4xf32>
      %42 = arith.addf %39, %41 : vector<2x4xf32>
      %c0_28 = arith.constant 0 : index
      %c0_29 = arith.constant 0 : index
      %43 = vector.load %arg12[%c0_28, %c0_29] : memref<2x4xf32, #tpu.memory_space<vmem>>, vector<2x4xf32>
      tpu.vector_store %arg12[%c0_28, %c0_29], %42 {strides = array<i32>} : memref<2x4xf32, #tpu.memory_space<vmem>>, vector<2x4xf32>,
      %c0_30 = arith.constant 0 : index
      %c0_31 = arith.constant 0 : index
      %44 = vector.load %arg8[%c0_30, %c0_31] : memref<128x64xf32, #tpu.memory_space<vmem>>, vector<128x64xf32>
      %cst_32 = arith.constant dense<0.000000e+00> : vector<2x64xf32>
      %45 = tpu.matmul %13, %44, %cst_32 {dimension_numbers = #tpu.dot_dimension_numbers<[1], [0], [0], [1], [0, 0, 1, 1], [], []>} : vector<2x128xf32>, vector<128x64xf32>, vector<2x64xf32> -> vector<2x64xf32>
      %c0_33 = arith.constant 0 : index
      %c0_34 = arith.constant 0 : index
      %46 = vector.load %arg9[%c0_33, %c0_34] : memref<1x64xf32, #tpu.memory_space<vmem>>, vector<1x64xf32>
      %47 = vector.broadcast %46 : vector<1x64xf32> to vector<2x64xf32>
      %48 = arith.addf %45, %47 : vector<2x64xf32>
      %cst_35 = arith.constant 0.000000e+00 : f32
      %49 = vector.broadcast %cst_35 : f32 to vector<2x64xf32>
      %50 = arith.maximumf %48, %49 : vector<2x64xf32>
      %c0_36 = arith.constant 0 : index
      %c0_37 = arith.constant 0 : index
      %51 = vector.load %arg10[%c0_36, %c0_37] : memref<64x8xf32, #tpu.memory_space<vmem>>, vector<64x8xf32>
      %cst_38 = arith.constant dense<0.000000e+00> : vector<2x8xf32>
      %52 = tpu.matmul %50, %51, %cst_38 {dimension_numbers = #tpu.dot_dimension_numbers<[1], [0], [0], [1], [0, 0, 1, 1], [], []>} : vector<2x64xf32>, vector<64x8xf32>, vector<2x8xf32> -> vector<2x8xf32>
      %c0_39 = arith.constant 0 : index
      %c0_40 = arith.constant 0 : index
      %53 = vector.load %arg11[%c0_39, %c0_40] : memref<1x8xf32, #tpu.memory_space<vmem>>, vector<1x8xf32>
      %54 = vector.broadcast %53 : vector<1x8xf32> to vector<2x8xf32>
      %55 = arith.addf %52, %54 : vector<2x8xf32>
      %c0_41 = arith.constant 0 : index
      %c0_42 = arith.constant 0 : index
      %56 = vector.load %arg15[%c0_41, %c0_42] : memref<2x8xf32, #tpu.memory_space<vmem>>, vector<2x8xf32>
      tpu.vector_store %arg15[%c0_41, %c0_42], %55 {strides = array<i32>} : memref<2x8xf32, #tpu.memory_space<vmem>>, vector<2x8xf32>,
      %c0_43 = arith.constant 0 : index
      %c0_44 = arith.constant 0 : index
      %57 = vector.load %arg13[%c0_43, %c0_44] : memref<2x128xf32, #tpu.memory_space<vmem>>, vector<2x128xf32>
      tpu.vector_store %arg13[%c0_43, %c0_44], %37 {strides = array<i32>} : memref<2x128xf32, #tpu.memory_space<vmem>>, vector<2x128xf32>,
      %c0_45 = arith.constant 0 : index
      %c0_46 = arith.constant 0 : index
      %58 = vector.load %arg14[%c0_45, %c0_46] : memref<2x5xf32, #tpu.memory_space<vmem>>, vector<2x5xf32>
      tpu.vector_store %arg14[%c0_45, %c0_46], %35 {strides = array<i32>} : memref<2x5xf32, #tpu.memory_space<vmem>>, vector<2x5xf32>,
    } else {
    }
    return
  }
  func.func @transform_0(%arg0: i32) -> (i32, i32) {
    %c0_i32 = arith.constant 0 : i32
    %c0_i32_0 = arith.constant 0 : i32
    return %c0_i32, %arg0 : i32, i32
  }
  func.func @transform_1(%arg0: i32) -> (i32, i32) {
    %c0_i32 = arith.constant 0 : i32
    %c0_i32_0 = arith.constant 0 : i32
    return %arg0, %c0_i32 : i32, i32
  }
  func.func @transform_2(%arg0: i32) -> (i32, i32) {
    %c0_i32 = arith.constant 0 : i32
    %c0_i32_0 = arith.constant 0 : i32
    %c0_i32_1 = arith.constant 0 : i32
    return %c0_i32, %c0_i32_0 : i32, i32
  }
  func.func @transform_3(%arg0: i32) -> (i32, i32) {
    %c0_i32 = arith.constant 0 : i32
    %c0_i32_0 = arith.constant 0 : i32
    %c0_i32_1 = arith.constant 0 : i32
    return %c0_i32, %c0_i32_0 : i32, i32
  }
  func.func @transform_4(%arg0: i32) -> (i32, i32) {
    %c0_i32 = arith.constant 0 : i32
    %c0_i32_0 = arith.constant 0 : i32
    %c0_i32_1 = arith.constant 0 : i32
    return %c0_i32, %c0_i32_0 : i32, i32
  }
  func.func @transform_5(%arg0: i32) -> (i32, i32) {
    %c0_i32 = arith.constant 0 : i32
    %c0_i32_0 = arith.constant 0 : i32
    %c0_i32_1 = arith.constant 0 : i32
    return %c0_i32, %c0_i32_0 : i32, i32
  }
  func.func @transform_6(%arg0: i32) -> (i32, i32) {
    %c0_i32 = arith.constant 0 : i32
    %c0_i32_0 = arith.constant 0 : i32
    %c0_i32_1 = arith.constant 0 : i32
    return %c0_i32, %c0_i32_0 : i32, i32
  }
  func.func @transform_7(%arg0: i32) -> (i32, i32) {
    %c0_i32 = arith.constant 0 : i32
    %c0_i32_0 = arith.constant 0 : i32
    %c0_i32_1 = arith.constant 0 : i32
    return %c0_i32, %c0_i32_0 : i32, i32
  }
  func.func @transform_8(%arg0: i32) -> (i32, i32) {
    %c0_i32 = arith.constant 0 : i32
    %c0_i32_0 = arith.constant 0 : i32
    %c0_i32_1 = arith.constant 0 : i32
    return %c0_i32, %c0_i32_0 : i32, i32
  }
  func.func @transform_9(%arg0: i32) -> (i32, i32) {
    %c0_i32 = arith.constant 0 : i32
    %c0_i32_0 = arith.constant 0 : i32
    %c0_i32_1 = arith.constant 0 : i32
    return %c0_i32, %c0_i32_0 : i32, i32
  }
  func.func @transform_10(%arg0: i32) -> (i32, i32) {
    %c0_i32 = arith.constant 0 : i32
    %c0_i32_0 = arith.constant 0 : i32
    %c0_i32_1 = arith.constant 0 : i32
    return %c0_i32, %c0_i32_0 : i32, i32
  }
  func.func @transform_11(%arg0: i32) -> (i32, i32) {
    %c0_i32 = arith.constant 0 : i32
    %c0_i32_0 = arith.constant 0 : i32
    %c0_i32_1 = arith.constant 0 : i32
    return %c0_i32, %c0_i32_0 : i32, i32
  }
  func.func @transform_12(%arg0: i32) -> (i32, i32) {
    %c0_i32 = arith.constant 0 : i32
    %c0_i32_0 = arith.constant 0 : i32
    %c0_i32_1 = arith.constant 0 : i32
    return %c0_i32, %c0_i32_0 : i32, i32
  }
  func.func @transform_13(%arg0: i32) -> (i32, i32) {
    %c0_i32 = arith.constant 0 : i32
    %c0_i32_0 = arith.constant 0 : i32
    %c0_i32_1 = arith.constant 0 : i32
    return %c0_i32, %c0_i32_0 : i32, i32
  }
  func.func @transform_14(%arg0: i32) -> (i32, i32) {
    %c0_i32 = arith.constant 0 : i32
    %c0_i32_0 = arith.constant 0 : i32
    %c0_i32_1 = arith.constant 0 : i32
    return %c0_i32, %c0_i32_0 : i32, i32
  }
}

</mosaic_0001>

<bundles_post_ra>
// kernel: enhanced_gcn_forward.4
= control target key start
LH: loop header
LB: loop body
LE: loop exit
PB: predicated region body
PF: predicated region fallthrough
CT: control target
= control target key end

     0   :  { %s2329_s0 = inlined_call_operand.hbm [shape: bf16[256,256], index: 0, kind: input, shape index: {}]   ;;  %s2330_s1 = inlined_call_operand.vmem [shape: bf16[256,128], index: 1, kind: input, shape index: {}]   ;;  %s2331_s2 = inlined_call_operand.vmem [shape: f32[1,128], index: 2, kind: input, shape index: {}]   ;;  %s2332_s3 = inlined_call_operand.vmem [shape: bf16[128,128], index: 3, kind: input, shape index: {}]   ;;  %s2333_s4 = inlined_call_operand.vmem [shape: bf16[128,128], index: 4, kind: input, shape index: {}]   ;;  %s2334_s5 = inlined_call_operand.vmem [shape: f32[1,128], index: 5, kind: input, shape index: {}]   ;;  %s2335_s6 = inlined_call_operand.vmem [shape: bf16[256,128], index: 6, kind: output, shape index: {0}]   ;;  %s2336_s7 = inlined_call_operand.vmem [shape: f32[256,128], index: 7, kind: output, shape index: {1}]  }
   0x1   :  { %2338 = sst [smem:[#allocation7_spill]] %s2331_s2 }
   0x2   :  { %2339 = sst [smem:[#allocation8_spill]] %s2334_s5 }
   0x3   :  { %13 = vsyncpa [#allocation4], 0 }
   0x4   :  { %15 = vsyncpa [#allocation4 + $0x1], 0  ;;  %s1938_s24 = smov 0   ;;  %s1940_s25 = smov 0  }
   0x5   :  { %s1942_s26 = smov 0   ;;  %s1944_s27 = smov 0  }
   0x6   :  { %s1946_s28 = smov 0   ;;  %s1948_s29 = smov 0  }
   0x7   :  { %s1950_s30 = smov 0   ;;  %s1952_s8 = smov 0  }
   0x8 LB: > { %s1346_s9 = sadd.s32 4294967295, %s1891_s8   ;;  %s30_s10 = sadd.s32 1, %s1883_s29  ;;  %s1891_s8 = sphi %s1952_s8, %s21_s8   ;;  %s1887_s30 = sphi %s1950_s30, %s2354_s30   ;;  %s1883_s29 = sphi %s1948_s29, %s2353_s29   ;;  %s1879_s28 = sphi %s1946_s28, %s2352_s28   ;;  %s1875_s27 = sphi %s1944_s27, %s2351_s27   ;;  %s1871_s26 = sphi %s1942_s26, %s2350_s26   ;;  %s1867_s25 = sphi %s1940_s25, %s2349_s25   ;;  %s1863_s24 = sphi %s1938_s24, %s2348_s24  }
   0x9   : > { %p31_p0 = scmp.ge.s32.totalorder %s30_s10, 2  ;;  %s33_s11 = sadd.s32 1, %s1887_s30 }
   0xa   : > { %s42_s12 = sadd.s32 1, %s1871_s26  ;;  %p49_p1 = scmp.ne.s32.totalorder %s1871_s26, %s1867_s25 }
   0xb   : > { %s2356_s10 = smov (%p31_p0, %s30_s10), 0  ;;  %s2358_s11 = smov (!%p31_p0, %s33_s11), %s1887_s30 }
   0xc   : > { %2340 = sst [smem:[#allocation6_spill]] %s2356_s10  ;;  %s38_s13 = ssub.s32 %s1883_s29, %s2356_s10 }
   0xd   : > { %p50_p2 = scmp.eq.s32.totalorder %s1891_s8, 0  ;;  %p35_p3 = scmp.ge.s32.totalorder %s2358_s11, 2 }
   0xe   : > { %p55_p4 = scmp.ne.s32.totalorder %s1867_s25, %s1863_s24  ;;  %p56_p6 = scmp.eq.s32.totalorder %s1346_s9, 0 }
   0xf   : > { %p1989_p5 = por %p50_p2, %p49_p1  ;;  %s2360_s11 = smov (%p35_p3, %s2358_s11), 0 }
  0x10   : > { %p1995_p7 = por %p56_p6, %p55_p4  ;;  %s37_s16 = ssub.s32 %s1887_s30, %s2360_s11 }
  0x11   : > { %p1662_p8 = scmp.lt.s32.totalorder %s1891_s8, 4  ;;  %s39_s17 = sor.u32 %s38_s13, %s37_s16 }
  0x12   : > { %s253_s18 = sand.u32 1, %s1871_s26   ;;  %p40_p9 = scmp.eq.s32.totalorder %s39_s17, 0 }
  0x13   : > { %s1350_s19 = sshll.u32 %s253_s18, 6  ;;  %s1432_s20 = sshll.u32 %s1887_s30, 5 }
  0x14   : > { %s2005_s21 = scalar_select %p40_p9, %s1871_s26, %s42_s12  }
  0x15   : > { %s263_s22 = sadd.s32 %s1883_s29, %s1432_s20  ;;  %s257_s24 = scalar_lea.vmem [#allocation3], %s1350_s19 }
  0x16   : > { %s1353_s23 = sshll.u32 %s263_s22, 6  ;;  %s266_s9 = sshll.u32 %s257_s24, 4  ;;  %s2013_s9 = int_to_ptr.vmem [resolvable:$true] %s266_s9 }
  0x17   : > { %s2011_s2 = scalar_lea.hbm %s2329_s0, %s1353_s23  ;;  %p2019_p10 = pnand %p1662_p8, %p1989_p5 }
  0x18   : > { %s2024_s13 = scalar_lea.sflag [#allocation4], %s253_s18  ;;  %s1795_s5 = scalar_lea.hbm %s2011_s2, 1024 }
  0x19   : > { %p1796_p12 = scmp.ne.s32.totalorder %s2011_s2, %s1795_s5  ;;  %p1797_p13 = pneg %p2019_p10 }
  0x1a   : > { %s1800_s16 = scalar_lea.hbm %s2329_s0, 4096  ;;  %p1801_p2 = scmp.lt.u32.totalorder %s2011_s2, %s2329_s0 }
  0x1b   : > { %p1798_p0 = pnand %p1797_p13, %p1796_p12  ;;  %p1802_p3 = scmp.lt.u32.totalorder %s1800_s16, %s1795_s5 }
  0x1c   : > { %p1804_p5 = scmp.lt.u32.totalorder %s1795_s5, %s2011_s2 }
  0x1d   : > { %p1799_p1 = pneg %p1798_p0  ;;  %p1803_p4 = por %p1802_p3, %p1801_p2 }
  0x1f   : > { %p1805_p6 = por %p1804_p5, %p1803_p4 }
  0x21   : > { %p1806_p8 = pnand %p1805_p6, %p1799_p1 }
  0x23   : > { %1809 = shalt.err (!%p1806_p8)
}
  0x24   : > { %s1810_s18 = scalar_lea.vmem %s2013_s9, 1024  ;;  %s1893_s20 = smov [#allocation3]  }
  0x25   : > { %p1811_p9 = scmp.ne.s32.totalorder %s2013_s9, %s1810_s18  ;;  %s1815_s22 = sshll.u32 %s1893_s20, 4  ;;  %s1816_s22 = int_to_ptr.vmem [resolvable:$false] %s1815_s22 }
  0x26   : > { %s1817_s23 = scalar_lea.vmem %s1816_s22, 2048  ;;  %p1818_p11 = scmp.lt.s32.totalorder %s2013_s9, %s1816_s22 }
  0x27   : > { %p1813_p12 = pnand %p1811_p9, %p1797_p13  ;;  %p1819_p2 = scmp.lt.s32.totalorder %s1817_s23, %s1810_s18 }
  0x29   : > { %p1814_p0 = pneg %p1813_p12  ;;  %p1820_p3 = por %p1819_p2, %p1818_p11 }
  0x2b   : > { %p1821_p4 = pnand %p1820_p3, %p1814_p0 }
  0x2d   : > { %1824 = shalt.err (!%p1821_p4)
}
  0x2e   : > { %s1894_s24 = smov 128   ;;  %s1895_s5 = smov 64  }
  0x2f   : > { %s1896_s10 = smov 4   ;;  %p283_p13 = scmp.lt.s32.totalorder %s1891_s8, 5 }
  0x30   : > { %1661 = dma.hbm_to_vmem [thread:$0]  (!%p2019_p10), %s2011_s2, 1024, %s2013_s9, %s2024_s13, %s1894_s24, %s1895_s5, %s1896_s10  }
  0x31   : > { %p2344_p1 = scmp.ge.s32.totalorder %s1891_s8, 1 }
  0x33   : > { %p284_p5 = pnand %p2344_p1, %p283_p13 }
  0x34   : > { %s289_s14 = sand.u32 (!%p284_p5), 1, %s1867_s25  }
  0x35   : > { %287 = sbr.rel (%p284_p5) target bundleno = 598 (0x256), region = 44  ;;  %s1355_s16 = sshll.u32 (!%p284_p5), %s289_s14, 6 }
  0x36   : > { %s290_s17 = scalar_lea.sflag (!%p284_p5), [#allocation4], %s289_s14  ;;  %s2056_s19 = scalar_lea.vmem (!%p284_p5), [#allocation3], %s1355_s16 }
  0x3c   : > { %1858 = dma.done.wait (%p1995_p7), %s290_s17, 1024  }
  0x3d   : > { %1860 = vsyncadd (%p1995_p7), %s290_s17, 4294966272  ;;  %s1356_s12 = sshll.u32 %s1875_s27, 4  ;;  %s1358_s2 = sshll.u32 %s1879_s28, 4 }
  0x3e   : > { %p336_p10 = scmp.lt.s32.totalorder %s1356_s12, 31  ;;  %p342_p11 = scmp.lt.s32.totalorder %s1358_s2, 31 }
  0x3f   : > { %p1362_p7 = scmp.ne.s32.totalorder %s1875_s27, 0 }
  0x40   : > { %s2362_s12 = smov (!%p336_p10, %s1356_s12), 31  ;;  %s2364_s2 = smov (!%p342_p11, %s1358_s2), 31 }
  0x41   : > { %s1357_s9 = sshll.u32 %s2362_s12, 2  ;;  %s1359_s22 = sshll.u32 %s2364_s2, 2  ;;  %v1897_v0 = vmov (!%p1362_p7), 0.0  }
  0x42   : > { %s2067_s20 = scalar_lea.vmem %s2330_s1, %s1357_s9  ;;  %s2072_s15 = scalar_lea.vmem %s2335_s6, %s1359_s22  ;;  %358 = vst [vmem:[#allocation2] sm:$0xff] (!%p1362_p7), %v1897_v0  ;;  %359 = vst [vmem:[#allocation2 + $0x8] sm:$0xff] (!%p1362_p7), %v1897_v0 }
  0x43   : > { %s1361_s5 = sshll.u32 %s2364_s2, 3  ;;  %357 = sbr.rel (%p1362_p7) target bundleno = 74 (0x4a), region = 52  ;;  %360 = vst [vmem:[#allocation2 + $0x10] sm:$0xff] (!%p1362_p7), %v1897_v0  ;;  %361 = vst [vmem:[#allocation2 + $0x18] sm:$0xff] (!%p1362_p7), %v1897_v0 }
  0x44   : > { %s2077_s28 = scalar_lea.vmem %s2336_s7, %s1361_s5  ;;  %362 = vst [vmem:[#allocation2 + $0x20] sm:$0xff] (!%p1362_p7), %v1897_v0  ;;  %363 = vst [vmem:[#allocation2 + $0x28] sm:$0xff] (!%p1362_p7), %v1897_v0 }
  0x45   : > { %364 = vst [vmem:[#allocation2 + $0x30] sm:$0xff] (!%p1362_p7), %v1897_v0  ;;  %365 = vst [vmem:[#allocation2 + $0x38] sm:$0xff] (!%p1362_p7), %v1897_v0 }
  0x46   : > { %366 = vst [vmem:[#allocation2 + $0x40] sm:$0xff] (!%p1362_p7), %v1897_v0  ;;  %367 = vst [vmem:[#allocation2 + $0x48] sm:$0xff] (!%p1362_p7), %v1897_v0 }
  0x47   : > { %368 = vst [vmem:[#allocation2 + $0x50] sm:$0xff] (!%p1362_p7), %v1897_v0  ;;  %369 = vst [vmem:[#allocation2 + $0x58] sm:$0xff] (!%p1362_p7), %v1897_v0 }
  0x48   : > { %370 = vst [vmem:[#allocation2 + $0x60] sm:$0xff] (!%p1362_p7), %v1897_v0  ;;  %371 = vst [vmem:[#allocation2 + $0x68] sm:$0xff] (!%p1362_p7), %v1897_v0 }
  0x49   : > { %372 = vst [vmem:[#allocation2 + $0x70] sm:$0xff] (!%p1362_p7), %v1897_v0  ;;  %373 = vst [vmem:[#allocation2 + $0x78] sm:$0xff] (!%p1362_p7), %v1897_v0 }
  0x4a PF: > { %v1731_v1 = vld [vmem:[%s2067_s20] sm:$0xff]   ;;  %v1732_v2 = vld [vmem:[%s2067_s20 + $0x8] sm:$0xff]   ;;  %v1733_v3 = vld [vmem:[%s2067_s20 + $0x10] sm:$0xff]   ;;  %p1379_p6 = scmp.ne.s32.totalorder %s1875_s27, 1 }
  0x4b   : > { %1544 = vmatprep.subr.bf16.mxu0 %v1731_v1  ;;  %1640 = vmatprep.subr.bf16.mxu1 %v1731_v1  ;;  %v1734_v4 = vld [vmem:[%s2067_s20 + $0x18] sm:$0xff]   ;;  %v1739_v5 = vld [vmem:[%s2056_s19] sm:$0xff]   ;;  %v1736_v8 = vld [vmem:[%s2067_s20 + $0x28] sm:$0xff]   ;;  %s2345_s22 = sld [smem:[#allocation7_spill]] (!%p1379_p6)  ;;  %s2346_s9 = sld [smem:[#allocation8_spill]] (!%p1379_p6) }
  0x4c   : > { %1545 = vmatpush3.bf16.msra.mxu0 %v1731_v1  ;;  %1648 = vmatpush3.bf16.msra.mxu1 %v1731_v1  ;;  %v1740_v6 = vld [vmem:[%s2056_s19 + $0x20] sm:$0xff]   ;;  %v1737_v9 = vld [vmem:[%s2067_s20 + $0x30] sm:$0xff]   ;;  %v1738_v10 = vld [vmem:[%s2067_s20 + $0x38] sm:$0xff]  }
  0x4d   : > { %1546 = vmatprep.subr.bf16.mxu0 %v1732_v2  ;;  %1641 = vmatprep.subr.bf16.mxu1 %v1732_v2  ;;  %v1735_v7 = vld [vmem:[%s2067_s20 + $0x20] sm:$0xff]   ;;  %v1741_v11 = vld [vmem:[%s2056_s19 + $0x8] sm:$0xff]   ;;  %v1743_v13 = vld [vmem:[%s2056_s19 + $0x10] sm:$0xff]  }
  0x4e   : > { %1560 = vmatprep.mubr.bf16.mxu0 %v1739_v5  ;;  %1568 = vmatprep.mubr.bf16.mxu1 %v1740_v6  ;;  %v1742_v12 = vld [vmem:[%s2056_s19 + $0x28] sm:$0xff]   ;;  %v1744_v14 = vld [vmem:[%s2056_s19 + $0x30] sm:$0xff]   ;;  %v1745_v15 = vld [vmem:[%s2056_s19 + $0x18] sm:$0xff]  }
  0x4f   : > { %v1746_v16 = vld [vmem:[%s2056_s19 + $0x38] sm:$0xff]   ;;  %v376_v17 = vld [vmem:[#allocation2 + $0x10] sm:$0xff]  ;;  %v374_v19 = vld [vmem:[#allocation2] sm:$0xff] }
  0x50   : > { %1547 = vmatpush3.bf16.msra.mxu0 %v1732_v2  ;;  %1649 = vmatpush3.bf16.msra.mxu1 %v1732_v2  ;;  %v384_v18 = vld [vmem:[#allocation2 + $0x50] sm:$0xff]  ;;  %v382_v20 = vld [vmem:[#allocation2 + $0x40] sm:$0xff]  ;;  %v377_v23 = vld [vmem:[#allocation2 + $0x18] sm:$0xff] }
  0x51   : > { %1548 = vmatprep.subr.bf16.mxu0 %v1733_v3  ;;  %1642 = vmatprep.subr.bf16.mxu1 %v1733_v3  ;;  %v385_v24 = vld [vmem:[#allocation2 + $0x58] sm:$0xff]  ;;  %v375_v29 = vld [vmem:[#allocation2 + $0x8] sm:$0xff]  ;;  %v380_v41 = vld [vmem:[#allocation2 + $0x30] sm:$0xff] }
  0x52   : > { %v383_v30 = vld [vmem:[#allocation2 + $0x48] sm:$0xff]  ;;  %v388_v42 = vld [vmem:[#allocation2 + $0x70] sm:$0xff]  ;;  %v378_v43 = vld [vmem:[#allocation2 + $0x20] sm:$0xff] }
  0x53   : > { %v386_v44 = vld [vmem:[#allocation2 + $0x60] sm:$0xff]  ;;  %v381_v47 = vld [vmem:[#allocation2 + $0x38] sm:$0xff]  ;;  %v379_v53 = vld [vmem:[#allocation2 + $0x28] sm:$0xff] }
  0x54   : > { %1549 = vmatpush3.bf16.msra.mxu0 %v1733_v3  ;;  %1650 = vmatpush3.bf16.msra.mxu1 %v1733_v3  ;;  %v389_v48 = vld [vmem:[#allocation2 + $0x78] sm:$0xff]  ;;  %v387_v54 = vld [vmem:[#allocation2 + $0x68] sm:$0xff]  ;;  %v1747_v1 = vld [vmem:[%s2332_s3] sm:$0xff] (!%p1379_p6)  }
  0x55   : > { %1550 = vmatprep.subr.bf16.mxu0 %v1734_v4  ;;  %1643 = vmatprep.subr.bf16.mxu1 %v1734_v4  ;;  %v1748_v2 = vld [vmem:[%s2333_s4] sm:$0xff] (!%p1379_p6)   ;;  %v1749_v3 = vld [vmem:[%s2332_s3 + $0x8] sm:$0xff] (!%p1379_p6)   ;;  %v1751_v5 = vld [vmem:[%s2332_s3 + $0x10] sm:$0xff] (!%p1379_p6)  }
  0x56   : > { %v1752_v6 = vld [vmem:[%s2333_s4 + $0x10] sm:$0xff] (!%p1379_p6)  }
  0x58   : > { %1551 = vmatpush3.bf16.msra.mxu0 %v1734_v4  ;;  %1651 = vmatpush3.bf16.msra.mxu1 %v1734_v4  ;;  %v1750_v4 = vld [vmem:[%s2333_s4 + $0x8] sm:$0xff] (!%p1379_p6)  }
  0x59   : > { %1552 = vmatprep.subr.bf16.mxu0 %v1735_v7  ;;  %1644 = vmatprep.subr.bf16.mxu1 %v1735_v7 }
  0x5c   : > { %1553 = vmatpush3.bf16.msra.mxu0 %v1735_v7  ;;  %1652 = vmatpush3.bf16.msra.mxu1 %v1735_v7  ;;  %v1753_v7 = vld [vmem:[%s2332_s3 + $0x18] sm:$0xff] (!%p1379_p6)  }
  0x5d   : > { %1554 = vmatprep.subr.bf16.mxu0 %v1736_v8  ;;  %1645 = vmatprep.subr.bf16.mxu1 %v1736_v8 }
  0x60   : > { %1555 = vmatpush3.bf16.msra.mxu0 %v1736_v8  ;;  %1653 = vmatpush3.bf16.msra.mxu1 %v1736_v8  ;;  %v1754_v8 = vld [vmem:[%s2333_s4 + $0x18] sm:$0xff] (!%p1379_p6)  }
  0x61   : > { %1556 = vmatprep.subr.bf16.mxu0 %v1737_v9  ;;  %1646 = vmatprep.subr.bf16.mxu1 %v1737_v9 }
  0x64   : > { %1557 = vmatpush3.bf16.msra.mxu0 %v1737_v9  ;;  %1654 = vmatpush3.bf16.msra.mxu1 %v1737_v9  ;;  %v1755_v9 = vld [vmem:[%s2332_s3 + $0x20] sm:$0xff] (!%p1379_p6)  }
  0x65   : > { %1558 = vmatprep.subr.bf16.mxu0 %v1738_v10  ;;  %1647 = vmatprep.subr.bf16.mxu1 %v1738_v10 }
  0x68   : > { %1559 = vmatpush3.bf16.msra.mxu0 %v1738_v10  ;;  %1655 = vmatpush3.bf16.msra.mxu1 %v1738_v10  ;;  %v1756_v10 = vld [vmem:[%s2333_s4 + $0x20] sm:$0xff] (!%p1379_p6)  }
  0x69   : > { %1576 = vmatprep.subr.bf16.mxu0 (!%p1379_p6), %v1747_v1  ;;  %1608 = vmatprep.subr.bf16.mxu1 (!%p1379_p6), %v1748_v2 }
  0x6b   : > { %1561 = vmatmul.mubr.bf16.vlgmr.msra.gmra.mrb[0].mxu0 %v1741_v11  ;;  %1569 = vmatmul.mubr.bf16.vlgmr.msra.gmra.mrb[0].mxu1 %v1742_v12  ;;  %v1757_v11 = vld [vmem:[%s2332_s3 + $0x28] sm:$0xff] (!%p1379_p6)  }
  0x6c   : > { %1564 = vmatprep.mubr.bf16.mxu0 %v1743_v13  ;;  %1572 = vmatprep.mubr.bf16.mxu1 %v1744_v14  ;;  %v1758_v12 = vld [vmem:[%s2333_s4 + $0x28] sm:$0xff] (!%p1379_p6)  }
  0x6d   : > { %1577 = vmatpush3.bf16.msra.mxu0 (!%p1379_p6), %v1747_v1  ;;  %1609 = vmatpush3.bf16.msra.mxu1 (!%p1379_p6), %v1748_v2 }
  0x6e   : > { %1578 = vmatprep.subr.bf16.mxu0 (!%p1379_p6), %v1749_v3  ;;  %1610 = vmatprep.subr.bf16.mxu1 (!%p1379_p6), %v1750_v4 }
  0x71   : > { %1579 = vmatpush3.bf16.msra.mxu0 (!%p1379_p6), %v1749_v3  ;;  %1611 = vmatpush3.bf16.msra.mxu1 (!%p1379_p6), %v1750_v4 }
  0x72   : > { %1580 = vmatprep.subr.bf16.mxu0 (!%p1379_p6), %v1751_v5  ;;  %1612 = vmatprep.subr.bf16.mxu1 (!%p1379_p6), %v1752_v6 }
  0x73   : > { %1565 = vmatmul.mubr.bf16.gmra.mrb[4].mxu0 %v1745_v15  ;;  %1573 = vmatmul.mubr.bf16.gmra.mrb[4].mxu1 %v1746_v16  ;;  %v2136_v15 = vld [vmem:[%s2345_s22] ss:$0 sm:$0xff] (!%p1379_p6) }
  0x75   : > { %1581 = vmatpush3.bf16.msra.mxu0 (!%p1379_p6), %v1751_v5  ;;  %1613 = vmatpush3.bf16.msra.mxu1 (!%p1379_p6), %v1752_v6 }
  0x76   : > { %1582 = vmatprep.subr.bf16.mxu0 (!%p1379_p6), %v1753_v7  ;;  %1614 = vmatprep.subr.bf16.mxu1 (!%p1379_p6), %v1754_v8 }
  0x79   : > { %1583 = vmatpush3.bf16.msra.mxu0 (!%p1379_p6), %v1753_v7  ;;  %1615 = vmatpush3.bf16.msra.mxu1 (!%p1379_p6), %v1754_v8 }
  0x7a   : > { %1584 = vmatprep.subr.bf16.mxu0 (!%p1379_p6), %v1755_v9  ;;  %1616 = vmatprep.subr.bf16.mxu1 (!%p1379_p6), %v1756_v10 }
  0x7d   : > { %1585 = vmatpush3.bf16.msra.mxu0 (!%p1379_p6), %v1755_v9  ;;  %1617 = vmatpush3.bf16.msra.mxu1 (!%p1379_p6), %v1756_v10 }
  0x7e   : > { %1586 = vmatprep.subr.bf16.mxu0 (!%p1379_p6), %v1757_v11  ;;  %1618 = vmatprep.subr.bf16.mxu1 (!%p1379_p6), %v1758_v12 }
  0x81   : > { %1587 = vmatpush3.bf16.msra.mxu0 (!%p1379_p6), %v1757_v11  ;;  %1619 = vmatpush3.bf16.msra.mxu1 (!%p1379_p6), %v1758_v12 }
 0x13e   : > { %v1562_v21 = vpop.f32.mrb[0].mxu0  ;;  %v1570_v22 = vpop.f32.mrb[0].mxu1 }
 0x13f   : > { %v617_v25 = vadd.f32 %v1562_v21, %v376_v17  ;;  %v625_v26 = vadd.f32 %v1570_v22, %v384_v18  ;;  %v552_v27 = vpop.f32.mrb[1].mxu0  ;;  %v584_v28 = vpop.f32.mrb[1].mxu1 }
 0x140   : > { %v615_v31 = vadd.f32 %v552_v27, %v374_v19  ;;  %v623_v32 = vadd.f32 %v584_v28, %v382_v20  ;;  %v1563_v33 = vpop.f32.mrb[2].mxu0  ;;  %v1571_v34 = vpop.f32.mrb[2].mxu1  ;;  %v1759_v28 = vld [vmem:[%s2332_s3 + $0x30] sm:$0xff] (!%p1379_p6)  }
 0x141   : > { %633 = vst [vmem:[#allocation2 + $0x10] sm:$0xff] %v617_v25  ;;  %641 = vst [vmem:[#allocation2 + $0x50] sm:$0xff] %v625_v26  ;;  %v618_v35 = vadd.f32 %v1563_v33, %v377_v23  ;;  %v626_v36 = vadd.f32 %v1571_v34, %v385_v24  ;;  %v555_v37 = vpop.f32.mrb[3].mxu0  ;;  %v587_v38 = vpop.f32.mrb[3].mxu1  ;;  %1588 = vmatprep.subr.bf16.mxu0 (!%p1379_p6), %v1759_v28 }
 0x142   : > { %631 = vst [vmem:[#allocation2] sm:$0xff] %v615_v31  ;;  %639 = vst [vmem:[#allocation2 + $0x40] sm:$0xff] %v623_v32  ;;  %v616_v39 = vadd.f32 %v555_v37, %v375_v29  ;;  %v624_v40 = vadd.f32 %v587_v38, %v383_v30  ;;  %v1760_v32 = vld [vmem:[%s2333_s4 + $0x30] sm:$0xff] (!%p1379_p6)   ;;  %1589 = vmatpush3.bf16.msra.mxu0 (!%p1379_p6), %v1759_v28 }
 0x143   : > { %634 = vst [vmem:[#allocation2 + $0x18] sm:$0xff] %v618_v35  ;;  %642 = vst [vmem:[#allocation2 + $0x58] sm:$0xff] %v626_v36  ;;  %1620 = vmatprep.subr.bf16.mxu1 (!%p1379_p6), %v1760_v32 }
 0x144   : > { %632 = vst [vmem:[#allocation2 + $0x8] sm:$0xff] %v616_v39  ;;  %640 = vst [vmem:[#allocation2 + $0x48] sm:$0xff] %v624_v40  ;;  %1621 = vmatpush3.bf16.msra.mxu1 (!%p1379_p6), %v1760_v32 }
 0x146   : > { %v1566_v45 = vpop.f32.mrb[4].mxu0  ;;  %v1574_v46 = vpop.f32.mrb[4].mxu1  ;;  %650 = sbr.rel (%p1379_p6) target bundleno = 598 (0x256), region = 56 }
 0x147   : > { %v621_v49 = vadd.f32 %v1566_v45, %v380_v41  ;;  %v629_v50 = vadd.f32 %v1574_v46, %v388_v42  ;;  %v568_v51 = vpop.f32.mrb[5].mxu0  ;;  %v600_v52 = vpop.f32.mrb[5].mxu1 }
 0x148   : > { %v619_v55 = vadd.f32 %v568_v51, %v378_v43  ;;  %v627_v56 = vadd.f32 %v600_v52, %v386_v44  ;;  %v1567_v57 = vpop.f32.mrb[6].mxu0  ;;  %v1575_v58 = vpop.f32.mrb[6].mxu1  ;;  %v653_v18 = vld [vmem:[#allocation2 + $0x10] sm:$0xff] (!%p1379_p6)  ;;  %v1761_v44 = vld [vmem:[%s2332_s3 + $0x38] sm:$0xff] (!%p1379_p6)  }
 0x149   : > { %637 = vst [vmem:[#allocation2 + $0x30] sm:$0xff] %v621_v49  ;;  %645 = vst [vmem:[#allocation2 + $0x70] sm:$0xff] %v629_v50  ;;  %v622_v59 = vadd.f32 %v1567_v57, %v381_v47  ;;  %v630_v60 = vadd.f32 %v1575_v58, %v389_v48  ;;  %v571_v61 = vpop.f32.mrb[7].mxu0  ;;  %v603_v62 = vpop.f32.mrb[7].mxu1  ;;  %v651_v13 = vld [vmem:[#allocation2] sm:$0xff] (!%p1379_p6)  ;;  %v2145_v21 = vadd.f32 (!%p1379_p6), %v2136_v15, %v653_v18  ;;  %v661_v47 = vld [vmem:[#allocation2 + $0x50] sm:$0xff] (!%p1379_p6)  ;;  %1590 = vmatprep.subr.bf16.mxu0 (!%p1379_p6), %v1761_v44 }
 0x14a   : > { %635 = vst [vmem:[#allocation2 + $0x20] sm:$0xff] %v619_v55  ;;  %643 = vst [vmem:[#allocation2 + $0x60] sm:$0xff] %v627_v56  ;;  %v620_v63 = vadd.f32 %v571_v61, %v379_v53  ;;  %v628_v0 = vadd.f32 %v603_v62, %v387_v54  ;;  %v2139_v16 = vadd.f32 (!%p1379_p6), %v2136_v15, %v651_v13  ;;  %v654_v19 = vld [vmem:[#allocation2 + $0x18] sm:$0xff] (!%p1379_p6)  ;;  %v659_v42 = vld [vmem:[#allocation2 + $0x40] sm:$0xff] (!%p1379_p6)  ;;  %1591 = vmatpush3.bf16.msra.mxu0 (!%p1379_p6), %v1761_v44 }
 0x14b   : > { %638 = vst [vmem:[#allocation2 + $0x38] sm:$0xff] %v622_v59  ;;  %646 = vst [vmem:[#allocation2 + $0x78] sm:$0xff] %v630_v60  ;;  %v652_v14 = vld [vmem:[#allocation2 + $0x8] sm:$0xff] (!%p1379_p6)  ;;  %v2148_v22 = vadd.f32 (!%p1379_p6), %v2136_v15, %v654_v19  ;;  %v708_v29 = vmin.f32 (!%p1379_p6), %v2145_v21, 0.0  ;;  %v662_v48 = vld [vmem:[#allocation2 + $0x58] sm:$0xff] (!%p1379_p6)  ;;  %v2183_v53 = vadd.f32 (!%p1379_p6), %v2136_v15, %v659_v42  ;;  %v2189_v56 = vadd.f32 (!%p1379_p6), %v2136_v15, %v661_v47 }
 0x14c   : > { %636 = vst [vmem:[#allocation2 + $0x28] sm:$0xff] %v620_v63  ;;  %644 = vst [vmem:[#allocation2 + $0x68] sm:$0xff] %v628_v0  ;;  %v2142_v17 = vadd.f32 (!%p1379_p6), %v2136_v15, %v652_v14  ;;  %v706_v25 = vmin.f32 (!%p1379_p6), %v2139_v16, 0.0  ;;  %v660_v43 = vld [vmem:[#allocation2 + $0x48] sm:$0xff] (!%p1379_p6)  ;;  %v1762_v49 = vld [vmem:[%s2333_s4 + $0x38] sm:$0xff] (!%p1379_p6)   ;;  %v2192_v57 = vadd.f32 (!%p1379_p6), %v2136_v15, %v662_v48  ;;  %vm690_vm0 = vcmp.gt.f32.partialorder (!%p1379_p6), %v2139_v16, 0.0 }
 0x14d   : > { %v709_v30 = vmin.f32 %v2148_v22, 0.0  ;;  %v726_v36 = vmul.f32 1.442695, %v708_v29  ;;  %v2186_v54 = vadd.f32 %v2136_v15, %v660_v43  ;;  %v714_v58 = vmin.f32 %v2183_v53, 0.0  ;;  %1622 = vmatprep.subr.bf16.mxu1 %v1762_v49 }
 0x14e   : > { %v707_v26 = vmin.f32 %v2142_v17, 0.0  ;;  %v722_v33 = vmul.f32 1.442695, %v706_v25  ;;  %vm691_vm1 = vcmp.gt.f32.partialorder %v2142_v17, 0.0  ;;  %vm692_vm2 = vcmp.gt.f32.partialorder %v2145_v21, 0.0  ;;  %1623 = vmatpush3.bf16.msra.mxu1 %v1762_v49 }
 0x14f   : > { %v728_v37 = vmul.f32 1.442695, %v709_v30  ;;  %v715_v61 = vmin.f32 %v2186_v54, 0.0  ;;  %v738_v63 = vmul.f32 1.442695, %v714_v58  ;;  %v716_v0 = vmin.f32 %v2189_v56, 0.0 }
 0x150   : > { %v657_v27 = vld [vmem:[#allocation2 + $0x30] sm:$0xff]  ;;  %v724_v34 = vmul.f32 1.442695, %v707_v26  ;;  %1763 = vpow2.f32 %v722_v33  ;;  %v717_v1 = vmin.f32 %v2192_v57, 0.0  ;;  %vm693_vm3 = vcmp.gt.f32.partialorder %v2148_v22, 0.0 }
 0x151   : > { %v655_v20 = vld [vmem:[#allocation2 + $0x20] sm:$0xff]  ;;  %v2168_v39 = vadd.f32 %v2136_v15, %v657_v27  ;;  %v665_v62 = vld [vmem:[#allocation2 + $0x70] sm:$0xff]  ;;  %v740_v3 = vmul.f32 1.442695, %v715_v61  ;;  %v742_v6 = vmul.f32 1.442695, %v716_v0 }
 0x152   : > { %v2151_v24 = vadd.f32 %v2136_v15, %v655_v20  ;;  %v658_v31 = vld [vmem:[#allocation2 + $0x38] sm:$0xff]  ;;  %1765 = vpow2.f32 %v724_v34  ;;  %v663_v59 = vld [vmem:[#allocation2 + $0x60] sm:$0xff]  ;;  %v744_v7 = vmul.f32 1.442695, %v717_v1  ;;  %v2209_v8 = vadd.f32 %v2136_v15, %v665_v62 }
 0x153   : > { %v656_v23 = vld [vmem:[#allocation2 + $0x28] sm:$0xff]  ;;  %v2172_v41 = vadd.f32 %v2136_v15, %v658_v31  ;;  %v712_v46 = vmin.f32 %v2168_v39, 0.0  ;;  %1767 = vpow2.f32 %v726_v36  ;;  %v666_v2 = vld [vmem:[#allocation2 + $0x78] sm:$0xff]  ;;  %v2203_v4 = vadd.f32 %v2136_v15, %v663_v59 }
 0x154   : > { %v2164_v35 = vadd.f32 %v2136_v15, %v656_v23  ;;  %v710_v38 = vmin.f32 %v2151_v24, 0.0  ;;  %1769 = vpow2.f32 %v728_v37  ;;  %v664_v60 = vld [vmem:[#allocation2 + $0x68] sm:$0xff]  ;;  %vm694_vm4 = vcmp.gt.f32.partialorder %v2151_v24, 0.0 }
 0x155   : > { %v713_v51 = vmin.f32 %v2172_v41, 0.0  ;;  %v734_v52 = vmul.f32 1.442695, %v712_v46  ;;  %v2206_v5 = vadd.f32 %v2136_v15, %v664_v60  ;;  %v718_v10 = vmin.f32 %v2203_v4, 0.0 }
 0x156   : > { %v711_v40 = vmin.f32 %v2164_v35, 0.0  ;;  %v730_v45 = vmul.f32 1.442695, %v710_v38  ;;  %v2214_v11 = vadd.f32 %v2136_v15, %v666_v2  ;;  %vm695_vm5 = vcmp.gt.f32.partialorder %v2164_v35, 0.0 }
 0x157   : > { %v736_v55 = vmul.f32 1.442695, %v713_v51  ;;  %v719_v14 = vmin.f32 %v2206_v5, 0.0  ;;  %vm696_vm6 = vcmp.gt.f32.partialorder %v2168_v39, 0.0  ;;  %v746_v20 = vmul.f32 1.442695, %v718_v10 }
 0x158   : > { %v732_v50 = vmul.f32 1.442695, %v711_v40  ;;  %1771 = vpow2.f32 %v730_v45  ;;  %v720_v27 = vmin.f32 %v2209_v8, 0.0  ;;  %v721_v31 = vmin.f32 %v2214_v11, 0.0 }
 0x159   : > { %v748_v26 = vmul.f32 1.442695, %v719_v14  ;;  %vm697_vm7 = vcmp.gt.f32.partialorder %v2172_v41, 0.0  ;;  %vm698_vm8 = vcmp.gt.f32.partialorder %v2183_v53, 0.0  ;;  %vm699_vm9 = vcmp.gt.f32.partialorder %v2186_v54, 0.0 }
 0x15a   : > { %1773 = vpow2.f32 %v732_v50  ;;  %v1764_v9 = vpop.eup %1763  ;;  %v750_v40 = vmul.f32 1.442695, %v720_v27  ;;  %vm700_vm10 = vcmp.gt.f32.partialorder %v2189_v56, 0.0  ;;  %vm701_vm11 = vcmp.gt.f32.partialorder %v2192_v57, 0.0 }
 0x15b   : > { %1775 = vpow2.f32 %v734_v52  ;;  %v1381_v13 = vadd.f32 -1.0, %v1764_v9  ;;  %vm702_vm12 = vcmp.gt.f32.partialorder %v2203_v4, 0.0  ;;  %vm703_vm13 = vcmp.gt.f32.partialorder %v2206_v5, 0.0 }
 0x15c   : > { %1777 = vpow2.f32 %v736_v55  ;;  %v1766_v12 = vpop.eup %1765  ;;  %vm704_vm14 = vcmp.gt.f32.partialorder %v2209_v8, 0.0  ;;  %vm705_vm15 = vcmp.gt.f32.partialorder %v2214_v11, 0.0 }
 0x15d   : > { %1779 = vpow2.f32 %v738_v63  ;;  %v1768_v18 = vpop.eup %1767  ;;  %v1382_v19 = vadd.f32 -1.0, %v1766_v12  ;;  %v770_v25 = vsel %vm690_vm0, %v2139_v16, %v1381_v13 }
 0x15e   : > { %1781 = vpow2.f32 %v740_v3  ;;  %v1770_v23 = vpop.eup %1769  ;;  %v1383_v15 = vadd.f32 -1.0, %v1768_v18 }
 0x15f   : > { %1783 = vpow2.f32 %v742_v6  ;;  %v771_v29 = vsel %vm691_vm1, %v2142_v17, %v1382_v19  ;;  %v1384_v30 = vadd.f32 -1.0, %v1770_v23  ;;  %v752_v17 = vmul.f32 1.442695, %v721_v31 }
 0x160   : > { %1785 = vpow2.f32 %v744_v7  ;;  %v786_v33 = vpack.c.bf16 %v771_v29, %v770_v25  ;;  %v772_v34 = vsel %vm692_vm2, %v2145_v21, %v1383_v15 }
 0x161   : > { %1787 = vpow2.f32 %v746_v20  ;;  %v773_v37 = vsel %vm693_vm3, %v2148_v22, %v1384_v30 }
 0x162   : > { %v1772_v28 = vpop.eup %1771  ;;  %1789 = vpow2.f32 %v748_v26  ;;  %1592 = vmatprep.mubr.bf16.mxu0 %v786_v33  ;;  %1624 = vmatprep.mubr.bf16.mxu1 %v786_v33  ;;  %v787_v43 = vpack.c.bf16 %v773_v37, %v772_v34 }
 0x163   : > { %v1385_v16 = vadd.f32 -1.0, %v1772_v28  ;;  %1791 = vpow2.f32 %v750_v40 }
 0x164   : > { %v1774_v32 = vpop.eup %1773  ;;  %1593 = vmatmul.mubr.bf16.vlgmr.msra.gmra.mrb[0].mxu0 %v787_v43  ;;  %1625 = vmatmul.mubr.bf16.vlgmr.msra.gmra.mrb[0].mxu1 %v787_v43  ;;  %1793 = vpow2.f32 %v752_v17 }
 0x165   : > { %v1776_v36 = vpop.eup %1775  ;;  %v1386_v38 = vadd.f32 -1.0, %v1774_v32  ;;  %v774_v44 = vsel %vm694_vm4, %v2151_v24, %v1385_v16 }
 0x166   : > { %v1778_v42 = vpop.eup %1777  ;;  %v1387_v21 = vadd.f32 -1.0, %v1776_v36 }
 0x167   : > { %v775_v45 = vsel %vm695_vm5, %v2164_v35, %v1386_v38  ;;  %v1388_v46 = vadd.f32 -1.0, %v1778_v42  ;;  %v1780_v22 = vpop.eup %1779 }
 0x168   : > { %v788_v47 = vpack.c.bf16 %v775_v45, %v774_v44  ;;  %v1782_v48 = vpop.eup %1781  ;;  %v776_v24 = vsel %vm696_vm6, %v2168_v39, %v1387_v21  ;;  %v1389_v50 = vadd.f32 -1.0, %v1780_v22 }
 0x169   : > { %v777_v49 = vsel %vm697_vm7, %v2172_v41, %v1388_v46  ;;  %v1784_v35 = vpop.eup %1783  ;;  %v1390_v51 = vadd.f32 -1.0, %v1782_v48 }
 0x16a   : > { %1596 = vmatprep.mubr.bf16.mxu0 %v788_v47  ;;  %1628 = vmatprep.mubr.bf16.mxu1 %v788_v47  ;;  %v1786_v52 = vpop.eup %1785  ;;  %v778_v55 = vsel %vm698_vm8, %v2183_v53, %v1389_v50  ;;  %v789_v58 = vpack.c.bf16 %v777_v49, %v776_v24  ;;  %v1391_v62 = vadd.f32 -1.0, %v1784_v35 }
 0x16b   : > { %v779_v59 = vsel %vm699_vm9, %v2186_v54, %v1390_v51  ;;  %v1788_v60 = vpop.eup %1787  ;;  %v1392_v63 = vadd.f32 -1.0, %v1786_v52 }
 0x16c   : > { %v790_v61 = vpack.c.bf16 %v779_v59, %v778_v55  ;;  %v1790_v39 = vpop.eup %1789  ;;  %v1393_v41 = vadd.f32 -1.0, %v1788_v60  ;;  %1597 = vmatmul.mubr.bf16.gmra.mrb[4].mxu0 %v789_v58  ;;  %1629 = vmatmul.mubr.bf16.gmra.mrb[4].mxu1 %v789_v58  ;;  %v780_v54 = vsel %vm700_vm10, %v2189_v56, %v1391_v62 }
 0x16d   : > { %v1394_v0 = vadd.f32 -1.0, %v1790_v39  ;;  %v1792_v53 = vpop.eup %1791  ;;  %v781_v1 = vsel %vm701_vm11, %v2192_v57, %v1392_v63 }
 0x16e   : > { %1600 = vmatprep.mubr.bf16.mxu0 %v790_v61  ;;  %1632 = vmatprep.mubr.bf16.mxu1 %v790_v61  ;;  %v1794_v2 = vpop.eup %1793  ;;  %v782_v3 = vsel %vm702_vm12, %v2203_v4, %v1393_v41  ;;  %v791_v7 = vpack.c.bf16 %v781_v1, %v780_v54  ;;  %v1395_v10 = vadd.f32 -1.0, %v1792_v53 }
 0x16f   : > { %v783_v6 = vsel %vm703_vm13, %v2206_v5, %v1394_v0  ;;  %v1396_v12 = vadd.f32 -1.0, %v1794_v2  ;;  %v2263_v5 = vld [vmem:[%s2346_s9] ss:$0 sm:$0xff] }
 0x170   : > { %v792_v9 = vpack.c.bf16 %v783_v6, %v782_v3  ;;  %v784_v56 = vsel %vm704_vm14, %v2209_v8, %v1395_v10 }
 0x171   : > { %v785_v57 = vsel %vm705_vm15, %v2214_v11, %v1396_v12 }
 0x172   : > { %v793_v4 = vpack.c.bf16 %v785_v57, %v784_v56 }
 0x174   : > { %1601 = vmatmul.mubr.bf16.gmra.mrb[8].mxu0 %v791_v7  ;;  %1633 = vmatmul.mubr.bf16.gmra.mrb[8].mxu1 %v791_v7 }
 0x175   : > { %1604 = vmatprep.mubr.bf16.mxu0 %v792_v9  ;;  %1636 = vmatprep.mubr.bf16.mxu1 %v792_v9 }
 0x17c   : > { %1605 = vmatmul.mubr.bf16.gmra.mrb[12].mxu0 %v793_v4  ;;  %1637 = vmatmul.mubr.bf16.gmra.mrb[12].mxu1 %v793_v4 }
 0x237   : > { %v1594_v13 = vpop.f32.mrb[0].mxu0  ;;  %v1626_v14 = vpop.f32.mrb[0].mxu1 }
 0x238   : > { %v1149_v18 = vadd.f32 %v1626_v14, %v2263_v5  ;;  %v892_v19 = vpop.f32.mrb[1].mxu0  ;;  %v1140_v8 = vpop.f32.mrb[1].mxu1 }
 0x239   : > { %v1141_v11 = vadd.f32 %v2263_v5, %v1140_v8  ;;  %v1595_v20 = vpop.f32.mrb[2].mxu0  ;;  %v1627_v23 = vpop.f32.mrb[2].mxu1 }
 0x23a   : > { %1205 = vst [vmem:[%s2077_s28 + $0x10] sm:$0xff] %v1149_v18  ;;  %v1457_v25 = vpack.c.bf16 %v1595_v20, %v1594_v13  ;;  %v1152_v15 = vadd.f32 %v1627_v23, %v2263_v5  ;;  %v895_v26 = vpop.f32.mrb[3].mxu0  ;;  %v1143_v27 = vpop.f32.mrb[3].mxu1 }
 0x23b   : > { %1203 = vst [vmem:[%s2077_s28] sm:$0xff] %v1141_v11  ;;  %v1452_v28 = vpack.c.bf16 %v895_v26, %v892_v19  ;;  %v1144_v29 = vadd.f32 %v2263_v5, %v1143_v27 }
 0x23c   : > { %1489 = vst [vmem:[%s2072_s15 + $0x8] sm:$0xff] %v1457_v25   ;;  %1206 = vst [vmem:[%s2077_s28 + $0x18] sm:$0xff] %v1152_v15 }
 0x23d   : > { %1453 = vst [vmem:[%s2072_s15] sm:$0xff] %v1452_v28   ;;  %1204 = vst [vmem:[%s2077_s28 + $0x8] sm:$0xff] %v1144_v29 }
 0x23f   : > { %v1598_v30 = vpop.f32.mrb[4].mxu0  ;;  %v1630_v31 = vpop.f32.mrb[4].mxu1 }
 0x240   : > { %v1165_v32 = vadd.f32 %v1630_v31, %v2263_v5  ;;  %v908_v33 = vpop.f32.mrb[5].mxu0  ;;  %v1156_v34 = vpop.f32.mrb[5].mxu1 }
 0x241   : > { %v1157_v16 = vadd.f32 %v2263_v5, %v1156_v34  ;;  %v1599_v36 = vpop.f32.mrb[6].mxu0  ;;  %v1631_v37 = vpop.f32.mrb[6].mxu1 }
 0x242   : > { %1209 = vst [vmem:[%s2077_s28 + $0x30] sm:$0xff] %v1165_v32  ;;  %v1467_v38 = vpack.c.bf16 %v1599_v36, %v1598_v30  ;;  %v1168_v40 = vadd.f32 %v1631_v37, %v2263_v5  ;;  %v911_v17 = vpop.f32.mrb[7].mxu0  ;;  %v1159_v42 = vpop.f32.mrb[7].mxu1 }
 0x243   : > { %1207 = vst [vmem:[%s2077_s28 + $0x20] sm:$0xff] %v1157_v16  ;;  %v1462_v43 = vpack.c.bf16 %v911_v17, %v908_v33  ;;  %v1160_v44 = vadd.f32 %v2263_v5, %v1159_v42 }
 0x244   : > { %1491 = vst [vmem:[%s2072_s15 + $0x18] sm:$0xff] %v1467_v38   ;;  %1210 = vst [vmem:[%s2077_s28 + $0x38] sm:$0xff] %v1168_v40 }
 0x245   : > { %1490 = vst [vmem:[%s2072_s15 + $0x10] sm:$0xff] %v1462_v43   ;;  %1208 = vst [vmem:[%s2077_s28 + $0x28] sm:$0xff] %v1160_v44 }
 0x247   : > { %v1602_v21 = vpop.f32.mrb[8].mxu0  ;;  %v1634_v45 = vpop.f32.mrb[8].mxu1 }
 0x248   : > { %v1181_v46 = vadd.f32 %v1634_v45, %v2263_v5  ;;  %v924_v22 = vpop.f32.mrb[9].mxu0  ;;  %v1172_v47 = vpop.f32.mrb[9].mxu1 }
 0x249   : > { %v1173_v48 = vadd.f32 %v2263_v5, %v1172_v47  ;;  %v1603_v24 = vpop.f32.mrb[10].mxu0  ;;  %v1635_v49 = vpop.f32.mrb[10].mxu1 }
 0x24a   : > { %1213 = vst [vmem:[%s2077_s28 + $0x50] sm:$0xff] %v1181_v46  ;;  %v1477_v50 = vpack.c.bf16 %v1603_v24, %v1602_v21  ;;  %v1184_v35 = vadd.f32 %v1635_v49, %v2263_v5  ;;  %v927_v51 = vpop.f32.mrb[11].mxu0  ;;  %v1175_v52 = vpop.f32.mrb[11].mxu1 }
 0x24b   : > { %1211 = vst [vmem:[%s2077_s28 + $0x40] sm:$0xff] %v1173_v48  ;;  %v1472_v55 = vpack.c.bf16 %v927_v51, %v924_v22  ;;  %v1176_v58 = vadd.f32 %v2263_v5, %v1175_v52 }
 0x24c   : > { %1493 = vst [vmem:[%s2072_s15 + $0x28] sm:$0xff] %v1477_v50   ;;  %1214 = vst [vmem:[%s2077_s28 + $0x58] sm:$0xff] %v1184_v35 }
 0x24d   : > { %1492 = vst [vmem:[%s2072_s15 + $0x20] sm:$0xff] %v1472_v55   ;;  %1212 = vst [vmem:[%s2077_s28 + $0x48] sm:$0xff] %v1176_v58 }
 0x24f   : > { %v1606_v59 = vpop.f32.mrb[12].mxu0  ;;  %v1638_v60 = vpop.f32.mrb[12].mxu1 }
 0x250   : > { %v1197_v61 = vadd.f32 %v1638_v60, %v2263_v5  ;;  %v940_v62 = vpop.f32.mrb[13].mxu0  ;;  %v1188_v63 = vpop.f32.mrb[13].mxu1 }
 0x251   : > { %v1189_v39 = vadd.f32 %v2263_v5, %v1188_v63  ;;  %v1607_v41 = vpop.f32.mrb[14].mxu0  ;;  %v1639_v0 = vpop.f32.mrb[14].mxu1 }
 0x252   : > { %1217 = vst [vmem:[%s2077_s28 + $0x70] sm:$0xff] %v1197_v61  ;;  %v1487_v53 = vpack.c.bf16 %v1607_v41, %v1606_v59  ;;  %v1200_v54 = vadd.f32 %v1639_v0, %v2263_v5  ;;  %v943_v1 = vpop.f32.mrb[15].mxu0  ;;  %v1191_v2 = vpop.f32.mrb[15].mxu1 }
 0x253   : > { %1215 = vst [vmem:[%s2077_s28 + $0x60] sm:$0xff] %v1189_v39  ;;  %v1482_v3 = vpack.c.bf16 %v943_v1, %v940_v62  ;;  %v1192_v6 = vadd.f32 %v2263_v5, %v1191_v2 }
 0x254   : > { %1495 = vst [vmem:[%s2072_s15 + $0x38] sm:$0xff] %v1487_v53   ;;  %1218 = vst [vmem:[%s2077_s28 + $0x78] sm:$0xff] %v1200_v54 }
 0x255   : > { %1494 = vst [vmem:[%s2072_s15 + $0x30] sm:$0xff] %v1482_v3   ;;  %1216 = vst [vmem:[%s2077_s28 + $0x68] sm:$0xff] %v1192_v6 }
 0x256 PF: > { %s21_s8 = sadd.s32 1, %s1891_s8   ;;  %s2347_s13 = sld [smem:[#allocation6_spill]] }
 0x257   : > { %p18_p8 = scmp.ge.s32.totalorder %s21_s8, 6   ;;  %s2348_s24 = smov %s1867_s25 }
 0x258   : > { %s2349_s25 = smov %s1871_s26  ;;  %s2350_s26 = smov %s2005_s21 }
 0x259   : > { %s2351_s27 = smov %s1883_s29  ;;  %s2352_s28 = smov %s1887_s30 }
 0x25a   : > { %s2354_s30 = smov %s2360_s11  ;;  %20 = sbr.rel (!%p18_p8) target bundleno = 8 (0x8), region = 107 }
 0x25c   : > { %s2353_s29 = smov %s2347_s13 }
 0x261   :  { %1258 = vsyncpa [#allocation4], 1 }
 0x262   :  { %1260 = vsyncpa [#allocation4 + $0x1], 1 }

// kernel: enhanced_gcn_forward.5
= control target key start
LH: loop header
LB: loop body
LE: loop exit
PB: predicated region body
PF: predicated region fallthrough
CT: control target
= control target key end

     0   :  { %s2742_s0 = inlined_call_operand.vmem [shape: bf16[256,256], index: 0, kind: input, shape index: {}]   ;;  %s2743_s1 = inlined_call_operand.vmem [shape: bf16[256,128], index: 1, kind: input, shape index: {}]   ;;  %s2744_s2 = inlined_call_operand.vmem [shape: f32[256,128], index: 2, kind: input, shape index: {}]   ;;  %s2745_s3 = inlined_call_operand.vmem [shape: bf16[128,384], index: 3, kind: input, shape index: {}]   ;;  %s2746_s4 = inlined_call_operand.vmem [shape: bf16[128,128], index: 4, kind: input, shape index: {}]   ;;  %s2747_s5 = inlined_call_operand.vmem [shape: bf16[256,384], index: 5, kind: output, shape index: {0}]   ;;  %s2748_s6 = inlined_call_operand.vmem [shape: f32[256,128], index: 6, kind: output, shape index: {1}]  }
   0x1   :  { %2749 = sst [smem:[#allocation4_spill]] %s2742_s0 }
   0x2   :  { %s2308_s21 = smov 0   ;;  %s2310_s22 = smov 0  }
   0x3   :  { %s2312_s23 = smov 0   ;;  %s2314_s24 = smov 0  }
   0x4   :  { %s2316_s25 = smov 0   ;;  %s2318_s26 = smov 0  }
   0x5   :  { %s2320_s27 = smov 0  }
   0x6 LB: > { %s26_s28 = sadd.s32 1, %s2261_s25  ;;  %s29_s29 = sadd.s32 1, %s2265_s26  ;;  %s2269_s27 = sphi %s2320_s27, %s17_s27   ;;  %s2265_s26 = sphi %s2318_s26, %s2756_s26   ;;  %s2261_s25 = sphi %s2316_s25, %s2755_s25   ;;  %s2257_s24 = sphi %s2314_s24, %s2754_s24   ;;  %s2253_s23 = sphi %s2312_s23, %s2753_s23   ;;  %s2249_s22 = sphi %s2310_s22, %s2752_s22   ;;  %s2245_s21 = sphi %s2308_s21, %s2751_s21  }
   0x7   : > { %p27_p0 = scmp.ge.s32.totalorder %s26_s28, 2  ;;  %p45_p1 = scmp.ne.s32.totalorder %s2249_s22, %s2245_s21 }
   0x8   : > { %p46_p2 = scmp.eq.s32.totalorder %s2269_s27, 0  ;;  %s38_s9 = sadd.s32 1, %s2249_s22 }
   0x9   : > { %s2758_s28 = smov (%p27_p0, %s26_s28), 0  ;;  %s2760_s29 = smov (!%p27_p0, %s29_s29), %s2265_s26 }
   0xa   : > { %p47_p3 = por %p46_p2, %p45_p1  ;;  %p31_p4 = scmp.ge.s32.totalorder %s2760_s29, 2 }
   0xb   : > { %s34_s30 = ssub.s32 %s2261_s25, %s2758_s28  ;;  %p1760_p6 = scmp.ge.s32.totalorder %s2269_s27, 4 }
   0xc   : > { %s2762_s29 = smov (%p31_p4, %s2760_s29), 0 }
   0xd   : > { %s33_s7 = ssub.s32 %s2265_s26, %s2762_s29  ;;  %223 = sbr.rel (%p1760_p6) target bundleno = 40 (0x28), region = 24 }
   0xe   : > { %s35_s8 = sor.u32 %s34_s30, %s33_s7 }
   0xf   : > { %p36_p5 = scmp.eq.s32.totalorder %s35_s8, 0 }
  0x11   : > { %s2359_s10 = scalar_select %p36_p5, %s2249_s22, %s38_s9  }
  0x14   : > { %226 = sbr.rel (!%p47_p3) target bundleno = 40 (0x28), region = 28  ;;  %s228_s11 = sand.u32 (%p47_p3), 1, %s2249_s22  }
  0x15   : > { %s1875_s12 = sshll.u32 (%p47_p3), %s2265_s26, 5  ;;  %s1761_s13 = sshll.u32 (%p47_p3), %s228_s11, 6 }
  0x16   : > { %s233_s14 = sadd.s32 (%p47_p3), %s2261_s25, %s1875_s12  ;;  %s2750_s0 = sld [smem:[#allocation4_spill]] (%p47_p3) }
  0x17   : > { %s1764_s15 = sshll.u32 (%p47_p3), %s233_s14, 2  ;;  %s230_s19 = scalar_lea.vmem (%p47_p3), [#allocation3], %s1761_s13 }
  0x1c   : > { %s2368_s18 = scalar_lea.vmem %s2750_s0, %s1764_s15 }
  0x1d   : > { %v251_v0 = vld [vmem:[%s2368_s18] sm:$0xf]  ;;  %v253_v1 = vld [vmem:[%s2368_s18 + $0x8] sm:$0xf]  ;;  %v255_v2 = vld [vmem:[%s2368_s18 + $0x10] sm:$0xf] }
  0x1e   : > { %252 = vst [vmem:[%s230_s19] sm:$0xf] %v251_v0  ;;  %254 = vst [vmem:[%s230_s19 + $0x4] sm:$0xf] %v253_v1  ;;  %v257_v3 = vld [vmem:[%s2368_s18 + $0x18] sm:$0xf] }
  0x1f   : > { %256 = vst [vmem:[%s230_s19 + $0x8] sm:$0xf] %v255_v2  ;;  %v259_v4 = vld [vmem:[%s2368_s18 + $0x20] sm:$0xf]  ;;  %v261_v5 = vld [vmem:[%s2368_s18 + $0x28] sm:$0xf] }
  0x20   : > { %258 = vst [vmem:[%s230_s19 + $0xc] sm:$0xf] %v257_v3  ;;  %260 = vst [vmem:[%s230_s19 + $0x10] sm:$0xf] %v259_v4  ;;  %v263_v6 = vld [vmem:[%s2368_s18 + $0x30] sm:$0xf] }
  0x21   : > { %262 = vst [vmem:[%s230_s19 + $0x14] sm:$0xf] %v261_v5  ;;  %v265_v7 = vld [vmem:[%s2368_s18 + $0x38] sm:$0xf]  ;;  %v267_v8 = vld [vmem:[%s2368_s18 + $0x40] sm:$0xf] }
  0x22   : > { %264 = vst [vmem:[%s230_s19 + $0x18] sm:$0xf] %v263_v6  ;;  %266 = vst [vmem:[%s230_s19 + $0x1c] sm:$0xf] %v265_v7  ;;  %v269_v9 = vld [vmem:[%s2368_s18 + $0x48] sm:$0xf] }
  0x23   : > { %268 = vst [vmem:[%s230_s19 + $0x20] sm:$0xf] %v267_v8  ;;  %v271_v10 = vld [vmem:[%s2368_s18 + $0x50] sm:$0xf]  ;;  %v273_v11 = vld [vmem:[%s2368_s18 + $0x58] sm:$0xf] }
  0x24   : > { %270 = vst [vmem:[%s230_s19 + $0x24] sm:$0xf] %v269_v9  ;;  %272 = vst [vmem:[%s230_s19 + $0x28] sm:$0xf] %v271_v10  ;;  %v275_v12 = vld [vmem:[%s2368_s18 + $0x60] sm:$0xf] }
  0x25   : > { %274 = vst [vmem:[%s230_s19 + $0x2c] sm:$0xf] %v273_v11  ;;  %v277_v13 = vld [vmem:[%s2368_s18 + $0x68] sm:$0xf]  ;;  %v279_v14 = vld [vmem:[%s2368_s18 + $0x70] sm:$0xf] }
  0x26   : > { %276 = vst [vmem:[%s230_s19 + $0x30] sm:$0xf] %v275_v12  ;;  %278 = vst [vmem:[%s230_s19 + $0x34] sm:$0xf] %v277_v13  ;;  %v281_v15 = vld [vmem:[%s2368_s18 + $0x78] sm:$0xf] }
  0x27   : > { %280 = vst [vmem:[%s230_s19 + $0x38] sm:$0xf] %v279_v14  ;;  %282 = vst [vmem:[%s230_s19 + $0x3c] sm:$0xf] %v281_v15 }
  0x28 PF: > { %p1765_p7 = scmp.ge.s32.totalorder %s2269_s27, 1  ;;  %p354_p8 = scmp.lt.s32.totalorder %s2269_s27, 5 }
  0x2a   : > { %p355_p9 = pnand %p1765_p7, %p354_p8 }
  0x2b   : > { %s361_s20 = sand.u32 (!%p355_p9), 1, %s2245_s21   ;;  %s1767_s30 = sshll.u32 (!%p355_p9), %s2253_s23, 4 }
  0x2c   : > { %358 = sbr.rel (%p355_p9) target bundleno = 617 (0x269), region = 77  ;;  %s1766_s7 = sshll.u32 (!%p355_p9), %s361_s20, 6 }
  0x2d   : > { %p408_p10 = scmp.lt.s32.totalorder (!%p355_p9), %s1767_s30, 31  ;;  %s1769_s8 = sshll.u32 (!%p355_p9), %s2257_s24, 4 }
  0x2e   : > { %p414_p11 = scmp.lt.s32.totalorder (!%p355_p9), %s1769_s8, 31  ;;  %p1775_p12 = scmp.ne.s32.totalorder (!%p355_p9), %s2253_s23, 0 }
  0x33   : > { %s2764_s30 = smov (!%p408_p10, %s1767_s30), 31  ;;  %s2766_s8 = smov (!%p414_p11, %s1769_s8), 31 }
  0x34   : > { %s1768_s9 = sshll.u32 %s2764_s30, 2  ;;  %s1770_s14 = sshll.u32 %s2766_s8, 3  ;;  %v2271_v16 = vmov (!%p1775_p12), 0.0  }
  0x35   : > { %s2394_s13 = scalar_lea.vmem %s2743_s1, %s1768_s9  ;;  %s2068_s15 = smul.u32 12, %s2766_s8  ;;  %437 = vst [vmem:[#allocation2] sm:$0xff] (!%p1775_p12), %v2271_v16  ;;  %438 = vst [vmem:[#allocation2 + $0x8] sm:$0xff] (!%p1775_p12), %v2271_v16 }
  0x36   : > { %s2399_s18 = scalar_lea.vmem %s2744_s2, %s1770_s14  ;;  %s2404_s24 = scalar_lea.vmem %s2748_s6, %s1770_s14  ;;  %439 = vst [vmem:[#allocation2 + $0x10] sm:$0xff] (!%p1775_p12), %v2271_v16  ;;  %440 = vst [vmem:[#allocation2 + $0x18] sm:$0xff] (!%p1775_p12), %v2271_v16 }
  0x37   : > { %s2409_s0 = scalar_lea.vmem %s2747_s5, %s2068_s15  ;;  %s2411_s9 = scalar_lea.vmem [#allocation3], %s1766_s7  ;;  %441 = vst [vmem:[#allocation2 + $0x20] sm:$0xff] (!%p1775_p12), %v2271_v16  ;;  %442 = vst [vmem:[#allocation2 + $0x28] sm:$0xff] (!%p1775_p12), %v2271_v16 }
  0x38   : > { %436 = sbr.rel (%p1775_p12) target bundleno = 63 (0x3f), region = 85  ;;  %443 = vst [vmem:[#allocation2 + $0x30] sm:$0xff] (!%p1775_p12), %v2271_v16  ;;  %444 = vst [vmem:[#allocation2 + $0x38] sm:$0xff] (!%p1775_p12), %v2271_v16 }
  0x39   : > { %445 = vst [vmem:[#allocation2 + $0x40] sm:$0xff] (!%p1775_p12), %v2271_v16  ;;  %446 = vst [vmem:[#allocation2 + $0x48] sm:$0xff] (!%p1775_p12), %v2271_v16 }
  0x3a   : > { %447 = vst [vmem:[#allocation2 + $0x50] sm:$0xff] (!%p1775_p12), %v2271_v16  ;;  %448 = vst [vmem:[#allocation2 + $0x58] sm:$0xff] (!%p1775_p12), %v2271_v16 }
  0x3b   : > { %449 = vst [vmem:[#allocation2 + $0x60] sm:$0xff] (!%p1775_p12), %v2271_v16  ;;  %450 = vst [vmem:[#allocation2 + $0x68] sm:$0xff] (!%p1775_p12), %v2271_v16 }
  0x3c   : > { %451 = vst [vmem:[#allocation2 + $0x70] sm:$0xff] (!%p1775_p12), %v2271_v16  ;;  %452 = vst [vmem:[#allocation2 + $0x78] sm:$0xff] (!%p1775_p12), %v2271_v16 }
  0x3f PF: > { %v2127_v17 = vld [vmem:[%s2394_s13] sm:$0xff]   ;;  %v2128_v18 = vld [vmem:[%s2394_s13 + $0x8] sm:$0xff]   ;;  %v2129_v19 = vld [vmem:[%s2394_s13 + $0x10] sm:$0xff]   ;;  %p1792_p13 = scmp.ne.s32.totalorder %s2253_s23, 1 }
  0x40   : > { %1956 = vmatprep.subr.bf16.mxu0 %v2127_v17  ;;  %2052 = vmatprep.subr.bf16.mxu1 %v2127_v17  ;;  %v2130_v20 = vld [vmem:[%s2394_s13 + $0x18] sm:$0xff]   ;;  %v2135_v21 = vld [vmem:[%s2411_s9] sm:$0xff]   ;;  %v2132_v24 = vld [vmem:[%s2394_s13 + $0x28] sm:$0xff]  }
  0x41   : > { %1957 = vmatpush3.bf16.msra.mxu0 %v2127_v17  ;;  %2060 = vmatpush3.bf16.msra.mxu1 %v2127_v17  ;;  %v2136_v22 = vld [vmem:[%s2411_s9 + $0x20] sm:$0xff]   ;;  %v2133_v25 = vld [vmem:[%s2394_s13 + $0x30] sm:$0xff]   ;;  %v2134_v26 = vld [vmem:[%s2394_s13 + $0x38] sm:$0xff]  }
  0x42   : > { %1958 = vmatprep.subr.bf16.mxu0 %v2128_v18  ;;  %2053 = vmatprep.subr.bf16.mxu1 %v2128_v18  ;;  %v2131_v23 = vld [vmem:[%s2394_s13 + $0x20] sm:$0xff]   ;;  %v2137_v27 = vld [vmem:[%s2411_s9 + $0x8] sm:$0xff]   ;;  %v2139_v29 = vld [vmem:[%s2411_s9 + $0x10] sm:$0xff]  }
  0x43   : > { %1972 = vmatprep.mubr.bf16.mxu0 %v2135_v21  ;;  %1980 = vmatprep.mubr.bf16.mxu1 %v2136_v22  ;;  %v2138_v28 = vld [vmem:[%s2411_s9 + $0x28] sm:$0xff]   ;;  %v2140_v30 = vld [vmem:[%s2411_s9 + $0x30] sm:$0xff]   ;;  %v2141_v31 = vld [vmem:[%s2411_s9 + $0x18] sm:$0xff]  }
  0x44   : > { %v2142_v32 = vld [vmem:[%s2411_s9 + $0x38] sm:$0xff]   ;;  %v455_v33 = vld [vmem:[#allocation2 + $0x10] sm:$0xff]  ;;  %v453_v35 = vld [vmem:[#allocation2] sm:$0xff] }
  0x45   : > { %1959 = vmatpush3.bf16.msra.mxu0 %v2128_v18  ;;  %2061 = vmatpush3.bf16.msra.mxu1 %v2128_v18  ;;  %v463_v34 = vld [vmem:[#allocation2 + $0x50] sm:$0xff]  ;;  %v461_v36 = vld [vmem:[#allocation2 + $0x40] sm:$0xff]  ;;  %v456_v39 = vld [vmem:[#allocation2 + $0x18] sm:$0xff] }
  0x46   : > { %1960 = vmatprep.subr.bf16.mxu0 %v2129_v19  ;;  %2054 = vmatprep.subr.bf16.mxu1 %v2129_v19  ;;  %v464_v40 = vld [vmem:[#allocation2 + $0x58] sm:$0xff]  ;;  %v454_v45 = vld [vmem:[#allocation2 + $0x8] sm:$0xff]  ;;  %v459_v57 = vld [vmem:[#allocation2 + $0x30] sm:$0xff] }
  0x47   : > { %v462_v46 = vld [vmem:[#allocation2 + $0x48] sm:$0xff]  ;;  %v467_v58 = vld [vmem:[#allocation2 + $0x70] sm:$0xff]  ;;  %v457_v59 = vld [vmem:[#allocation2 + $0x20] sm:$0xff] }
  0x48   : > { %v465_v60 = vld [vmem:[#allocation2 + $0x60] sm:$0xff]  ;;  %v460_v63 = vld [vmem:[#allocation2 + $0x38] sm:$0xff]  ;;  %v458_v5 = vld [vmem:[#allocation2 + $0x28] sm:$0xff] }
  0x49   : > { %1961 = vmatpush3.bf16.msra.mxu0 %v2129_v19  ;;  %2062 = vmatpush3.bf16.msra.mxu1 %v2129_v19  ;;  %v468_v0 = vld [vmem:[#allocation2 + $0x78] sm:$0xff]  ;;  %v466_v6 = vld [vmem:[#allocation2 + $0x68] sm:$0xff]  ;;  %v2143_v17 = vld [vmem:[%s2745_s3 + $0x4] ss:$12 sps:$4 sm:$0xff] (!%p1792_p13)   ;;  %v2272_v19 = vmov (!%p1792_p13), 0  }
  0x4a   : > { %1962 = vmatprep.subr.bf16.mxu0 %v2130_v20  ;;  %2055 = vmatprep.subr.bf16.mxu1 %v2130_v20  ;;  %v2145_v18 = vld [vmem:[%s2745_s3 + $0x8] ss:$12 sps:$4 sm:$0xff] (!%p1792_p13)   ;;  %v2149_v22 = vld [vmem:[%s2745_s3 + $0x20] ss:$12 sps:$4 sm:$0xff] (!%p1792_p13)  }
  0x4b   : > { %v2147_v21 = vld [vmem:[%s2745_s3 + $0x1c] ss:$12 sps:$4 sm:$0xff] (!%p1792_p13)  }
  0x4d   : > { %1963 = vmatpush3.bf16.msra.mxu0 %v2130_v20  ;;  %2063 = vmatpush3.bf16.msra.mxu1 %v2130_v20  ;;  %v2146_v20 = vld [vmem:[%s2745_s3] ss:$12 sps:$4 sm:$0xff] (!%p1792_p13)  }
  0x4e   : > { %1964 = vmatprep.subr.bf16.mxu0 %v2131_v23  ;;  %2056 = vmatprep.subr.bf16.mxu1 %v2131_v23 }
  0x51   : > { %1965 = vmatpush3.bf16.msra.mxu0 %v2131_v23  ;;  %2064 = vmatpush3.bf16.msra.mxu1 %v2131_v23  ;;  %v2150_v23 = vld [vmem:[%s2745_s3 + $0x18] ss:$12 sps:$4 sm:$0xff] (!%p1792_p13)  }
  0x52   : > { %1966 = vmatprep.subr.bf16.mxu0 %v2132_v24  ;;  %2057 = vmatprep.subr.bf16.mxu1 %v2132_v24 }
  0x55   : > { %1967 = vmatpush3.bf16.msra.mxu0 %v2132_v24  ;;  %2065 = vmatpush3.bf16.msra.mxu1 %v2132_v24  ;;  %v2151_v24 = vld [vmem:[%s2745_s3 + $0x34] ss:$12 sps:$4 sm:$0xff] (!%p1792_p13)  }
  0x56   : > { %1968 = vmatprep.subr.bf16.mxu0 %v2133_v25  ;;  %2058 = vmatprep.subr.bf16.mxu1 %v2133_v25 }
  0x59   : > { %1969 = vmatpush3.bf16.msra.mxu0 %v2133_v25  ;;  %2066 = vmatpush3.bf16.msra.mxu1 %v2133_v25  ;;  %v2153_v25 = vld [vmem:[%s2745_s3 + $0x38] ss:$12 sps:$4 sm:$0xff] (!%p1792_p13)  }
  0x5a   : > { %1970 = vmatprep.subr.bf16.mxu0 %v2134_v26  ;;  %2059 = vmatprep.subr.bf16.mxu1 %v2134_v26 }
  0x5d   : > { %1971 = vmatpush3.bf16.msra.mxu0 %v2134_v26  ;;  %2067 = vmatpush3.bf16.msra.mxu1 %v2134_v26  ;;  %v2154_v26 = vld [vmem:[%s2745_s3 + $0x30] ss:$12 sps:$4 sm:$0xff] (!%p1792_p13)  }
  0x5e   : > { %1042 = vmatprep.subr.bf16.mxu0 (!%p1792_p13), %v2143_v17  ;;  %1988 = vmatprep.subr.bf16.mxu1 (!%p1792_p13), %v2145_v18  ;;  %v754_v17 = vld [vmem:[%s2399_s18 + $0x40] sm:$0xff] (!%p1792_p13) }
  0x60   : > { %1973 = vmatmul.mubr.bf16.vlgmr.msra.gmra.mrb[0].mxu0 %v2137_v27  ;;  %1981 = vmatmul.mubr.bf16.vlgmr.msra.gmra.mrb[0].mxu1 %v2138_v28  ;;  %v2155_v27 = vld [vmem:[%s2745_s3 + $0x4c] ss:$12 sps:$4 sm:$0xff] (!%p1792_p13)   ;;  %v2157_v28 = vld [vmem:[%s2745_s3 + $0x50] ss:$12 sps:$4 sm:$0xff] (!%p1792_p13)  }
  0x61   : > { %1976 = vmatprep.mubr.bf16.mxu0 %v2139_v29  ;;  %1984 = vmatprep.mubr.bf16.mxu1 %v2140_v30  ;;  %v2158_v29 = vld [vmem:[%s2745_s3 + $0x48] ss:$12 sps:$4 sm:$0xff] (!%p1792_p13)   ;;  %v2159_v30 = vld [vmem:[%s2745_s3 + $0x64] ss:$12 sps:$4 sm:$0xff] (!%p1792_p13)  }
  0x62   : > { %1043 = vmatpush1.bf16.msra.mxu0 (!%p1792_p13), %v2146_v20  ;;  %1989 = vmatpush3.bf16.msra.mxu1 (!%p1792_p13), %v2145_v18 }
  0x63   : > { %1044 = vmatprep.subr.bf16.mxu0 (!%p1792_p13), %v2147_v21  ;;  %1990 = vmatprep.subr.bf16.mxu1 (!%p1792_p13), %v2149_v22  ;;  %v755_v21 = vld [vmem:[%s2399_s18 + $0x48] sm:$0xff] (!%p1792_p13) }
  0x66   : > { %1045 = vmatpush1.bf16.msra.mxu0 (!%p1792_p13), %v2150_v23  ;;  %1991 = vmatpush3.bf16.msra.mxu1 (!%p1792_p13), %v2149_v22 }
  0x67   : > { %1046 = vmatprep.subr.bf16.mxu0 (!%p1792_p13), %v2151_v24  ;;  %1992 = vmatprep.subr.bf16.mxu1 (!%p1792_p13), %v2153_v25 }
  0x68   : > { %1977 = vmatmul.mubr.bf16.gmra.mrb[4].mxu0 %v2141_v31  ;;  %1985 = vmatmul.mubr.bf16.gmra.mrb[4].mxu1 %v2142_v32  ;;  %v2161_v31 = vld [vmem:[%s2745_s3 + $0x68] ss:$12 sps:$4 sm:$0xff] (!%p1792_p13)   ;;  %v2162_v32 = vld [vmem:[%s2745_s3 + $0x60] ss:$12 sps:$4 sm:$0xff] (!%p1792_p13)  }
  0x69   : > { %1074 = vmatprep.mubr.bf16.mxu0 (!%p1792_p13), %v2272_v19 }
  0x6a   : > { %1047 = vmatpush1.bf16.msra.mxu0 (!%p1792_p13), %v2154_v26  ;;  %1993 = vmatpush3.bf16.msra.mxu1 (!%p1792_p13), %v2153_v25 }
  0x6b   : > { %1048 = vmatprep.subr.bf16.mxu0 (!%p1792_p13), %v2155_v27  ;;  %1994 = vmatprep.subr.bf16.mxu1 (!%p1792_p13), %v2157_v28  ;;  %v756_v27 = vld [vmem:[%s2399_s18 + $0x50] sm:$0xff] (!%p1792_p13) }
  0x6e   : > { %1049 = vmatpush1.bf16.msra.mxu0 (!%p1792_p13), %v2158_v29  ;;  %1995 = vmatpush3.bf16.msra.mxu1 (!%p1792_p13), %v2157_v28  ;;  %v757_v28 = vld [vmem:[%s2399_s18 + $0x58] sm:$0xff] (!%p1792_p13) }
  0x6f   : > { %1050 = vmatprep.subr.bf16.mxu0 (!%p1792_p13), %v2159_v30  ;;  %1996 = vmatprep.subr.bf16.mxu1 (!%p1792_p13), %v2161_v31 }
  0x72   : > { %1051 = vmatpush1.bf16.msra.mxu0 (!%p1792_p13), %v2162_v32  ;;  %1997 = vmatpush3.bf16.msra.mxu1 (!%p1792_p13), %v2161_v31 }
 0x133   : > { %v1974_v37 = vpop.f32.mrb[0].mxu0  ;;  %v1982_v38 = vpop.f32.mrb[0].mxu1 }
 0x134   : > { %v696_v41 = vadd.f32 %v1974_v37, %v455_v33  ;;  %v704_v42 = vadd.f32 %v1982_v38, %v463_v34  ;;  %v631_v43 = vpop.f32.mrb[1].mxu0  ;;  %v663_v44 = vpop.f32.mrb[1].mxu1  ;;  %v2163_v33 = vld [vmem:[%s2745_s3 + $0x7c] ss:$12 sps:$4 sm:$0xff] (!%p1792_p13)   ;;  %v2165_v34 = vld [vmem:[%s2745_s3 + $0x80] ss:$12 sps:$4 sm:$0xff] (!%p1792_p13)  }
 0x135   : > { %v694_v47 = vadd.f32 %v631_v43, %v453_v35  ;;  %v702_v48 = vadd.f32 %v663_v44, %v461_v36  ;;  %v1975_v49 = vpop.f32.mrb[2].mxu0  ;;  %v1983_v50 = vpop.f32.mrb[2].mxu1  ;;  %v2166_v35 = vld [vmem:[%s2745_s3 + $0x78] ss:$12 sps:$4 sm:$0xff] (!%p1792_p13)   ;;  %v2167_v37 = vld [vmem:[%s2745_s3 + $0x94] ss:$12 sps:$4 sm:$0xff] (!%p1792_p13)   ;;  %1052 = vmatprep.subr.bf16.mxu0 (!%p1792_p13), %v2163_v33  ;;  %1998 = vmatprep.subr.bf16.mxu1 (!%p1792_p13), %v2165_v34 }
 0x136   : > { %712 = vst [vmem:[#allocation2 + $0x10] sm:$0xff] %v696_v41  ;;  %720 = vst [vmem:[#allocation2 + $0x50] sm:$0xff] %v704_v42  ;;  %v697_v51 = vadd.f32 %v1975_v49, %v456_v39  ;;  %v705_v52 = vadd.f32 %v1983_v50, %v464_v40  ;;  %v634_v53 = vpop.f32.mrb[3].mxu0  ;;  %v666_v54 = vpop.f32.mrb[3].mxu1  ;;  %v2169_v38 = vld [vmem:[%s2745_s3 + $0x98] ss:$12 sps:$4 sm:$0xff] (!%p1792_p13)   ;;  %1053 = vmatpush1.bf16.msra.mxu0 (!%p1792_p13), %v2166_v35  ;;  %1999 = vmatpush3.bf16.msra.mxu1 (!%p1792_p13), %v2165_v34 }
 0x137   : > { %710 = vst [vmem:[#allocation2] sm:$0xff] %v694_v47  ;;  %718 = vst [vmem:[#allocation2 + $0x40] sm:$0xff] %v702_v48  ;;  %v695_v55 = vadd.f32 %v634_v53, %v454_v45  ;;  %v703_v56 = vadd.f32 %v666_v54, %v462_v46  ;;  %v746_v40 = vld [vmem:[%s2399_s18] sm:$0xff] (!%p1792_p13)  ;;  %v747_v41 = vld [vmem:[%s2399_s18 + $0x8] sm:$0xff] (!%p1792_p13)  ;;  %1054 = vmatprep.subr.bf16.mxu0 (!%p1792_p13), %v2167_v37  ;;  %2000 = vmatprep.subr.bf16.mxu1 (!%p1792_p13), %v2169_v38 }
 0x138   : > { %713 = vst [vmem:[#allocation2 + $0x18] sm:$0xff] %v697_v51  ;;  %721 = vst [vmem:[#allocation2 + $0x58] sm:$0xff] %v705_v52  ;;  %v748_v46 = vld [vmem:[%s2399_s18 + $0x10] sm:$0xff] (!%p1792_p13)  ;;  %v749_v47 = vld [vmem:[%s2399_s18 + $0x18] sm:$0xff] (!%p1792_p13) }
 0x139   : > { %711 = vst [vmem:[#allocation2 + $0x8] sm:$0xff] %v695_v55  ;;  %719 = vst [vmem:[#allocation2 + $0x48] sm:$0xff] %v703_v56  ;;  %v2170_v49 = vld [vmem:[%s2745_s3 + $0x90] ss:$12 sps:$4 sm:$0xff] (!%p1792_p13)   ;;  %v2171_v52 = vld [vmem:[%s2745_s3 + $0xac] ss:$12 sps:$4 sm:$0xff] (!%p1792_p13)  }
 0x13a   : > { %v2173_v53 = vld [vmem:[%s2745_s3 + $0xb0] ss:$12 sps:$4 sm:$0xff] (!%p1792_p13)   ;;  %1055 = vmatpush1.bf16.msra.mxu0 (!%p1792_p13), %v2170_v49  ;;  %2001 = vmatpush3.bf16.msra.mxu1 (!%p1792_p13), %v2169_v38 }
 0x13b   : > { %v1978_v61 = vpop.f32.mrb[4].mxu0  ;;  %v1986_v62 = vpop.f32.mrb[4].mxu1  ;;  %729 = sbr.rel (%p1792_p13) target bundleno = 617 (0x269), region = 89  ;;  %1056 = vmatprep.subr.bf16.mxu0 (!%p1792_p13), %v2171_v52  ;;  %2002 = vmatprep.subr.bf16.mxu1 (!%p1792_p13), %v2173_v53 }
 0x13c   : > { %v700_v1 = vadd.f32 %v1978_v61, %v459_v57  ;;  %v708_v2 = vadd.f32 %v1986_v62, %v467_v58  ;;  %v647_v3 = vpop.f32.mrb[5].mxu0  ;;  %v679_v4 = vpop.f32.mrb[5].mxu1  ;;  %v750_v62 = vld [vmem:[%s2399_s18 + $0x20] sm:$0xff] (!%p1792_p13) }
 0x13d   : > { %v698_v7 = vadd.f32 %v647_v3, %v457_v59  ;;  %v706_v8 = vadd.f32 %v679_v4, %v465_v60  ;;  %v1979_v9 = vpop.f32.mrb[6].mxu0  ;;  %v1987_v10 = vpop.f32.mrb[6].mxu1  ;;  %v732_v44 = vld [vmem:[#allocation2 + $0x10] sm:$0xff] (!%p1792_p13) }
 0x13e   : > { %716 = vst [vmem:[#allocation2 + $0x30] sm:$0xff] %v700_v1  ;;  %724 = vst [vmem:[#allocation2 + $0x70] sm:$0xff] %v708_v2  ;;  %v701_v11 = vadd.f32 %v1979_v9, %v460_v63  ;;  %v709_v12 = vadd.f32 %v1987_v10, %v468_v0  ;;  %v650_v13 = vpop.f32.mrb[7].mxu0  ;;  %v682_v14 = vpop.f32.mrb[7].mxu1  ;;  %v730_v36 = vld [vmem:[#allocation2] sm:$0xff] (!%p1792_p13)  ;;  %v2500_v48 = vadd.f32 (!%p1792_p13), %v748_v46, %v732_v44  ;;  %v751_v63 = vld [vmem:[%s2399_s18 + $0x28] sm:$0xff] (!%p1792_p13)  ;;  %2003 = vmatpush3.bf16.msra.mxu1 (!%p1792_p13), %v2173_v53 }
 0x13f   : > { %714 = vst [vmem:[#allocation2 + $0x20] sm:$0xff] %v698_v7  ;;  %722 = vst [vmem:[#allocation2 + $0x60] sm:$0xff] %v706_v8  ;;  %v699_v15 = vadd.f32 %v650_v13, %v458_v5  ;;  %v707_v16 = vadd.f32 %v682_v14, %v466_v6  ;;  %v2494_v42 = vadd.f32 (!%p1792_p13), %v746_v40, %v730_v36  ;;  %v733_v45 = vld [vmem:[#allocation2 + $0x18] sm:$0xff] (!%p1792_p13)  ;;  %v752_v4 = vld [vmem:[%s2399_s18 + $0x30] sm:$0xff] (!%p1792_p13) }
 0x140   : > { %717 = vst [vmem:[#allocation2 + $0x38] sm:$0xff] %v701_v11  ;;  %725 = vst [vmem:[#allocation2 + $0x78] sm:$0xff] %v709_v12  ;;  %v731_v39 = vld [vmem:[#allocation2 + $0x8] sm:$0xff] (!%p1792_p13)  ;;  %v2513_v54 = vadd.f32 (!%p1792_p13), %v749_v47, %v733_v45  ;;  %v796_v55 = vmin.f32 (!%p1792_p13), %v2500_v48, 0.0  ;;  %v753_v6 = vld [vmem:[%s2399_s18 + $0x38] sm:$0xff] (!%p1792_p13)  ;;  %vm780_vm2 = vcmp.gt.f32.partialorder (!%p1792_p13), %v2500_v48, 0.0 }
 0x141   : > { %715 = vst [vmem:[#allocation2 + $0x28] sm:$0xff] %v699_v15  ;;  %723 = vst [vmem:[#allocation2 + $0x68] sm:$0xff] %v707_v16  ;;  %v2496_v43 = vadd.f32 (!%p1792_p13), %v747_v41, %v731_v39  ;;  %v794_v50 = vmin.f32 (!%p1792_p13), %v2494_v42, 0.0  ;;  %v2174_v8 = vld [vmem:[%s2745_s3 + $0xa8] ss:$12 sps:$4 sm:$0xff] (!%p1792_p13)   ;;  %v2534_v10 = vld [vmem:[%s2746_s4] sm:$0xff] (!%p1792_p13)  }
 0x142   : > { %v797_v60 = vmin.f32 %v2513_v54, 0.0  ;;  %v814_v61 = vmul.f32 1.442695, %v796_v55  ;;  %v738_v15 = vld [vmem:[#allocation2 + $0x40] sm:$0xff]  ;;  %v739_v16 = vld [vmem:[#allocation2 + $0x48] sm:$0xff]  ;;  %v740_v23 = vld [vmem:[#allocation2 + $0x50] sm:$0xff]  ;;  %1057 = vmatpush1.bf16.msra.mxu0 %v2174_v8  ;;  %2020 = vmatprep.subr.bf16.mxu1 %v2534_v10 }
 0x143   : > { %v795_v51 = vmin.f32 %v2496_v43, 0.0  ;;  %v810_v56 = vmul.f32 1.442695, %v794_v50  ;;  %v2543_v22 = vadd.f32 %v754_v17, %v738_v15  ;;  %vm778_vm0 = vcmp.gt.f32.partialorder %v2494_v42, 0.0  ;;  %v741_v26 = vld [vmem:[#allocation2 + $0x58] sm:$0xff]  ;;  %v758_v45 = vld [vmem:[%s2399_s18 + $0x60] sm:$0xff] }
 0x144   : > { %v816_v5 = vmul.f32 1.442695, %v797_v60  ;;  %v2546_v25 = vadd.f32 %v755_v21, %v739_v16  ;;  %vm779_vm1 = vcmp.gt.f32.partialorder %v2496_v43, 0.0  ;;  %v2555_v32 = vadd.f32 %v756_v27, %v740_v23  ;;  %v759_v46 = vld [vmem:[%s2399_s18 + $0x68] sm:$0xff]  ;;  %v760_v60 = vld [vmem:[%s2399_s18 + $0x70] sm:$0xff] }
 0x145   : > { %v812_v57 = vmul.f32 1.442695, %v795_v51  ;;  %2183 = vpow2.f32 %v810_v56  ;;  %v736_v2 = vld [vmem:[#allocation2 + $0x30] sm:$0xff]  ;;  %v802_v30 = vmin.f32 %v2543_v22, 0.0  ;;  %v2557_v34 = vadd.f32 %v757_v28, %v741_v26 }
 0x146   : > { %v734_v58 = vld [vmem:[#allocation2 + $0x20] sm:$0xff]  ;;  %v2525_v7 = vadd.f32 %v752_v4, %v736_v2  ;;  %v803_v31 = vmin.f32 %v2546_v25, 0.0  ;;  %vm781_vm3 = vcmp.gt.f32.partialorder %v2513_v54, 0.0  ;;  %v804_v37 = vmin.f32 %v2555_v32, 0.0  ;;  %v744_v52 = vld [vmem:[#allocation2 + $0x70] sm:$0xff] }
 0x147   : > { %v2519_v0 = vadd.f32 %v750_v62, %v734_v58  ;;  %v737_v3 = vld [vmem:[#allocation2 + $0x38] sm:$0xff]  ;;  %2185 = vpow2.f32 %v812_v57  ;;  %v826_v33 = vmul.f32 1.442695, %v802_v30  ;;  %v742_v38 = vld [vmem:[#allocation2 + $0x60] sm:$0xff]  ;;  %v805_v44 = vmin.f32 %v2557_v34, 0.0 }
 0x148   : > { %v735_v59 = vld [vmem:[#allocation2 + $0x28] sm:$0xff]  ;;  %2187 = vpow2.f32 %v814_v61  ;;  %v2537_v12 = vadd.f32 %v753_v6, %v737_v3  ;;  %v800_v14 = vmin.f32 %v2525_v7, 0.0  ;;  %v828_v36 = vmul.f32 1.442695, %v803_v31  ;;  %v745_v53 = vld [vmem:[#allocation2 + $0x78] sm:$0xff] }
 0x149   : > { %v2521_v1 = vadd.f32 %v751_v63, %v735_v59  ;;  %v798_v9 = vmin.f32 %v2519_v0, 0.0  ;;  %2189 = vpow2.f32 %v816_v5  ;;  %v743_v39 = vld [vmem:[#allocation2 + $0x68] sm:$0xff]  ;;  %vm782_vm4 = vcmp.gt.f32.partialorder %v2519_v0, 0.0  ;;  %v761_v63 = vld [vmem:[%s2399_s18 + $0x78] sm:$0xff] }
 0x14a   : > { %v801_v20 = vmin.f32 %v2537_v12, 0.0  ;;  %v822_v24 = vmul.f32 1.442695, %v800_v14  ;;  %v830_v50 = vmul.f32 1.442695, %v804_v37  ;;  %v2565_v51 = vadd.f32 %v758_v45, %v742_v38 }
 0x14b   : > { %v799_v11 = vmin.f32 %v2521_v1, 0.0  ;;  %v818_v13 = vmul.f32 1.442695, %v798_v9  ;;  %v832_v58 = vmul.f32 1.442695, %v805_v44  ;;  %v2570_v59 = vadd.f32 %v759_v46, %v743_v39  ;;  %v2176_v9 = vld [vmem:[%s2746_s4 + $0x8] sm:$0xff]  }
 0x14c   : > { %v824_v29 = vmul.f32 1.442695, %v801_v20  ;;  %vm783_vm5 = vcmp.gt.f32.partialorder %v2521_v1, 0.0  ;;  %v806_v5 = vmin.f32 %v2565_v51, 0.0  ;;  %v2588_v6 = vadd.f32 %v760_v60, %v744_v52 }
 0x14d   : > { %v820_v18 = vmul.f32 1.442695, %v799_v11  ;;  %2191 = vpow2.f32 %v818_v13  ;;  %vm784_vm6 = vcmp.gt.f32.partialorder %v2525_v7, 0.0  ;;  %vm785_vm7 = vcmp.gt.f32.partialorder %v2537_v12, 0.0 }
 0x14e   : > { %v834_v15 = vmul.f32 1.442695, %v806_v5  ;;  %vm786_vm8 = vcmp.gt.f32.partialorder %v2543_v22, 0.0  ;;  %v808_v21 = vmin.f32 %v2588_v6, 0.0  ;;  %vm787_vm9 = vcmp.gt.f32.partialorder %v2546_v25, 0.0 }
 0x14f   : > { %2193 = vpow2.f32 %v820_v18  ;;  %v2184_v35 = vpop.eup %2183  ;;  %vm788_vm10 = vcmp.gt.f32.partialorder %v2555_v32, 0.0  ;;  %vm789_vm11 = vcmp.gt.f32.partialorder %v2557_v34, 0.0  ;;  %vm790_vm12 = vcmp.gt.f32.partialorder %v2565_v51, 0.0 }
 0x150   : > { %2195 = vpow2.f32 %v822_v24  ;;  %v1793_v41 = vadd.f32 -1.0, %v2184_v35  ;;  %vm791_vm13 = vcmp.gt.f32.partialorder %v2570_v59, 0.0  ;;  %vm792_vm14 = vcmp.gt.f32.partialorder %v2588_v6, 0.0 }
 0x151   : > { %2197 = vpow2.f32 %v824_v29  ;;  %v2186_v40 = vpop.eup %2185  ;;  %v838_v29 = vmul.f32 1.442695, %v808_v21 }
 0x152   : > { %2199 = vpow2.f32 %v826_v33  ;;  %v2188_v47 = vpop.eup %2187  ;;  %v1794_v49 = vadd.f32 -1.0, %v2186_v40  ;;  %v858_v56 = vsel %vm778_vm0, %v2494_v42, %v1793_v41 }
 0x153   : > { %2201 = vpow2.f32 %v828_v36  ;;  %v2190_v55 = vpop.eup %2189  ;;  %v1795_v57 = vadd.f32 -1.0, %v2188_v47 }
 0x154   : > { %v859_v61 = vsel %vm779_vm1, %v2496_v43, %v1794_v49  ;;  %v1796_v62 = vadd.f32 -1.0, %v2190_v55  ;;  %2203 = vpow2.f32 %v830_v50  ;;  %v807_v43 = vmin.f32 %v2570_v59, 0.0 }
 0x155   : > { %v2577_v2 = vpack.c.bf16 %v859_v61, %v858_v56  ;;  %v860_v3 = vsel %vm780_vm2, %v2500_v48, %v1795_v57  ;;  %2205 = vpow2.f32 %v832_v58 }
 0x156   : > { %v861_v4 = vsel %vm781_vm3, %v2513_v54, %v1796_v62  ;;  %v2598_v54 = vadd.f32 %v761_v63, %v745_v53  ;;  %v836_v16 = vmul.f32 1.442695, %v807_v43  ;;  %2207 = vpow2.f32 %v834_v15  ;;  %v2181_v62 = vld [vmem:[%s2746_s4 + $0x30] sm:$0xff]  }
 0x157   : > { %v2192_v42 = vpop.eup %2191  ;;  %2004 = vmatprep.mubr.bf16.mxu1 %v2577_v2  ;;  %1075 = vmatmul.mubr.bf16.vlgmr.msra.gmra.mrb[0].mxu0 %v2577_v2  ;;  %v2592_v48 = vpack.c.bf16 %v861_v4, %v860_v3 }
 0x158   : > { %v1797_v11 = vadd.f32 -1.0, %v2192_v42  ;;  %1084 = vmatprep.mubr.bf16.mxu0 %v2272_v19  ;;  %v809_v26 = vmin.f32 %v2598_v54, 0.0  ;;  %2209 = vpow2.f32 %v836_v16  ;;  %vm793_vm15 = vcmp.gt.f32.partialorder %v2598_v54, 0.0 }
 0x159   : > { %v2194_v8 = vpop.eup %2193  ;;  %2005 = vmatmul.mubr.bf16.vlgmr.msra.gmra.mrb[0].mxu1 %v2592_v48  ;;  %2211 = vpow2.f32 %v838_v29 }
 0x15a   : > { %v2196_v13 = vpop.eup %2195  ;;  %v1798_v14 = vadd.f32 -1.0, %v2194_v8  ;;  %v862_v18 = vsel %vm782_vm4, %v2519_v0, %v1797_v11  ;;  %2021 = vmatpush3.bf16.msra.mxu1 %v2534_v10  ;;  %v2177_v10 = vld [vmem:[%s2746_s4 + $0x10] sm:$0xff]   ;;  %v840_v33 = vmul.f32 1.442695, %v809_v26 }
 0x15b   : > { %v2198_v17 = vpop.eup %2197  ;;  %v1799_v20 = vadd.f32 -1.0, %v2196_v13  ;;  %2022 = vmatprep.subr.bf16.mxu1 %v2176_v9 }
 0x15c   : > { %v863_v23 = vsel %vm783_vm5, %v2521_v1, %v1798_v14  ;;  %v1800_v24 = vadd.f32 -1.0, %v2198_v17  ;;  %v2200_v27 = vpop.eup %2199  ;;  %2213 = vpow2.f32 %v840_v33 }
 0x15d   : > { %v2613_v28 = vpack.c.bf16 %v863_v23, %v862_v18  ;;  %v864_v0 = vsel %vm784_vm6, %v2525_v7, %v1799_v20  ;;  %v2202_v30 = vpop.eup %2201  ;;  %v1801_v31 = vadd.f32 -1.0, %v2200_v27 }
 0x15e   : > { %v865_v1 = vsel %vm785_vm7, %v2537_v12, %v1800_v24  ;;  %v1802_v7 = vadd.f32 -1.0, %v2202_v30  ;;  %v2204_v36 = vpop.eup %2203  ;;  %2023 = vmatpush3.bf16.msra.mxu1 %v2176_v9  ;;  %v2178_v12 = vld [vmem:[%s2746_s4 + $0x18] sm:$0xff]  }
 0x15f   : > { %2008 = vmatprep.mubr.bf16.mxu1 %v2613_v28  ;;  %v2626_v35 = vpack.c.bf16 %v865_v1, %v864_v0  ;;  %v866_v37 = vsel %vm786_vm8, %v2543_v22, %v1801_v31  ;;  %v2206_v38 = vpop.eup %2205  ;;  %1085 = vmatmul.mubr.bf16.gmra.mrb[4].mxu0 %v2592_v48  ;;  %v1803_v40 = vadd.f32 -1.0, %v2204_v36 }
 0x160   : > { %2024 = vmatprep.subr.bf16.mxu1 %v2177_v10  ;;  %v867_v39 = vsel %vm787_vm9, %v2546_v25, %v1802_v7  ;;  %1094 = vmatprep.mubr.bf16.mxu0 %v2272_v19  ;;  %v1804_v22 = vadd.f32 -1.0, %v2206_v38  ;;  %v2179_v25 = vld [vmem:[%s2746_s4 + $0x20] sm:$0xff]   ;;  %v2208_v46 = vpop.eup %2207 }
 0x161   : > { %v878_v41 = vpack.c.bf16 %v867_v39, %v866_v37  ;;  %2009 = vmatmul.mubr.bf16.gmra.mrb[4].mxu1 %v2626_v35  ;;  %v868_v44 = vsel %vm788_vm10, %v2555_v32, %v1803_v40  ;;  %v1805_v50 = vadd.f32 -1.0, %v2208_v46  ;;  %v2180_v32 = vld [vmem:[%s2746_s4 + $0x28] sm:$0xff]  }
 0x162   : > { %2025 = vmatpush3.bf16.msra.mxu1 %v2177_v10  ;;  %v869_v45 = vsel %vm789_vm11, %v2557_v34, %v1804_v22  ;;  %v2210_v47 = vpop.eup %2209 }
 0x163   : > { %2012 = vmatprep.mubr.bf16.mxu1 %v878_v41  ;;  %2026 = vmatprep.subr.bf16.mxu1 %v2178_v12  ;;  %v879_v49 = vpack.c.bf16 %v869_v45, %v868_v44  ;;  %v1806_v52 = vadd.f32 -1.0, %v2210_v47  ;;  %v2212_v53 = vpop.eup %2211  ;;  %v870_v34 = vsel %vm790_vm12, %v2565_v51, %v1805_v50 }
 0x164   : > { %v1807_v57 = vadd.f32 -1.0, %v2212_v53 }
 0x165   : > { %v871_v56 = vsel %vm791_vm13, %v2570_v59, %v1806_v52  ;;  %v2182_v59 = vld [vmem:[%s2746_s4 + $0x38] sm:$0xff]  }
 0x166   : > { %2027 = vmatpush3.bf16.msra.mxu1 %v2178_v12  ;;  %v2214_v55 = vpop.eup %2213  ;;  %v880_v58 = vpack.c.bf16 %v871_v56, %v870_v34  ;;  %v872_v61 = vsel %vm792_vm14, %v2588_v6, %v1807_v57 }
 0x167   : > { %1095 = vmatmul.mubr.bf16.gmra.mrb[8].mxu0 %v2613_v28  ;;  %2028 = vmatprep.subr.bf16.mxu1 %v2179_v25  ;;  %v1808_v60 = vadd.f32 -1.0, %v2214_v55 }
 0x168   : > { %1104 = vmatprep.mubr.bf16.mxu0 %v2272_v19 }
 0x169   : > { %2013 = vmatmul.mubr.bf16.gmra.mrb[8].mxu1 %v879_v49  ;;  %v873_v51 = vsel %vm793_vm15, %v2598_v54, %v1808_v60 }
 0x16a   : > { %2029 = vmatpush3.bf16.msra.mxu1 %v2179_v25  ;;  %2016 = vmatprep.mubr.bf16.mxu1 %v880_v58  ;;  %v881_v63 = vpack.c.bf16 %v873_v51, %v872_v61 }
 0x16b   : > { %2030 = vmatprep.subr.bf16.mxu1 %v2180_v32 }
 0x16e   : > { %2031 = vmatpush3.bf16.msra.mxu1 %v2180_v32 }
 0x16f   : > { %1105 = vmatmul.mubr.bf16.gmra.mrb[12].mxu0 %v2626_v35  ;;  %2032 = vmatprep.subr.bf16.mxu1 %v2181_v62 }
 0x170   : > { %1114 = vmatprep.mubr.bf16.mxu0 %v2272_v19 }
 0x171   : > { %2017 = vmatmul.mubr.bf16.gmra.mrb[12].mxu1 %v881_v63 }
 0x172   : > { %2033 = vmatpush3.bf16.msra.mxu1 %v2181_v62  ;;  %2036 = vmatprep.mubr.bf16.mxu1 %v2577_v2 }
 0x173   : > { %2034 = vmatprep.subr.bf16.mxu1 %v2182_v59 }
 0x176   : > { %2035 = vmatpush3.bf16.msra.mxu1 %v2182_v59 }
 0x177   : > { %1115 = vmatmul.mubr.bf16.gmra.mrb[16].mxu0 %v878_v41 }
 0x178   : > { %1124 = vmatprep.mubr.bf16.mxu0 %v2272_v19 }
 0x179   : > { %2037 = vmatmul.mubr.bf16.vlgmr.msra.gmra.mrb[16].mxu1 %v2592_v48 }
 0x17a   : > { %2040 = vmatprep.mubr.bf16.mxu1 %v2613_v28 }
 0x17f   : > { %1125 = vmatmul.mubr.bf16.gmra.mrb[20].mxu0 %v879_v49 }
 0x180   : > { %1134 = vmatprep.mubr.bf16.mxu0 %v2272_v19 }
 0x181   : > { %2041 = vmatmul.mubr.bf16.gmra.mrb[20].mxu1 %v2626_v35 }
 0x182   : > { %2044 = vmatprep.mubr.bf16.mxu1 %v878_v41 }
 0x187   : > { %1135 = vmatmul.mubr.bf16.gmra.mrb[24].mxu0 %v880_v58 }
 0x188   : > { %1144 = vmatprep.mubr.bf16.mxu0 %v2272_v19 }
 0x189   : > { %2045 = vmatmul.mubr.bf16.gmra.mrb[24].mxu1 %v879_v49 }
 0x18a   : > { %2048 = vmatprep.mubr.bf16.mxu1 %v880_v58 }
 0x18f   : > { %1145 = vmatmul.mubr.bf16.gmra.mrb[28].mxu0 %v881_v63 }
 0x191   : > { %2049 = vmatmul.mubr.bf16.gmra.mrb[28].mxu1 %v881_v63 }
 0x22a   : > { %v1076_v2 = vpop.f32.mrb[0].mxu0 }
 0x22b   : > { %v1078_v3 = vpop.f32.mrb[1].mxu0 }
 0x22c   : > { %v2006_v42 = vpop.f32.mrb[0].mxu1  ;;  %v1876_v4 = vpack.c.bf16 %v1078_v3, %v1076_v2  ;;  %v1080_v5 = vpop.f32.mrb[2].mxu0 }
 0x22d   : > { %v1881_v43 = vpack.c.bf16 %v2006_v42, %v2006_v42  ;;  %v1189_v6 = vpop.f32.mrb[1].mxu1  ;;  %v1082_v8 = vpop.f32.mrb[3].mxu0 }
 0x22e   : > { %1412 = vst [vmem:[%s2409_s0] sm:$0xff] %v1876_v4  ;;  %v1877_v48 = vpack.c.bf16 %v1189_v6, %v1189_v6  ;;  %v2007_v19 = vpop.f32.mrb[2].mxu1  ;;  %v1878_v9 = vpack.c.bf16 %v1082_v8, %v1080_v5 }
 0x22f   : > { %1417 = vst [vmem:[%s2409_s0 + $0x20] sm:$0xf] %v1881_v43  ;;  %v1883_v11 = vpack.c.bf16 %v2007_v19, %v2007_v19  ;;  %v1192_v54 = vpop.f32.mrb[3].mxu1 }
 0x230   : > { %1413 = vst [vmem:[%s2409_s0 + $0x8] sm:$0xf] %v1877_v48  ;;  %1414 = vst [vmem:[%s2409_s0 + $0xc] sm:$0xff] %v1878_v9  ;;  %v1879_v13 = vpack.c.bf16 %v1192_v54, %v1192_v54 }
 0x231   : > { %1419 = vst [vmem:[%s2409_s0 + $0x2c] sm:$0xf] %v1883_v11 }
 0x232   : > { %1415 = vst [vmem:[%s2409_s0 + $0x14] sm:$0xf] %v1879_v13  ;;  %v1086_v14 = vpop.f32.mrb[4].mxu0 }
 0x233   : > { %v1088_v15 = vpop.f32.mrb[5].mxu0 }
 0x234   : > { %v2010_v16 = vpop.f32.mrb[4].mxu1  ;;  %v1880_v17 = vpack.c.bf16 %v1088_v15, %v1086_v14  ;;  %v1090_v18 = vpop.f32.mrb[6].mxu0 }
 0x235   : > { %v1889_v20 = vpack.c.bf16 %v2010_v16, %v2010_v16  ;;  %v1205_v21 = vpop.f32.mrb[5].mxu1  ;;  %v1092_v23 = vpop.f32.mrb[7].mxu0 }
 0x236   : > { %1416 = vst [vmem:[%s2409_s0 + $0x18] sm:$0xff] %v1880_v17  ;;  %v1885_v24 = vpack.c.bf16 %v1205_v21, %v1205_v21  ;;  %v2011_v26 = vpop.f32.mrb[6].mxu1  ;;  %v1882_v27 = vpack.c.bf16 %v1092_v23, %v1090_v18 }
 0x237   : > { %1425 = vst [vmem:[%s2409_s0 + $0x50] sm:$0xf] %v1889_v20  ;;  %v1891_v28 = vpack.c.bf16 %v2011_v26, %v2011_v26  ;;  %v1208_v0 = vpop.f32.mrb[7].mxu1 }
 0x238   : > { %1421 = vst [vmem:[%s2409_s0 + $0x38] sm:$0xf] %v1885_v24  ;;  %1418 = vst [vmem:[%s2409_s0 + $0x24] sm:$0xff] %v1882_v27  ;;  %v1887_v10 = vpack.c.bf16 %v1208_v0, %v1208_v0 }
 0x239   : > { %1427 = vst [vmem:[%s2409_s0 + $0x5c] sm:$0xf] %v1891_v28 }
 0x23a   : > { %1423 = vst [vmem:[%s2409_s0 + $0x44] sm:$0xf] %v1887_v10  ;;  %v1096_v29 = vpop.f32.mrb[8].mxu0 }
 0x23b   : > { %v1098_v30 = vpop.f32.mrb[9].mxu0 }
 0x23c   : > { %v2014_v1 = vpop.f32.mrb[8].mxu1  ;;  %v1884_v31 = vpack.c.bf16 %v1098_v30, %v1096_v29  ;;  %v1100_v33 = vpop.f32.mrb[10].mxu0 }
 0x23d   : > { %v1897_v35 = vpack.c.bf16 %v2014_v1, %v2014_v1  ;;  %v1221_v7 = vpop.f32.mrb[9].mxu1  ;;  %v1102_v36 = vpop.f32.mrb[11].mxu0 }
 0x23e   : > { %1420 = vst [vmem:[%s2409_s0 + $0x30] sm:$0xff] %v1884_v31  ;;  %v1893_v37 = vpack.c.bf16 %v1221_v7, %v1221_v7  ;;  %v2015_v38 = vpop.f32.mrb[10].mxu1  ;;  %v1886_v12 = vpack.c.bf16 %v1102_v36, %v1100_v33 }
 0x23f   : > { %1433 = vst [vmem:[%s2409_s0 + $0x80] sm:$0xf] %v1897_v35  ;;  %v1899_v39 = vpack.c.bf16 %v2015_v38, %v2015_v38  ;;  %v1224_v40 = vpop.f32.mrb[11].mxu1 }
 0x240   : > { %1429 = vst [vmem:[%s2409_s0 + $0x68] sm:$0xf] %v1893_v37  ;;  %1422 = vst [vmem:[%s2409_s0 + $0x3c] sm:$0xff] %v1886_v12  ;;  %v1895_v41 = vpack.c.bf16 %v1224_v40, %v1224_v40 }
 0x241   : > { %1435 = vst [vmem:[%s2409_s0 + $0x8c] sm:$0xf] %v1899_v39 }
 0x242   : > { %1431 = vst [vmem:[%s2409_s0 + $0x74] sm:$0xf] %v1895_v41  ;;  %v1106_v22 = vpop.f32.mrb[12].mxu0 }
 0x243   : > { %v1108_v44 = vpop.f32.mrb[13].mxu0 }
 0x244   : > { %v2018_v45 = vpop.f32.mrb[12].mxu1  ;;  %v1888_v25 = vpack.c.bf16 %v1108_v44, %v1106_v22  ;;  %v1110_v46 = vpop.f32.mrb[14].mxu0 }
 0x245   : > { %v1905_v47 = vpack.c.bf16 %v2018_v45, %v2018_v45  ;;  %v1237_v49 = vpop.f32.mrb[13].mxu1  ;;  %v1112_v50 = vpop.f32.mrb[15].mxu0 }
 0x246   : > { %1424 = vst [vmem:[%s2409_s0 + $0x48] sm:$0xff] %v1888_v25  ;;  %v1901_v52 = vpack.c.bf16 %v1237_v49, %v1237_v49  ;;  %v2019_v53 = vpop.f32.mrb[14].mxu1  ;;  %v1890_v32 = vpack.c.bf16 %v1112_v50, %v1110_v46 }
 0x247   : > { %1441 = vst [vmem:[%s2409_s0 + $0xb0] sm:$0xf] %v1905_v47  ;;  %v1907_v34 = vpack.c.bf16 %v2019_v53, %v2019_v53  ;;  %v1240_v55 = vpop.f32.mrb[15].mxu1 }
 0x248   : > { %1437 = vst [vmem:[%s2409_s0 + $0x98] sm:$0xf] %v1901_v52  ;;  %1426 = vst [vmem:[%s2409_s0 + $0x54] sm:$0xff] %v1890_v32  ;;  %v1903_v56 = vpack.c.bf16 %v1240_v55, %v1240_v55 }
 0x249   : > { %1443 = vst [vmem:[%s2409_s0 + $0xbc] sm:$0xf] %v1907_v34 }
 0x24a   : > { %1439 = vst [vmem:[%s2409_s0 + $0xa4] sm:$0xf] %v1903_v56  ;;  %v1116_v57 = vpop.f32.mrb[16].mxu0 }
 0x24b   : > { %v1118_v58 = vpop.f32.mrb[17].mxu0 }
 0x24c   : > { %v2038_v60 = vpop.f32.mrb[16].mxu1  ;;  %v1892_v61 = vpack.c.bf16 %v1118_v58, %v1116_v57  ;;  %v1120_v51 = vpop.f32.mrb[18].mxu0 }
 0x24d   : > { %1607 = vst [vmem:[%s2404_s24 + $0x10] sm:$0xff] %v2038_v60  ;;  %v1542_v62 = vpop.f32.mrb[17].mxu1  ;;  %v1122_v63 = vpop.f32.mrb[19].mxu0 }
 0x24e   : > { %1428 = vst [vmem:[%s2409_s0 + $0x60] sm:$0xff] %v1892_v61  ;;  %1605 = vst [vmem:[%s2404_s24] sm:$0xff] %v1542_v62  ;;  %v2039_v59 = vpop.f32.mrb[18].mxu1  ;;  %v1894_v2 = vpack.c.bf16 %v1122_v63, %v1120_v51 }
 0x24f   : > { %1608 = vst [vmem:[%s2404_s24 + $0x18] sm:$0xff] %v2039_v59  ;;  %v1545_v3 = vpop.f32.mrb[19].mxu1 }
 0x250   : > { %1430 = vst [vmem:[%s2409_s0 + $0x6c] sm:$0xff] %v1894_v2  ;;  %1606 = vst [vmem:[%s2404_s24 + $0x8] sm:$0xff] %v1545_v3 }
 0x252   : > { %v1126_v42 = vpop.f32.mrb[20].mxu0 }
 0x253   : > { %v1128_v4 = vpop.f32.mrb[21].mxu0 }
 0x254   : > { %v2042_v5 = vpop.f32.mrb[20].mxu1  ;;  %v1896_v43 = vpack.c.bf16 %v1128_v4, %v1126_v42  ;;  %v1130_v6 = vpop.f32.mrb[22].mxu0 }
 0x255   : > { %1611 = vst [vmem:[%s2404_s24 + $0x30] sm:$0xff] %v2042_v5  ;;  %v1558_v8 = vpop.f32.mrb[21].mxu1  ;;  %v1132_v48 = vpop.f32.mrb[23].mxu0 }
 0x256   : > { %1432 = vst [vmem:[%s2409_s0 + $0x78] sm:$0xff] %v1896_v43  ;;  %1609 = vst [vmem:[%s2404_s24 + $0x20] sm:$0xff] %v1558_v8  ;;  %v2043_v19 = vpop.f32.mrb[22].mxu1  ;;  %v1898_v9 = vpack.c.bf16 %v1132_v48, %v1130_v6 }
 0x257   : > { %1612 = vst [vmem:[%s2404_s24 + $0x38] sm:$0xff] %v2043_v19  ;;  %v1561_v11 = vpop.f32.mrb[23].mxu1 }
 0x258   : > { %1434 = vst [vmem:[%s2409_s0 + $0x84] sm:$0xff] %v1898_v9  ;;  %1610 = vst [vmem:[%s2404_s24 + $0x28] sm:$0xff] %v1561_v11 }
 0x25a   : > { %v1136_v54 = vpop.f32.mrb[24].mxu0 }
 0x25b   : > { %v1138_v13 = vpop.f32.mrb[25].mxu0 }
 0x25c   : > { %v2046_v14 = vpop.f32.mrb[24].mxu1  ;;  %v1900_v15 = vpack.c.bf16 %v1138_v13, %v1136_v54  ;;  %v1140_v16 = vpop.f32.mrb[26].mxu0 }
 0x25d   : > { %1615 = vst [vmem:[%s2404_s24 + $0x50] sm:$0xff] %v2046_v14  ;;  %v1574_v17 = vpop.f32.mrb[25].mxu1  ;;  %v1142_v18 = vpop.f32.mrb[27].mxu0 }
 0x25e   : > { %1436 = vst [vmem:[%s2409_s0 + $0x90] sm:$0xff] %v1900_v15  ;;  %1613 = vst [vmem:[%s2404_s24 + $0x40] sm:$0xff] %v1574_v17  ;;  %v2047_v20 = vpop.f32.mrb[26].mxu1  ;;  %v1902_v21 = vpack.c.bf16 %v1142_v18, %v1140_v16 }
 0x25f   : > { %1616 = vst [vmem:[%s2404_s24 + $0x58] sm:$0xff] %v2047_v20  ;;  %v1577_v23 = vpop.f32.mrb[27].mxu1 }
 0x260   : > { %1438 = vst [vmem:[%s2409_s0 + $0x9c] sm:$0xff] %v1902_v21  ;;  %1614 = vst [vmem:[%s2404_s24 + $0x48] sm:$0xff] %v1577_v23 }
 0x262   : > { %v1146_v24 = vpop.f32.mrb[28].mxu0 }
 0x263   : > { %v1148_v26 = vpop.f32.mrb[29].mxu0 }
 0x264   : > { %v2050_v27 = vpop.f32.mrb[28].mxu1  ;;  %v1904_v28 = vpack.c.bf16 %v1148_v26, %v1146_v24  ;;  %v1150_v0 = vpop.f32.mrb[30].mxu0 }
 0x265   : > { %1619 = vst [vmem:[%s2404_s24 + $0x70] sm:$0xff] %v2050_v27  ;;  %v1590_v10 = vpop.f32.mrb[29].mxu1  ;;  %v1152_v29 = vpop.f32.mrb[31].mxu0 }
 0x266   : > { %1440 = vst [vmem:[%s2409_s0 + $0xa8] sm:$0xff] %v1904_v28  ;;  %1617 = vst [vmem:[%s2404_s24 + $0x60] sm:$0xff] %v1590_v10  ;;  %v2051_v30 = vpop.f32.mrb[30].mxu1  ;;  %v1906_v1 = vpack.c.bf16 %v1152_v29, %v1150_v0 }
 0x267   : > { %1620 = vst [vmem:[%s2404_s24 + $0x78] sm:$0xff] %v2051_v30  ;;  %v1593_v31 = vpop.f32.mrb[31].mxu1 }
 0x268   : > { %1442 = vst [vmem:[%s2409_s0 + $0xb4] sm:$0xff] %v1906_v1  ;;  %1618 = vst [vmem:[%s2404_s24 + $0x68] sm:$0xff] %v1593_v31 }
 0x269 PF: > { %s17_s27 = sadd.s32 1, %s2269_s27   ;;  %s2751_s21 = smov %s2249_s22 }
 0x26a   : > { %p14_p0 = scmp.ge.s32.totalorder %s17_s27, 6   ;;  %s2752_s22 = smov %s2359_s10 }
 0x26b   : > { %s2753_s23 = smov %s2261_s25  ;;  %s2754_s24 = smov %s2265_s26 }
 0x26c   : > { %s2755_s25 = smov %s2758_s28  ;;  %s2756_s26 = smov %s2762_s29 }
 0x26d   :  { %16 = sbr.rel (!%p14_p0) target bundleno = 6 (0x6), region = 142 }

// kernel: enhanced_gcn_forward.7
= control target key start
LH: loop header
LB: loop body
LE: loop exit
PB: predicated region body
PF: predicated region fallthrough
CT: control target
= control target key end

     0   :  { %20 = vsyncpa [#allocation4], 0  ;;  %s2218_s0 = inlined_call_operand.vmem [shape: f32[2,256], index: 0, kind: input, shape index: {}]   ;;  %s2219_s1 = inlined_call_operand.vmem [shape: bf16[256,128], index: 1, kind: input, shape index: {}]   ;;  %s2220_s2 = inlined_call_operand.vmem [shape: f32[5,128], index: 2, kind: input, shape index: {}]   ;;  %s2221_s3 = inlined_call_operand.vmem [shape: f32[128,5], index: 3, kind: input, shape index: {}]   ;;  %s2222_s4 = inlined_call_operand.vmem [shape: f32[1,5], index: 4, kind: input, shape index: {}]   ;;  %s2223_s5 = inlined_call_operand.vmem [shape: f32[128,4], index: 5, kind: input, shape index: {}]   ;;  %s2224_s6 = inlined_call_operand.vmem [shape: f32[1,4], index: 6, kind: input, shape index: {}]   ;;  %s2225_s7 = inlined_call_operand.vmem [shape: f32[128,64], index: 7, kind: input, shape index: {}]   ;;  %s2226_s8 = inlined_call_operand.vmem [shape: f32[1,64], index: 8, kind: input, shape index: {}]   ;;  %s2227_s9 = inlined_call_operand.vmem [shape: f32[64,8], index: 9, kind: input, shape index: {}]   ;;  %s2228_s10 = inlined_call_operand.vmem [shape: f32[1,8], index: 10, kind: input, shape index: {}]   ;;  %s2229_s11 = inlined_call_operand.hbm [shape: f32[2,4], index: 11, kind: output, shape index: {0}]   ;;  %s2230_s12 = inlined_call_operand.hbm [shape: f32[2,128], index: 12, kind: output, shape index: {1}]   ;;  %s2231_s13 = inlined_call_operand.hbm [shape: f32[2,5], index: 13, kind: output, shape index: {2}]   ;;  %s2232_s14 = inlined_call_operand.hbm [shape: f32[2,8], index: 14, kind: output, shape index: {3}]  }
   0x1   :  { %21 = vsyncpa [#allocation6], 0 }
   0x2   :  { %22 = vsyncpa [#allocation9], 0  ;;  %s1865_s29 = smov 0  }
   0x3 LB: > { %s1871_s30 = sadd.s32 4294967295, %s1777_s29   ;;  %p1191_p0 = scmp.ge.s32.totalorder %s1777_s29, 1  ;;  %s1777_s29 = sphi %s1865_s29, %s28_s29  }
   0x4   : > { %p412_p1 = scmp.lt.s32.totalorder %s1777_s29, 3 }
   0x6   : > { %p413_p2 = pnand %p1191_p0, %p412_p1 }
   0x7   : > { %p457_p3 = scmp.lt.s32.totalorder (!%p413_p2), %s1871_s30, 1  ;;  %s1193_s15 = sshll.u32 (!%p413_p2), %s1871_s30, 4 }
   0x8   : > { %416 = sbr.rel (%p413_p2) target bundleno = 1343 (0x53f), region = 64  ;;  %p462_p4 = scmp.lt.s32.totalorder (!%p413_p2), %s1193_s15, 31 }
   0x9   : > { %p1195_p5 = scmp.ne.s32.totalorder (!%p413_p2), %s1871_s30, 0 }
   0xf   : > { %s458_s16 = scalar_select %p457_p3, %s1871_s30, 1 }
  0x10   : > { %s2234_s15 = smov (!%p462_p4, %s1193_s15), 31  ;;  %470 = sbr.rel (%p1195_p5) target bundleno = 23 (0x17), region = 68 }
  0x11   : > { %s1192_s17 = sshll.u32 %s458_s16, 1  ;;  %s1194_s21 = sshll.u32 %s2234_s15, 2  ;;  %v1779_v0 = vmov (!%p1195_p5), 0.0  }
  0x12   : > { %s1881_s20 = scalar_lea.vmem %s2218_s0, %s1192_s17  ;;  %s1886_s24 = scalar_lea.vmem %s2219_s1, %s1194_s21  ;;  %471 = vst [vmem:[#allocation2] sm:$0x3] (!%p1195_p5), %v1779_v0 }
  0x17 PF: > { %v1215_v1 = vld [vmem:[%s1886_s24] sm:$0xff]   ;;  %v1780_v2 = vmov 0.0|0.0   ;;  %vm1781_vm0 = vmmov 0   ;;  %v1782_v3 = vmov 0.0   ;;  %v1246_v4 = vld [vmem:[%s1886_s24 + $0x8] sm:$0xff]   ;;  %v1247_v5 = vld [vmem:[%s1886_s24 + $0x10] sm:$0xff]  }
  0x18   : > { %1496 = vmatprep.subr.bf16.mxu0 %v1780_v2  ;;  %1364 = vmatprep.mubr.msk.f32.mxu0 %vm1781_vm0, %v1782_v3  ;;  %v1248_v6 = vld [vmem:[%s1886_s24 + $0x18] sm:$0xff]   ;;  %v1249_v7 = vld [vmem:[%s1886_s24 + $0x20] sm:$0xff]   ;;  %v1250_v8 = vld [vmem:[%s1886_s24 + $0x28] sm:$0xff]   ;;  %p1196_p6 = scmp.ne.s32.totalorder %s1871_s30, 1 }
  0x19   : > { %1498 = vmatpush3.bf16.msra.mxu0 %v1215_v1  ;;  %v1251_v9 = vld [vmem:[%s1886_s24 + $0x30] sm:$0xff]   ;;  %v1252_v10 = vld [vmem:[%s1886_s24 + $0x38] sm:$0xff]   ;;  %v473_v11 = vld [vmem:[%s1881_s20] sm:$0x3]  ;;  %v1783_v19 = vmov (!%p1196_p6), 0.0|0.0   ;;  %vm1784_vm1 = vmmov (!%p1196_p6), 0  }
  0x1a   : > { %1499 = vmatprep.subr.bf16.mxu0 %v1780_v2  ;;  %v472_v12 = vld [vmem:[#allocation2] sm:$0x3]  ;;  %v597_v17 = vld [vmem:[%s2221_s3 + $0x8] sm:$0xff] (!%p1196_p6)  ;;  %v598_v18 = vld [vmem:[%s2221_s3 + $0x10] sm:$0xff] (!%p1196_p6)  ;;  %v1785_v22 = vmov (!%p1196_p6), 0.0   ;;  %vm584_vm2 = vcmask (!%p1196_p6), 1041408  }
  0x1b   : > { %v596_v16 = vld [vmem:[%s2221_s3] sm:$0xff] (!%p1196_p6)  ;;  %v599_v21 = vld [vmem:[%s2221_s3 + $0x18] sm:$0xff] (!%p1196_p6)  ;;  %1402 = vmatprep.subr.mxu1 (!%p1196_p6), %v1785_v22  ;;  %1404 = vmatprep.mubr.msk.f32.mxu1 (!%p1196_p6), %vm1784_vm1, %v1785_v22  ;;  %v601_v25 = vld [vmem:[%s2221_s3 + $0x28] sm:$0xff] (!%p1196_p6)  ;;  %vm692_vm5 = vcmask (!%p1196_p6), 33792   ;;  %vm709_vm6 = vcmask (!%p1196_p6), 1044480   ;;  %vm705_vm7 = vcmask (!%p1196_p6), 39936  }
  0x1c   : > { %v1521_v20 = vpack.c.bf16 (!%p1196_p6), %v597_v17, %v596_v16  ;;  %v1524_v23 = vpack.c.bf16 (!%p1196_p6), %v599_v21, %v598_v18  ;;  %v600_v24 = vld [vmem:[%s2221_s3 + $0x20] sm:$0xff] (!%p1196_p6)  ;;  %v602_v29 = vld [vmem:[%s2221_s3 + $0x30] sm:$0xff] (!%p1196_p6)  ;;  %v603_v30 = vld [vmem:[%s2221_s3 + $0x38] sm:$0xff] (!%p1196_p6)  ;;  %vm987_vm8 = vcmask (!%p1196_p6), 523264   ;;  %vm876_vm9 = vcmask (!%p1196_p6), 25600  }
  0x1d   : > { %1501 = vmatpush3.bf16.msra.mxu0 %v1246_v4  ;;  %v1527_v28 = vpack.c.bf16 (!%p1196_p6), %v601_v25, %v600_v24  ;;  %v1530_v32 = vpack.c.bf16 (!%p1196_p6), %v603_v30, %v602_v29  ;;  %v604_v33 = vld [vmem:[%s2221_s3 + $0x40] sm:$0xff] (!%p1196_p6)  ;;  %v605_v34 = vld [vmem:[%s2221_s3 + $0x48] sm:$0xff] (!%p1196_p6)  ;;  %v606_v36 = vld [vmem:[%s2221_s3 + $0x50] sm:$0xff] (!%p1196_p6)  ;;  %vm1061_vm10 = vcmask (!%p1196_p6), 58368  }
  0x1e   : > { %1502 = vmatprep.subr.bf16.mxu0 %v1780_v2  ;;  %v1533_v35 = vpack.c.bf16 (!%p1196_p6), %v605_v34, %v604_v33  ;;  %v607_v37 = vld [vmem:[%s2221_s3 + $0x58] sm:$0xff] (!%p1196_p6)  ;;  %v608_v39 = vld [vmem:[%s2221_s3 + $0x60] sm:$0xff] (!%p1196_p6)  ;;  %v609_v40 = vld [vmem:[%s2221_s3 + $0x68] sm:$0xff] (!%p1196_p6) }
  0x1f   : > { %v1536_v38 = vpack.c.bf16 (!%p1196_p6), %v607_v37, %v606_v36  ;;  %v1539_v41 = vpack.c.bf16 (!%p1196_p6), %v609_v40, %v608_v39  ;;  %v610_v42 = vld [vmem:[%s2221_s3 + $0x70] sm:$0xff] (!%p1196_p6)  ;;  %v611_v43 = vld [vmem:[%s2221_s3 + $0x78] sm:$0xff] (!%p1196_p6)  ;;  %v1197_v52 = vld [vmem:[%s2222_s4] ss:$0 sm:$0xff] (!%p1196_p6) }
  0x20   : > { %v1542_v44 = vpack.c.bf16 (!%p1196_p6), %v611_v43, %v610_v42  ;;  %v878_v59 = vld [vmem:[%s2225_s7] sm:$0xff] (!%p1196_p6)  ;;  %v879_v60 = vld [vmem:[%s2225_s7 + $0x8] sm:$0xff] (!%p1196_p6)  ;;  %v880_v61 = vld [vmem:[%s2225_s7 + $0x10] sm:$0xff] (!%p1196_p6) }
  0x21   : > { %1504 = vmatpush3.bf16.msra.mxu0 %v1247_v5  ;;  %v1569_v62 = vpack.c.bf16 (!%p1196_p6), %v879_v60, %v878_v59  ;;  %v881_v63 = vld [vmem:[%s2225_s7 + $0x18] sm:$0xff] (!%p1196_p6)  ;;  %v888_v16 = vld [vmem:[%s2225_s7 + $0x50] sm:$0xff] (!%p1196_p6)  ;;  %v891_v21 = vld [vmem:[%s2225_s7 + $0x68] sm:$0xff] (!%p1196_p6) }
  0x22   : > { %1505 = vmatprep.subr.bf16.mxu0 %v1780_v2  ;;  %v1572_v0 = vpack.c.bf16 (!%p1196_p6), %v881_v63, %v880_v61  ;;  %v889_v17 = vld [vmem:[%s2225_s7 + $0x58] sm:$0xff] (!%p1196_p6)  ;;  %v783_v29 = vld [vmem:[%s2223_s5] sm:$0xff] (!%p1196_p6)  ;;  %v784_v30 = vld [vmem:[%s2223_s5 + $0x8] sm:$0xff] (!%p1196_p6) }
  0x23   : > { %v1584_v18 = vpack.c.bf16 (!%p1196_p6), %v889_v17, %v888_v16  ;;  %v893_v25 = vld [vmem:[%s2225_s7 + $0x78] sm:$0xff] (!%p1196_p6)  ;;  %v785_v34 = vld [vmem:[%s2223_s5 + $0x10] sm:$0xff] (!%p1196_p6)  ;;  %v787_v36 = vld [vmem:[%s2223_s5 + $0x20] sm:$0xff] (!%p1196_p6) }
  0x24   : > { %v788_v37 = vld [vmem:[%s2223_s5 + $0x28] sm:$0xff] (!%p1196_p6)  ;;  %v789_v39 = vld [vmem:[%s2223_s5 + $0x30] sm:$0xff] (!%p1196_p6)  ;;  %v790_v40 = vld [vmem:[%s2223_s5 + $0x38] sm:$0xff] (!%p1196_p6) }
  0x25   : > { %1507 = vmatpush3.bf16.msra.mxu0 %v1248_v6  ;;  %v882_v6 = vld [vmem:[%s2225_s7 + $0x20] sm:$0xff] (!%p1196_p6)  ;;  %v792_v43 = vld [vmem:[%s2223_s5 + $0x48] sm:$0xff] (!%p1196_p6)  ;;  %v974_v59 = vld [vmem:[%s2227_s9 + $0x10] sm:$0xff] (!%p1196_p6) }
  0x26   : > { %1508 = vmatprep.subr.bf16.mxu0 %v1780_v2  ;;  %v791_v42 = vld [vmem:[%s2223_s5 + $0x40] sm:$0xff] (!%p1196_p6)  ;;  %v975_v60 = vld [vmem:[%s2227_s9 + $0x18] sm:$0xff] (!%p1196_p6) }
  0x27   : > { %v1596_v63 = vpack.c.bf16 (!%p1196_p6), %v975_v60, %v974_v59 }
  0x29   : > { %1510 = vmatpush3.bf16.msra.mxu0 %v1249_v7  ;;  %v883_v7 = vld [vmem:[%s2225_s7 + $0x28] sm:$0xff] (!%p1196_p6) }
  0x2a   : > { %1511 = vmatprep.subr.bf16.mxu0 %v1780_v2 }
  0x2d   : > { %1513 = vmatpush3.bf16.msra.mxu0 %v1250_v8  ;;  %v1575_v8 = vpack.c.bf16 (!%p1196_p6), %v883_v7, %v882_v6 }
  0x2e   : > { %1514 = vmatprep.subr.bf16.mxu0 %v1780_v2 }
  0x31   : > { %1516 = vmatpush3.bf16.msra.mxu0 %v1251_v9  ;;  %v884_v9 = vld [vmem:[%s2225_s7 + $0x30] sm:$0xff] (!%p1196_p6) }
  0x32   : > { %1517 = vmatprep.subr.bf16.mxu0 %v1780_v2 }
  0x35   : > { %1519 = vmatpush3.bf16.msra.mxu0 %v1252_v10  ;;  %v885_v10 = vld [vmem:[%s2225_s7 + $0x38] sm:$0xff] (!%p1196_p6) }
  0x36   : > { %1520 = vmatprep.subr.bf16.mxu0 (!%p1196_p6), %v1783_v19 }
  0x38   : > { %1365 = vmatmul.mubr.f32.vlgmr.msra.gmra.mrb[0].mxu0 %v473_v11  ;;  %v1578_v11 = vpack.c.bf16 (!%p1196_p6), %v885_v10, %v884_v9 }
  0x39   : > { %1399 = vmatprep.mubr.msk.f32.mxu0 (!%p1196_p6), %vm1784_vm1, %v1785_v22  ;;  %1522 = vmatpush3.bf16.msra.mxu0 (!%p1196_p6), %v1521_v20  ;;  %v890_v20 = vld [vmem:[%s2225_s7 + $0x60] sm:$0xff] (!%p1196_p6) }
  0x3a   : > { %1523 = vmatprep.subr.bf16.mxu0 (!%p1196_p6), %v1783_v19  ;;  %v1587_v24 = vpack.c.bf16 (!%p1196_p6), %v891_v21, %v890_v20 }
  0x3d   : > { %1525 = vmatpush3.bf16.msra.mxu0 (!%p1196_p6), %v1524_v23  ;;  %v892_v23 = vld [vmem:[%s2225_s7 + $0x70] sm:$0xff] (!%p1196_p6) }
  0x3e   : > { %1526 = vmatprep.subr.bf16.mxu0 (!%p1196_p6), %v1783_v19 }
  0x41   : > { %1528 = vmatpush3.bf16.msra.mxu0 (!%p1196_p6), %v1527_v28 }
  0x42   : > { %1529 = vmatprep.subr.bf16.mxu0 (!%p1196_p6), %v1783_v19 }
  0x45   : > { %1531 = vmatpush3.bf16.msra.mxu0 (!%p1196_p6), %v1530_v32  ;;  %v1545_v32 = vpack.c.bf16 (!%p1196_p6), %v784_v30, %v783_v29 }
  0x46   : > { %1532 = vmatprep.subr.bf16.mxu0 (!%p1196_p6), %v1783_v19 }
  0x49   : > { %1534 = vmatpush3.bf16.msra.mxu0 (!%p1196_p6), %v1533_v35 }
  0x4a   : > { %1535 = vmatprep.subr.bf16.mxu0 (!%p1196_p6), %v1783_v19 }
  0x4d   : > { %1537 = vmatpush3.bf16.msra.mxu0 (!%p1196_p6), %v1536_v38  ;;  %v1551_v38 = vpack.c.bf16 (!%p1196_p6), %v788_v37, %v787_v36 }
  0x4e   : > { %1538 = vmatprep.subr.bf16.mxu0 (!%p1196_p6), %v1783_v19 }
  0x51   : > { %1540 = vmatpush3.bf16.msra.mxu0 (!%p1196_p6), %v1539_v41  ;;  %v1554_v41 = vpack.c.bf16 (!%p1196_p6), %v790_v40, %v789_v39 }
  0x52   : > { %1541 = vmatprep.subr.bf16.mxu0 (!%p1196_p6), %v1783_v19 }
  0x55   : > { %1543 = vmatpush3.bf16.msra.mxu0 (!%p1196_p6), %v1542_v44  ;;  %v1557_v44 = vpack.c.bf16 (!%p1196_p6), %v792_v43, %v791_v42 }
  0x56   : > { %1568 = vmatprep.subr.bf16.mxu0 (!%p1196_p6), %v1783_v19 }
 0x108   : > { %581 = sbr.rel (%p1196_p6) target bundleno = 1249 (0x4e1), region = 72 }
 0x10b   : > { %v572_v13 = vpop.f32.mrb[0].mxu0 }
 0x10c   : > { %v576_v14 = vadd.f32 %v572_v13, %v472_v12  ;;  %v1366_v15 = vpop.f32.mrb[1].mxu0  ;;  %v886_v12 = vld [vmem:[%s2225_s7 + $0x40] sm:$0xff] (!%p1196_p6)  ;;  %v887_v13 = vld [vmem:[%s2225_s7 + $0x48] sm:$0xff] (!%p1196_p6) }
 0x10d   : > { %v1581_v15 = vpack.c.bf16 (!%p1196_p6), %v887_v13, %v886_v12  ;;  %v1202_v12 = vld [vmem:[%s2228_s10] ss:$0 sm:$0xff] (!%p1196_p6) }
 0x10e   : > { %577 = vst [vmem:[#allocation2] sm:$0x3] %v576_v14  ;;  %v704_v14 = vld [vmem:[%s2220_s2] sm:$0x1f] (!%p1196_p6) }
 0x10f   : > { %1403 = vmatpush3.msk.msra.mxu1 %vm709_vm6, %v704_v14 }
 0x110   : > { %1544 = vmatprep.subr.bf16.mxu1 %v1783_v19 }
 0x115   : > { %v1924_v26 = vld [vmem:[#allocation2] sm:$0x3] }
 0x116   : > { %v583_v27 = vmul.f32 %v1924_v26, %v1924_v26  ;;  %1400 = vmatmul.mubr.f32.vlgmr.msra.gmra.mrb[0].mxu0 %v1924_v26 }
 0x117   : > { %1474 = vmatprep.mubr.msk.f32.mxu0 %vm1784_vm1, %v1785_v22  ;;  %1570 = vmatpush3.bf16.msra.mxu0 %v1569_v62 }
 0x118   : > { %v585_v31 = vsel %vm584_vm2, %v583_v27, 0.0  ;;  %1571 = vmatprep.subr.bf16.mxu0 %v1783_v19  ;;  %v1590_v27 = vpack.c.bf16 %v893_v25, %v892_v23 }
 0x119   : > { %586 = vadd.xlane.f32.xlu0 %v585_v31 }
 0x11b   : > { %1573 = vmatpush3.bf16.msra.mxu0 %v1572_v0  ;;  %v976_v0 = vld [vmem:[%s2227_s9 + $0x20] sm:$0xff] }
 0x11c   : > { %1574 = vmatprep.subr.bf16.mxu0 %v1783_v19 }
 0x11f   : > { %1576 = vmatpush3.bf16.msra.mxu0 %v1575_v8  ;;  %v1200_v8 = vld [vmem:[%s2224_s6] ss:$0 sm:$0xff] }
 0x120   : > { %1577 = vmatprep.subr.bf16.mxu0 %v1783_v19 }
 0x123   : > { %1579 = vmatpush3.bf16.msra.mxu0 %v1578_v11 }
 0x124   : > { %1580 = vmatprep.subr.bf16.mxu0 %v1783_v19 }
 0x127   : > { %1582 = vmatpush3.bf16.msra.mxu0 %v1581_v15 }
 0x128   : > { %1583 = vmatprep.subr.bf16.mxu0 %v1783_v19 }
 0x12b   : > { %1585 = vmatpush3.bf16.msra.mxu0 %v1584_v18 }
 0x12c   : > { %1586 = vmatprep.subr.bf16.mxu0 %v1783_v19 }
 0x12f   : > { %1588 = vmatpush3.bf16.msra.mxu0 %v1587_v24 }
 0x130   : > { %1589 = vmatprep.subr.bf16.mxu0 %v1783_v19 }
 0x133   : > { %1591 = vmatpush3.bf16.msra.mxu0 %v1590_v27 }
 0x136   : > { %1475 = vmatmul.mubr.f32.vlgmr.msra.gmra.mrb[2].mxu0 %v1924_v26  ;;  %v786_v26 = vld [vmem:[%s2223_s5 + $0x18] sm:$0xff] }
 0x137   : > { %v1548_v35 = vpack.c.bf16 %v786_v26, %v785_v34 }
 0x1a6   : > { %v587_v45 = vpop.xlane.xlu0 %586 }
 0x1a7   : > { %1647 = vrsqrt.f32 %v587_v45  ;;  %vm590_vm3 = vcmp.eq.f32.partialorder %v587_v45, inf  ;;  %v593_v48 = vand.u32 2147483648, %v587_v45  ;;  %vm592_vm4 = vcmp.eq.f32.partialorder %v587_v45, 0.0 }
 0x1b1   : > { %v1648_v46 = vpop.eup %1647 }
 0x1b2   : > { %v589_v47 = vmul.f32 %v1648_v46, %v587_v45  ;;  %v794_v46 = vld [vmem:[%s2223_s5 + $0x58] sm:$0xff] }
 0x1b4   : > { %v591_v49 = vsel %vm590_vm3, %v587_v45, %v589_v47  ;;  %v793_v45 = vld [vmem:[%s2223_s5 + $0x50] sm:$0xff] }
 0x1b5   : > { %v594_v50 = vsel %vm592_vm4, %v593_v48, %v591_v49  ;;  %v1560_v47 = vpack.c.bf16 %v794_v46, %v793_v45  ;;  %v795_v48 = vld [vmem:[%s2223_s5 + $0x60] sm:$0xff]  ;;  %v796_v49 = vld [vmem:[%s2223_s5 + $0x68] sm:$0xff] }
 0x1b6   : > { %v595_v51 = vmax.f32 %v594_v50, 1e-08  ;;  %v1563_v50 = vpack.c.bf16 %v796_v49, %v795_v48 }
 0x1b8   : > { %v689_v53 = vmul.f32 %v1197_v52, %v595_v51  ;;  %v797_v51 = vld [vmem:[%s2223_s5 + $0x70] sm:$0xff]  ;;  %v798_v52 = vld [vmem:[%s2223_s5 + $0x78] sm:$0xff] }
 0x1ba   : > { %1649 = vrcp.f32 %v689_v53  ;;  %v1566_v53 = vpack.c.bf16 %v798_v52, %v797_v51 }
 0x1c4   : > { %v1650_v54 = vpop.eup %1649 }
 0x1e9   : > { %v678_v55 = vpop.f32.mrb[0].mxu0 }
 0x1ea   : > { %v691_v56 = vmul.f32 %v1650_v54, %v678_v55  ;;  %v1401_v57 = vpop.f32.mrb[1].mxu0 }
 0x1eb   : > { %v973_v57 = vld [vmem:[%s2227_s9 + $0x8] sm:$0xff] }
 0x1ec   : > { %v693_v58 = vsel %vm692_vm5, %v691_v56, -inf }
 0x1ed   : > { %694 = vmax.xlane.f32.xlu0 %v693_v58 }
 0x209   : > { %v967_v54 = vpop.f32.mrb[2].mxu0 }
 0x20a   : > { %v1476_v55 = vpop.f32.mrb[3].mxu0 }
 0x27a   : > { %v695_v1 = vpop.xlane.xlu0 %694 }
 0x27b   : > { %v696_v2 = vsub.f32 %v691_v56, %v695_v1  ;;  %v972_v56 = vld [vmem:[%s2227_s9] sm:$0xff]  ;;  %v977_v1 = vld [vmem:[%s2227_s9 + $0x28] sm:$0xff] }
 0x27c   : > { %v1593_v58 = vpack.c.bf16 %v973_v57, %v972_v56 }
 0x27d   : > { %v697_v3 = vmul.f32 1.442695, %v696_v2  ;;  %v1599_v2 = vpack.c.bf16 %v977_v1, %v976_v0 }
 0x27f   : > { %1651 = vpow2.f32 %v697_v3  ;;  %v1201_v3 = vld [vmem:[%s2226_s8] ss:$0 sm:$0xff] }
 0x289   : > { %v1652_v4 = vpop.eup %1651 }
 0x28a   : > { %v699_v5 = vsel %vm692_vm5, %v1652_v4, 0.0 }
 0x28b   : > { %700 = vadd.xlane.f32.xlu1 %v699_v5  ;;  %v968_v5 = vadd.f32 %v1201_v3, %v967_v54 }
 0x28d   : > { %v971_v7 = vmax.f32 %v968_v5, 0.0 }
 0x318   : > { %v701_v28 = vpop.xlane.xlu1 %700 }
 0x319   : > { %1653 = vrcp.f32 %v701_v28 }
 0x323   : > { %v1654_v31 = vpop.eup %1653 }
 0x324   : > { %v703_v33 = vmul.f32 %v1654_v31, %v1652_v4  ;;  %v979_v4 = vld [vmem:[%s2227_s9 + $0x38] sm:$0xff] }
 0x326   : > { %1405 = vmatmul.mubr.msk.f32.vlgmr.msra.gmra.mrb[0].mxu1 %vm705_vm7, %v703_v33  ;;  %1064 = vst.msk [vmem:[#allocation7] sm:$0x3] %vm692_vm5, %v703_v33 }
 0x327   : > { %1546 = vmatpush3.bf16.msra.mxu1 %v1545_v32  ;;  %1439 = vmatprep.mubr.msk.f32.mxu1 %vm1784_vm1, %v1785_v22 }
 0x328   : > { %1547 = vmatprep.subr.bf16.mxu1 %v1783_v19 }
 0x32b   : > { %1549 = vmatpush3.bf16.msra.mxu1 %v1548_v35 }
 0x32c   : > { %1550 = vmatprep.subr.bf16.mxu1 %v1783_v19 }
 0x32f   : > { %1552 = vmatpush3.bf16.msra.mxu1 %v1551_v38 }
 0x330   : > { %1553 = vmatprep.subr.bf16.mxu1 %v1783_v19 }
 0x333   : > { %1555 = vmatpush3.bf16.msra.mxu1 %v1554_v41 }
 0x334   : > { %1556 = vmatprep.subr.bf16.mxu1 %v1783_v19 }
 0x337   : > { %1558 = vmatpush3.bf16.msra.mxu1 %v1557_v44 }
 0x338   : > { %1559 = vmatprep.subr.bf16.mxu1 %v1783_v19 }
 0x33b   : > { %1561 = vmatpush3.bf16.msra.mxu1 %v1560_v47 }
 0x33c   : > { %1562 = vmatprep.subr.bf16.mxu1 %v1783_v19 }
 0x33f   : > { %1564 = vmatpush3.bf16.msra.mxu1 %v1563_v50 }
 0x340   : > { %1565 = vmatprep.subr.bf16.mxu1 %v1783_v19 }
 0x343   : > { %1567 = vmatpush3.bf16.msra.mxu1 %v1566_v53 }
 0x344   : > { %1592 = vmatprep.subr.bf16.mxu1 %v1783_v19 }
 0x3f9   : > { %v779_v61 = vpop.f32.mrb[0].mxu1 }
 0x3fa   : > { %1063 = vst [vmem:[#allocation5] sm:$0x3] %v779_v61  ;;  %v1406_v62 = vpop.f32.mrb[1].mxu1  ;;  %1440 = vmatmul.mubr.f32.vlgmr.msra.gmra.mrb[2].mxu1 %v779_v61 }
 0x3fb   : > { %1594 = vmatpush3.bf16.msra.mxu1 %v1593_v58  ;;  %1493 = vmatprep.mubr.msk.f32.mxu1 %vm1784_vm1, %v1785_v22  ;;  %v978_v22 = vld [vmem:[%s2227_s9 + $0x30] sm:$0xff] }
 0x3fc   : > { %1595 = vmatprep.subr.bf16.mxu1 %v1783_v19  ;;  %v1602_v6 = vpack.c.bf16 %v979_v4, %v978_v22 }
 0x3ff   : > { %1597 = vmatpush3.bf16.msra.mxu1 %v1596_v63 }
 0x400   : > { %1598 = vmatprep.subr.bf16.mxu1 %v1783_v19 }
 0x403   : > { %1600 = vmatpush3.bf16.msra.mxu1 %v1599_v2 }
 0x404   : > { %1601 = vmatprep.subr.bf16.mxu1 %v1783_v19 }
 0x407   : > { %1603 = vmatpush3.bf16.msra.mxu1 %v1602_v6 }
 0x40a   : > { %1494 = vmatmul.mubr.msk.f32.vlgmr.msra.gmra.mrb[4].mxu1 %vm987_vm8, %v971_v7 }
 0x4cd   : > { %v872_v9 = vpop.f32.mrb[2].mxu1 }
 0x4ce   : > { %v873_v10 = vadd.f32 %v1200_v8, %v872_v9  ;;  %v1441_v11 = vpop.f32.mrb[3].mxu1 }
 0x4d0   : > { %877 = vst.msk [vmem:[#allocation3] sm:$0x3] %vm876_vm9, %v873_v10 }
 0x4dd   : > { %v1057_v13 = vpop.f32.mrb[4].mxu1 }
 0x4de   : > { %v1058_v19 = vadd.f32 %v1202_v12, %v1057_v13  ;;  %v1495_v14 = vpop.f32.mrb[5].mxu1 }
 0x4e0   : > { %1062 = vst.msk [vmem:[#allocation8] sm:$0x3] %vm1061_vm10, %v1058_v19 }
 0x4e1 PF: > { %p1620_p7 = scmp.eq.s32.totalorder %s1871_s30, 1  ;;  %s1786_s21 = smov [#allocation5]  }
 0x4e2   : > { %s1083_s22 = sshll.u32 %s1786_s21, 4  ;;  %s1787_s23 = smov [#allocation3]   ;;  %s1084_s22 = int_to_ptr.vmem [resolvable:$true] %s1083_s22 }
 0x4e3   : > { %s1072_s24 = sshll.u32 %s1787_s23, 4  ;;  %s1655_s25 = scalar_lea.vmem %s1084_s22, 32  ;;  %s1073_s24 = int_to_ptr.vmem [resolvable:$true] %s1072_s24 }
 0x4e4   : > { %p1656_p8 = scmp.ne.s32.totalorder %s1084_s22, %s1655_s25  ;;  %p1662_p11 = scmp.lt.s32.totalorder %s1084_s22, %s1084_s22 }
 0x4e5   : > { %p1663_p12 = scmp.lt.s32.totalorder %s1655_s25, %s1655_s25 }
 0x4e6   : > { %p1657_p9 = pnand %p1656_p8, %p1620_p7 }
 0x4e7   : > { %p1664_p13 = por %p1663_p12, %p1662_p11 }
 0x4e8   : > { %p1658_p10 = pneg %p1657_p9 }
 0x4ea   : > { %p1665_p0 = pnand %p1664_p13, %p1658_p10 }
 0x4ec   : > { %1668 = shalt.err (!%p1665_p0)
}
 0x4ed   : > { %s1669_s28 = scalar_lea.hbm %s2230_s12, 32 }
 0x4ee   : > { %p1670_p1 = scmp.ne.s32.totalorder %s2230_s12, %s1669_s28  ;;  %p1675_p4 = scmp.lt.u32.totalorder %s1669_s28, %s2230_s12 }
 0x4f0   : > { %p1671_p2 = pnand %p1670_p1, %p1620_p7 }
 0x4f2   : > { %p1672_p3 = pneg %p1671_p2 }
 0x4f4   : > { %p1677_p5 = pnand %p1675_p4, %p1672_p3 }
 0x4f6   : > { %1680 = shalt.err (!%p1677_p5)
}
 0x4f7   : > { %1607 = dma.vmem_to_hbm [thread:$0]  (%p1620_p7), %s1084_s22, 32, %s2230_s12, [#allocation6]  }
 0x4f8   : > { %s1681_s21 = scalar_lea.vmem %s1073_s24, 32  ;;  %p1688_p10 = scmp.lt.s32.totalorder %s1073_s24, %s1073_s24 }
 0x4f9   : > { %p1682_p6 = scmp.ne.s32.totalorder %s1073_s24, %s1681_s21  ;;  %p1689_p11 = scmp.lt.s32.totalorder %s1681_s21, %s1681_s21 }
 0x4fb   : > { %p1683_p8 = pnand %p1682_p6, %p1620_p7  ;;  %p1690_p12 = por %p1689_p11, %p1688_p10 }
 0x4fd   : > { %p1684_p9 = pneg %p1683_p8 }
 0x4ff   : > { %p1691_p13 = pnand %p1690_p12, %p1684_p9 }
 0x501   : > { %1694 = shalt.err (!%p1691_p13)
}
 0x502   : > { %s1695_s26 = scalar_lea.hbm %s2229_s11, 32 }
 0x503   : > { %p1696_p0 = scmp.ne.s32.totalorder %s2229_s11, %s1695_s26  ;;  %p1701_p3 = scmp.lt.u32.totalorder %s1695_s26, %s2229_s11 }
 0x505   : > { %p1697_p1 = pnand %p1696_p0, %p1620_p7 }
 0x507   : > { %p1698_p2 = pneg %p1697_p1 }
 0x509   : > { %p1703_p4 = pnand %p1701_p3, %p1698_p2 }
 0x50b   : > { %1706 = shalt.err (!%p1703_p4)
}
 0x50c   : > { %1605 = dma.vmem_to_hbm [thread:$0]  (%p1620_p7), %s1073_s24, 32, %s2229_s11, [#allocation4]  }
 0x50d   : > { %s1788_s18 = smov [#allocation7]   ;;  %s1789_s20 = smov [#allocation8]  }
 0x50e   : > { %s1094_s19 = sshll.u32 %s1788_s18, 4  ;;  %s1105_s21 = sshll.u32 %s1789_s20, 4  ;;  %s1095_s19 = int_to_ptr.vmem [resolvable:$true] %s1094_s19  ;;  %s1106_s21 = int_to_ptr.vmem [resolvable:$true] %s1105_s21 }
 0x50f   : > { %s1707_s23 = scalar_lea.vmem %s1095_s19, 32  ;;  %p1714_p9 = scmp.lt.s32.totalorder %s1095_s19, %s1095_s19 }
 0x510   : > { %p1708_p5 = scmp.ne.s32.totalorder %s1095_s19, %s1707_s23  ;;  %p1715_p10 = scmp.lt.s32.totalorder %s1707_s23, %s1707_s23 }
 0x512   : > { %p1709_p6 = pnand %p1708_p5, %p1620_p7  ;;  %p1716_p11 = por %p1715_p10, %p1714_p9 }
 0x514   : > { %p1710_p8 = pneg %p1709_p6 }
 0x516   : > { %p1717_p12 = pnand %p1716_p11, %p1710_p8 }
 0x518   : > { %1720 = shalt.err (!%p1717_p12)
}
 0x519   : > { %s1721_s24 = scalar_lea.hbm %s2231_s13, 32 }
 0x51a   : > { %p1722_p13 = scmp.ne.s32.totalorder %s2231_s13, %s1721_s24  ;;  %p1727_p2 = scmp.lt.u32.totalorder %s1721_s24, %s2231_s13 }
 0x51c   : > { %p1723_p0 = pnand %p1722_p13, %p1620_p7 }
 0x51e   : > { %p1724_p1 = pneg %p1723_p0 }
 0x520   : > { %p1729_p3 = pnand %p1727_p2, %p1724_p1 }
 0x522   : > { %1732 = shalt.err (!%p1729_p3)
}
 0x523   : > { %1609 = dma.vmem_to_hbm [thread:$0]  (%p1620_p7), %s1095_s19, 32, %s2231_s13, [#allocation6]  }
 0x524   : > { %s1733_s18 = scalar_lea.vmem %s1106_s21, 32  ;;  %p1740_p8 = scmp.lt.s32.totalorder %s1106_s21, %s1106_s21 }
 0x525   : > { %p1734_p4 = scmp.ne.s32.totalorder %s1106_s21, %s1733_s18  ;;  %p1741_p9 = scmp.lt.s32.totalorder %s1733_s18, %s1733_s18 }
 0x527   : > { %p1735_p5 = pnand %p1734_p4, %p1620_p7  ;;  %p1742_p10 = por %p1741_p9, %p1740_p8 }
 0x529   : > { %p1736_p6 = pneg %p1735_p5 }
 0x52b   : > { %p1743_p11 = pnand %p1742_p10, %p1736_p6 }
 0x52d   : > { %1746 = shalt.err (!%p1743_p11)
}
 0x52e   : > { %s1747_s25 = scalar_lea.hbm %s2232_s14, 32 }
 0x52f   : > { %p1748_p12 = scmp.ne.s32.totalorder %s2232_s14, %s1747_s25  ;;  %p1753_p1 = scmp.lt.u32.totalorder %s1747_s25, %s2232_s14 }
 0x531   : > { %p1749_p13 = pnand %p1748_p12, %p1620_p7 }
 0x533   : > { %p1750_p0 = pneg %p1749_p13 }
 0x535   : > { %p1755_p2 = pnand %p1753_p1, %p1750_p0 }
 0x537   : > { %1758 = shalt.err (!%p1755_p2)
}
 0x538   : > { %1611 = dma.vmem_to_hbm [thread:$0]  (%p1620_p7), %s1106_s21, 32, %s2232_s14, [#allocation9]  }
 0x539   : > { %1764 = dma.done.wait (%p1620_p7), [#allocation4], 32  }
 0x53a   : > { %1766 = vsyncadd (%p1620_p7), [#allocation4], 4294967264 }
 0x53b   : > { %1768 = dma.done.wait (%p1620_p7), [#allocation6], 64  }
 0x53c   : > { %1770 = vsyncadd (%p1620_p7), [#allocation6], 4294967232 }
 0x53d   : > { %1772 = dma.done.wait (%p1620_p7), [#allocation9], 32  }
 0x53e   : > { %1774 = vsyncadd (%p1620_p7), [#allocation9], 4294967264 }
 0x53f PF: > { %s28_s29 = sadd.s32 1, %s1777_s29  }
 0x540   : > { %p25_p3 = scmp.ge.s32.totalorder %s28_s29, 4  }
 0x542   :  { %27 = sbr.rel (!%p25_p3) target bundleno = 3 (0x3), region = 126 }
 0x549   :  { %1130 = vsyncpa [#allocation4], 1 }
 0x54a   :  { %1132 = vsyncpa [#allocation4 + $0x1], 1 }
 0x54b   :  { %1133 = vsyncpa [#allocation6], 1 }
 0x54c   :  { %1134 = vsyncpa [#allocation9], 1 }

// kernel: enhanced_gcn_forward.6
= control target key start
LH: loop header
LB: loop body
LE: loop exit
PB: predicated region body
PF: predicated region fallthrough
CT: control target
= control target key end

     0   :  { %s6456_s0 = inlined_call_operand.vmem [shape: s8[256,256], index: 0, kind: input, shape index: {}]   ;;  %s6457_s1 = inlined_call_operand.vmem [shape: f32[256,128], index: 1, kind: input, shape index: {}]   ;;  %s6458_s2 = inlined_call_operand.vmem [shape: f32[8,256], index: 2, kind: input, shape index: {}]   ;;  %s6459_s3 = inlined_call_operand.vmem [shape: bf16[256,384], index: 3, kind: input, shape index: {}]   ;;  %s6460_s4 = inlined_call_operand.vmem [shape: f32[1,128], index: 4, kind: input, shape index: {}]   ;;  %s6461_s5 = inlined_call_operand.vmem [shape: bf16[256,128], index: 5, kind: output, shape index: {}]  }
   0x1   :  { %6562 = sst [smem:[#allocation62_spill]] %s6456_s0 }
   0x2   :  { %s4650_s18 = smov 0   ;;  %s4652_s19 = smov 0  }
   0x3   :  { %s4654_s20 = smov 0   ;;  %s4656_s21 = smov 0  }
   0x4   :  { %s4658_s22 = smov 0   ;;  %s4660_s23 = smov 0  }
   0x5   :  { %s4662_s24 = smov 0  }
   0x6 LB: > { %s24_s25 = sadd.s32 1, %s4603_s22  ;;  %s27_s26 = sadd.s32 1, %s4607_s23  ;;  %s4611_s24 = sphi %s4662_s24, %s15_s24   ;;  %s4607_s23 = sphi %s4660_s23, %s6792_s23   ;;  %s4603_s22 = sphi %s4658_s22, %s6791_s22   ;;  %s4599_s21 = sphi %s4656_s21, %s6790_s21   ;;  %s4595_s20 = sphi %s4654_s20, %s6789_s20   ;;  %s4591_s19 = sphi %s4652_s19, %s6788_s19   ;;  %s4587_s18 = sphi %s4650_s18, %s6787_s18  }
   0x7   : > { %p25_p0 = scmp.ge.s32.totalorder %s24_s25, 2  ;;  %p43_p1 = scmp.ne.s32.totalorder %s4591_s19, %s4587_s18 }
   0x8   : > { %p44_p2 = scmp.eq.s32.totalorder %s4611_s24, 0  ;;  %s36_s30 = sadd.s32 1, %s4591_s19 }
   0x9   : > { %s6794_s25 = smov (%p25_p0, %s24_s25), 0  ;;  %s6796_s26 = smov (!%p25_p0, %s27_s26), %s4607_s23 }
   0xa   : > { %p45_p3 = por %p44_p2, %p43_p1  ;;  %p29_p4 = scmp.ge.s32.totalorder %s6796_s26, 2 }
   0xb   : > { %s32_s27 = ssub.s32 %s4603_s22, %s6794_s25  ;;  %p3835_p6 = scmp.ge.s32.totalorder %s4611_s24, 4 }
   0xc   : > { %s6798_s26 = smov (%p29_p4, %s6796_s26), 0 }
   0xd   : > { %6563 = sst [smem:[#allocation6_spill]] %s6798_s26  ;;  %s31_s28 = ssub.s32 %s4607_s23, %s6798_s26 }
   0xe   : > { %s33_s29 = sor.u32 %s32_s27, %s31_s28  ;;  %197 = sbr.rel (%p3835_p6) target bundleno = 33 (0x21), region = 20 }
   0xf   : > { %p34_p5 = scmp.eq.s32.totalorder %s33_s29, 0 }
  0x11   : > { %s4701_s6 = scalar_select %p34_p5, %s4591_s19, %s36_s30  }
  0x15   : > { %200 = sbr.rel (!%p45_p3) target bundleno = 33 (0x21), region = 24  ;;  %s202_s7 = sand.u32 (%p45_p3), 1, %s4591_s19  }
  0x16   : > { %s3913_s8 = sshll.u32 (%p45_p3), %s4607_s23, 3  ;;  %s3836_s9 = sshll.u32 (%p45_p3), %s202_s7, 5 }
  0x17   : > { %s207_s10 = sadd.s32 (%p45_p3), %s4603_s22, %s3913_s8  ;;  %s6564_s0 = sld [smem:[#allocation62_spill]] (%p45_p3) }
  0x18   : > { %s3839_s11 = sshll.u32 (%p45_p3), %s207_s10, 3  ;;  %s204_s15 = scalar_lea.vmem (%p45_p3), [#allocation5], %s3836_s9 }
  0x1d   : > { %s209_s14 = scalar_lea.vmem %s6564_s0, %s3839_s11 }
  0x1e   : > { %v243_v0 = vld [vmem:[%s209_s14] sm:$0xff]  ;;  %v245_v1 = vld [vmem:[%s209_s14 + $0x10] sm:$0xff] }
  0x1f   : > { %v247_v2 = vld [vmem:[%s209_s14 + $0x20] sm:$0xff]  ;;  %244 = vst [vmem:[%s204_s15] sm:$0xff] %v243_v0  ;;  %246 = vst [vmem:[%s204_s15 + $0x8] sm:$0xff] %v245_v1  ;;  %v249_v3 = vld [vmem:[%s209_s14 + $0x30] sm:$0xff] }
  0x20   : > { %248 = vst [vmem:[%s204_s15 + $0x10] sm:$0xff] %v247_v2  ;;  %250 = vst [vmem:[%s204_s15 + $0x18] sm:$0xff] %v249_v3 }
  0x21 PF: > { %p3840_p7 = scmp.ge.s32.totalorder %s4611_s24, 1  ;;  %p281_p8 = scmp.lt.s32.totalorder %s4611_s24, 5 }
  0x23   : > { %p282_p9 = pnand %p3840_p7, %p281_p8 }
  0x25   : > { %285 = sbr.rel (%p282_p9) target bundleno = 1702 (0x6a6), region = 74 }
  0x2c   : > { %s288_s16 = sand.u32 1, %s4587_s18   ;;  %s3842_s17 = sshll.u32 %s4599_s21, 4 }
  0x2d   : > { %s3841_s27 = sshll.u32 %s288_s16, 5  ;;  %p332_p10 = scmp.lt.s32.totalorder %s3842_s17, 31 }
  0x2e   : > { %p337_p11 = scmp.lt.s32.totalorder %s4595_s20, 1  ;;  %s3845_s30 = sshll.u32 %s4595_s20, 4 }
  0x2f   : > { %s6800_s17 = smov (!%p332_p10, %s3842_s17), 31  ;;  %p342_p12 = scmp.lt.s32.totalorder %s3845_s30, 31 }
  0x30   : > { %s338_s28 = scalar_select %p337_p11, %s4595_s20, 1 }
  0x31   : > { %s3843_s29 = sshll.u32 %s6800_s17, 3  ;;  %s3848_s18 = sshll.u32 %s6800_s17, 2 }
  0x32   : > { %s4720_s9 = scalar_lea.vmem %s6457_s1, %s3843_s29  ;;  %s3844_s10 = sshll.u32 %s338_s28, 3 }
  0x33   : > { %s4725_s13 = scalar_lea.vmem %s6458_s2, %s3844_s10  ;;  %s6802_s30 = smov (!%p342_p12, %s3845_s30), 31 }
  0x34   : > { %s4730_s15 = scalar_lea.vmem %s6461_s5, %s3848_s18  ;;  %s4137_s16 = smul.u32 12, %s6802_s30 }
  0x35   : > { %s4737_s28 = scalar_lea.vmem [#allocation5], %s3841_s27  ;;  %p3849_p13 = scmp.ne.s32.totalorder %s4595_s20, 0 }
  0x36   : > { %s4735_s29 = scalar_lea.vmem %s6459_s3, %s4137_s16  ;;  %vm359_vm0 = vcmask (!%p3849_p13), 7168   ;;  %v4613_v4 = vmov (!%p3849_p13), -1e+30   ;;  %v4614_v5 = vmov (!%p3849_p13), 0.0  }
  0x37   : > { %358 = sbr.rel (%p3849_p13) target bundleno = 127 (0x7f), region = 82  ;;  %360 = vst.msk [vmem:[#allocation2] sm:$0xff] (!%p3849_p13), %vm359_vm0, %v4613_v4  ;;  %361 = vst.msk [vmem:[#allocation2 + $0x8] sm:$0xff] (!%p3849_p13), %vm359_vm0, %v4613_v4 }
  0x38   : > { %362 = vst.msk [vmem:[#allocation2 + $0x10] sm:$0xff] (!%p3849_p13), %vm359_vm0, %v4613_v4  ;;  %363 = vst.msk [vmem:[#allocation2 + $0x18] sm:$0xff] (!%p3849_p13), %vm359_vm0, %v4613_v4 }
  0x39   : > { %364 = vst.msk [vmem:[#allocation2 + $0x20] sm:$0xff] (!%p3849_p13), %vm359_vm0, %v4613_v4  ;;  %365 = vst.msk [vmem:[#allocation2 + $0x28] sm:$0xff] (!%p3849_p13), %vm359_vm0, %v4613_v4 }
  0x3a   : > { %366 = vst.msk [vmem:[#allocation2 + $0x30] sm:$0xff] (!%p3849_p13), %vm359_vm0, %v4613_v4  ;;  %367 = vst.msk [vmem:[#allocation2 + $0x38] sm:$0xff] (!%p3849_p13), %vm359_vm0, %v4613_v4 }
  0x3b   : > { %368 = vst.msk [vmem:[#allocation2 + $0x40] sm:$0xff] (!%p3849_p13), %vm359_vm0, %v4613_v4  ;;  %369 = vst.msk [vmem:[#allocation2 + $0x48] sm:$0xff] (!%p3849_p13), %vm359_vm0, %v4613_v4 }
  0x3c   : > { %370 = vst.msk [vmem:[#allocation2 + $0x50] sm:$0xff] (!%p3849_p13), %vm359_vm0, %v4613_v4  ;;  %371 = vst.msk [vmem:[#allocation2 + $0x58] sm:$0xff] (!%p3849_p13), %vm359_vm0, %v4613_v4 }
  0x3d   : > { %372 = vst.msk [vmem:[#allocation2 + $0x60] sm:$0xff] (!%p3849_p13), %vm359_vm0, %v4613_v4  ;;  %373 = vst.msk [vmem:[#allocation2 + $0x68] sm:$0xff] (!%p3849_p13), %vm359_vm0, %v4613_v4 }
  0x3e   : > { %374 = vst.msk [vmem:[#allocation2 + $0x70] sm:$0xff] %vm359_vm0, %v4613_v4  ;;  %375 = vst.msk [vmem:[#allocation2 + $0x78] sm:$0xff] %vm359_vm0, %v4613_v4 }
  0x3f   : > { %376 = vst.msk [vmem:[#allocation2 + $0x80] sm:$0xff] %vm359_vm0, %v4613_v4  ;;  %377 = vst.msk [vmem:[#allocation2 + $0x88] sm:$0xff] %vm359_vm0, %v4613_v4 }
  0x40   : > { %378 = vst.msk [vmem:[#allocation2 + $0x90] sm:$0xff] %vm359_vm0, %v4613_v4  ;;  %379 = vst.msk [vmem:[#allocation2 + $0x98] sm:$0xff] %vm359_vm0, %v4613_v4 }
  0x41   : > { %380 = vst.msk [vmem:[#allocation2 + $0xa0] sm:$0xff] %vm359_vm0, %v4613_v4  ;;  %381 = vst.msk [vmem:[#allocation2 + $0xa8] sm:$0xff] %vm359_vm0, %v4613_v4 }
  0x42   : > { %382 = vst.msk [vmem:[#allocation2 + $0xb0] sm:$0xff] %vm359_vm0, %v4613_v4  ;;  %383 = vst.msk [vmem:[#allocation2 + $0xb8] sm:$0xff] %vm359_vm0, %v4613_v4 }
  0x43   : > { %384 = vst.msk [vmem:[#allocation2 + $0xc0] sm:$0xff] %vm359_vm0, %v4613_v4  ;;  %385 = vst.msk [vmem:[#allocation2 + $0xc8] sm:$0xff] %vm359_vm0, %v4613_v4 }
  0x44   : > { %386 = vst.msk [vmem:[#allocation2 + $0xd0] sm:$0xff] %vm359_vm0, %v4613_v4  ;;  %387 = vst.msk [vmem:[#allocation2 + $0xd8] sm:$0xff] %vm359_vm0, %v4613_v4 }
  0x45   : > { %388 = vst.msk [vmem:[#allocation2 + $0xe0] sm:$0xff] %vm359_vm0, %v4613_v4  ;;  %389 = vst.msk [vmem:[#allocation2 + $0xe8] sm:$0xff] %vm359_vm0, %v4613_v4 }
  0x46   : > { %390 = vst.msk [vmem:[#allocation2 + $0xf0] sm:$0xff] %vm359_vm0, %v4613_v4  ;;  %391 = vst.msk [vmem:[#allocation2 + $0xf8] sm:$0xff] %vm359_vm0, %v4613_v4 }
  0x47   : > { %392 = vst.msk [vmem:[#allocation2 + $0x100] sm:$0xff] %vm359_vm0, %v4613_v4  ;;  %393 = vst.msk [vmem:[#allocation2 + $0x108] sm:$0xff] %vm359_vm0, %v4613_v4 }
  0x48   : > { %394 = vst.msk [vmem:[#allocation2 + $0x110] sm:$0xff] %vm359_vm0, %v4613_v4  ;;  %395 = vst.msk [vmem:[#allocation2 + $0x118] sm:$0xff] %vm359_vm0, %v4613_v4 }
  0x49   : > { %396 = vst.msk [vmem:[#allocation2 + $0x120] sm:$0xff] %vm359_vm0, %v4613_v4  ;;  %397 = vst.msk [vmem:[#allocation2 + $0x128] sm:$0xff] %vm359_vm0, %v4613_v4 }
  0x4a   : > { %398 = vst.msk [vmem:[#allocation2 + $0x130] sm:$0xff] %vm359_vm0, %v4613_v4  ;;  %399 = vst.msk [vmem:[#allocation2 + $0x138] sm:$0xff] %vm359_vm0, %v4613_v4 }
  0x4b   : > { %400 = vst.msk [vmem:[#allocation2 + $0x140] sm:$0xff] %vm359_vm0, %v4613_v4  ;;  %401 = vst.msk [vmem:[#allocation2 + $0x148] sm:$0xff] %vm359_vm0, %v4613_v4 }
  0x4c   : > { %402 = vst.msk [vmem:[#allocation2 + $0x150] sm:$0xff] %vm359_vm0, %v4613_v4  ;;  %403 = vst.msk [vmem:[#allocation2 + $0x158] sm:$0xff] %vm359_vm0, %v4613_v4 }
  0x4d   : > { %404 = vst.msk [vmem:[#allocation2 + $0x160] sm:$0xff] %vm359_vm0, %v4613_v4  ;;  %405 = vst.msk [vmem:[#allocation2 + $0x168] sm:$0xff] %vm359_vm0, %v4613_v4 }
  0x4e   : > { %406 = vst.msk [vmem:[#allocation2 + $0x170] sm:$0xff] %vm359_vm0, %v4613_v4  ;;  %407 = vst.msk [vmem:[#allocation2 + $0x178] sm:$0xff] %vm359_vm0, %v4613_v4 }
  0x4f   : > { %408 = vst.msk [vmem:[#allocation3] sm:$0xff] %vm359_vm0, %v4614_v5  ;;  %409 = vst.msk [vmem:[#allocation3 + $0x8] sm:$0xff] %vm359_vm0, %v4614_v5 }
  0x50   : > { %410 = vst.msk [vmem:[#allocation3 + $0x10] sm:$0xff] %vm359_vm0, %v4614_v5  ;;  %411 = vst.msk [vmem:[#allocation3 + $0x18] sm:$0xff] %vm359_vm0, %v4614_v5 }
  0x51   : > { %412 = vst.msk [vmem:[#allocation3 + $0x20] sm:$0xff] %vm359_vm0, %v4614_v5  ;;  %413 = vst.msk [vmem:[#allocation3 + $0x28] sm:$0xff] %vm359_vm0, %v4614_v5 }
  0x52   : > { %414 = vst.msk [vmem:[#allocation3 + $0x30] sm:$0xff] %vm359_vm0, %v4614_v5  ;;  %415 = vst.msk [vmem:[#allocation3 + $0x38] sm:$0xff] %vm359_vm0, %v4614_v5 }
  0x53   : > { %416 = vst.msk [vmem:[#allocation3 + $0x40] sm:$0xff] %vm359_vm0, %v4614_v5  ;;  %417 = vst.msk [vmem:[#allocation3 + $0x48] sm:$0xff] %vm359_vm0, %v4614_v5 }
  0x54   : > { %418 = vst.msk [vmem:[#allocation3 + $0x50] sm:$0xff] %vm359_vm0, %v4614_v5  ;;  %419 = vst.msk [vmem:[#allocation3 + $0x58] sm:$0xff] %vm359_vm0, %v4614_v5 }
  0x55   : > { %420 = vst.msk [vmem:[#allocation3 + $0x60] sm:$0xff] %vm359_vm0, %v4614_v5  ;;  %421 = vst.msk [vmem:[#allocation3 + $0x68] sm:$0xff] %vm359_vm0, %v4614_v5 }
  0x56   : > { %422 = vst.msk [vmem:[#allocation3 + $0x70] sm:$0xff] %vm359_vm0, %v4614_v5  ;;  %423 = vst.msk [vmem:[#allocation3 + $0x78] sm:$0xff] %vm359_vm0, %v4614_v5 }
  0x57   : > { %424 = vst.msk [vmem:[#allocation3 + $0x80] sm:$0xff] %vm359_vm0, %v4614_v5  ;;  %425 = vst.msk [vmem:[#allocation3 + $0x88] sm:$0xff] %vm359_vm0, %v4614_v5 }
  0x58   : > { %426 = vst.msk [vmem:[#allocation3 + $0x90] sm:$0xff] %vm359_vm0, %v4614_v5  ;;  %427 = vst.msk [vmem:[#allocation3 + $0x98] sm:$0xff] %vm359_vm0, %v4614_v5 }
  0x59   : > { %428 = vst.msk [vmem:[#allocation3 + $0xa0] sm:$0xff] %vm359_vm0, %v4614_v5  ;;  %429 = vst.msk [vmem:[#allocation3 + $0xa8] sm:$0xff] %vm359_vm0, %v4614_v5 }
  0x5a   : > { %430 = vst.msk [vmem:[#allocation3 + $0xb0] sm:$0xff] %vm359_vm0, %v4614_v5  ;;  %431 = vst.msk [vmem:[#allocation3 + $0xb8] sm:$0xff] %vm359_vm0, %v4614_v5 }
  0x5b   : > { %432 = vst.msk [vmem:[#allocation3 + $0xc0] sm:$0xff] %vm359_vm0, %v4614_v5  ;;  %433 = vst.msk [vmem:[#allocation3 + $0xc8] sm:$0xff] %vm359_vm0, %v4614_v5 }
  0x5c   : > { %434 = vst.msk [vmem:[#allocation3 + $0xd0] sm:$0xff] %vm359_vm0, %v4614_v5  ;;  %435 = vst.msk [vmem:[#allocation3 + $0xd8] sm:$0xff] %vm359_vm0, %v4614_v5 }
  0x5d   : > { %436 = vst.msk [vmem:[#allocation3 + $0xe0] sm:$0xff] %vm359_vm0, %v4614_v5  ;;  %437 = vst.msk [vmem:[#allocation3 + $0xe8] sm:$0xff] %vm359_vm0, %v4614_v5 }
  0x5e   : > { %438 = vst.msk [vmem:[#allocation3 + $0xf0] sm:$0xff] %vm359_vm0, %v4614_v5  ;;  %439 = vst.msk [vmem:[#allocation3 + $0xf8] sm:$0xff] %vm359_vm0, %v4614_v5 }
  0x5f   : > { %440 = vst.msk [vmem:[#allocation3 + $0x100] sm:$0xff] %vm359_vm0, %v4614_v5  ;;  %441 = vst.msk [vmem:[#allocation3 + $0x108] sm:$0xff] %vm359_vm0, %v4614_v5 }
  0x60   : > { %442 = vst.msk [vmem:[#allocation3 + $0x110] sm:$0xff] %vm359_vm0, %v4614_v5  ;;  %443 = vst.msk [vmem:[#allocation3 + $0x118] sm:$0xff] %vm359_vm0, %v4614_v5 }
  0x61   : > { %444 = vst.msk [vmem:[#allocation3 + $0x120] sm:$0xff] %vm359_vm0, %v4614_v5  ;;  %445 = vst.msk [vmem:[#allocation3 + $0x128] sm:$0xff] %vm359_vm0, %v4614_v5 }
  0x62   : > { %446 = vst.msk [vmem:[#allocation3 + $0x130] sm:$0xff] %vm359_vm0, %v4614_v5  ;;  %447 = vst.msk [vmem:[#allocation3 + $0x138] sm:$0xff] %vm359_vm0, %v4614_v5 }
  0x63   : > { %448 = vst.msk [vmem:[#allocation3 + $0x140] sm:$0xff] %vm359_vm0, %v4614_v5  ;;  %449 = vst.msk [vmem:[#allocation3 + $0x148] sm:$0xff] %vm359_vm0, %v4614_v5 }
  0x64   : > { %450 = vst.msk [vmem:[#allocation3 + $0x150] sm:$0xff] %vm359_vm0, %v4614_v5  ;;  %451 = vst.msk [vmem:[#allocation3 + $0x158] sm:$0xff] %vm359_vm0, %v4614_v5 }
  0x65   : > { %452 = vst.msk [vmem:[#allocation3 + $0x160] sm:$0xff] %vm359_vm0, %v4614_v5  ;;  %453 = vst.msk [vmem:[#allocation3 + $0x168] sm:$0xff] %vm359_vm0, %v4614_v5 }
  0x66   : > { %454 = vst.msk [vmem:[#allocation3 + $0x170] sm:$0xff] %vm359_vm0, %v4614_v5  ;;  %455 = vst.msk [vmem:[#allocation3 + $0x178] sm:$0xff] %vm359_vm0, %v4614_v5 }
  0x67   : > { %456 = vst [vmem:[#allocation4] sm:$0xff] %v4614_v5  ;;  %457 = vst [vmem:[#allocation4 + $0x8] sm:$0xff] %v4614_v5 }
  0x68   : > { %458 = vst [vmem:[#allocation4 + $0x10] sm:$0xff] %v4614_v5  ;;  %459 = vst [vmem:[#allocation4 + $0x18] sm:$0xff] %v4614_v5 }
  0x69   : > { %460 = vst [vmem:[#allocation4 + $0x20] sm:$0xff] %v4614_v5  ;;  %461 = vst [vmem:[#allocation4 + $0x28] sm:$0xff] %v4614_v5 }
  0x6a   : > { %462 = vst [vmem:[#allocation4 + $0x30] sm:$0xff] %v4614_v5  ;;  %463 = vst [vmem:[#allocation4 + $0x38] sm:$0xff] %v4614_v5 }
  0x6b   : > { %464 = vst [vmem:[#allocation4 + $0x40] sm:$0xff] %v4614_v5  ;;  %465 = vst [vmem:[#allocation4 + $0x48] sm:$0xff] %v4614_v5 }
  0x6c   : > { %466 = vst [vmem:[#allocation4 + $0x50] sm:$0xff] %v4614_v5  ;;  %467 = vst [vmem:[#allocation4 + $0x58] sm:$0xff] %v4614_v5 }
  0x6d   : > { %468 = vst [vmem:[#allocation4 + $0x60] sm:$0xff] %v4614_v5  ;;  %469 = vst [vmem:[#allocation4 + $0x68] sm:$0xff] %v4614_v5 }
  0x6e   : > { %470 = vst [vmem:[#allocation4 + $0x70] sm:$0xff] %v4614_v5  ;;  %471 = vst [vmem:[#allocation4 + $0x78] sm:$0xff] %v4614_v5 }
  0x6f   : > { %472 = vst [vmem:[#allocation4 + $0x80] sm:$0xff] %v4614_v5  ;;  %473 = vst [vmem:[#allocation4 + $0x88] sm:$0xff] %v4614_v5 }
  0x70   : > { %474 = vst [vmem:[#allocation4 + $0x90] sm:$0xff] %v4614_v5  ;;  %475 = vst [vmem:[#allocation4 + $0x98] sm:$0xff] %v4614_v5 }
  0x71   : > { %476 = vst [vmem:[#allocation4 + $0xa0] sm:$0xff] %v4614_v5  ;;  %477 = vst [vmem:[#allocation4 + $0xa8] sm:$0xff] %v4614_v5 }
  0x72   : > { %478 = vst [vmem:[#allocation4 + $0xb0] sm:$0xff] %v4614_v5  ;;  %479 = vst [vmem:[#allocation4 + $0xb8] sm:$0xff] %v4614_v5 }
  0x73   : > { %480 = vst [vmem:[#allocation4 + $0xc0] sm:$0xff] %v4614_v5  ;;  %481 = vst [vmem:[#allocation4 + $0xc8] sm:$0xff] %v4614_v5 }
  0x74   : > { %482 = vst [vmem:[#allocation4 + $0xd0] sm:$0xff] %v4614_v5  ;;  %483 = vst [vmem:[#allocation4 + $0xd8] sm:$0xff] %v4614_v5 }
  0x75   : > { %484 = vst [vmem:[#allocation4 + $0xe0] sm:$0xff] %v4614_v5  ;;  %485 = vst [vmem:[#allocation4 + $0xe8] sm:$0xff] %v4614_v5 }
  0x76   : > { %486 = vst [vmem:[#allocation4 + $0xf0] sm:$0xff] %v4614_v5  ;;  %487 = vst [vmem:[#allocation4 + $0xf8] sm:$0xff] %v4614_v5 }
  0x77   : > { %488 = vst [vmem:[#allocation4 + $0x100] sm:$0xff] %v4614_v5  ;;  %489 = vst [vmem:[#allocation4 + $0x108] sm:$0xff] %v4614_v5 }
  0x78   : > { %490 = vst [vmem:[#allocation4 + $0x110] sm:$0xff] %v4614_v5  ;;  %491 = vst [vmem:[#allocation4 + $0x118] sm:$0xff] %v4614_v5 }
  0x79   : > { %492 = vst [vmem:[#allocation4 + $0x120] sm:$0xff] %v4614_v5  ;;  %493 = vst [vmem:[#allocation4 + $0x128] sm:$0xff] %v4614_v5 }
  0x7a   : > { %494 = vst [vmem:[#allocation4 + $0x130] sm:$0xff] %v4614_v5  ;;  %495 = vst [vmem:[#allocation4 + $0x138] sm:$0xff] %v4614_v5 }
  0x7b   : > { %496 = vst [vmem:[#allocation4 + $0x140] sm:$0xff] %v4614_v5  ;;  %497 = vst [vmem:[#allocation4 + $0x148] sm:$0xff] %v4614_v5 }
  0x7c   : > { %498 = vst [vmem:[#allocation4 + $0x150] sm:$0xff] %v4614_v5  ;;  %499 = vst [vmem:[#allocation4 + $0x158] sm:$0xff] %v4614_v5 }
  0x7d   : > { %500 = vst [vmem:[#allocation4 + $0x160] sm:$0xff] %v4614_v5  ;;  %501 = vst [vmem:[#allocation4 + $0x168] sm:$0xff] %v4614_v5 }
  0x7e   : > { %502 = vst [vmem:[#allocation4 + $0x170] sm:$0xff] %v4614_v5  ;;  %503 = vst [vmem:[#allocation4 + $0x178] sm:$0xff] %v4614_v5 }
  0x7f PF: > { %v4933_v6 = vld [vmem:[%s4720_s9 + $0x10] sm:$0xff]  ;;  %v4936_v7 = vld [vmem:[%s4720_s9] sm:$0xff]  ;;  %v4615_v8 = vmov 3   ;;  %v543_v9 = vld [vmem:[%s4720_s9 + $0x18] sm:$0xff]  ;;  %v4616_v23 = vmov 4   ;;  %vm1025_vm1 = vcmask 7168  }
  0x80   : > { %4202 = vset.pattern.permute.xlu1 %v4615_v8  ;;  %4201 = vset.pattern.permute.xlu0 %v4615_v8  ;;  %v4942_v10 = vld [vmem:[%s4720_s9 + $0x8] sm:$0xff]  ;;  %v4946_v12 = vld [vmem:[%s4720_s9 + $0x20] sm:$0xff]  ;;  %v547_v13 = vld [vmem:[%s4720_s9 + $0x38] sm:$0xff]  ;;  %p3877_p0 = scmp.ne.s32.totalorder %s4595_s20, 1 }
  0x81   : > { %569 = vperm.xlu1 %4202, %v4933_v6   ;;  %559 = vperm.xlu0 %4201, %v4936_v7   ;;  %v545_v11 = vld [vmem:[%s4720_s9 + $0x28] sm:$0xff]  ;;  %v546_v14 = vld [vmem:[%s4720_s9 + $0x30] sm:$0xff]  ;;  %v4956_v16 = vld [vmem:[%s4720_s9 + $0x40] sm:$0xff] }
  0x82   : > { %v4953_v15 = vld [vmem:[%s4720_s9 + $0x48] sm:$0xff]  ;;  %v551_v17 = vld [vmem:[%s4720_s9 + $0x58] sm:$0xff]  ;;  %v4960_v18 = vld [vmem:[%s4720_s9 + $0x50] sm:$0xff] }
  0x83   : > { %v553_v19 = vld [vmem:[%s4720_s9 + $0x68] sm:$0xff]  ;;  %v552_v20 = vld [vmem:[%s4720_s9 + $0x60] sm:$0xff]  ;;  %v555_v21 = vld [vmem:[%s4720_s9 + $0x78] sm:$0xff] }
  0x84   : > { %v554_v22 = vld [vmem:[%s4720_s9 + $0x70] sm:$0xff]  ;;  %v4977_v24 = vld [vmem:[%s4725_s13] ss:$0 sm:$0xff] }
  0x85   : > { %574 = vperm.xlu1 %4202, %v543_v9   ;;  %564 = vperm.xlu0 %4201, %v4942_v10  }
  0x89   : > { %584 = vperm.xlu1 %4202, %v545_v11   ;;  %579 = vperm.xlu0 %4201, %v4946_v12  }
  0x8d   : > { %594 = vperm.xlu1 %4202, %v547_v13   ;;  %589 = vperm.xlu0 %4201, %v546_v14  }
  0x91   : > { %604 = vperm.xlu1 %4202, %v4953_v15   ;;  %599 = vperm.xlu0 %4201, %v4956_v16  }
  0x95   : > { %614 = vperm.xlu1 %4202, %v551_v17   ;;  %609 = vperm.xlu0 %4201, %v4960_v18  }
  0x99   : > { %624 = vperm.xlu1 %4202, %v553_v19   ;;  %619 = vperm.xlu0 %4201, %v552_v20  }
  0x9d   : > { %634 = vperm.xlu1 %4202, %v555_v21   ;;  %629 = vperm.xlu0 %4201, %v554_v22  }
  0xa1   : > { %4203 = vset.pattern.permute.xlu0 %v4616_v23  ;;  %4204 = vset.pattern.permute.xlu1 %v4616_v23 }
  0xa2   : > { %1390 = vperm.xlu0 %4203, %v4936_v7   ;;  %1395 = vperm.xlu1 %4204, %v4942_v10  }
  0xa6   : > { %1405 = vperm.xlu0 %4203, %v543_v9   ;;  %1400 = vperm.xlu1 %4204, %v4933_v6  }
  0xaa   : > { %1415 = vperm.xlu0 %4203, %v545_v11   ;;  %1410 = vperm.xlu1 %4204, %v4946_v12   ;;  %v6463_v11 = vmov 0  }
  0xae   : > { %1425 = vperm.xlu0 %4203, %v547_v13   ;;  %1420 = vperm.xlu1 %4204, %v546_v14  }
  0xb2   : > { %1435 = vperm.xlu0 %4203, %v4953_v15   ;;  %1430 = vperm.xlu1 %4204, %v4956_v16  }
  0xb6   : > { %1445 = vperm.xlu0 %4203, %v551_v17   ;;  %1440 = vperm.xlu1 %4204, %v4960_v18  }
  0xba   : > { %1455 = vperm.xlu0 %4203, %v553_v19   ;;  %1450 = vperm.xlu1 %4204, %v552_v20  }
  0xbe   : > { %1465 = vperm.xlu0 %4203, %v555_v21   ;;  %1460 = vperm.xlu1 %4204, %v554_v22  }
  0xc2   : > { %4205 = vset.pattern.permute.xlu1 %v6463_v11  ;;  %4206 = vset.pattern.permute.xlu0 %v6463_v11  ;;  %v4216_v11 = vld [vmem:[%s4735_s29 + $0x78] ss:$12 sps:$4 sm:$0xff]  }
 0x100   : > { %v570_v25 = vpop.permute.xlu1 %569  ;;  %v560_v26 = vpop.permute.xlu0 %559 }
 0x101   : > { %v643_v27 = vadd.f32 %v4977_v24, %v570_v25  ;;  %v641_v28 = vadd.f32 %v4977_v24, %v560_v26 }
 0x103   : > { %v657_v29 = vmul.f32 0.2, %v641_v28  ;;  %v659_v35 = vmul.f32 0.2, %v643_v27 }
 0x104   : > { %v575_v30 = vpop.permute.xlu1 %574  ;;  %v565_v31 = vpop.permute.xlu0 %564 }
 0x105   : > { %v644_v32 = vadd.f32 %v4977_v24, %v575_v30  ;;  %v642_v33 = vadd.f32 %v4977_v24, %v565_v31  ;;  %v4983_v34 = vmax.f32 %v641_v28, %v657_v29  ;;  %v4988_v42 = vmax.f32 %v643_v27, %v659_v35  ;;  %v5037_v30 = vld [vmem:[%s4725_s13 + $0x1] ss:$0 sm:$0xff] }
 0x107   : > { %705 = vmax.xlane.f32.xlu0 %v4983_v34  ;;  %v658_v36 = vmul.f32 0.2, %v642_v33  ;;  %v660_v39 = vmul.f32 0.2, %v644_v32 }
 0x108   : > { %v585_v37 = vpop.permute.xlu1 %584  ;;  %v580_v38 = vpop.permute.xlu0 %579 }
 0x109   : > { %v646_v40 = vadd.f32 %v4977_v24, %v585_v37  ;;  %v645_v41 = vadd.f32 %v4977_v24, %v580_v38  ;;  %v4990_v43 = vmax.f32 %v642_v33, %v658_v36  ;;  %v4994_v47 = vmax.f32 %v644_v32, %v660_v39 }
 0x10b   : > { %709 = vmax.xlane.f32.xlu0 %v4988_v42  ;;  %707 = vmax.xlane.f32.xlu1 %v4990_v43  ;;  %v661_v44 = vmul.f32 0.2, %v645_v41  ;;  %v662_v51 = vmul.f32 0.2, %v646_v40 }
 0x10c   : > { %v595_v45 = vpop.permute.xlu1 %594  ;;  %v590_v46 = vpop.permute.xlu0 %589 }
 0x10d   : > { %v648_v48 = vadd.f32 %v4977_v24, %v595_v45  ;;  %v647_v49 = vadd.f32 %v4977_v24, %v590_v46  ;;  %v4998_v50 = vmax.f32 %v645_v41, %v661_v44  ;;  %v5004_v58 = vmax.f32 %v646_v40, %v662_v51 }
 0x10f   : > { %711 = vmax.xlane.f32.xlu0 %v4994_v47  ;;  %713 = vmax.xlane.f32.xlu1 %v4998_v50  ;;  %v663_v52 = vmul.f32 0.2, %v647_v49  ;;  %v664_v55 = vmul.f32 0.2, %v648_v48 }
 0x110   : > { %v605_v53 = vpop.permute.xlu1 %604  ;;  %v600_v54 = vpop.permute.xlu0 %599 }
 0x111   : > { %v650_v56 = vadd.f32 %v4977_v24, %v605_v53  ;;  %v649_v57 = vadd.f32 %v4977_v24, %v600_v54  ;;  %v5006_v59 = vmax.f32 %v647_v49, %v663_v52  ;;  %v5010_v63 = vmax.f32 %v648_v48, %v664_v55 }
 0x113   : > { %715 = vmax.xlane.f32.xlu0 %v5004_v58  ;;  %717 = vmax.xlane.f32.xlu1 %v5006_v59  ;;  %v665_v60 = vmul.f32 0.2, %v649_v57  ;;  %v666_v3 = vmul.f32 0.2, %v650_v56 }
 0x114   : > { %v615_v61 = vpop.permute.xlu1 %614  ;;  %v610_v62 = vpop.permute.xlu0 %609 }
 0x115   : > { %v652_v0 = vadd.f32 %v4977_v24, %v615_v61  ;;  %v651_v1 = vadd.f32 %v4977_v24, %v610_v62  ;;  %v5014_v2 = vmax.f32 %v649_v57, %v665_v60  ;;  %v5022_v17 = vmax.f32 %v650_v56, %v666_v3 }
 0x117   : > { %719 = vmax.xlane.f32.xlu0 %v5010_v63  ;;  %721 = vmax.xlane.f32.xlu1 %v5014_v2  ;;  %v667_v4 = vmul.f32 0.2, %v651_v1  ;;  %v668_v9 = vmul.f32 0.2, %v652_v0 }
 0x118   : > { %v625_v5 = vpop.permute.xlu1 %624  ;;  %v620_v8 = vpop.permute.xlu0 %619 }
 0x119   : > { %v654_v13 = vadd.f32 %v4977_v24, %v625_v5  ;;  %v653_v14 = vadd.f32 %v4977_v24, %v620_v8  ;;  %v5024_v19 = vmax.f32 %v651_v1, %v667_v4  ;;  %v5028_v23 = vmax.f32 %v652_v0, %v668_v9 }
 0x11b   : > { %723 = vmax.xlane.f32.xlu0 %v5022_v17  ;;  %725 = vmax.xlane.f32.xlu1 %v5024_v19  ;;  %v669_v20 = vmul.f32 0.2, %v653_v14  ;;  %v670_v28 = vmul.f32 0.2, %v654_v13 }
 0x11c   : > { %v635_v21 = vpop.permute.xlu1 %634  ;;  %v630_v22 = vpop.permute.xlu0 %629 }
 0x11d   : > { %v656_v25 = vadd.f32 %v4977_v24, %v635_v21  ;;  %v655_v26 = vadd.f32 %v4977_v24, %v630_v22  ;;  %v5032_v27 = vmax.f32 %v653_v14, %v669_v20  ;;  %v5039_v31 = vmax.f32 %v654_v13, %v670_v28 }
 0x11f   : > { %727 = vmax.xlane.f32.xlu0 %v5028_v23  ;;  %729 = vmax.xlane.f32.xlu1 %v5032_v27  ;;  %v671_v29 = vmul.f32 0.2, %v655_v26  ;;  %v672_v33 = vmul.f32 0.2, %v656_v25 }
 0x121   : > { %v5041_v32 = vmax.f32 %v655_v26, %v671_v29  ;;  %v1391_v35 = vpop.permute.xlu0 %1390  ;;  %v1396_v36 = vpop.permute.xlu1 %1395  ;;  %v5047_v40 = vmax.f32 %v656_v25, %v672_v33 }
 0x122   : > { %v1472_v37 = vadd.f32 %v5037_v30, %v1391_v35  ;;  %v1473_v24 = vadd.f32 %v5037_v30, %v1396_v36 }
 0x123   : > { %731 = vmax.xlane.f32.xlu0 %v5039_v31  ;;  %733 = vmax.xlane.f32.xlu1 %v5041_v32 }
 0x124   : > { %v1488_v38 = vmul.f32 0.2, %v1472_v37  ;;  %v1489_v39 = vmul.f32 0.2, %v1473_v24 }
 0x125   : > { %v1406_v41 = vpop.permute.xlu0 %1405  ;;  %v1401_v44 = vpop.permute.xlu1 %1400 }
 0x126   : > { %v1475_v45 = vadd.f32 %v5037_v30, %v1406_v41  ;;  %v1474_v46 = vadd.f32 %v5037_v30, %v1401_v44  ;;  %v5051_v48 = vmax.f32 %v1472_v37, %v1488_v38  ;;  %v5054_v49 = vmax.f32 %v1473_v24, %v1489_v39 }
 0x127   : > { %735 = vmax.xlane.f32.xlu0 %v5047_v40 }
 0x128   : > { %6565 = vst [vmem:[#allocation7_spill] sm:$0xff] %v5051_v48  ;;  %6566 = vst [vmem:[#allocation8_spill] sm:$0xff] %v5054_v49  ;;  %1537 = vmax.xlane.f32.xlu1 %v5051_v48  ;;  %v1491_v51 = vmul.f32 0.2, %v1475_v45  ;;  %v1490_v52 = vmul.f32 0.2, %v1474_v46 }
 0x129   : > { %v1416_v53 = vpop.permute.xlu0 %1415  ;;  %v1411_v54 = vpop.permute.xlu1 %1410  ;;  %v5243_v48 = vld [vmem:[#allocation2 + $0x78] sm:$0xff] }
 0x12a   : > { %v1477_v55 = vadd.f32 %v5037_v30, %v1416_v53  ;;  %v1476_v56 = vadd.f32 %v5037_v30, %v1411_v54  ;;  %v5059_v57 = vmax.f32 %v1475_v45, %v1491_v51  ;;  %v5062_v60 = vmax.f32 %v1474_v46, %v1490_v52 }
 0x12b   : > { %1539 = vmax.xlane.f32.xlu0 %v5054_v49 }
 0x12c   : > { %6567 = vst [vmem:[#allocation9_spill] sm:$0xff] %v5059_v57  ;;  %6568 = vst [vmem:[#allocation10_spill] sm:$0xff] %v5062_v60  ;;  %1543 = vmax.xlane.f32.xlu1 %v5059_v57  ;;  %v1493_v61 = vmul.f32 0.2, %v1477_v55  ;;  %v1492_v62 = vmul.f32 0.2, %v1476_v56 }
 0x12d   : > { %v1426_v0 = vpop.permute.xlu0 %1425  ;;  %v1421_v1 = vpop.permute.xlu1 %1420  ;;  %v6483_v57 = vmov 5  }
 0x12e   : > { %v1479_v3 = vadd.f32 %v5037_v30, %v1426_v0  ;;  %v1478_v4 = vadd.f32 %v5037_v30, %v1421_v1  ;;  %v5067_v5 = vmax.f32 %v1477_v55, %v1493_v61  ;;  %v5070_v8 = vmax.f32 %v1476_v56, %v1492_v62 }
 0x12f   : > { %1541 = vmax.xlane.f32.xlu0 %v5062_v60 }
 0x130   : > { %6569 = vst [vmem:[#allocation11_spill] sm:$0xff] %v5067_v5  ;;  %6570 = vst [vmem:[#allocation12_spill] sm:$0xff] %v5070_v8  ;;  %1547 = vmax.xlane.f32.xlu1 %v5067_v5  ;;  %v1495_v9 = vmul.f32 0.2, %v1479_v3  ;;  %v1494_v13 = vmul.f32 0.2, %v1478_v4 }
 0x131   : > { %v1436_v14 = vpop.permute.xlu0 %1435  ;;  %v1431_v20 = vpop.permute.xlu1 %1430  ;;  %v5268_v5 = vld [vmem:[#allocation2 + $0x98] sm:$0xff] }
 0x132   : > { %v1481_v21 = vadd.f32 %v5037_v30, %v1436_v14  ;;  %v1480_v22 = vadd.f32 %v5037_v30, %v1431_v20  ;;  %v5075_v25 = vmax.f32 %v1479_v3, %v1495_v9  ;;  %v5078_v26 = vmax.f32 %v1478_v4, %v1494_v13  ;;  %v5113_v20 = vld [vmem:[#allocation2] sm:$0xff]  ;;  %6584 = vst [vmem:[#allocation26_spill] sm:$0xff] %v5268_v5 }
 0x133   : > { %1545 = vmax.xlane.f32.xlu0 %v5070_v8 }
 0x134   : > { %6571 = vst [vmem:[#allocation13_spill] sm:$0xff] %v5075_v25  ;;  %6572 = vst [vmem:[#allocation14_spill] sm:$0xff] %v5078_v26  ;;  %1551 = vmax.xlane.f32.xlu1 %v5075_v25  ;;  %v1497_v28 = vmul.f32 0.2, %v1481_v21  ;;  %v1496_v29 = vmul.f32 0.2, %v1480_v22 }
 0x135   : > { %v1446_v33 = vpop.permute.xlu0 %1445  ;;  %v1441_v35 = vpop.permute.xlu1 %1440  ;;  %v5263_v25 = vld [vmem:[#allocation2 + $0x88] sm:$0xff] }
 0x136   : > { %v1483_v36 = vadd.f32 %v5037_v30, %v1446_v33  ;;  %v1482_v37 = vadd.f32 %v5037_v30, %v1441_v35  ;;  %v5083_v24 = vmax.f32 %v1481_v21, %v1497_v28  ;;  %v5086_v38 = vmax.f32 %v1480_v22, %v1496_v29  ;;  %v4212_v22 = vld [vmem:[%s4735_s29 + $0x18] ss:$12 sps:$4 sm:$0xff]   ;;  %v5119_v29 = vld [vmem:[#allocation2 + $0x8] sm:$0xff]  ;;  %v5121_v33 = vld [vmem:[#allocation2 + $0x10] sm:$0xff]  ;;  %6583 = vst [vmem:[#allocation25_spill] sm:$0xff] %v5263_v25 }
 0x137   : > { %1549 = vmax.xlane.f32.xlu0 %v5078_v26  ;;  %v5227_v26 = vld [vmem:[#allocation2 + $0x68] sm:$0xff] }
 0x138   : > { %6573 = vst [vmem:[#allocation15_spill] sm:$0xff] %v5083_v24  ;;  %6574 = vst [vmem:[#allocation16_spill] sm:$0xff] %v5086_v38  ;;  %1555 = vmax.xlane.f32.xlu1 %v5083_v24  ;;  %v1499_v39 = vmul.f32 0.2, %v1483_v36  ;;  %v1498_v41 = vmul.f32 0.2, %v1482_v37 }
 0x139   : > { %v1456_v44 = vpop.permute.xlu0 %1455  ;;  %v1451_v45 = vpop.permute.xlu1 %1450 }
 0x13a   : > { %v1485_v46 = vadd.f32 %v5037_v30, %v1456_v44  ;;  %v1484_v51 = vadd.f32 %v5037_v30, %v1451_v45  ;;  %v5091_v52 = vmax.f32 %v1483_v36, %v1499_v39  ;;  %v5094_v53 = vmax.f32 %v1482_v37, %v1498_v41  ;;  %v4213_v41 = vld [vmem:[%s4735_s29 + $0x30] ss:$12 sps:$4 sm:$0xff]   ;;  %v5133_v44 = vld [vmem:[#allocation2 + $0x20] sm:$0xff] }
 0x13b   : > { %1553 = vmax.xlane.f32.xlu0 %v5086_v38  ;;  %v5135_v45 = vld [vmem:[#allocation2 + $0x18] sm:$0xff]  ;;  %v5225_v38 = vld [vmem:[#allocation2 + $0x70] sm:$0xff] }
 0x13c   : > { %6575 = vst [vmem:[#allocation17_spill] sm:$0xff] %v5091_v52  ;;  %6576 = vst [vmem:[#allocation18_spill] sm:$0xff] %v5094_v53  ;;  %1559 = vmax.xlane.f32.xlu1 %v5091_v52  ;;  %v1501_v54 = vmul.f32 0.2, %v1485_v46  ;;  %v1500_v55 = vmul.f32 0.2, %v1484_v51 }
 0x13d   : > { %v1466_v56 = vpop.permute.xlu0 %1465  ;;  %v1461_v61 = vpop.permute.xlu1 %1460 }
 0x13e   : > { %v1487_v62 = vadd.f32 %v5037_v30, %v1466_v56  ;;  %v1486_v0 = vadd.f32 %v5037_v30, %v1461_v61  ;;  %v5099_v1 = vmax.f32 %v1485_v46, %v1501_v54  ;;  %v5102_v3 = vmax.f32 %v1484_v51, %v1500_v55  ;;  %v4211_v30 = vld [vmem:[%s4735_s29] ss:$12 sps:$4 sm:$0xff]   ;;  %v4214_v61 = vld [vmem:[%s4735_s29 + $0x48] ss:$12 sps:$4 sm:$0xff]   ;;  %v4217_v46 = vld [vmem:[%s4735_s29 + $0x90] ss:$12 sps:$4 sm:$0xff]  }
 0x13f   : > { %1557 = vmax.xlane.f32.xlu0 %v5094_v53  ;;  %4025 = vmatprep.subr.bf16.mxu0 %v4211_v30 }
 0x140   : > { %6577 = vst [vmem:[#allocation19_spill] sm:$0xff] %v5099_v1  ;;  %6578 = vst [vmem:[#allocation20_spill] sm:$0xff] %v5102_v3  ;;  %1563 = vmax.xlane.f32.xlu1 %v5099_v1  ;;  %v1503_v4 = vmul.f32 0.2, %v1487_v62  ;;  %v1502_v9 = vmul.f32 0.2, %v1486_v0  ;;  %4026 = vmatpush3.bf16.msra.mxu0 %v4211_v30 }
 0x141   : > { %4027 = vmatprep.subr.bf16.mxu0 %v4212_v22  ;;  %v5208_v1 = vld [vmem:[#allocation2 + $0x58] sm:$0xff] }
 0x142   : > { %v5105_v13 = vmax.f32 %v1487_v62, %v1503_v4  ;;  %v5108_v14 = vmax.f32 %v1486_v0, %v1502_v9  ;;  %v5152_v62 = vld [vmem:[#allocation2 + $0x30] sm:$0xff]  ;;  %v5154_v0 = vld [vmem:[#allocation2 + $0x28] sm:$0xff] }
 0x143   : > { %1561 = vmax.xlane.f32.xlu0 %v5102_v3  ;;  %v5190_v4 = vld [vmem:[#allocation2 + $0x48] sm:$0xff] }
 0x144   : > { %6579 = vst [vmem:[#allocation21_spill] sm:$0xff] %v5105_v13  ;;  %6580 = vst [vmem:[#allocation22_spill] sm:$0xff] %v5108_v14  ;;  %1567 = vmax.xlane.f32.xlu1 %v5105_v13  ;;  %4028 = vmatpush3.bf16.msra.mxu0 %v4212_v22  ;;  %v4218_v3 = vld [vmem:[%s4735_s29 + $0xa8] ss:$12 sps:$4 sm:$0xff]  }
 0x145   : > { %4029 = vmatprep.subr.bf16.mxu0 %v4213_v41 }
 0x147   : > { %1565 = vmax.xlane.f32.xlu0 %v5108_v14  ;;  %v5206_v14 = vld [vmem:[#allocation2 + $0x60] sm:$0xff] }
 0x148   : > { %4030 = vmatpush3.bf16.msra.mxu0 %v4213_v41  ;;  %v5172_v41 = vld [vmem:[#allocation2 + $0x38] sm:$0xff] }
 0x149   : > { %4031 = vmatprep.subr.bf16.mxu0 %v4214_v61 }
 0x14c   : > { %4032 = vmatpush3.bf16.msra.mxu0 %v4214_v61 }
 0x194   : > { %v706_v21 = vpop.xlane.xlu0 %705 }
 0x195   : > { %v5117_v28 = vmax.f32 %v5113_v20, %v706_v21 }
 0x197   : > { %1355 = vst.msk [vmem:[#allocation2] sm:$0xff] %vm1025_vm1, %v5117_v28  ;;  %803 = vperm.xlu1 %4205, %v5117_v28  }
 0x198   : > { %v708_v35 = vpop.xlane.xlu1 %707  ;;  %v710_v36 = vpop.xlane.xlu0 %709 }
 0x199   : > { %v5127_v37 = vmax.f32 %v5119_v29, %v708_v35  ;;  %v5130_v39 = vmax.f32 %v5121_v33, %v710_v36  ;;  %v4215_v35 = vld [vmem:[%s4735_s29 + $0x60] ss:$12 sps:$4 sm:$0xff]  }
 0x19a   : > { %v5170_v36 = vld [vmem:[#allocation2 + $0x40] sm:$0xff]  ;;  %4033 = vmatprep.subr.bf16.mxu0 %v4215_v35 }
 0x19b   : > { %1356 = vst.msk [vmem:[#allocation2 + $0x8] sm:$0xff] %vm1025_vm1, %v5127_v37  ;;  %1357 = vst.msk [vmem:[#allocation2 + $0x10] sm:$0xff] %vm1025_vm1, %v5130_v39  ;;  %808 = vperm.xlu0 %4206, %v5127_v37   ;;  %813 = vperm.xlu1 %4205, %v5130_v39  }
 0x19c   : > { %v714_v51 = vpop.xlane.xlu1 %713  ;;  %v712_v54 = vpop.xlane.xlu0 %711  ;;  %4034 = vmatpush3.bf16.msra.mxu0 %v4215_v35 }
 0x19d   : > { %v5146_v55 = vmax.f32 %v5133_v44, %v714_v51  ;;  %v5149_v56 = vmax.f32 %v5135_v45, %v712_v54  ;;  %v5188_v51 = vld [vmem:[#allocation2 + $0x50] sm:$0xff]  ;;  %4035 = vmatprep.subr.bf16.mxu0 %v4216_v11 }
 0x19f   : > { %1359 = vst.msk [vmem:[#allocation2 + $0x20] sm:$0xff] %vm1025_vm1, %v5146_v55  ;;  %1358 = vst.msk [vmem:[#allocation2 + $0x18] sm:$0xff] %vm1025_vm1, %v5149_v56  ;;  %818 = vperm.xlu1 %4205, %v5149_v56  }
 0x1a0   : > { %v718_v9 = vpop.xlane.xlu1 %717  ;;  %v716_v30 = vpop.xlane.xlu0 %715  ;;  %4036 = vmatpush3.bf16.msra.mxu0 %v4216_v11 }
 0x1a1   : > { %v5164_v21 = vmax.f32 %v5152_v62, %v718_v9  ;;  %v5167_v22 = vmax.f32 %v5154_v0, %v716_v30  ;;  %4037 = vmatprep.subr.bf16.mxu0 %v4217_v46 }
 0x1a3   : > { %1361 = vst.msk [vmem:[#allocation2 + $0x30] sm:$0xff] %vm1025_vm1, %v5164_v21  ;;  %1360 = vst.msk [vmem:[#allocation2 + $0x28] sm:$0xff] %vm1025_vm1, %v5167_v22  ;;  %823 = vperm.xlu1 %4205, %v5146_v55  }
 0x1a4   : > { %v722_v54 = vpop.xlane.xlu1 %721  ;;  %v720_v9 = vpop.xlane.xlu0 %719  ;;  %4038 = vmatpush3.bf16.msra.mxu0 %v4217_v46 }
 0x1a5   : > { %v5182_v61 = vmax.f32 %v5170_v36, %v722_v54  ;;  %v5185_v30 = vmax.f32 %v5172_v41, %v720_v9  ;;  %4039 = vmatprep.subr.bf16.mxu0 %v4218_v3 }
 0x1a7   : > { %1363 = vst.msk [vmem:[#allocation2 + $0x40] sm:$0xff] %vm1025_vm1, %v5182_v61  ;;  %1362 = vst.msk [vmem:[#allocation2 + $0x38] sm:$0xff] %vm1025_vm1, %v5185_v30  ;;  %828 = vperm.xlu1 %4205, %v5167_v22  }
 0x1a8   : > { %v726_v54 = vpop.xlane.xlu1 %725  ;;  %v724_v9 = vpop.xlane.xlu0 %723  ;;  %4040 = vmatpush3.bf16.msra.mxu0 %v4218_v3  ;;  %v753_v3 = vsub.f32 %v5113_v20, %v5117_v28  ;;  %v755_v28 = vsub.f32 %v5121_v33, %v5130_v39  ;;  %v5289_v39 = vld [vmem:[#allocation2 + $0xa8] sm:$0xff] }
 0x1a9   : > { %v5200_v35 = vmax.f32 %v5188_v51, %v726_v54  ;;  %v5203_v13 = vmax.f32 %v5190_v4, %v724_v9  ;;  %6588 = vst [vmem:[#allocation30_spill] sm:$0xff] %v5289_v39 }
 0x1aa   : > { %v769_v20 = vmul.f32 1.442695, %v753_v3  ;;  %v756_v3 = vsub.f32 %v5135_v45, %v5149_v56  ;;  %v5311_v56 = vld [vmem:[#allocation2 + $0xb8] sm:$0xff] }
 0x1ab   : > { %1365 = vst.msk [vmem:[#allocation2 + $0x50] sm:$0xff] %vm1025_vm1, %v5200_v35  ;;  %1364 = vst.msk [vmem:[#allocation2 + $0x48] sm:$0xff] %vm1025_vm1, %v5203_v13  ;;  %853 = vperm.xlu0 %4206, %v5200_v35   ;;  %833 = vperm.xlu1 %4205, %v5164_v21  }
 0x1ac   : > { %v730_v54 = vpop.xlane.xlu1 %729  ;;  %v728_v11 = vpop.xlane.xlu0 %727  ;;  %4235 = vpow2.f32 %v769_v20  ;;  %v5304_v20 = vld [vmem:[#allocation2 + $0xa0] sm:$0xff]  ;;  %6592 = vst [vmem:[#allocation34_spill] sm:$0xff] %v5311_v56 }
 0x1ad   : > { %v5219_v9 = vmax.f32 %v5206_v14, %v730_v54  ;;  %v5222_v53 = vmax.f32 %v5208_v1, %v728_v11  ;;  %6591 = vst [vmem:[#allocation33_spill] sm:$0xff] %v5304_v20 }
 0x1af   : > { %1367 = vst.msk [vmem:[#allocation2 + $0x60] sm:$0xff] %vm1025_vm1, %v5219_v9  ;;  %1366 = vst.msk [vmem:[#allocation2 + $0x58] sm:$0xff] %vm1025_vm1, %v5222_v53  ;;  %863 = vperm.xlu0 %4206, %v5219_v9   ;;  %838 = vperm.xlu1 %4205, %v5185_v30  }
 0x1b0   : > { %v734_v54 = vpop.xlane.xlu1 %733  ;;  %v732_v46 = vpop.xlane.xlu0 %731 }
 0x1b1   : > { %v5238_v11 = vmax.f32 %v5225_v38, %v734_v54  ;;  %v5241_v8 = vmax.f32 %v5227_v26, %v732_v46  ;;  %v5253_v54 = vld [vmem:[#allocation2 + $0x80] sm:$0xff] }
 0x1b2   : > { %6582 = vst [vmem:[#allocation24_spill] sm:$0xff] %v5253_v54 }
 0x1b3   : > { %6581 = vst [vmem:[#allocation23_spill] sm:$0xff] %v5238_v11  ;;  %1369 = vst.msk [vmem:[#allocation2 + $0x70] sm:$0xff] %vm1025_vm1, %v5238_v11  ;;  %873 = vperm.xlu0 %4206, %v5238_v11   ;;  %843 = vperm.xlu1 %4205, %v5182_v61   ;;  %v5282_v11 = vld [vmem:[#allocation2 + $0x90] sm:$0xff] }
 0x1b4   : > { %1368 = vst.msk [vmem:[#allocation2 + $0x68] sm:$0xff] %vm1025_vm1, %v5241_v8  ;;  %v736_v46 = vpop.xlane.xlu0 %735  ;;  %6587 = vst [vmem:[#allocation29_spill] sm:$0xff] %v5282_v11 }
 0x1b5   : > { %v5258_v52 = vmax.f32 %v5243_v48, %v736_v46  ;;  %v1538_v60 = vpop.xlane.xlu1 %1537 }
 0x1b6   : > { %v5261_v24 = vmax.f32 %v5253_v54, %v1538_v60 }
 0x1b7   : > { %1370 = vst.msk [vmem:[#allocation2 + $0x78] sm:$0xff] %vm1025_vm1, %v5258_v52  ;;  %848 = vperm.xlu1 %4205, %v5203_v13   ;;  %4208 = vset.pattern.permute.xlu0 %v6483_v57 }
 0x1b8   : > { %2188 = vst.msk [vmem:[#allocation2 + $0x80] sm:$0xff] %vm1025_vm1, %v5261_v24  ;;  %v1540_v60 = vpop.xlane.xlu0 %1539  ;;  %2228 = vperm.xlu0 %4208, %v4942_v10   ;;  %v773_v10 = vmul.f32 1.442695, %v755_v28  ;;  %v758_v28 = vsub.f32 %v5154_v0, %v5167_v22  ;;  %v5333_v22 = vld [vmem:[#allocation2 + $0xc8] sm:$0xff] }
 0x1b9   : > { %v5277_v46 = vmax.f32 %v5263_v25, %v1540_v60  ;;  %v1544_v54 = vpop.xlane.xlu1 %1543  ;;  %6596 = vst [vmem:[#allocation38_spill] sm:$0xff] %v5333_v22 }
 0x1ba   : > { %v5280_v49 = vmax.f32 %v5268_v5, %v1544_v54  ;;  %4237 = vpow2.f32 %v773_v10  ;;  %v5326_v10 = vld [vmem:[#allocation2 + $0xb0] sm:$0xff] }
 0x1bb   : > { %6585 = vst [vmem:[#allocation27_spill] sm:$0xff] %v5277_v46  ;;  %858 = vperm.xlu1 %4205, %v5222_v53   ;;  %2189 = vst.msk [vmem:[#allocation2 + $0x88] sm:$0xff] %vm1025_vm1, %v5277_v46 }
 0x1bc   : > { %6586 = vst [vmem:[#allocation28_spill] sm:$0xff] %v5280_v49  ;;  %2191 = vst.msk [vmem:[#allocation2 + $0x98] sm:$0xff] %vm1025_vm1, %v5280_v49  ;;  %v1542_v60 = vpop.xlane.xlu0 %1541  ;;  %2233 = vperm.xlu0 %4208, %v4933_v6   ;;  %v775_v6 = vmul.f32 1.442695, %v756_v3  ;;  %v760_v3 = vsub.f32 %v5172_v41, %v5185_v30 }
 0x1bd   : > { %v5299_v33 = vmax.f32 %v5282_v11, %v1542_v60  ;;  %v1548_v57 = vpop.xlane.xlu1 %1547  ;;  %6595 = vst [vmem:[#allocation37_spill] sm:$0xff] %v5326_v10 }
 0x1be   : > { %v5302_v25 = vmax.f32 %v5289_v39, %v1548_v57  ;;  %4239 = vpow2.f32 %v775_v6  ;;  %v783_v30 = vmul.f32 1.442695, %v760_v3  ;;  %v764_v3 = vsub.f32 %v5208_v1, %v5222_v53  ;;  %v5399_v53 = vld [vmem:[#allocation2 + $0xf8] sm:$0xff] }
 0x1bf   : > { %6589 = vst [vmem:[#allocation31_spill] sm:$0xff] %v5299_v33  ;;  %868 = vperm.xlu1 %4205, %v5241_v8   ;;  %2190 = vst.msk [vmem:[#allocation2 + $0x90] sm:$0xff] %vm1025_vm1, %v5299_v33 }
 0x1c0   : > { %6590 = vst [vmem:[#allocation32_spill] sm:$0xff] %v5302_v25  ;;  %2193 = vst.msk [vmem:[#allocation2 + $0xa8] sm:$0xff] %vm1025_vm1, %v5302_v25  ;;  %v1546_v60 = vpop.xlane.xlu0 %1545  ;;  %2273 = vperm.xlu0 %4208, %v4960_v18   ;;  %v779_v18 = vmul.f32 1.442695, %v758_v28  ;;  %v5350_v28 = vld [vmem:[#allocation2 + $0xc0] sm:$0xff] }
 0x1c1   : > { %v5321_v45 = vmax.f32 %v5304_v20, %v1546_v60  ;;  %v1552_v54 = vpop.xlane.xlu1 %1551  ;;  %v5345_v20 = vpop.eup %4235  ;;  %6599 = vst [vmem:[#allocation41_spill] sm:$0xff] %v5350_v28  ;;  %6606 = vst [vmem:[#allocation48_spill] sm:$0xff] %v5399_v53  ;;  %v791_v1 = vmul.f32 1.442695, %v764_v3 }
 0x1c2   : > { %v5324_v11 = vmax.f32 %v5311_v56, %v1552_v54  ;;  %4241 = vpow2.f32 %v779_v18  ;;  %v5373_v18 = vld [vmem:[#allocation2 + $0xd0] sm:$0xff] }
 0x1c3   : > { %6593 = vst [vmem:[#allocation35_spill] sm:$0xff] %v5321_v45  ;;  %878 = vperm.xlu1 %4205, %v5258_v52   ;;  %2192 = vst.msk [vmem:[#allocation2 + $0xa0] sm:$0xff] %vm1025_vm1, %v5321_v45  ;;  %4243 = vpow2.f32 %v783_v30  ;;  %v5394_v30 = vld [vmem:[#allocation2 + $0xe0] sm:$0xff] }
 0x1c4   : > { %6594 = vst [vmem:[#allocation36_spill] sm:$0xff] %v5324_v11  ;;  %2195 = vst.msk [vmem:[#allocation2 + $0xb8] sm:$0xff] %vm1025_vm1, %v5324_v11  ;;  %v1550_v60 = vpop.xlane.xlu0 %1549  ;;  %2243 = vperm.xlu0 %4208, %v4946_v12   ;;  %v5357_v12 = vld [vmem:[#allocation2 + $0xd8] sm:$0xff] }
 0x1c5   : > { %v5343_v0 = vmax.f32 %v5326_v10, %v1550_v60  ;;  %v1556_v57 = vpop.xlane.xlu1 %1555  ;;  %6600 = vst [vmem:[#allocation42_spill] sm:$0xff] %v5357_v12  ;;  %v762_v60 = vsub.f32 %v5190_v4, %v5203_v13  ;;  %v5368_v10 = vpop.eup %4237  ;;  %6602 = vst [vmem:[#allocation44_spill] sm:$0xff] %v5373_v18  ;;  %v5378_v13 = vld [vmem:[#allocation2 + $0xe8] sm:$0xff] }
 0x1c6   : > { %v5348_v6 = vmax.f32 %v5333_v22, %v1556_v57  ;;  %6603 = vst [vmem:[#allocation45_spill] sm:$0xff] %v5378_v13  ;;  %6605 = vst [vmem:[#allocation47_spill] sm:$0xff] %v5394_v30 }
 0x1c7   : > { %6597 = vst [vmem:[#allocation39_spill] sm:$0xff] %v5343_v0  ;;  %1060 = vperm.xlu1 %4205, %v5345_v20   ;;  %2194 = vst.msk [vmem:[#allocation2 + $0xb0] sm:$0xff] %vm1025_vm1, %v5343_v0  ;;  %v787_v4 = vmul.f32 1.442695, %v762_v60  ;;  %v766_v60 = vsub.f32 %v5227_v26, %v5241_v8  ;;  %v768_v26 = vsub.f32 %v5243_v48, %v5258_v52 }
 0x1c8   : > { %6598 = vst [vmem:[#allocation40_spill] sm:$0xff] %v5348_v6  ;;  %2197 = vst.msk [vmem:[#allocation2 + $0xc8] sm:$0xff] %vm1025_vm1, %v5348_v6  ;;  %v1554_v54 = vpop.xlane.xlu0 %1553  ;;  %v5389_v22 = vpop.eup %4239 }
 0x1c9   : > { %v5366_v56 = vmax.f32 %v5350_v28, %v1554_v54  ;;  %v1560_v41 = vpop.xlane.xlu1 %1559  ;;  %4245 = vpow2.f32 %v787_v4  ;;  %v795_v8 = vmul.f32 1.442695, %v766_v60 }
 0x1ca   : > { %v5371_v39 = vmax.f32 %v5357_v12, %v1560_v41  ;;  %v5413_v12 = vld [vmem:[#allocation2 + $0xf0] sm:$0xff]  ;;  %4247 = vpow2.f32 %v791_v1  ;;  %v799_v1 = vmul.f32 1.442695, %v768_v26 }
 0x1cb   : > { %1070 = vperm.xlu1 %4205, %v5368_v10   ;;  %2196 = vst.msk [vmem:[#allocation2 + $0xc0] sm:$0xff] %vm1025_vm1, %v5366_v56  ;;  %6608 = vst [vmem:[#allocation50_spill] sm:$0xff] %v5413_v12  ;;  %4249 = vpow2.f32 %v795_v8  ;;  %v6610_v8 = vmov 5  }
 0x1cc   : > { %6601 = vst [vmem:[#allocation43_spill] sm:$0xff] %v5371_v39  ;;  %2199 = vst.msk [vmem:[#allocation2 + $0xd8] sm:$0xff] %vm1025_vm1, %v5371_v39  ;;  %v1558_v41 = vpop.xlane.xlu0 %1557  ;;  %4251 = vpow2.f32 %v799_v1 }
 0x1cd   : > { %v5387_v57 = vmax.f32 %v5373_v18, %v1558_v41  ;;  %v1564_v28 = vpop.xlane.xlu1 %1563 }
 0x1ce   : > { %v5392_v5 = vmax.f32 %v5378_v13, %v1564_v28  ;;  %v5408_v13 = vpop.eup %4241 }
 0x1cf   : > { %1075 = vperm.xlu1 %4205, %v5389_v22   ;;  %2198 = vst.msk [vmem:[#allocation2 + $0xd0] sm:$0xff] %vm1025_vm1, %v5387_v57 }
 0x1d0   : > { %6604 = vst [vmem:[#allocation46_spill] sm:$0xff] %v5392_v5  ;;  %2201 = vst.msk [vmem:[#allocation2 + $0xe8] sm:$0xff] %vm1025_vm1, %v5392_v5  ;;  %v1562_v41 = vpop.xlane.xlu0 %1561 }
 0x1d1   : > { %v5406_v28 = vmax.f32 %v5394_v30, %v1562_v41  ;;  %v1568_v54 = vpop.xlane.xlu1 %1567 }
 0x1d2   : > { %v5411_v18 = vmax.f32 %v5399_v53, %v1568_v54  ;;  %v5425_v54 = vpop.eup %4243 }
 0x1d3   : > { %1085 = vperm.xlu1 %4205, %v5408_v13   ;;  %2200 = vst.msk [vmem:[#allocation2 + $0xe0] sm:$0xff] %vm1025_vm1, %v5406_v28  ;;  %v5430_v60 = vpop.eup %4245 }
 0x1d4   : > { %6607 = vst [vmem:[#allocation49_spill] sm:$0xff] %v5411_v18  ;;  %2203 = vst.msk [vmem:[#allocation2 + $0xf8] sm:$0xff] %vm1025_vm1, %v5411_v18  ;;  %v1566_v4 = vpop.xlane.xlu0 %1565  ;;  %v5433_v48 = vpop.eup %4247 }
 0x1d5   : > { %v5423_v3 = vmax.f32 %v5413_v12, %v1566_v4  ;;  %v5436_v52 = vpop.eup %4249  ;;  %v2207_v12 = vld [vmem:[%s4720_s9 + $0x18] sm:$0xff] }
 0x1d6   : > { %v5439_v41 = vpop.eup %4251 }
 0x1d7   : > { %6609 = vst [vmem:[#allocation51_spill] sm:$0xff] %v5423_v3  ;;  %1095 = vperm.xlu1 %4205, %v5425_v54   ;;  %2202 = vst.msk [vmem:[#allocation2 + $0xf0] sm:$0xff] %vm1025_vm1, %v5423_v3 }
 0x1db   : > { %1105 = vperm.xlu1 %4205, %v5430_v60  }
 0x1df   : > { %1115 = vperm.xlu1 %4205, %v5433_v48  }
 0x1e3   : > { %1125 = vperm.xlu1 %4205, %v5436_v52  }
 0x1e7   : > { %1135 = vperm.xlu1 %4205, %v5439_v41  }
 0x1eb   : > { %1640 = vperm.xlu1 %4205, %v5277_v46  }
 0x1ef   : > { %1645 = vperm.xlu1 %4205, %v5299_v33  }
 0x1f3   : > { %1650 = vperm.xlu1 %4205, %v5280_v49  }
 0x1f7   : > { %1655 = vperm.xlu1 %4205, %v5321_v45   ;;  %v2215_v45 = vld [vmem:[%s4720_s9 + $0x58] sm:$0xff] }
 0x1fb   : > { %1660 = vperm.xlu1 %4205, %v5302_v25  }
 0x1ff   : > { %1665 = vperm.xlu1 %4205, %v5343_v0  }
 0x203   : > { %1670 = vperm.xlu1 %4205, %v5324_v11  }
 0x207   : > { %1680 = vperm.xlu1 %4205, %v5348_v6  }
 0x20b   : > { %1690 = vperm.xlu1 %4205, %v5371_v39  }
 0x20f   : > { %4207 = vset.pattern.permute.xlu1 %v6610_v8  ;;  %v504_v8 = vld [vmem:[%s4737_s28] sm:$0xff] }
 0x210   : > { %2223 = vperm.xlu1 %4207, %v4936_v7   ;;  %v508_v33 = vunpack.c.0.s8 %v504_v8 }
 0x214   : > { %2263 = vperm.xlu1 %4207, %v4956_v16  }
 0x216   : > { %v804_v26 = vpop.permute.xlu1 %803 }
 0x217   : > { %v881_v4 = vsub.f32 %v4983_v34, %v804_v26 }
 0x218   : > { %2268 = vperm.xlu1 %4207, %v4953_v15  }
 0x219   : > { %v897_v1 = vmul.f32 1.442695, %v881_v4  ;;  %v5462_v4 = vcvt.s32.f32 %v508_v33 }
 0x21a   : > { %v814_v53 = vpop.permute.xlu1 %813  ;;  %v809_v18 = vpop.permute.xlu0 %808 }
 0x21b   : > { %4253 = vpow2.f32 %v897_v1  ;;  %v883_v3 = vsub.f32 %v4988_v42, %v814_v53  ;;  %v882_v30 = vsub.f32 %v4990_v43, %v809_v18  ;;  %v510_v1 = vunpack.c.2.s8 %v504_v8 }
 0x21c   : > { %2238 = vperm.xlu1 %4207, %v2207_v12   ;;  %v509_v43 = vunpack.c.1.s8 %v504_v8 }
 0x21d   : > { %v901_v7 = vmul.f32 1.442695, %v883_v3  ;;  %v899_v0 = vmul.f32 1.442695, %v882_v30  ;;  %v5466_v3 = vcvt.s32.f32 %v510_v1 }
 0x21e   : > { %v819_v16 = vpop.permute.xlu1 %818 }
 0x21f   : > { %4255 = vpow2.f32 %v901_v7  ;;  %v884_v34 = vsub.f32 %v4994_v47, %v819_v16  ;;  %v511_v47 = vunpack.c.3.s8 %v504_v8  ;;  %v505_v8 = vld [vmem:[%s4737_s28 + $0x8] sm:$0xff] }
 0x220   : > { %4257 = vpow2.f32 %v899_v0  ;;  %2278 = vperm.xlu1 %4207, %v2215_v45   ;;  %v5469_v0 = vcvt.s32.f32 %v509_v43 }
 0x221   : > { %v903_v15 = vmul.f32 1.442695, %v884_v34 }
 0x222   : > { %v824_v26 = vpop.permute.xlu1 %823 }
 0x223   : > { %4259 = vpow2.f32 %v903_v15  ;;  %v885_v42 = vsub.f32 %v4998_v50, %v824_v26  ;;  %v5472_v15 = vcvt.s32.f32 %v511_v47 }
 0x225   : > { %v4254_v12 = vpop.eup %4253  ;;  %v905_v18 = vmul.f32 1.442695, %v885_v42 }
 0x226   : > { %v829_v30 = vpop.permute.xlu1 %828  ;;  %v929_v53 = vmul.f32 %v4254_v12, %v5462_v4 }
 0x227   : > { %v886_v45 = vsub.f32 %v5004_v58, %v829_v30  ;;  %4261 = vpow2.f32 %v905_v18 }
 0x228   : > { %977 = vadd.xlane.f32.xlu0 %v929_v53 }
 0x229   : > { %v4256_v33 = vpop.eup %4255  ;;  %v907_v7 = vmul.f32 1.442695, %v886_v45  ;;  %v512_v45 = vunpack.c.0.s8 %v505_v8 }
 0x22a   : > { %v4258_v16 = vpop.eup %4257  ;;  %v834_v50 = vpop.permute.xlu1 %833  ;;  %v931_v34 = vmul.f32 %v4256_v33, %v5466_v3  ;;  %v513_v33 = vunpack.c.1.s8 %v505_v8 }
 0x22b   : > { %4263 = vpow2.f32 %v907_v7  ;;  %v887_v26 = vsub.f32 %v5006_v59, %v834_v50  ;;  %v5476_v1 = vmul.f32 %v4258_v16, %v5469_v0  ;;  %v854_v12 = vpop.permute.xlu0 %853  ;;  %v5482_v50 = vcvt.s32.f32 %v512_v45 }
 0x22c   : > { %981 = vadd.xlane.f32.xlu0 %v931_v34  ;;  %v891_v11 = vsub.f32 %v5024_v19, %v854_v12 }
 0x22d   : > { %v4260_v58 = vpop.eup %4259  ;;  %v909_v42 = vmul.f32 1.442695, %v887_v26  ;;  %v1154_v43 = vpack.c.bf16 %v5476_v1, %v929_v53  ;;  %v5484_v26 = vcvt.s32.f32 %v513_v33 }
 0x22e   : > { %v839_v18 = vpop.permute.xlu1 %838  ;;  %v932_v30 = vmul.f32 %v4260_v58, %v5472_v15 }
 0x22f   : > { %v888_v47 = vsub.f32 %v5010_v63, %v839_v18  ;;  %4041 = vmatprep.mubr.bf16.mxu0 %v1154_v43  ;;  %4265 = vpow2.f32 %v909_v42  ;;  %v864_v58 = vpop.permute.xlu0 %863  ;;  %v514_v18 = vunpack.c.2.s8 %v505_v8 }
 0x230   : > { %v1155_v7 = vpack.c.bf16 %v932_v30, %v931_v34  ;;  %983 = vadd.xlane.f32.xlu0 %v932_v30  ;;  %v515_v30 = vunpack.c.3.s8 %v505_v8 }
 0x231   : > { %v911_v59 = vmul.f32 1.442695, %v888_v47  ;;  %v4262_v53 = vpop.eup %4261  ;;  %v917_v47 = vmul.f32 1.442695, %v891_v11 }
 0x232   : > { %v844_v16 = vpop.permute.xlu1 %843  ;;  %4042 = vmatmul.mubr.bf16.vlgmr.msra.gmra.mrb[0].mxu0 %v1155_v7  ;;  %v933_v34 = vmul.f32 %v4262_v53, %v5482_v50  ;;  %v893_v7 = vsub.f32 %v5032_v27, %v864_v58  ;;  %v5494_v12 = vcvt.s32.f32 %v515_v30  ;;  %v506_v53 = vld [vmem:[%s4737_s28 + $0x10] sm:$0xff] }
 0x233   : > { %4267 = vpow2.f32 %v911_v59  ;;  %v889_v39 = vsub.f32 %v5014_v2, %v844_v16  ;;  %v874_v59 = vpop.permute.xlu0 %873 }
 0x234   : > { %v921_v16 = vmul.f32 1.442695, %v893_v7  ;;  %v895_v11 = vsub.f32 %v5041_v32, %v874_v59  ;;  %v519_v59 = vunpack.c.3.s8 %v506_v53 }
 0x235   : > { %v4264_v6 = vpop.eup %4263  ;;  %v913_v63 = vmul.f32 1.442695, %v889_v39  ;;  %v5492_v39 = vcvt.s32.f32 %v514_v18  ;;  %v517_v18 = vunpack.c.1.s8 %v506_v53 }
 0x236   : > { %v849_v43 = vpop.permute.xlu1 %848  ;;  %v934_v42 = vmul.f32 %v4264_v6, %v5484_v26 }
 0x237   : > { %v890_v45 = vsub.f32 %v5022_v17, %v849_v43  ;;  %4269 = vpow2.f32 %v913_v63  ;;  %6611 = vst [vmem:[#allocation52_spill] sm:$0xff] %v5492_v39 }
 0x238   : > { %v1156_v33 = vpack.c.bf16 %v934_v42, %v933_v34  ;;  %987 = vadd.xlane.f32.xlu0 %v934_v42  ;;  %v516_v42 = vunpack.c.0.s8 %v506_v53 }
 0x239   : > { %v915_v2 = vmul.f32 1.442695, %v890_v45  ;;  %v4266_v6 = vpop.eup %4265 }
 0x23a   : > { %v859_v19 = vpop.permute.xlu1 %858  ;;  %4045 = vmatprep.mubr.bf16.mxu0 %v1156_v33  ;;  %v935_v63 = vmul.f32 %v4266_v6, %v5492_v39  ;;  %v5502_v7 = vcvt.s32.f32 %v516_v42 }
 0x23b   : > { %4271 = vpow2.f32 %v915_v2  ;;  %v892_v8 = vsub.f32 %v5028_v23, %v859_v19  ;;  %v925_v23 = vmul.f32 1.442695, %v895_v11  ;;  %v5504_v2 = vcvt.s32.f32 %v517_v18  ;;  %v507_v19 = vld [vmem:[%s4737_s28 + $0x18] sm:$0xff] }
 0x23c   : > { %4273 = vpow2.f32 %v917_v47  ;;  %v518_v47 = vunpack.c.2.s8 %v506_v53  ;;  %6612 = vst [vmem:[#allocation53_spill] sm:$0xff] %v5502_v7  ;;  %v520_v11 = vunpack.c.0.s8 %v507_v19  ;;  %v5515_v53 = vcvt.s32.f32 %v519_v59 }
 0x23d   : > { %v4268_v17 = vpop.eup %4267  ;;  %v919_v27 = vmul.f32 1.442695, %v892_v8  ;;  %v521_v42 = vunpack.c.1.s8 %v507_v19  ;;  %v523_v59 = vunpack.c.3.s8 %v507_v19 }
 0x23e   : > { %v869_v58 = vpop.permute.xlu1 %868  ;;  %v936_v43 = vmul.f32 %v4268_v17, %v5494_v12 }
 0x23f   : > { %4275 = vpow2.f32 %v919_v27  ;;  %v894_v30 = vsub.f32 %v5039_v31, %v869_v58 }
 0x240   : > { %v1157_v45 = vpack.c.bf16 %v936_v43, %v935_v63  ;;  %991 = vadd.xlane.f32.xlu0 %v936_v43  ;;  %4277 = vpow2.f32 %v921_v16  ;;  %v5509_v16 = vcvt.s32.f32 %v518_v47 }
 0x241   : > { %v923_v33 = vmul.f32 1.442695, %v894_v30  ;;  %v4270_v6 = vpop.eup %4269  ;;  %v5517_v30 = vcvt.s32.f32 %v520_v11 }
 0x242   : > { %v879_v32 = vpop.permute.xlu1 %878  ;;  %4046 = vmatmul.mubr.bf16.gmra.mrb[4].mxu0 %v1157_v45  ;;  %6613 = vst [vmem:[#allocation54_spill] sm:$0xff] %v5509_v16  ;;  %v937_v58 = vmul.f32 %v4270_v6, %v5502_v7  ;;  %v522_v45 = vunpack.c.2.s8 %v507_v19 }
 0x243   : > { %4279 = vpow2.f32 %v923_v33  ;;  %v896_v8 = vsub.f32 %v5047_v40, %v879_v32  ;;  %6614 = vst [vmem:[#allocation55_spill] sm:$0xff] %v5517_v30  ;;  %v5523_v32 = vcvt.s32.f32 %v521_v42 }
 0x244   : > { %979 = vadd.xlane.f32.xlu1 %v5476_v1  ;;  %4281 = vpow2.f32 %v925_v23 }
 0x245   : > { %v4272_v31 = vpop.eup %4271  ;;  %v927_v17 = vmul.f32 1.442695, %v896_v8  ;;  %6615 = vst [vmem:[#allocation56_spill] sm:$0xff] %v5523_v32 }
 0x246   : > { %v5511_v27 = vpop.permute.xlu1 %1060  ;;  %v938_v43 = vmul.f32 %v4272_v31, %v5504_v2  ;;  %v4274_v18 = vpop.eup %4273 }
 0x247   : > { %4283 = vpow2.f32 %v927_v17  ;;  %v939_v33 = vmul.f32 %v4274_v18, %v5509_v16  ;;  %v5531_v18 = vcvt.s32.f32 %v523_v59 }
 0x248   : > { %985 = vadd.xlane.f32.xlu1 %v933_v34  ;;  %v1158_v40 = vpack.c.bf16 %v938_v43, %v937_v58  ;;  %995 = vadd.xlane.f32.xlu0 %v938_v43  ;;  %v5529_v43 = vcvt.s32.f32 %v522_v45 }
 0x249   : > { %v4276_v1 = vpop.eup %4275  ;;  %6617 = vst [vmem:[#allocation58_spill] sm:$0xff] %v5531_v18 }
 0x24a   : > { %v5519_v23 = vpop.permute.xlu1 %1070  ;;  %4049 = vmatprep.mubr.bf16.mxu0 %v1158_v40  ;;  %v940_v47 = vmul.f32 %v4276_v1, %v5515_v53  ;;  %v4278_v6 = vpop.eup %4277  ;;  %6616 = vst [vmem:[#allocation57_spill] sm:$0xff] %v5529_v43 }
 0x24b   : > { %v941_v17 = vmul.f32 %v4278_v6, %v5517_v30 }
 0x24c   : > { %989 = vadd.xlane.f32.xlu1 %v935_v63  ;;  %v1159_v8 = vpack.c.bf16 %v940_v47, %v939_v33  ;;  %999 = vadd.xlane.f32.xlu0 %v940_v47 }
 0x24d   : > { %v4280_v34 = vpop.eup %4279 }
 0x24e   : > { %v5525_v31 = vpop.permute.xlu1 %1075  ;;  %4050 = vmatmul.mubr.bf16.gmra.mrb[8].mxu0 %v1159_v8  ;;  %v942_v11 = vmul.f32 %v4280_v34, %v5523_v32  ;;  %v4282_v40 = vpop.eup %4281  ;;  %v2216_v34 = vld [vmem:[%s4720_s9 + $0x60] sm:$0xff] }
 0x24f   : > { %v943_v1 = vmul.f32 %v4282_v40, %v5529_v43 }
 0x250   : > { %993 = vadd.xlane.f32.xlu1 %v937_v58  ;;  %v1160_v42 = vpack.c.bf16 %v942_v11, %v941_v17  ;;  %1003 = vadd.xlane.f32.xlu0 %v942_v11  ;;  %v6618_v11 = vsub.f32 %v5119_v29, %v5127_v37  ;;  %v6620_v29 = vsub.f32 %v5152_v62, %v5164_v21  ;;  %v2211_v62 = vld [vmem:[%s4720_s9 + $0x38] sm:$0xff] }
 0x251   : > { %v4284_v63 = vpop.eup %4283  ;;  %v6623_v21 = vsub.f32 %v5188_v51, %v5200_v35  ;;  %v6625_v51 = vld [vmem:[#allocation23_spill] sm:$0xff] }
 0x252   : > { %v5533_v19 = vpop.permute.xlu1 %1085  ;;  %4053 = vmatprep.mubr.bf16.mxu0 %v1160_v42  ;;  %v5537_v47 = vmul.f32 %v4284_v63, %v5531_v18  ;;  %v2210_v42 = vld [vmem:[%s4720_s9 + $0x30] sm:$0xff]  ;;  %v781_v37 = vmul.f32 1.442695, %v6620_v29  ;;  %v6626_v35 = vsub.f32 %v5225_v38, %v6625_v51 }
 0x253   : > { %v2218_v18 = vld [vmem:[%s4720_s9 + $0x70] sm:$0xff] }
 0x254   : > { %997 = vadd.xlane.f32.xlu1 %v939_v33  ;;  %v1161_v45 = vpack.c.bf16 %v5537_v47, %v943_v1  ;;  %v771_v33 = vmul.f32 1.442695, %v6618_v11 }
 0x256   : > { %v5540_v59 = vpop.permute.xlu1 %1095  ;;  %4054 = vmatmul.mubr.bf16.gmra.mrb[12].mxu0 %v1161_v45  ;;  %4285 = vpow2.f32 %v771_v33  ;;  %v2209_v45 = vld [vmem:[%s4720_s9 + $0x28] sm:$0xff] }
 0x258   : > { %1001 = vadd.xlane.f32.xlu1 %v941_v17  ;;  %v6619_v17 = vsub.f32 %v5133_v44, %v5146_v55  ;;  %v6621_v44 = vsub.f32 %v5170_v36, %v5182_v61  ;;  %v2219_v61 = vld [vmem:[%s4720_s9 + $0x78] sm:$0xff] }
 0x25a   : > { %v5542_v58 = vpop.permute.xlu1 %1105  ;;  %v777_v63 = vmul.f32 1.442695, %v6619_v17  ;;  %v785_v55 = vmul.f32 1.442695, %v6621_v44  ;;  %v6622_v17 = vmov 0  }
 0x25b   : > { %v797_v44 = vmul.f32 1.442695, %v6626_v35 }
 0x25c   : > { %1005 = vadd.xlane.f32.xlu1 %v943_v1  ;;  %4287 = vpow2.f32 %v777_v63 }
 0x25d   : > { %4289 = vpow2.f32 %v781_v37 }
 0x25e   : > { %v5544_v6 = vpop.permute.xlu1 %1115  ;;  %4291 = vpow2.f32 %v785_v55 }
 0x260   : > { %v5571_v33 = vpop.eup %4285 }
 0x262   : > { %v5546_v8 = vpop.permute.xlu1 %1125 }
 0x266   : > { %v5552_v40 = vpop.permute.xlu1 %1135  ;;  %2283 = vperm.xlu0 %4208, %v2216_v34   ;;  %v2217_v34 = vld [vmem:[%s4720_s9 + $0x68] sm:$0xff]  ;;  %v5581_v63 = vpop.eup %4287 }
 0x267   : > { %v5590_v37 = vpop.eup %4289 }
 0x268   : > { %v5599_v55 = vpop.eup %4291 }
 0x26a   : > { %v5558_v1 = vpop.permute.xlu1 %1640  ;;  %2253 = vperm.xlu0 %4208, %v2210_v42  }
 0x26d   : > { %2248 = vperm.xlu1 %4207, %v2209_v45   ;;  %v6624_v45 = vsub.f32 %v5206_v14, %v5219_v9 }
 0x26e   : > { %v5565_v11 = vpop.permute.xlu1 %1645  ;;  %2293 = vperm.xlu0 %4208, %v2218_v18   ;;  %v789_v18 = vmul.f32 1.442695, %v6623_v21 }
 0x26f   : > { %v793_v29 = vmul.f32 1.442695, %v6624_v45 }
 0x270   : > { %4293 = vpow2.f32 %v789_v18 }
 0x271   : > { %2288 = vperm.xlu1 %4207, %v2217_v34   ;;  %4295 = vpow2.f32 %v793_v29  ;;  %v5622_v29 = vld [vmem:[%s4725_s13 + $0x2] ss:$0 sm:$0xff] }
 0x272   : > { %v5573_v42 = vpop.permute.xlu1 %1650  ;;  %4209 = vset.pattern.permute.xlu0 %v6622_v17  ;;  %4297 = vpow2.f32 %v797_v44 }
 0x273   : > { %1065 = vperm.xlu0 %4209, %v5571_v33  }
 0x275   : > { %2258 = vperm.xlu1 %4207, %v2211_v62  }
 0x276   : > { %v5583_v36 = vpop.permute.xlu1 %1655 }
 0x277   : > { %1080 = vperm.xlu0 %4209, %v5581_v63  }
 0x279   : > { %2298 = vperm.xlu1 %4207, %v2219_v61   ;;  %v5619_v61 = vpop.permute.xlu0 %2228 }
 0x27a   : > { %v5592_v34 = vpop.permute.xlu1 %1660  ;;  %v5604_v14 = vpop.eup %4293 }
 0x27b   : > { %1090 = vperm.xlu0 %4209, %v5590_v37   ;;  %v5609_v21 = vpop.eup %4295 }
 0x27d   : > { %4210 = vset.pattern.permute.xlu1 %v6622_v17  ;;  %v5614_v17 = vpop.eup %4297  ;;  %v2234_v44 = vpop.permute.xlu0 %2233 }
 0x27e   : > { %v5601_v62 = vpop.permute.xlu1 %1665  ;;  %v2307_v5 = vadd.f32 %v5622_v29, %v2234_v44 }
 0x27f   : > { %1100 = vperm.xlu0 %4209, %v5599_v55  }
 0x280   : > { %v2323_v16 = vmul.f32 0.2, %v2307_v5 }
 0x281   : > { %v2274_v46 = vpop.permute.xlu0 %2273 }
 0x282   : > { %v5606_v9 = vpop.permute.xlu1 %1670  ;;  %v2315_v39 = vadd.f32 %v5622_v29, %v2274_v46  ;;  %v5634_v7 = vmax.f32 %v2307_v5, %v2323_v16  ;;  %v945_v46 = vld [vmem:[#allocation3] sm:$0xff] }
 0x283   : > { %1110 = vperm.xlu0 %4209, %v5604_v14   ;;  %v961_v5 = vmul.f32 %v5345_v20, %v945_v46  ;;  %v4219_v16 = vld [vmem:[%s4735_s29 + $0x4] ss:$12 sps:$4 sm:$0xff]   ;;  %v4221_v46 = vld [vmem:[%s4735_s29 + $0x34] ss:$12 sps:$4 sm:$0xff]  }
 0x284   : > { %6627 = vst [vmem:[#allocation23_spill] sm:$0xff] %v5634_v7  ;;  %4057 = vmatprep.subr.bf16.mxu1 %v4219_v16 }
 0x285   : > { %4058 = vmatpush3.bf16.msra.mxu1 %v4219_v16 }
 0x286   : > { %v5611_v38 = vpop.permute.xlu1 %1680 }
 0x287   : > { %1120 = vperm.xlu0 %4209, %v5609_v21  }
 0x28a   : > { %v5616_v18 = vpop.permute.xlu1 %1690 }
 0x28b   : > { %1130 = vperm.xlu0 %4209, %v5614_v17  }
 0x28f   : > { %v2224_v45 = vpop.permute.xlu1 %2223 }
 0x290   : > { %v2305_v51 = vadd.f32 %v5622_v29, %v2224_v45  ;;  %v2244_v45 = vpop.permute.xlu0 %2243 }
 0x292   : > { %v2321_v43 = vmul.f32 0.2, %v2305_v51 }
 0x293   : > { %v2264_v35 = vpop.permute.xlu1 %2263 }
 0x294   : > { %v2313_v32 = vadd.f32 %v5622_v29, %v2264_v35  ;;  %v5626_v25 = vmax.f32 %v2305_v51, %v2321_v43  ;;  %v2331_v35 = vmul.f32 0.2, %v2315_v39  ;;  %v2309_v43 = vadd.f32 %v5622_v29, %v2244_v45  ;;  %v947_v45 = vld [vmem:[#allocation3 + $0x10] sm:$0xff] }
 0x296   : > { %v2329_v49 = vmul.f32 0.2, %v2313_v32  ;;  %v5638_v51 = vmax.f32 %v2315_v39, %v2331_v35  ;;  %v963_v39 = vmul.f32 %v5368_v10, %v947_v45  ;;  %v4220_v35 = vld [vmem:[%s4735_s29 + $0x1c] ss:$12 sps:$4 sm:$0xff]   ;;  %v4222_v10 = vld [vmem:[%s4735_s29 + $0x4c] ss:$12 sps:$4 sm:$0xff]  }
 0x297   : > { %4059 = vmatprep.subr.bf16.mxu1 %v4220_v35  ;;  %v5653_v16 = vpop.permute.xlu1 %2268  ;;  %v4223_v45 = vld [vmem:[%s4735_s29 + $0x64] ss:$12 sps:$4 sm:$0xff]  }
 0x298   : > { %v5629_v30 = vmax.f32 %v2313_v32, %v2329_v49  ;;  %6628 = vst [vmem:[#allocation59_spill] sm:$0xff] %v5638_v51  ;;  %v2325_v49 = vmul.f32 0.2, %v2309_v43  ;;  %4060 = vmatpush3.bf16.msra.mxu1 %v4220_v35 }
 0x299   : > { %4061 = vmatprep.subr.bf16.mxu1 %v4221_v46 }
 0x29a   : > { %v5642_v32 = vmax.f32 %v2309_v43, %v2325_v49  ;;  %v948_v43 = vld [vmem:[#allocation3 + $0x18] sm:$0xff] }
 0x29b   : > { %v964_v20 = vmul.f32 %v5389_v22, %v948_v43  ;;  %v5661_v35 = vpop.permute.xlu1 %2238  ;;  %v4224_v43 = vld [vmem:[%s4735_s29 + $0x7c] ss:$12 sps:$4 sm:$0xff]  }
 0x29c   : > { %6629 = vst [vmem:[#allocation60_spill] sm:$0xff] %v5642_v32  ;;  %4062 = vmatpush3.bf16.msra.mxu1 %v4221_v46  ;;  %v4225_v46 = vld [vmem:[%s4735_s29 + $0x94] ss:$12 sps:$4 sm:$0xff]  }
 0x29d   : > { %2370 = vmax.xlane.f32.xlu1 %v5626_v25  ;;  %4063 = vmatprep.subr.bf16.mxu1 %v4222_v10 }
 0x2a0   : > { %4064 = vmatpush3.bf16.msra.mxu1 %v4222_v10 }
 0x2a1   : > { %2386 = vmax.xlane.f32.xlu1 %v5629_v30  ;;  %4065 = vmatprep.subr.bf16.mxu1 %v4223_v45 }
 0x2a4   : > { %4066 = vmatpush3.bf16.msra.mxu1 %v4223_v45 }
 0x2a5   : > { %2374 = vmax.xlane.f32.xlu1 %v5634_v7  ;;  %4067 = vmatprep.subr.bf16.mxu1 %v4224_v43 }
 0x2a8   : > { %4068 = vmatpush3.bf16.msra.mxu1 %v4224_v43 }
 0x2a9   : > { %2390 = vmax.xlane.f32.xlu1 %v5638_v51  ;;  %4069 = vmatprep.subr.bf16.mxu1 %v4225_v46 }
 0x2aa   : > { %1007 = vadd.xlane.f32.xlu0 %v5537_v47 }
 0x2ac   : > { %4070 = vmatpush3.bf16.msra.mxu1 %v4225_v46  ;;  %v951_v46 = vld [vmem:[#allocation3 + $0x30] sm:$0xff] }
 0x2ad   : > { %2378 = vmax.xlane.f32.xlu1 %v5642_v32 }
 0x2b5   : > { %v978_v44 = vpop.xlane.xlu0 %977 }
 0x2b6   : > { %v1009_v7 = vadd.f32 %v978_v44, %v961_v5 }
 0x2b8   : > { %1026 = vst.msk [vmem:[#allocation3] sm:$0xff] %vm1025_vm1, %v1009_v7  ;;  %v950_v7 = vld [vmem:[#allocation3 + $0x28] sm:$0xff] }
 0x2b9   : > { %v982_v47 = vpop.xlane.xlu0 %981  ;;  %v966_v22 = vmul.f32 %v5408_v13, %v950_v7 }
 0x2ba   : > { %v1011_v49 = vadd.f32 %v982_v47, %v963_v39 }
 0x2bc   : > { %1028 = vst.msk [vmem:[#allocation3 + $0x10] sm:$0xff] %vm1025_vm1, %v1011_v49  ;;  %v952_v49 = vld [vmem:[#allocation3 + $0x38] sm:$0xff] }
 0x2bd   : > { %v984_v5 = vpop.xlane.xlu0 %983  ;;  %v968_v13 = vmul.f32 %v5425_v54, %v952_v49 }
 0x2be   : > { %v1012_v44 = vadd.f32 %v984_v5, %v964_v20  ;;  %v5666_v20 = vpop.permute.xlu1 %2278 }
 0x2c0   : > { %1029 = vst.msk [vmem:[#allocation3 + $0x18] sm:$0xff] %vm1025_vm1, %v1012_v44  ;;  %1635 = vperm.xlu0 %4209, %v5261_v24   ;;  %v946_v44 = vld [vmem:[#allocation3 + $0x8] sm:$0xff] }
 0x2c1   : > { %v962_v7 = vmul.f32 %v5571_v33, %v946_v44  ;;  %v967_v33 = vmul.f32 %v5590_v37, %v951_v46 }
 0x2c4   : > { %1675 = vperm.xlu0 %4209, %v5366_v56  }
 0x2c5   : > { %v988_v39 = vpop.xlane.xlu0 %987 }
 0x2c6   : > { %v1014_v47 = vadd.f32 %v988_v39, %v966_v22  ;;  %v4226_v22 = vld [vmem:[%s4735_s29 + $0xac] ss:$12 sps:$4 sm:$0xff]   ;;  %v949_v39 = vld [vmem:[#allocation3 + $0x20] sm:$0xff] }
 0x2c7   : > { %4071 = vmatprep.subr.bf16.mxu1 %v4226_v22  ;;  %v965_v54 = vmul.f32 %v5581_v63, %v949_v39  ;;  %v958_v63 = vld [vmem:[#allocation3 + $0x68] sm:$0xff] }
 0x2c8   : > { %1031 = vst.msk [vmem:[#allocation3 + $0x28] sm:$0xff] %vm1025_vm1, %v1014_v47  ;;  %1685 = vperm.xlu0 %4209, %v5387_v57   ;;  %v954_v47 = vld [vmem:[#allocation3 + $0x48] sm:$0xff]  ;;  %4072 = vmatpush3.bf16.msra.mxu1 %v4226_v22  ;;  %v953_v22 = vld [vmem:[#allocation3 + $0x40] sm:$0xff] }
 0x2c9   : > { %v970_v43 = vmul.f32 %v5430_v60, %v954_v47  ;;  %v969_v39 = vmul.f32 %v5599_v55, %v953_v22  ;;  %v974_v47 = vmul.f32 %v5436_v52, %v958_v63  ;;  %v2314_v52 = vadd.f32 %v5622_v29, %v5653_v16 }
 0x2cb   : > { %v2330_v63 = vmul.f32 0.2, %v2314_v52 }
 0x2cc   : > { %1695 = vperm.xlu0 %4209, %v5406_v28  }
 0x2cd   : > { %v992_v5 = vpop.xlane.xlu0 %991 }
 0x2ce   : > { %v1016_v10 = vadd.f32 %v992_v5, %v968_v13  ;;  %v956_v5 = vld [vmem:[#allocation3 + $0x58] sm:$0xff] }
 0x2cf   : > { %v972_v44 = vmul.f32 %v5433_v48, %v956_v5  ;;  %v957_v5 = vld [vmem:[#allocation3 + $0x60] sm:$0xff] }
 0x2d0   : > { %1033 = vst.msk [vmem:[#allocation3 + $0x38] sm:$0xff] %vm1025_vm1, %v1016_v10  ;;  %v973_v55 = vmul.f32 %v5609_v21, %v957_v5 }
 0x2d1   : > { %v980_v45 = vpop.xlane.xlu1 %979 }
 0x2d2   : > { %v1010_v32 = vadd.f32 %v980_v45, %v962_v7 }
 0x2d4   : > { %1027 = vst.msk [vmem:[#allocation3 + $0x8] sm:$0xff] %vm1025_vm1, %v1010_v32 }
 0x2d5   : > { %v986_v49 = vpop.xlane.xlu1 %985  ;;  %v996_v13 = vpop.xlane.xlu0 %995 }
 0x2d6   : > { %v1013_v10 = vadd.f32 %v986_v49, %v965_v54  ;;  %v1018_v51 = vadd.f32 %v996_v13, %v970_v43  ;;  %v955_v43 = vld [vmem:[#allocation3 + $0x50] sm:$0xff]  ;;  %v2306_v13 = vadd.f32 %v5622_v29, %v5619_v61  ;;  %v2308_v61 = vadd.f32 %v5622_v29, %v5661_v35 }
 0x2d7   : > { %v971_v48 = vmul.f32 %v5604_v14, %v955_v43  ;;  %v5704_v43 = vmax.f32 %v2314_v52, %v2330_v63  ;;  %v2316_v35 = vadd.f32 %v5622_v29, %v5666_v20 }
 0x2d8   : > { %1030 = vst.msk [vmem:[#allocation3 + $0x20] sm:$0xff] %vm1025_vm1, %v1013_v10  ;;  %1035 = vst.msk [vmem:[#allocation3 + $0x48] sm:$0xff] %vm1025_vm1, %v1018_v51 }
 0x2d9   : > { %v990_v7 = vpop.xlane.xlu1 %989  ;;  %v1000_v32 = vpop.xlane.xlu0 %999 }
 0x2da   : > { %v1015_v45 = vadd.f32 %v990_v7, %v967_v33  ;;  %v1020_v60 = vadd.f32 %v1000_v32, %v972_v44  ;;  %v2322_v33 = vmul.f32 0.2, %v2306_v13  ;;  %v959_v32 = vld [vmem:[#allocation3 + $0x70] sm:$0xff] }
 0x2db   : > { %v975_v16 = vmul.f32 %v5614_v17, %v959_v32 }
 0x2dc   : > { %1032 = vst.msk [vmem:[#allocation3 + $0x30] sm:$0xff] %vm1025_vm1, %v1015_v45  ;;  %1037 = vst.msk [vmem:[#allocation3 + $0x58] sm:$0xff] %vm1025_vm1, %v1020_v60  ;;  %v5699_v60 = vmax.f32 %v2306_v13, %v2322_v33 }
 0x2dd   : > { %v994_v54 = vpop.xlane.xlu1 %993  ;;  %v1004_v51 = vpop.xlane.xlu0 %1003 }
 0x2de   : > { %v1017_v37 = vadd.f32 %v994_v54, %v969_v39  ;;  %v1022_v49 = vadd.f32 %v1004_v51, %v974_v47 }
 0x2e0   : > { %1034 = vst.msk [vmem:[#allocation3 + $0x40] sm:$0xff] %vm1025_vm1, %v1017_v37  ;;  %1039 = vst.msk [vmem:[#allocation3 + $0x68] sm:$0xff] %vm1025_vm1, %v1022_v49  ;;  %v2324_v37 = vmul.f32 0.2, %v2308_v61 }
 0x2e1   : > { %v998_v46 = vpop.xlane.xlu1 %997 }
 0x2e2   : > { %v1019_v10 = vadd.f32 %v998_v46, %v971_v48  ;;  %v5714_v5 = vmax.f32 %v2308_v61, %v2324_v37 }
 0x2e4   : > { %1036 = vst.msk [vmem:[#allocation3 + $0x50] sm:$0xff] %vm1025_vm1, %v1019_v10  ;;  %v2332_v10 = vmul.f32 0.2, %v2316_v35 }
 0x2e5   : > { %v1002_v44 = vpop.xlane.xlu1 %1001  ;;  %v2284_v7 = vpop.permute.xlu0 %2283 }
 0x2e6   : > { %v1021_v22 = vadd.f32 %v1002_v44, %v973_v55  ;;  %v2317_v14 = vadd.f32 %v5622_v29, %v2284_v7  ;;  %v5721_v44 = vmax.f32 %v2316_v35, %v2332_v10 }
 0x2e8   : > { %1038 = vst.msk [vmem:[#allocation3 + $0x60] sm:$0xff] %vm1025_vm1, %v1021_v22  ;;  %v2333_v45 = vmul.f32 0.2, %v2317_v14  ;;  %v6630_v22 = vld [vmem:[#allocation8_spill] sm:$0xff] }
 0x2e9   : > { %v1006_v39 = vpop.xlane.xlu1 %1005  ;;  %v2254_v21 = vpop.permute.xlu0 %2253 }
 0x2ea   : > { %v5701_v47 = vmax.f32 %v2317_v14, %v2333_v45  ;;  %v1023_v54 = vadd.f32 %v1006_v39, %v975_v16  ;;  %v2311_v51 = vadd.f32 %v5622_v29, %v2254_v21  ;;  %v1714_v14 = vsub.f32 %v6630_v22, %v5558_v1  ;;  %v6631_v21 = vld [vmem:[#allocation9_spill] sm:$0xff]  ;;  %v1045_v22 = vld [vmem:[#allocation4 + $0x18] sm:$0xff] }
 0x2eb   : > { %2372 = vmax.xlane.f32.xlu0 %v5699_v60 }
 0x2ec   : > { %1040 = vst.msk [vmem:[#allocation3 + $0x70] sm:$0xff] %vm1025_vm1, %v1023_v54  ;;  %v2327_v17 = vmul.f32 0.2, %v2311_v51  ;;  %2394 = vmax.xlane.f32.xlu1 %v5701_v47  ;;  %v1731_v39 = vmul.f32 1.442695, %v1714_v14  ;;  %v1716_v54 = vsub.f32 %v6631_v21, %v5573_v42 }
 0x2ed   : > { %v2294_v49 = vpop.permute.xlu0 %2293  ;;  %v2249_v48 = vpop.permute.xlu1 %2248 }
 0x2ee   : > { %v5711_v13 = vmax.f32 %v2311_v51, %v2327_v17  ;;  %v2319_v46 = vadd.f32 %v5622_v29, %v2294_v49  ;;  %v2310_v20 = vadd.f32 %v5622_v29, %v2249_v48  ;;  %4299 = vpow2.f32 %v1731_v39  ;;  %v6632_v49 = vld [vmem:[#allocation11_spill] sm:$0xff] }
 0x2ef   : > { %2388 = vmax.xlane.f32.xlu0 %v5704_v43  ;;  %v1735_v17 = vmul.f32 1.442695, %v1716_v54  ;;  %v1718_v48 = vsub.f32 %v6632_v49, %v5592_v34  ;;  %v1141_v54 = vmul.f32 %v5525_v31, %v1045_v22  ;;  %v1048_v22 = vld [vmem:[#allocation4 + $0x30] sm:$0xff] }
 0x2f0   : > { %v2335_v52 = vmul.f32 0.2, %v2319_v46  ;;  %2382 = vmax.xlane.f32.xlu1 %v5711_v13  ;;  %v2326_v7 = vmul.f32 0.2, %v2310_v20 }
 0x2f1   : > { %v2289_v55 = vpop.permute.xlu1 %2288  ;;  %4301 = vpow2.f32 %v1735_v17  ;;  %v1739_v42 = vmul.f32 1.442695, %v1718_v48 }
 0x2f2   : > { %v5719_v33 = vmax.f32 %v2319_v46, %v2335_v52  ;;  %v2318_v32 = vadd.f32 %v5622_v29, %v2289_v55  ;;  %v5728_v61 = vmax.f32 %v2310_v20, %v2326_v7  ;;  %v6633_v20 = vld [vmem:[#allocation13_spill] sm:$0xff]  ;;  %v1066_v7 = vpop.permute.xlu0 %1065 }
 0x2f3   : > { %2376 = vmax.xlane.f32.xlu0 %v5714_v5  ;;  %v1720_v52 = vsub.f32 %v6633_v20, %v5606_v9  ;;  %v1044_v55 = vld [vmem:[#allocation4 + $0x10] sm:$0xff]  ;;  %4303 = vpow2.f32 %v1739_v42 }
 0x2f4   : > { %2398 = vmax.xlane.f32.xlu1 %v5719_v33  ;;  %v2334_v45 = vmul.f32 0.2, %v2318_v32  ;;  %v1140_v34 = vmul.f32 %v5519_v23, %v1044_v55 }
 0x2f5   : > { %v2259_v63 = vpop.permute.xlu1 %2258  ;;  %v1743_v14 = vmul.f32 1.442695, %v1720_v52 }
 0x2f6   : > { %v2312_v16 = vadd.f32 %v5622_v29, %v2259_v63  ;;  %v5734_v37 = vmax.f32 %v2318_v32, %v2334_v45  ;;  %v1042_v32 = vld [vmem:[#allocation4] sm:$0xff]  ;;  %v1081_v17 = vpop.permute.xlu0 %1080 }
 0x2f7   : > { %2392 = vmax.xlane.f32.xlu0 %v5721_v44  ;;  %v6634_v63 = vld [vmem:[#allocation15_spill] sm:$0xff]  ;;  %v1138_v39 = vmul.f32 %v5511_v27, %v1042_v32  ;;  %4305 = vpow2.f32 %v1743_v14 }
 0x2f8   : > { %v2328_v1 = vmul.f32 0.2, %v2312_v16  ;;  %v1722_v45 = vsub.f32 %v6634_v63, %v5611_v38  ;;  %v4300_v9 = vpop.eup %4299  ;;  %v1046_v63 = vld [vmem:[#allocation4 + $0x20] sm:$0xff] }
 0x2f9   : > { %v2299_v51 = vpop.permute.xlu1 %2298  ;;  %v5757_v31 = vmul.f32 %v4300_v9, %v5469_v0  ;;  %v1142_v9 = vmul.f32 %v1081_v17, %v1046_v63 }
 0x2fa   : > { %v2320_v35 = vadd.f32 %v5622_v29, %v2299_v51  ;;  %v5740_v46 = vmax.f32 %v2312_v16, %v2328_v1  ;;  %v1043_v16 = vld [vmem:[#allocation4 + $0x8] sm:$0xff]  ;;  %v1747_v48 = vmul.f32 1.442695, %v1722_v45  ;;  %v1049_v45 = vld [vmem:[#allocation4 + $0x38] sm:$0xff] }
 0x2fb   : > { %2380 = vmax.xlane.f32.xlu0 %v5728_v61  ;;  %v4302_v52 = vpop.eup %4301 }
 0x2fc   : > { %v2336_v10 = vmul.f32 0.2, %v2320_v35  ;;  %4307 = vpow2.f32 %v1747_v48  ;;  %v5761_v32 = vmul.f32 %v4302_v52, %v5472_v15 }
 0x2fe   : > { %v5745_v29 = vmax.f32 %v2320_v35, %v2336_v10  ;;  %v1139_v35 = vmul.f32 %v1066_v7, %v1043_v16  ;;  %v6635_v10 = vld [vmem:[#allocation17_spill] sm:$0xff]  ;;  %v1091_v7 = vpop.permute.xlu0 %1090 }
 0x2ff   : > { %2396 = vmax.xlane.f32.xlu0 %v5734_v37  ;;  %v1724_v38 = vsub.f32 %v6635_v10, %v5616_v18  ;;  %v4304_v18 = vpop.eup %4303 }
 0x301   : > { %v1751_v55 = vmul.f32 1.442695, %v1724_v38  ;;  %v4306_v14 = vpop.eup %4305 }
 0x302   : > { %v1101_v16 = vpop.permute.xlu0 %1100 }
 0x303   : > { %2384 = vmax.xlane.f32.xlu0 %v5740_v46  ;;  %4309 = vpow2.f32 %v1751_v55 }
 0x305   : > { %v4043_v21 = vpop.f32.mrb[0].mxu0 }
 0x306   : > { %v1325_v51 = vadd.f32 %v4043_v21, %v1140_v34  ;;  %v1260_v1 = vpop.f32.mrb[1].mxu0  ;;  %v5765_v34 = vmul.f32 %v4304_v18, %v5484_v26  ;;  %v1144_v21 = vmul.f32 %v1091_v7, %v1048_v22  ;;  %v1050_v7 = vld [vmem:[#allocation4 + $0x40] sm:$0xff]  ;;  %v1053_v18 = vld [vmem:[#allocation4 + $0x58] sm:$0xff] }
 0x307   : > { %v1323_v49 = vadd.f32 %v1260_v1, %v1138_v39  ;;  %2400 = vmax.xlane.f32.xlu0 %v5745_v29  ;;  %v4044_v23 = vpop.f32.mrb[2].mxu0  ;;  %v1047_v39 = vld [vmem:[#allocation4 + $0x28] sm:$0xff]  ;;  %v4308_v1 = vpop.eup %4307 }
 0x308   : > { %1341 = vst [vmem:[#allocation4 + $0x10] sm:$0xff] %v1325_v51  ;;  %v1326_v42 = vadd.f32 %v4044_v23, %v1141_v54  ;;  %v1263_v27 = vpop.f32.mrb[3].mxu0  ;;  %v5769_v51 = vmul.f32 %v4306_v14, %v5494_v12  ;;  %v1143_v48 = vmul.f32 %v5533_v19, %v1047_v39  ;;  %v5775_v52 = vmul.f32 %v4308_v1, %v5504_v2  ;;  %v1051_v14 = vld [vmem:[#allocation4 + $0x48] sm:$0xff] }
 0x309   : > { %1339 = vst [vmem:[#allocation4] sm:$0xff] %v1323_v49  ;;  %v1324_v20 = vadd.f32 %v1263_v27, %v1139_v35  ;;  %v1145_v35 = vmul.f32 %v5540_v59, %v1049_v45  ;;  %v1052_v59 = vld [vmem:[#allocation4 + $0x50] sm:$0xff]  ;;  %v1146_v45 = vmul.f32 %v1101_v16, %v1050_v7  ;;  %v1147_v1 = vmul.f32 %v5542_v58, %v1051_v14  ;;  %v1055_v16 = vld [vmem:[#allocation4 + $0x68] sm:$0xff] }
 0x30a   : > { %1342 = vst [vmem:[#allocation4 + $0x18] sm:$0xff] %v1326_v42 }
 0x30b   : > { %1340 = vst [vmem:[#allocation4 + $0x8] sm:$0xff] %v1324_v20  ;;  %1812 = vadd.xlane.f32.xlu0 %v5757_v31  ;;  %v1111_v20 = vpop.permute.xlu0 %1110 }
 0x30c   : > { %v1148_v63 = vmul.f32 %v1111_v20, %v1052_v59  ;;  %v1057_v20 = vld [vmem:[#allocation4 + $0x78] sm:$0xff] }
 0x30d   : > { %v4310_v55 = vpop.eup %4309  ;;  %v1153_v58 = vmul.f32 %v5552_v40, %v1057_v20 }
 0x30e   : > { %v5779_v19 = vmul.f32 %v4310_v55, %v5515_v53 }
 0x30f   : > { %1816 = vadd.xlane.f32.xlu0 %v5761_v32  ;;  %v1121_v22 = vpop.permute.xlu0 %1120 }
 0x313   : > { %1820 = vadd.xlane.f32.xlu0 %v5765_v34 }
 0x315   : > { %v4047_v54 = vpop.f32.mrb[4].mxu0 }
 0x316   : > { %v1329_v49 = vadd.f32 %v4047_v54, %v1144_v21  ;;  %v1276_v23 = vpop.f32.mrb[5].mxu0  ;;  %v1149_v21 = vmul.f32 %v5544_v6, %v1053_v18  ;;  %v5784_v6 = vld [vmem:[#allocation2 + $0x100] sm:$0xff] }
 0x317   : > { %v1327_v10 = vadd.f32 %v1276_v23, %v1142_v9  ;;  %1824 = vadd.xlane.f32.xlu0 %v5769_v51  ;;  %v4048_v38 = vpop.f32.mrb[6].mxu0 }
 0x318   : > { %1345 = vst [vmem:[#allocation4 + $0x30] sm:$0xff] %v1329_v49  ;;  %v1330_v42 = vadd.f32 %v4048_v38, %v1145_v35  ;;  %v1279_v27 = vpop.f32.mrb[7].mxu0  ;;  %v1131_v38 = vpop.permute.xlu0 %1130 }
 0x319   : > { %1343 = vst [vmem:[#allocation4 + $0x20] sm:$0xff] %v1327_v10  ;;  %v1328_v17 = vadd.f32 %v1279_v27, %v1143_v48  ;;  %v1056_v10 = vld [vmem:[#allocation4 + $0x70] sm:$0xff]  ;;  %v1054_v27 = vld [vmem:[#allocation4 + $0x60] sm:$0xff] }
 0x31a   : > { %1346 = vst [vmem:[#allocation4 + $0x38] sm:$0xff] %v1330_v42  ;;  %v1150_v55 = vmul.f32 %v1121_v22, %v1054_v27 }
 0x31b   : > { %1344 = vst [vmem:[#allocation4 + $0x28] sm:$0xff] %v1328_v17  ;;  %1828 = vadd.xlane.f32.xlu0 %v5775_v52  ;;  %v1152_v17 = vmul.f32 %v1131_v38, %v1056_v10  ;;  %v5805_v10 = vld [vmem:[#allocation2 + $0x150] sm:$0xff] }
 0x31c   : > { %6639 = vst [vmem:[#allocation13_spill] sm:$0xff] %v5805_v10 }
 0x31f   : > { %1832 = vadd.xlane.f32.xlu0 %v5779_v19 }
 0x321   : > { %v4051_v39 = vpop.f32.mrb[8].mxu0 }
 0x322   : > { %v1333_v9 = vadd.f32 %v4051_v39, %v1148_v63  ;;  %v1292_v54 = vpop.f32.mrb[9].mxu0  ;;  %v1151_v63 = vmul.f32 %v5546_v8, %v1055_v16 }
 0x323   : > { %v1331_v35 = vadd.f32 %v1292_v54, %v1146_v45  ;;  %v4052_v49 = vpop.f32.mrb[10].mxu0 }
 0x324   : > { %1349 = vst [vmem:[#allocation4 + $0x50] sm:$0xff] %v1333_v9  ;;  %v1334_v23 = vadd.f32 %v4052_v49, %v1149_v21  ;;  %v1295_v48 = vpop.f32.mrb[11].mxu0 }
 0x325   : > { %1347 = vst [vmem:[#allocation4 + $0x40] sm:$0xff] %v1331_v35  ;;  %v1332_v42 = vadd.f32 %v1295_v48, %v1147_v1  ;;  %v5791_v1 = vld [vmem:[#allocation2 + $0x140] sm:$0xff]  ;;  %v5798_v35 = vld [vmem:[#allocation2 + $0x110] sm:$0xff]  ;;  %v960_v48 = vld [vmem:[#allocation3 + $0x78] sm:$0xff] }
 0x326   : > { %1350 = vst [vmem:[#allocation4 + $0x58] sm:$0xff] %v1334_v23  ;;  %6636 = vst [vmem:[#allocation8_spill] sm:$0xff] %v5791_v1 }
 0x327   : > { %1348 = vst [vmem:[#allocation4 + $0x48] sm:$0xff] %v1332_v42  ;;  %6638 = vst [vmem:[#allocation11_spill] sm:$0xff] %v5798_v35  ;;  %v976_v42 = vmul.f32 %v5439_v41, %v960_v48 }
 0x329   : > { %v4055_v59 = vpop.f32.mrb[12].mxu0 }
 0x32a   : > { %v1337_v7 = vadd.f32 %v4055_v59, %v1152_v17  ;;  %v2371_v18 = vpop.xlane.xlu1 %2370  ;;  %v1308_v14 = vpop.f32.mrb[13].mxu0  ;;  %v5813_v17 = vld [vmem:[#allocation2 + $0x120] sm:$0xff] }
 0x32b   : > { %v5789_v45 = vmax.f32 %v5784_v6, %v2371_v18  ;;  %v1335_v39 = vadd.f32 %v1308_v14, %v1150_v55  ;;  %v4056_v21 = vpop.f32.mrb[14].mxu0  ;;  %6641 = vst [vmem:[#allocation17_spill] sm:$0xff] %v5813_v17  ;;  %v6642_v55 = vld [vmem:[#allocation10_spill] sm:$0xff] }
 0x32c   : > { %1353 = vst [vmem:[#allocation4 + $0x70] sm:$0xff] %v1337_v7  ;;  %v1338_v9 = vadd.f32 %v4056_v21, %v1153_v58  ;;  %v1311_v54 = vpop.f32.mrb[15].mxu0  ;;  %v1715_v59 = vsub.f32 %v6642_v55, %v5565_v11  ;;  %v6643_v7 = vld [vmem:[#allocation12_spill] sm:$0xff]  ;;  %v6645_v21 = vld [vmem:[#allocation7_spill] sm:$0xff]  ;;  %v6646_v11 = vld [vmem:[#allocation14_spill] sm:$0xff] }
 0x32d   : > { %3021 = vst.msk [vmem:[#allocation2 + $0x100] sm:$0xff] %vm1025_vm1, %v5789_v45  ;;  %1351 = vst [vmem:[#allocation4 + $0x60] sm:$0xff] %v1335_v39  ;;  %v1336_v40 = vadd.f32 %v1311_v54, %v1151_v63  ;;  %v1717_v18 = vsub.f32 %v6643_v7, %v5583_v36  ;;  %v6647_v36 = vld [vmem:[#allocation16_spill] sm:$0xff] }
 0x32e   : > { %1354 = vst [vmem:[#allocation4 + $0x78] sm:$0xff] %v1338_v9  ;;  %v2387_v22 = vpop.xlane.xlu1 %2386  ;;  %v1733_v14 = vmul.f32 1.442695, %v1715_v59 }
 0x32f   : > { %1352 = vst [vmem:[#allocation4 + $0x68] sm:$0xff] %v1336_v40  ;;  %v5796_v8 = vmax.f32 %v5791_v1, %v2387_v22  ;;  %v1737_v63 = vmul.f32 1.442695, %v1717_v18  ;;  %v1719_v40 = vsub.f32 %v6646_v11, %v5601_v62 }
 0x330   : > { %4311 = vpow2.f32 %v1733_v14 }
 0x331   : > { %6637 = vst [vmem:[#allocation9_spill] sm:$0xff] %v5796_v8  ;;  %3029 = vst.msk [vmem:[#allocation2 + $0x140] sm:$0xff] %vm1025_vm1, %v5796_v8  ;;  %4313 = vpow2.f32 %v1737_v63 }
 0x332   : > { %v2375_v49 = vpop.xlane.xlu1 %2374 }
 0x333   : > { %v5803_v23 = vmax.f32 %v5798_v35, %v2375_v49 }
 0x335   : > { %3023 = vst.msk [vmem:[#allocation2 + $0x110] sm:$0xff] %vm1025_vm1, %v5803_v23 }
 0x336   : > { %v2391_v38 = vpop.xlane.xlu1 %2390 }
 0x337   : > { %v5811_v27 = vmax.f32 %v5805_v10, %v2391_v38  ;;  %v1008_v20 = vpop.xlane.xlu0 %1007  ;;  %v1741_v38 = vmul.f32 1.442695, %v1719_v40 }
 0x338   : > { %v1024_v16 = vadd.f32 %v1008_v20, %v976_v42  ;;  %v6648_v20 = vld [vmem:[#allocation18_spill] sm:$0xff] }
 0x339   : > { %6640 = vst [vmem:[#allocation15_spill] sm:$0xff] %v5811_v27  ;;  %3031 = vst.msk [vmem:[#allocation2 + $0x150] sm:$0xff] %vm1025_vm1, %v5811_v27 }
 0x33a   : > { %1041 = vst.msk [vmem:[#allocation3 + $0x78] sm:$0xff] %vm1025_vm1, %v1024_v16  ;;  %v2379_v58 = vpop.xlane.xlu1 %2378  ;;  %v4312_v55 = vpop.eup %4311 }
 0x33b   : > { %v5823_v41 = vmax.f32 %v5813_v17, %v2379_v58  ;;  %v4314_v59 = vpop.eup %4313  ;;  %v1763_v62 = vmul.f32 %v4312_v55, %v5466_v3  ;;  %v6698_v17 = vld [vmem:[#allocation33_spill] sm:$0xff] }
 0x33d   : > { %6644 = vst [vmem:[#allocation10_spill] sm:$0xff] %v5823_v41  ;;  %3025 = vst.msk [vmem:[#allocation2 + $0x120] sm:$0xff] %vm1025_vm1, %v5823_v41 }
 0x33f   : > { %v1636_v39 = vpop.permute.xlu0 %1635 }
 0x340   : > { %v1713_v9 = vsub.f32 %v6645_v21, %v1636_v39  ;;  %v1765_v39 = vmul.f32 %v4314_v59, %v5482_v50  ;;  %v6649_v21 = vld [vmem:[#allocation20_spill] sm:$0xff] }
 0x342   : > { %v1729_v54 = vmul.f32 1.442695, %v1713_v9  ;;  %v1989_v11 = vpack.c.bf16 %v5765_v34, %v1765_v39  ;;  %v6652_v34 = vld [vmem:[#allocation54_spill] sm:$0xff] }
 0x343   : > { %v1676_v22 = vpop.permute.xlu0 %1675 }
 0x344   : > { %4315 = vpow2.f32 %v1729_v54  ;;  %v1721_v49 = vsub.f32 %v6647_v36, %v1676_v22  ;;  %v1988_v54 = vpack.c.bf16 %v5761_v32, %v1763_v62 }
 0x346   : > { %v1745_v48 = vmul.f32 1.442695, %v1721_v49  ;;  %v6650_v49 = vld [vmem:[#allocation53_spill] sm:$0xff] }
 0x347   : > { %v1686_v42 = vpop.permute.xlu0 %1685 }
 0x348   : > { %v1723_v16 = vsub.f32 %v6648_v20, %v1686_v42  ;;  %4317 = vpow2.f32 %v1745_v48 }
 0x349   : > { %4319 = vpow2.f32 %v1741_v38  ;;  %v6651_v38 = vld [vmem:[#allocation52_spill] sm:$0xff] }
 0x34a   : > { %v1749_v58 = vmul.f32 1.442695, %v1723_v16 }
 0x34b   : > { %v1696_v18 = vpop.permute.xlu0 %1695 }
 0x34c   : > { %4321 = vpow2.f32 %v1749_v58  ;;  %v1725_v9 = vsub.f32 %v6649_v21, %v1696_v18  ;;  %v6653_v58 = vld [vmem:[#allocation55_spill] sm:$0xff]  ;;  %v5864_v21 = vld [vmem:[#allocation2 + $0x130] sm:$0xff] }
 0x34d   : > { %v5851_v18 = vld [vmem:[#allocation2 + $0x160] sm:$0xff]  ;;  %6658 = vst [vmem:[#allocation16_spill] sm:$0xff] %v5864_v21 }
 0x34e   : > { %v4316_v7 = vpop.eup %4315  ;;  %v1753_v36 = vmul.f32 1.442695, %v1725_v9  ;;  %6654 = vst [vmem:[#allocation12_spill] sm:$0xff] %v5851_v18 }
 0x34f   : > { %v1761_v14 = vmul.f32 %v4316_v7, %v5462_v4 }
 0x350   : > { %4323 = vpow2.f32 %v1753_v36 }
 0x351   : > { %1810 = vadd.xlane.f32.xlu1 %v1761_v14  ;;  %v1987_v63 = vpack.c.bf16 %v5757_v31, %v1761_v14 }
 0x352   : > { %v4318_v40 = vpop.eup %4317 }
 0x353   : > { %4073 = vmatprep.mubr.bf16.mxu1 %v1987_v63  ;;  %v4320_v22 = vpop.eup %4319  ;;  %v1769_v48 = vmul.f32 %v4318_v40, %v6650_v49 }
 0x354   : > { %4074 = vmatmul.mubr.bf16.vlgmr.msra.gmra.mrb[0].mxu1 %v1988_v54  ;;  %v1767_v42 = vmul.f32 %v4320_v22, %v6651_v38  ;;  %v5875_v22 = vld [vmem:[#allocation2 + $0x118] sm:$0xff] }
 0x355   : > { %1814 = vadd.xlane.f32.xlu1 %v1763_v62  ;;  %4077 = vmatprep.mubr.bf16.mxu1 %v1989_v11  ;;  %v1991_v32 = vpack.c.bf16 %v5775_v52, %v1769_v48  ;;  %6661 = vst [vmem:[#allocation53_spill] sm:$0xff] %v5875_v22 }
 0x356   : > { %v1990_v31 = vpack.c.bf16 %v5769_v51, %v1767_v42  ;;  %v4322_v20 = vpop.eup %4321  ;;  %v5849_v51 = vld [vmem:[#allocation2 + $0x108] sm:$0xff] }
 0x357   : > { %v1771_v16 = vmul.f32 %v4322_v20, %v6652_v34 }
 0x359   : > { %1818 = vadd.xlane.f32.xlu1 %v1765_v39  ;;  %v1992_v55 = vpack.c.bf16 %v5779_v19, %v1771_v16  ;;  %v6656_v19 = vld [vmem:[#allocation46_spill] sm:$0xff]  ;;  %v5860_v39 = vld [vmem:[#allocation2 + $0x148] sm:$0xff] }
 0x35a   : > { %v4324_v59 = vpop.eup %4323  ;;  %6657 = vst [vmem:[#allocation14_spill] sm:$0xff] %v5860_v39 }
 0x35b   : > { %v5846_v7 = vmul.f32 %v4324_v59, %v6653_v58 }
 0x35c   : > { %4078 = vmatmul.mubr.bf16.gmra.mrb[4].mxu1 %v1990_v31 }
 0x35d   : > { %1822 = vadd.xlane.f32.xlu1 %v1767_v42  ;;  %4081 = vmatprep.mubr.bf16.mxu1 %v1991_v32 }
 0x361   : > { %1826 = vadd.xlane.f32.xlu1 %v1769_v48  ;;  %v5881_v48 = vld [vmem:[#allocation2 + $0x170] sm:$0xff] }
 0x362   : > { %6662 = vst [vmem:[#allocation52_spill] sm:$0xff] %v5881_v48 }
 0x364   : > { %4082 = vmatmul.mubr.bf16.gmra.mrb[8].mxu1 %v1992_v55 }
 0x365   : > { %1830 = vadd.xlane.f32.xlu1 %v1771_v16  ;;  %v5892_v16 = vld [vmem:[#allocation2 + $0x158] sm:$0xff] }
 0x366   : > { %6665 = vst [vmem:[#allocation46_spill] sm:$0xff] %v5892_v16 }
 0x369   : > { %1834 = vadd.xlane.f32.xlu1 %v5846_v7 }
 0x378   : > { %v2373_v52 = vpop.xlane.xlu0 %2372 }
 0x379   : > { %v5854_v14 = vmax.f32 %v5849_v51, %v2373_v52  ;;  %v2395_v62 = vpop.xlane.xlu1 %2394 }
 0x37a   : > { %v5857_v63 = vmax.f32 %v5851_v18, %v2395_v62  ;;  %1700 = vperm.xlu1 %4210, %v6656_v19   ;;  %v6667_v62 = vld [vmem:[#allocation25_spill] sm:$0xff] }
 0x37b   : > { %3022 = vst.msk [vmem:[#allocation2 + $0x108] sm:$0xff] %vm1025_vm1, %v5854_v14 }
 0x37c   : > { %6655 = vst [vmem:[#allocation7_spill] sm:$0xff] %v5857_v63  ;;  %3033 = vst.msk [vmem:[#allocation2 + $0x160] sm:$0xff] %vm1025_vm1, %v5857_v63  ;;  %v2389_v9 = vpop.xlane.xlu0 %2388 }
 0x37d   : > { %v5869_v54 = vmax.f32 %v5860_v39, %v2389_v9  ;;  %v2383_v11 = vpop.xlane.xlu1 %2382  ;;  %v6668_v9 = vld [vmem:[#allocation27_spill] sm:$0xff]  ;;  %v6673_v39 = vld [vmem:[#allocation28_spill] sm:$0xff] }
 0x37e   : > { %v5872_v40 = vmax.f32 %v5864_v21, %v2383_v11  ;;  %2468 = vperm.xlu1 %4210, %v5789_v45   ;;  %v6669_v11 = vsub.f32 %v6667_v62, %v6668_v9  ;;  %v5920_v9 = vld [vmem:[#allocation2 + $0x168] sm:$0xff] }
 0x37f   : > { %6659 = vst [vmem:[#allocation18_spill] sm:$0xff] %v5869_v54  ;;  %3030 = vst.msk [vmem:[#allocation2 + $0x148] sm:$0xff] %vm1025_vm1, %v5869_v54 }
 0x380   : > { %6660 = vst [vmem:[#allocation20_spill] sm:$0xff] %v5872_v40  ;;  %3027 = vst.msk [vmem:[#allocation2 + $0x130] sm:$0xff] %vm1025_vm1, %v5872_v40  ;;  %v2377_v42 = vpop.xlane.xlu0 %2376 }
 0x381   : > { %v5886_v31 = vmax.f32 %v5875_v22, %v2377_v42  ;;  %v2399_v20 = vpop.xlane.xlu1 %2398  ;;  %v1603_v42 = vmul.f32 1.442695, %v6669_v11 }
 0x382   : > { %v5889_v32 = vmax.f32 %v5881_v48, %v2399_v20  ;;  %2508 = vperm.xlu1 %4210, %v5796_v8   ;;  %v5907_v20 = vld [vmem:[#allocation2 + $0x128] sm:$0xff] }
 0x383   : > { %6663 = vst [vmem:[#allocation54_spill] sm:$0xff] %v5886_v31  ;;  %3024 = vst.msk [vmem:[#allocation2 + $0x118] sm:$0xff] %vm1025_vm1, %v5886_v31  ;;  %4325 = vpow2.f32 %v1603_v42  ;;  %v6678_v42 = vld [vmem:[#allocation32_spill] sm:$0xff] }
 0x384   : > { %6664 = vst [vmem:[#allocation55_spill] sm:$0xff] %v5889_v32  ;;  %3035 = vst.msk [vmem:[#allocation2 + $0x170] sm:$0xff] %vm1025_vm1, %v5889_v32  ;;  %v2393_v59 = vpop.xlane.xlu0 %2392 }
 0x385   : > { %v5901_v52 = vmax.f32 %v5892_v16, %v2393_v59  ;;  %6670 = vst [vmem:[#allocation25_spill] sm:$0xff] %v5907_v20  ;;  %v6672_v59 = vld [vmem:[#allocation26_spill] sm:$0xff] }
 0x386   : > { %2513 = vperm.xlu1 %4210, %v5869_v54   ;;  %v6674_v18 = vsub.f32 %v6672_v59, %v6673_v39  ;;  %6675 = vst [vmem:[#allocation26_spill] sm:$0xff] %v5920_v9 }
 0x387   : > { %6666 = vst [vmem:[#allocation61_spill] sm:$0xff] %v5901_v52  ;;  %3032 = vst.msk [vmem:[#allocation2 + $0x158] sm:$0xff] %vm1025_vm1, %v5901_v52 }
 0x388   : > { %v2381_v55 = vpop.xlane.xlu0 %2380  ;;  %v1607_v62 = vmul.f32 1.442695, %v6674_v18  ;;  %v5933_v18 = vld [vmem:[#allocation2 + $0x138] sm:$0xff] }
 0x389   : > { %v5914_v48 = vmax.f32 %v5907_v20, %v2381_v55  ;;  %v6677_v55 = vld [vmem:[#allocation30_spill] sm:$0xff] }
 0x38a   : > { %2483 = vperm.xlu1 %4210, %v5886_v31   ;;  %4327 = vpow2.f32 %v1607_v62  ;;  %v6679_v54 = vsub.f32 %v6677_v55, %v6678_v42  ;;  %6680 = vst [vmem:[#allocation30_spill] sm:$0xff] %v5933_v18  ;;  %v6683_v62 = vld [vmem:[#allocation36_spill] sm:$0xff]  ;;  %v6691_v31 = vld [vmem:[#allocation43_spill] sm:$0xff] }
 0x38b   : > { %6671 = vst [vmem:[#allocation27_spill] sm:$0xff] %v5914_v48  ;;  %3026 = vst.msk [vmem:[#allocation2 + $0x128] sm:$0xff] %vm1025_vm1, %v5914_v48 }
 0x38c   : > { %v2397_v36 = vpop.xlane.xlu0 %2396  ;;  %v1611_v39 = vmul.f32 1.442695, %v6679_v54  ;;  %v5946_v54 = vld [vmem:[#allocation2 + $0x178] sm:$0xff] }
 0x38d   : > { %v5927_v16 = vmax.f32 %v5920_v9, %v2397_v36  ;;  %v6682_v36 = vld [vmem:[#allocation34_spill] sm:$0xff]  ;;  %v5952_v59 = vpop.eup %4325 }
 0x38e   : > { %2523 = vperm.xlu1 %4210, %v5901_v52   ;;  %4329 = vpow2.f32 %v1611_v39  ;;  %v6684_v20 = vsub.f32 %v6682_v36, %v6683_v62  ;;  %6685 = vst [vmem:[#allocation34_spill] sm:$0xff] %v5946_v54  ;;  %v6687_v36 = vld [vmem:[#allocation38_spill] sm:$0xff] }
 0x38f   : > { %6676 = vst [vmem:[#allocation28_spill] sm:$0xff] %v5927_v16  ;;  %3034 = vst.msk [vmem:[#allocation2 + $0x168] sm:$0xff] %vm1025_vm1, %v5927_v16 }
 0x390   : > { %v2385_v11 = vpop.xlane.xlu0 %2384  ;;  %v1615_v55 = vmul.f32 1.442695, %v6684_v20  ;;  %v6688_v20 = vld [vmem:[#allocation40_spill] sm:$0xff] }
 0x391   : > { %v5940_v10 = vmax.f32 %v5933_v18, %v2385_v11  ;;  %v1779_v11 = vld [vmem:[#allocation3 + $0x88] sm:$0xff]  ;;  %v6689_v62 = vsub.f32 %v6687_v36, %v6688_v20 }
 0x392   : > { %2493 = vperm.xlu1 %4210, %v5914_v48   ;;  %4331 = vpow2.f32 %v1615_v55  ;;  %v1795_v18 = vmul.f32 %v5952_v59, %v1779_v11  ;;  %v6690_v55 = vld [vmem:[#allocation42_spill] sm:$0xff]  ;;  %v1783_v11 = vld [vmem:[#allocation3 + $0xa8] sm:$0xff] }
 0x393   : > { %6681 = vst [vmem:[#allocation32_spill] sm:$0xff] %v5940_v10  ;;  %3028 = vst.msk [vmem:[#allocation2 + $0x138] sm:$0xff] %vm1025_vm1, %v5940_v10  ;;  %v1619_v52 = vmul.f32 1.442695, %v6689_v62  ;;  %v6692_v36 = vsub.f32 %v6690_v55, %v6691_v31 }
 0x394   : > { %v2401_v9 = vpop.xlane.xlu0 %2400  ;;  %v5966_v48 = vpop.eup %4327 }
 0x395   : > { %v5955_v39 = vmax.f32 %v5946_v54, %v2401_v9  ;;  %v1781_v9 = vld [vmem:[#allocation3 + $0x98] sm:$0xff]  ;;  %4333 = vpow2.f32 %v1619_v52  ;;  %v1623_v20 = vmul.f32 1.442695, %v6692_v36 }
 0x396   : > { %2533 = vperm.xlu1 %4210, %v5927_v16   ;;  %v1797_v62 = vmul.f32 %v5966_v48, %v1781_v9 }
 0x397   : > { %6686 = vst [vmem:[#allocation36_spill] sm:$0xff] %v5955_v39  ;;  %3036 = vst.msk [vmem:[#allocation2 + $0x178] sm:$0xff] %vm1025_vm1, %v5955_v39  ;;  %4335 = vpow2.f32 %v1623_v20 }
 0x398   : > { %v1813_v1 = vpop.xlane.xlu0 %1812  ;;  %v5974_v42 = vpop.eup %4329 }
 0x399   : > { %v1843_v8 = vadd.f32 %v1813_v1, %v1795_v18  ;;  %v1799_v1 = vmul.f32 %v5974_v42, %v1783_v11  ;;  %v1785_v18 = vld [vmem:[#allocation3 + $0xb8] sm:$0xff] }
 0x39a   : > { %2503 = vperm.xlu1 %4210, %v5940_v10  }
 0x39b   : > { %1859 = vst.msk [vmem:[#allocation3 + $0x88] sm:$0xff] %vm1025_vm1, %v1843_v8 }
 0x39c   : > { %v1817_v54 = vpop.xlane.xlu0 %1816  ;;  %v5979_v31 = vpop.eup %4331 }
 0x39d   : > { %v1845_v16 = vadd.f32 %v1817_v54, %v1797_v62  ;;  %v1801_v8 = vmul.f32 %v5979_v31, %v1785_v18  ;;  %v1787_v54 = vld [vmem:[#allocation3 + $0xc8] sm:$0xff] }
 0x39e   : > { %2543 = vperm.xlu1 %4210, %v5955_v39   ;;  %v1789_v39 = vld [vmem:[#allocation3 + $0xd8] sm:$0xff] }
 0x39f   : > { %1861 = vst.msk [vmem:[#allocation3 + $0x98] sm:$0xff] %vm1025_vm1, %v1845_v16  ;;  %v5983_v9 = vpop.eup %4333 }
 0x3a0   : > { %v1821_v52 = vpop.xlane.xlu0 %1820  ;;  %v1803_v16 = vmul.f32 %v5983_v9, %v1787_v54  ;;  %v6696_v54 = vld [vmem:[#allocation31_spill] sm:$0xff] }
 0x3a1   : > { %v1847_v55 = vadd.f32 %v1821_v52, %v1799_v1  ;;  %v5987_v62 = vpop.eup %4335 }
 0x3a2   : > { %6693 = vst [vmem:[#allocation38_spill] sm:$0xff] %v5987_v62  ;;  %v1805_v1 = vmul.f32 %v5987_v62, %v1789_v39  ;;  %v6701_v39 = vld [vmem:[#allocation37_spill] sm:$0xff]  ;;  %v6702_v62 = vld [vmem:[#allocation39_spill] sm:$0xff] }
 0x3a3   : > { %1863 = vst.msk [vmem:[#allocation3 + $0xa8] sm:$0xff] %vm1025_vm1, %v1847_v55  ;;  %v6694_v55 = vld [vmem:[#allocation24_spill] sm:$0xff] }
 0x3a4   : > { %v1825_v36 = vpop.xlane.xlu0 %1824 }
 0x3a5   : > { %v1849_v20 = vadd.f32 %v1825_v36, %v1801_v8  ;;  %v1585_v8 = vsub.f32 %v6694_v55, %v5261_v24  ;;  %v1778_v55 = vld [vmem:[#allocation3 + $0x80] sm:$0xff] }
 0x3a7   : > { %1865 = vst.msk [vmem:[#allocation3 + $0xb8] sm:$0xff] %vm1025_vm1, %v1849_v20  ;;  %v1601_v36 = vmul.f32 1.442695, %v1585_v8  ;;  %v6695_v20 = vld [vmem:[#allocation29_spill] sm:$0xff] }
 0x3a8   : > { %v1829_v11 = vpop.xlane.xlu0 %1828  ;;  %v6697_v22 = vsub.f32 %v6695_v20, %v6696_v54  ;;  %v1780_v54 = vld [vmem:[#allocation3 + $0x90] sm:$0xff] }
 0x3a9   : > { %v1851_v10 = vadd.f32 %v1829_v11, %v1803_v16  ;;  %4337 = vpow2.f32 %v1601_v36  ;;  %v6699_v16 = vld [vmem:[#allocation35_spill] sm:$0xff] }
 0x3aa   : > { %v1605_v21 = vmul.f32 1.442695, %v6697_v22  ;;  %v6700_v11 = vsub.f32 %v6698_v17, %v6699_v16  ;;  %v6705_v22 = vld [vmem:[#allocation44_spill] sm:$0xff] }
 0x3ab   : > { %1867 = vst.msk [vmem:[#allocation3 + $0xc8] sm:$0xff] %vm1025_vm1, %v1851_v10 }
 0x3ac   : > { %v1833_v52 = vpop.xlane.xlu0 %1832  ;;  %4339 = vpow2.f32 %v1605_v21  ;;  %v1609_v10 = vmul.f32 1.442695, %v6700_v11  ;;  %v1595_v21 = vsub.f32 %v6705_v22, %v5387_v57  ;;  %v6706_v11 = vld [vmem:[#allocation47_spill] sm:$0xff]  ;;  %v1784_v22 = vld [vmem:[#allocation3 + $0xb0] sm:$0xff] }
 0x3ad   : > { %v1853_v18 = vadd.f32 %v1833_v52, %v1805_v1  ;;  %v6703_v1 = vsub.f32 %v6701_v39, %v6702_v62  ;;  %v1782_v57 = vld [vmem:[#allocation3 + $0xa0] sm:$0xff] }
 0x3ae   : > { %4341 = vpow2.f32 %v1609_v10  ;;  %v1621_v62 = vmul.f32 1.442695, %v1595_v21 }
 0x3af   : > { %1869 = vst.msk [vmem:[#allocation3 + $0xd8] sm:$0xff] %vm1025_vm1, %v1853_v18  ;;  %v1613_v52 = vmul.f32 1.442695, %v6703_v1  ;;  %v6704_v18 = vld [vmem:[#allocation41_spill] sm:$0xff] }
 0x3b0   : > { %v1593_v35 = vsub.f32 %v6704_v18, %v5366_v56  ;;  %v1597_v56 = vsub.f32 %v6706_v11, %v5406_v28 }
 0x3b1   : > { %4343 = vpow2.f32 %v1613_v52 }
 0x3b2   : > { %v1617_v8 = vmul.f32 1.442695, %v1593_v35  ;;  %v1625_v52 = vmul.f32 1.442695, %v1597_v56 }
 0x3b3   : > { %v6005_v24 = vpop.eup %4337 }
 0x3b4   : > { %v1794_v36 = vmul.f32 %v6005_v24, %v1778_v55  ;;  %4345 = vpow2.f32 %v1617_v8 }
 0x3b5   : > { %4347 = vpow2.f32 %v1621_v62 }
 0x3b6   : > { %v6010_v17 = vpop.eup %4339  ;;  %4349 = vpow2.f32 %v1625_v52 }
 0x3b7   : > { %v1796_v10 = vmul.f32 %v6010_v17, %v1780_v54  ;;  %v1786_v54 = vld [vmem:[#allocation3 + $0xc0] sm:$0xff] }
 0x3b8   : > { %v6016_v35 = vpop.eup %4341 }
 0x3b9   : > { %v1798_v18 = vmul.f32 %v6016_v35, %v1782_v57 }
 0x3bb   : > { %v6020_v55 = vpop.eup %4343 }
 0x3bc   : > { %v1800_v21 = vmul.f32 %v6020_v55, %v1784_v22 }
 0x3de   : > { %v1811_v20 = vpop.xlane.xlu1 %1810 }
 0x3df   : > { %v1842_v16 = vadd.f32 %v1811_v20, %v1794_v36  ;;  %v6024_v36 = vpop.eup %4345 }
 0x3e0   : > { %v1802_v62 = vmul.f32 %v6024_v36, %v1786_v54  ;;  %v6028_v11 = vpop.eup %4347  ;;  %v6709_v54 = vld [vmem:[#allocation19_spill] sm:$0xff] }
 0x3e1   : > { %1858 = vst.msk [vmem:[#allocation3 + $0x80] sm:$0xff] %vm1025_vm1, %v1842_v16  ;;  %6707 = vst [vmem:[#allocation40_spill] sm:$0xff] %v6028_v11 }
 0x3e2   : > { %v1815_v39 = vpop.xlane.xlu1 %1814 }
 0x3e3   : > { %v1844_v1 = vadd.f32 %v1815_v39, %v1796_v10  ;;  %v1788_v10 = vld [vmem:[#allocation3 + $0xd0] sm:$0xff] }
 0x3e4   : > { %v1804_v57 = vmul.f32 %v6028_v11, %v1788_v10  ;;  %v6710_v10 = vld [vmem:[#allocation56_spill] sm:$0xff] }
 0x3e5   : > { %1860 = vst.msk [vmem:[#allocation3 + $0x90] sm:$0xff] %vm1025_vm1, %v1844_v1  ;;  %v6032_v1 = vpop.eup %4349 }
 0x3e6   : > { %v1819_v8 = vpop.xlane.xlu1 %1818  ;;  %6708 = vst [vmem:[#allocation42_spill] sm:$0xff] %v6032_v1 }
 0x3e7   : > { %v1846_v28 = vadd.f32 %v1819_v8, %v1798_v18  ;;  %v1790_v18 = vld [vmem:[#allocation3 + $0xe0] sm:$0xff] }
 0x3e8   : > { %v1806_v22 = vmul.f32 %v6032_v1, %v1790_v18  ;;  %v6711_v18 = vld [vmem:[#allocation51_spill] sm:$0xff] }
 0x3e9   : > { %1862 = vst.msk [vmem:[#allocation3 + $0xa0] sm:$0xff] %vm1025_vm1, %v1846_v28 }
 0x3ea   : > { %v1823_v20 = vpop.xlane.xlu1 %1822 }
 0x3eb   : > { %v1848_v16 = vadd.f32 %v1823_v20, %v1800_v21 }
 0x3ed   : > { %1864 = vst.msk [vmem:[#allocation3 + $0xb0] sm:$0xff] %vm1025_vm1, %v1848_v16 }
 0x3ee   : > { %v1827_v56 = vpop.xlane.xlu1 %1826 }
 0x3ef   : > { %v1850_v39 = vadd.f32 %v1827_v56, %v1802_v62 }
 0x3f1   : > { %1866 = vst.msk [vmem:[#allocation3 + $0xc0] sm:$0xff] %vm1025_vm1, %v1850_v39 }
 0x3f2   : > { %v1831_v52 = vpop.xlane.xlu1 %1830 }
 0x3f3   : > { %v1852_v8 = vadd.f32 %v1831_v52, %v1804_v57  ;;  %v4227_v52 = vld [vmem:[%s4735_s29 + $0x8] ss:$12 sps:$4 sm:$0xff]  }
 0x3f4   : > { %4089 = vmatprep.subr.bf16.mxu0 %v4227_v52  ;;  %4121 = vmatprep.subr.bf16.mxu1 %v4227_v52 }
 0x3f5   : > { %1868 = vst.msk [vmem:[#allocation3 + $0xd0] sm:$0xff] %vm1025_vm1, %v1852_v8  ;;  %4090 = vmatpush3.bf16.msra.mxu0 %v4227_v52  ;;  %4129 = vmatpush3.bf16.msra.mxu1 %v4227_v52  ;;  %v4228_v8 = vld [vmem:[%s4735_s29 + $0x20] ss:$12 sps:$4 sm:$0xff]  }
 0x3f6   : > { %v1835_v28 = vpop.xlane.xlu1 %1834  ;;  %4091 = vmatprep.subr.bf16.mxu0 %v4228_v8  ;;  %4122 = vmatprep.subr.bf16.mxu1 %v4228_v8 }
 0x3f7   : > { %v1854_v21 = vadd.f32 %v1835_v28, %v1806_v22  ;;  %v6712_v22 = vld [vmem:[#allocation49_spill] sm:$0xff] }
 0x3f9   : > { %1870 = vst.msk [vmem:[#allocation3 + $0xe0] sm:$0xff] %vm1025_vm1, %v1854_v21  ;;  %4092 = vmatpush3.bf16.msra.mxu0 %v4228_v8  ;;  %4130 = vmatpush3.bf16.msra.mxu1 %v4228_v8  ;;  %v4232_v8 = vld [vmem:[%s4735_s29 + $0x80] ss:$12 sps:$4 sm:$0xff]  }
 0x3fa   : > { %v1701_v20 = vpop.permute.xlu1 %1700 }
 0x3fb   : > { %v1726_v16 = vsub.f32 %v6709_v54, %v1701_v20  ;;  %v4229_v20 = vld [vmem:[%s4735_s29 + $0x38] ss:$12 sps:$4 sm:$0xff]  }
 0x3fc   : > { %4093 = vmatprep.subr.bf16.mxu0 %v4229_v20  ;;  %4123 = vmatprep.subr.bf16.mxu1 %v4229_v20 }
 0x3fd   : > { %v1755_v62 = vmul.f32 1.442695, %v1726_v16  ;;  %4094 = vmatpush3.bf16.msra.mxu0 %v4229_v20  ;;  %4131 = vmatpush3.bf16.msra.mxu1 %v4229_v20  ;;  %v4230_v16 = vld [vmem:[%s4735_s29 + $0x50] ss:$12 sps:$4 sm:$0xff]  }
 0x3fe   : > { %4095 = vmatprep.subr.bf16.mxu0 %v4230_v16  ;;  %4124 = vmatprep.subr.bf16.mxu1 %v4230_v16 }
 0x3ff   : > { %4351 = vpow2.f32 %v1755_v62 }
 0x401   : > { %4096 = vmatpush3.bf16.msra.mxu0 %v4230_v16  ;;  %4132 = vmatpush3.bf16.msra.mxu1 %v4230_v16 }
 0x409   : > { %v4352_v56 = vpop.eup %4351 }
 0x40a   : > { %v1774_v39 = vmul.f32 %v4352_v56, %v6710_v10 }
 0x40c   : > { %1836 = vadd.xlane.f32.xlu0 %v1774_v39  ;;  %v1993_v57 = vpack.c.bf16 %v1774_v39, %v5846_v7 }
 0x40e   : > { %4085 = vmatprep.mubr.bf16.mxu1 %v1993_v57  ;;  %v4231_v57 = vld [vmem:[%s4735_s29 + $0x68] ss:$12 sps:$4 sm:$0xff]  }
 0x40f   : > { %4097 = vmatprep.subr.bf16.mxu0 %v4231_v57  ;;  %4125 = vmatprep.subr.bf16.mxu1 %v4231_v57 }
 0x410   : > { %4098 = vmatpush3.bf16.msra.mxu0 %v4231_v57  ;;  %4133 = vmatpush3.bf16.msra.mxu1 %v4231_v57  ;;  %v4234_v57 = vld [vmem:[%s4735_s29 + $0xb0] ss:$12 sps:$4 sm:$0xff]  }
 0x411   : > { %4099 = vmatprep.subr.bf16.mxu0 %v4232_v8  ;;  %4126 = vmatprep.subr.bf16.mxu1 %v4232_v8 }
 0x414   : > { %4100 = vmatpush3.bf16.msra.mxu0 %v4232_v8  ;;  %4134 = vmatpush3.bf16.msra.mxu1 %v4232_v8  ;;  %v6725_v8 = vld [vmem:[#allocation45_spill] sm:$0xff] }
 0x422   : > { %1705 = vperm.xlu0 %4209, %v6711_v18  }
 0x426   : > { %1710 = vperm.xlu0 %4209, %v6712_v22  }
 0x427   : > { %v6044_v28 = vpop.f32.mrb[0].mxu1 }
 0x428   : > { %6713 = vst [vmem:[#allocation43_spill] sm:$0xff] %v6044_v28  ;;  %v6046_v21 = vpop.f32.mrb[1].mxu1 }
 0x429   : > { %6714 = vst [vmem:[#allocation24_spill] sm:$0xff] %v6046_v21  ;;  %v6048_v7 = vpop.f32.mrb[2].mxu1 }
 0x42a   : > { %6715 = vst [vmem:[#allocation29_spill] sm:$0xff] %v6048_v7  ;;  %v6051_v54 = vpop.f32.mrb[3].mxu1  ;;  %2473 = vperm.xlu0 %4209, %v5854_v14  }
 0x42b   : > { %6716 = vst [vmem:[#allocation31_spill] sm:$0xff] %v6051_v54 }
 0x42e   : > { %2478 = vperm.xlu0 %4209, %v5803_v23  }
 0x42f   : > { %v6056_v62 = vpop.f32.mrb[4].mxu1 }
 0x430   : > { %6717 = vst [vmem:[#allocation33_spill] sm:$0xff] %v6056_v62  ;;  %v6058_v56 = vpop.f32.mrb[5].mxu1 }
 0x431   : > { %6718 = vst [vmem:[#allocation35_spill] sm:$0xff] %v6058_v56  ;;  %v6060_v39 = vpop.f32.mrb[6].mxu1 }
 0x432   : > { %6719 = vst [vmem:[#allocation37_spill] sm:$0xff] %v6060_v39  ;;  %v6063_v52 = vpop.f32.mrb[7].mxu1  ;;  %2518 = vperm.xlu0 %4209, %v5811_v27   ;;  %v4233_v39 = vld [vmem:[%s4735_s29 + $0x98] ss:$12 sps:$4 sm:$0xff]  }
 0x433   : > { %6720 = vst [vmem:[#allocation39_spill] sm:$0xff] %v6063_v52  ;;  %4101 = vmatprep.subr.bf16.mxu0 %v4233_v39  ;;  %4127 = vmatprep.subr.bf16.mxu1 %v4233_v39 }
 0x434   : > { %4102 = vmatpush3.bf16.msra.mxu0 %v4233_v39  ;;  %4135 = vmatpush3.bf16.msra.mxu1 %v4233_v39  ;;  %v1791_v39 = vld [vmem:[#allocation3 + $0xe8] sm:$0xff] }
 0x435   : > { %4103 = vmatprep.subr.bf16.mxu0 %v4234_v57  ;;  %4128 = vmatprep.subr.bf16.mxu1 %v4234_v57 }
 0x436   : > { %2488 = vperm.xlu0 %4209, %v5823_v41  }
 0x437   : > { %v6068_v20 = vpop.f32.mrb[8].mxu1 }
 0x438   : > { %6721 = vst [vmem:[#allocation41_spill] sm:$0xff] %v6068_v20  ;;  %v6070_v16 = vpop.f32.mrb[9].mxu1  ;;  %4104 = vmatpush3.bf16.msra.mxu0 %v4234_v57  ;;  %4136 = vmatpush3.bf16.msra.mxu1 %v4234_v57  ;;  %v1598_v20 = vsub.f32 %v6725_v8, %v6656_v19  ;;  %v6727_v8 = vld [vmem:[#allocation22_spill] sm:$0xff] }
 0x439   : > { %6722 = vst [vmem:[#allocation44_spill] sm:$0xff] %v6070_v16  ;;  %v6072_v62 = vpop.f32.mrb[10].mxu1  ;;  %v2469_v16 = vpop.permute.xlu1 %2468 }
 0x43a   : > { %6723 = vst [vmem:[#allocation47_spill] sm:$0xff] %v6072_v62  ;;  %v6075_v56 = vpop.f32.mrb[11].mxu1  ;;  %2528 = vperm.xlu0 %4209, %v5857_v63   ;;  %v1627_v62 = vmul.f32 1.442695, %v1598_v20  ;;  %v2546_v19 = vsub.f32 %v5626_v25, %v2469_v16 }
 0x43b   : > { %6724 = vst [vmem:[#allocation19_spill] sm:$0xff] %v6075_v56 }
 0x43c   : > { %4353 = vpow2.f32 %v1627_v62 }
 0x43d   : > { %v2509_v56 = vpop.permute.xlu1 %2508 }
 0x43e   : > { %2498 = vperm.xlu0 %4209, %v5872_v40   ;;  %v2554_v20 = vsub.f32 %v5629_v30, %v2509_v56  ;;  %v2562_v40 = vmul.f32 1.442695, %v2546_v19 }
 0x440   : > { %v2578_v41 = vmul.f32 1.442695, %v2554_v20 }
 0x441   : > { %v2514_v52 = vpop.permute.xlu1 %2513 }
 0x442   : > { %2538 = vperm.xlu0 %4209, %v5889_v32   ;;  %v2555_v57 = vsub.f32 %v5704_v43, %v2514_v52 }
 0x444   : > { %v2580_v1 = vmul.f32 1.442695, %v2555_v57 }
 0x445   : > { %v2484_v21 = vpop.permute.xlu1 %2483 }
 0x446   : > { %v6083_v28 = vpop.eup %4353  ;;  %v2549_v43 = vsub.f32 %v5714_v5, %v2484_v21 }
 0x447   : > { %6726 = vst [vmem:[#allocation56_spill] sm:$0xff] %v6083_v28  ;;  %v1807_v7 = vmul.f32 %v6083_v28, %v1791_v39 }
 0x449   : > { %v2524_v32 = vpop.permute.xlu1 %2523 }
 0x44a   : > { %v2557_v56 = vsub.f32 %v5721_v44, %v2524_v32  ;;  %v6731_v44 = vld [vmem:[#allocation59_spill] sm:$0xff] }
 0x44d   : > { %v2494_v39 = vpop.permute.xlu1 %2493 }
 0x44e   : > { %v2551_v5 = vsub.f32 %v5728_v61, %v2494_v39 }
 0x451   : > { %v2534_v52 = vpop.permute.xlu1 %2533 }
 0x455   : > { %v2504_v21 = vpop.permute.xlu1 %2503 }
 0x499   : > { %v1837_v54 = vpop.xlane.xlu0 %1836 }
 0x49a   : > { %v1855_v63 = vadd.f32 %v1837_v54, %v1807_v7  ;;  %v6728_v7 = vld [vmem:[#allocation21_spill] sm:$0xff] }
 0x49c   : > { %1871 = vst.msk [vmem:[#allocation3 + $0xe8] sm:$0xff] %vm1025_vm1, %v1855_v63 }
 0x4a1   : > { %v1706_v62 = vpop.permute.xlu0 %1705 }
 0x4a2   : > { %v1727_v27 = vsub.f32 %v6727_v8, %v1706_v62  ;;  %v6730_v62 = vld [vmem:[#allocation57_spill] sm:$0xff] }
 0x4a4   : > { %v1757_v11 = vmul.f32 1.442695, %v1727_v27  ;;  %v2568_v27 = vmul.f32 1.442695, %v2549_v43 }
 0x4a5   : > { %v1711_v28 = vpop.permute.xlu0 %1710 }
 0x4a6   : > { %4355 = vpow2.f32 %v1757_v11  ;;  %v1728_v54 = vsub.f32 %v6728_v7, %v1711_v28  ;;  %v6729_v11 = vld [vmem:[#allocation23_spill] sm:$0xff]  ;;  %v2584_v28 = vmul.f32 1.442695, %v2557_v56 }
 0x4a7   : > { %4357 = vpow2.f32 %v2580_v1 }
 0x4a8   : > { %4359 = vpow2.f32 %v2562_v40  ;;  %v1759_v63 = vmul.f32 1.442695, %v1728_v54  ;;  %v2559_v54 = vsub.f32 %v5734_v37, %v2534_v52 }
 0x4a9   : > { %4361 = vpow2.f32 %v2578_v41  ;;  %v2474_v25 = vpop.permute.xlu0 %2473 }
 0x4aa   : > { %4363 = vpow2.f32 %v1759_v63  ;;  %v2547_v30 = vsub.f32 %v5699_v60, %v2474_v25  ;;  %v2572_v63 = vmul.f32 1.442695, %v2551_v5  ;;  %v2553_v25 = vsub.f32 %v5740_v46, %v2504_v21 }
 0x4ab   : > { %v2588_v37 = vmul.f32 1.442695, %v2559_v54 }
 0x4ac   : > { %v2564_v16 = vmul.f32 1.442695, %v2547_v30 }
 0x4ad   : > { %v2479_v57 = vpop.permute.xlu0 %2478 }
 0x4ae   : > { %4365 = vpow2.f32 %v2564_v16  ;;  %v2548_v19 = vsub.f32 %v6729_v11, %v2479_v57  ;;  %v6733_v57 = vld [vmem:[#allocation60_spill] sm:$0xff] }
 0x4af   : > { %4367 = vpow2.f32 %v2568_v27  ;;  %v6732_v27 = vld [vmem:[#allocation58_spill] sm:$0xff] }
 0x4b0   : > { %v4356_v1 = vpop.eup %4355  ;;  %v2566_v40 = vmul.f32 1.442695, %v2548_v19 }
 0x4b1   : > { %v4358_v41 = vpop.eup %4357  ;;  %v2519_v20 = vpop.permute.xlu0 %2518  ;;  %v1775_v60 = vmul.f32 %v4356_v1, %v6730_v62 }
 0x4b2   : > { %v4360_v8 = vpop.eup %4359  ;;  %4369 = vpow2.f32 %v2566_v40  ;;  %v2556_v32 = vsub.f32 %v6731_v44, %v2519_v20  ;;  %v6102_v39 = vmul.f32 %v4358_v41, %v5504_v2 }
 0x4b3   : > { %v4362_v7 = vpop.eup %4361  ;;  %4371 = vpow2.f32 %v2584_v28  ;;  %1838 = vadd.xlane.f32.xlu0 %v1775_v60  ;;  %v2594_v56 = vmul.f32 %v4360_v8, %v5462_v4  ;;  %v2576_v28 = vmul.f32 1.442695, %v2553_v25  ;;  %v2544_v4 = vpop.permute.xlu1 %2543 }
 0x4b4   : > { %v4364_v43 = vpop.eup %4363  ;;  %v2582_v61 = vmul.f32 1.442695, %v2556_v32  ;;  %v6108_v19 = vmul.f32 %v4362_v7, %v6650_v49 }
 0x4b5   : > { %v2489_v30 = vpop.permute.xlu0 %2488  ;;  %v1776_v16 = vmul.f32 %v4364_v43, %v6732_v27 }
 0x4b6   : > { %4373 = vpow2.f32 %v2582_v61  ;;  %v2550_v11 = vsub.f32 %v6733_v57, %v2489_v30  ;;  %v2824_v1 = vpack.c.bf16 %v6102_v39, %v6108_v19 }
 0x4b7   : > { %2643 = vadd.xlane.f32.xlu0 %v2594_v56  ;;  %1840 = vadd.xlane.f32.xlu1 %v1776_v16  ;;  %v1994_v52 = vpack.c.bf16 %v1776_v16, %v1775_v60  ;;  %4375 = vpow2.f32 %v2572_v63  ;;  %v2561_v60 = vsub.f32 %v5745_v29, %v2544_v4 }
 0x4b8   : > { %v4366_v46 = vpop.eup %4365  ;;  %v2570_v2 = vmul.f32 1.442695, %v2550_v11 }
 0x4b9   : > { %4086 = vmatmul.mubr.bf16.gmra.mrb[12].mxu1 %v1994_v52  ;;  %v2529_v5 = vpop.permute.xlu0 %2528  ;;  %v2595_v40 = vmul.f32 %v4366_v46, %v5469_v0  ;;  %v4368_v41 = vpop.eup %4367  ;;  %v2592_v63 = vmul.f32 1.442695, %v2561_v60  ;;  %v6747_v60 = vld [vmem:[#allocation42_spill] sm:$0xff] }
 0x4ba   : > { %4377 = vpow2.f32 %v2570_v2  ;;  %v2558_v49 = vsub.f32 %v5701_v47, %v2529_v5  ;;  %4113 = vmatprep.mubr.bf16.mxu1 %v2824_v1  ;;  %v2597_v0 = vmul.f32 %v4368_v41, %v5472_v15 }
 0x4bb   : > { %4379 = vpow2.f32 %v2588_v37  ;;  %2645 = vadd.xlane.f32.xlu1 %v2595_v40  ;;  %v2820_v21 = vpack.c.bf16 %v2595_v40, %v2594_v56 }
 0x4bc   : > { %v4370_v20 = vpop.eup %4369  ;;  %4381 = vpow2.f32 %v2576_v28  ;;  %v2586_v8 = vmul.f32 1.442695, %v2558_v49  ;;  %v6743_v49 = vld [vmem:[#allocation56_spill] sm:$0xff] }
 0x4bd   : > { %v4372_v44 = vpop.eup %4371  ;;  %v2499_v32 = vpop.permute.xlu0 %2498  ;;  %4105 = vmatprep.mubr.bf16.mxu0 %v2820_v21  ;;  %v2596_v7 = vmul.f32 %v4370_v20, %v5466_v3 }
 0x4be   : > { %4383 = vpow2.f32 %v2586_v8  ;;  %v2552_v54 = vsub.f32 %v5711_v13, %v2499_v32  ;;  %v2605_v61 = vmul.f32 %v4372_v44, %v5515_v53  ;;  %v6748_v8 = vld [vmem:[#allocation9_spill] sm:$0xff]  ;;  %v6749_v44 = vld [vmem:[#allocation8_spill] sm:$0xff] }
 0x4bf   : > { %2647 = vadd.xlane.f32.xlu0 %v2596_v7  ;;  %v2821_v47 = vpack.c.bf16 %v2597_v0, %v2596_v7  ;;  %v2426_v32 = vsub.f32 %v6749_v44, %v6748_v8 }
 0x4c0   : > { %v4374_v43 = vpop.eup %4373  ;;  %v2574_v25 = vmul.f32 1.442695, %v2552_v54 }
 0x4c1   : > { %v2604_v29 = vmul.f32 %v4374_v43, %v6652_v34  ;;  %v2539_v30 = vpop.permute.xlu0 %2538  ;;  %4106 = vmatmul.mubr.bf16.vlgmr.msra.gmra.mrb[16].mxu0 %v2821_v47  ;;  %v4376_v56 = vpop.eup %4375  ;;  %v6750_v47 = vld [vmem:[#allocation25_spill] sm:$0xff]  ;;  %v6751_v43 = vld [vmem:[#allocation27_spill] sm:$0xff] }
 0x4c2   : > { %4385 = vpow2.f32 %v2574_v25  ;;  %v2560_v3 = vsub.f32 %v5719_v33, %v2539_v30  ;;  %v2599_v11 = vmul.f32 %v4376_v56, %v5484_v26  ;;  %v6754_v30 = vld [vmem:[#allocation13_spill] sm:$0xff] }
 0x4c3   : > { %2649 = vadd.xlane.f32.xlu0 %v2597_v0  ;;  %v2825_v15 = vpack.c.bf16 %v2605_v61, %v2604_v29  ;;  %4387 = vpow2.f32 %v2592_v63  ;;  %v6752_v63 = vsub.f32 %v6750_v47, %v6751_v43  ;;  %v2612_v43 = vld [vmem:[#allocation3 + $0x108] sm:$0xff] }
 0x4c4   : > { %v4378_v16 = vpop.eup %4377  ;;  %v2590_v13 = vmul.f32 1.442695, %v2560_v3 }
 0x4c5   : > { %v4380_v57 = vpop.eup %4379  ;;  %4114 = vmatmul.mubr.bf16.vlgmr.msra.gmra.mrb[16].mxu1 %v2825_v15  ;;  %v2598_v37 = vmul.f32 %v4378_v16, %v5482_v50  ;;  %v2444_v25 = vmul.f32 1.442695, %v6752_v63  ;;  %v6755_v16 = vld [vmem:[#allocation30_spill] sm:$0xff] }
 0x4c6   : > { %v4382_v53 = vpop.eup %4381  ;;  %4389 = vpow2.f32 %v2590_v13  ;;  %v2607_v28 = vmul.f32 %v4380_v57, %v6710_v10  ;;  %v6756_v13 = vld [vmem:[#allocation32_spill] sm:$0xff] }
 0x4c7   : > { %2653 = vadd.xlane.f32.xlu0 %v2599_v11  ;;  %2651 = vadd.xlane.f32.xlu1 %v2598_v37  ;;  %v2822_v34 = vpack.c.bf16 %v2599_v11, %v2598_v37  ;;  %v2601_v33 = vmul.f32 %v4382_v53, %v5494_v12  ;;  %v6757_v57 = vsub.f32 %v6755_v16, %v6756_v13  ;;  %v6758_v53 = vld [vmem:[#allocation7_spill] sm:$0xff] }
 0x4c8   : > { %v4384_v52 = vpop.eup %4383 }
 0x4c9   : > { %4109 = vmatprep.mubr.bf16.mxu0 %v2822_v34  ;;  %v2606_v46 = vmul.f32 %v4384_v52, %v6653_v58  ;;  %v2448_v11 = vmul.f32 1.442695, %v6757_v57  ;;  %v6759_v34 = vld [vmem:[#allocation12_spill] sm:$0xff] }
 0x4ca   : > { %v2430_v52 = vsub.f32 %v6759_v34, %v6758_v53 }
 0x4cb   : > { %2657 = vadd.xlane.f32.xlu0 %v2601_v33  ;;  %v2826_v2 = vpack.c.bf16 %v2607_v28, %v2606_v46 }
 0x4cc   : > { %v4386_v1 = vpop.eup %4385 }
 0x4cd   : > { %4117 = vmatprep.mubr.bf16.mxu1 %v2826_v2  ;;  %v2600_v26 = vmul.f32 %v4386_v1, %v6651_v38  ;;  %v4388_v50 = vpop.eup %4387  ;;  %v6734_v38 = vld [vmem:[#allocation48_spill] sm:$0xff]  ;;  %v6761_v2 = vld [vmem:[#allocation18_spill] sm:$0xff] }
 0x4ce   : > { %v2609_v12 = vmul.f32 %v4388_v50, %v6732_v27  ;;  %v1600_v10 = vsub.f32 %v6734_v38, %v6712_v22  ;;  %v2458_v50 = vmul.f32 1.442695, %v2430_v52  ;;  %v6765_v38 = vld [vmem:[#allocation46_spill] sm:$0xff] }
 0x4cf   : > { %2661 = vadd.xlane.f32.xlu0 %v6102_v39  ;;  %2655 = vadd.xlane.f32.xlu1 %v2600_v26  ;;  %v2823_v4 = vpack.c.bf16 %v2601_v33, %v2600_v26 }
 0x4d0   : > { %v4390_v5 = vpop.eup %4389  ;;  %v1631_v27 = vmul.f32 1.442695, %v1600_v10  ;;  %v6766_v10 = vld [vmem:[#allocation61_spill] sm:$0xff] }
 0x4d1   : > { %4110 = vmatmul.mubr.bf16.gmra.mrb[20].mxu0 %v2823_v4  ;;  %v2608_v40 = vmul.f32 %v4390_v5, %v6730_v62  ;;  %v6735_v62 = vld [vmem:[#allocation50_spill] sm:$0xff]  ;;  %v6763_v4 = vld [vmem:[#allocation55_spill] sm:$0xff]  ;;  %v6764_v5 = vld [vmem:[#allocation52_spill] sm:$0xff] }
 0x4d2   : > { %v1599_v39 = vsub.f32 %v6735_v62, %v6711_v18  ;;  %4391 = vpow2.f32 %v1631_v27  ;;  %v6738_v18 = vld [vmem:[#allocation17_spill] sm:$0xff]  ;;  %v6767_v62 = vsub.f32 %v6765_v38, %v6766_v10 }
 0x4d3   : > { %2665 = vadd.xlane.f32.xlu0 %v2605_v61  ;;  %2659 = vadd.xlane.f32.xlu1 %v6108_v19  ;;  %v2827_v58 = vpack.c.bf16 %v2609_v12, %v2608_v40  ;;  %v6740_v19 = vld [vmem:[#allocation40_spill] sm:$0xff]  ;;  %v2450_v61 = vmul.f32 1.442695, %v2426_v32 }
 0x4d5   : > { %4118 = vmatmul.mubr.bf16.gmra.mrb[20].mxu1 %v2827_v58 }
 0x4d7   : > { %2669 = vadd.xlane.f32.xlu0 %v2607_v28  ;;  %2663 = vadd.xlane.f32.xlu1 %v2604_v29  ;;  %v6753_v29 = vld [vmem:[#allocation15_spill] sm:$0xff]  ;;  %v6760_v28 = vld [vmem:[#allocation14_spill] sm:$0xff] }
 0x4d8   : > { %v2428_v56 = vsub.f32 %v6754_v30, %v6753_v29  ;;  %v6762_v1 = vsub.f32 %v6760_v28, %v6761_v2  ;;  %v2613_v29 = vld [vmem:[#allocation3 + $0x110] sm:$0xff]  ;;  %v2618_v2 = vld [vmem:[#allocation3 + $0x138] sm:$0xff] }
 0x4da   : > { %v2454_v37 = vmul.f32 1.442695, %v2428_v56  ;;  %v2452_v26 = vmul.f32 1.442695, %v6762_v1 }
 0x4db   : > { %2673 = vadd.xlane.f32.xlu0 %v2609_v12  ;;  %2667 = vadd.xlane.f32.xlu1 %v2606_v46 }
 0x4dc   : > { %v6164_v0 = vpop.eup %4391 }
 0x4df   : > { %2671 = vadd.xlane.f32.xlu1 %v2608_v40  ;;  %v2432_v40 = vsub.f32 %v6764_v5, %v6763_v4  ;;  %v2617_v4 = vld [vmem:[#allocation3 + $0x130] sm:$0xff]  ;;  %v2620_v5 = vld [vmem:[#allocation3 + $0x148] sm:$0xff] }
 0x4e1   : > { %v2462_v27 = vmul.f32 1.442695, %v2432_v40 }
 0x4f0   : > { %1898 = vperm.xlu1 %4210, %v5952_v59   ;;  %v2418_v59 = vsub.f32 %v5784_v6, %v5789_v45  ;;  %v6739_v45 = vld [vmem:[#allocation38_spill] sm:$0xff] }
 0x4f1   : > { %1893 = vperm.xlu0 %4209, %v6005_v24  }
 0x4f2   : > { %v2434_v24 = vmul.f32 1.442695, %v2418_v59 }
 0x4f4   : > { %1908 = vperm.xlu1 %4210, %v5966_v48   ;;  %v1629_v48 = vmul.f32 1.442695, %v1599_v39  ;;  %v2456_v39 = vmul.f32 1.442695, %v6767_v62  ;;  %v2619_v62 = vld [vmem:[#allocation3 + $0x140] sm:$0xff] }
 0x4f5   : > { %1903 = vperm.xlu0 %4209, %v6010_v17   ;;  %v6736_v17 = vld [vmem:[#allocation11_spill] sm:$0xff] }
 0x4f6   : > { %4393 = vpow2.f32 %v1629_v48 }
 0x4f7   : > { %4395 = vpow2.f32 %v2434_v24  ;;  %v6769_v24 = vld [vmem:[#allocation28_spill] sm:$0xff] }
 0x4f8   : > { %1918 = vperm.xlu1 %4210, %v5974_v42   ;;  %v2419_v42 = vsub.f32 %v5849_v51, %v5854_v14  ;;  %v6741_v14 = vld [vmem:[#allocation20_spill] sm:$0xff] }
 0x4f9   : > { %1913 = vperm.xlu0 %4209, %v6016_v35   ;;  %v2420_v35 = vsub.f32 %v6736_v17, %v5803_v23  ;;  %v6744_v23 = vld [vmem:[#allocation53_spill] sm:$0xff] }
 0x4fa   : > { %v2436_v6 = vmul.f32 1.442695, %v2419_v42  ;;  %v6768_v42 = vld [vmem:[#allocation26_spill] sm:$0xff] }
 0x4fb   : > { %v6770_v17 = vsub.f32 %v6768_v42, %v6769_v24 }
 0x4fc   : > { %1928 = vperm.xlu1 %4210, %v5979_v31   ;;  %v6737_v31 = vld [vmem:[#allocation10_spill] sm:$0xff]  ;;  %4397 = vpow2.f32 %v2436_v6  ;;  %v6772_v6 = vld [vmem:[#allocation36_spill] sm:$0xff] }
 0x4fd   : > { %1923 = vperm.xlu0 %4209, %v6020_v55   ;;  %v2422_v22 = vsub.f32 %v6738_v18, %v6737_v31  ;;  %v2438_v55 = vmul.f32 1.442695, %v2420_v35  ;;  %v2460_v35 = vmul.f32 1.442695, %v6770_v17 }
 0x4ff   : > { %v2442_v51 = vmul.f32 1.442695, %v2422_v22  ;;  %4399 = vpow2.f32 %v2438_v55  ;;  %v6771_v22 = vld [vmem:[#allocation34_spill] sm:$0xff] }
 0x500   : > { %1938 = vperm.xlu1 %4210, %v5983_v9   ;;  %v6742_v9 = vld [vmem:[#allocation16_spill] sm:$0xff]  ;;  %v4394_v54 = vpop.eup %4393 }
 0x501   : > { %1933 = vperm.xlu0 %4209, %v6024_v36   ;;  %v2424_v41 = vsub.f32 %v6742_v9, %v6741_v14  ;;  %v6745_v36 = vld [vmem:[#allocation54_spill] sm:$0xff]  ;;  %4401 = vpow2.f32 %v2442_v51  ;;  %v4396_v3 = vpop.eup %4395 }
 0x502   : > { %v6746_v21 = vsub.f32 %v6744_v23, %v6745_v36  ;;  %v1792_v23 = vld [vmem:[#allocation3 + $0xf0] sm:$0xff] }
 0x503   : > { %v2446_v7 = vmul.f32 1.442695, %v2424_v41  ;;  %v1808_v36 = vmul.f32 %v4394_v54, %v1792_v23 }
 0x504   : > { %1948 = vperm.xlu1 %4210, %v6739_v45   ;;  %v2440_v20 = vmul.f32 1.442695, %v6746_v21  ;;  %v6773_v45 = vsub.f32 %v6771_v22, %v6772_v6  ;;  %v2624_v22 = vld [vmem:[#allocation3 + $0x168] sm:$0xff] }
 0x505   : > { %1943 = vperm.xlu0 %4209, %v6740_v19  }
 0x506   : > { %4403 = vpow2.f32 %v2440_v20  ;;  %v6172_v15 = vpop.eup %4397  ;;  %v2464_v55 = vmul.f32 1.442695, %v6773_v45  ;;  %v1793_v20 = vld [vmem:[#allocation3 + $0xf8] sm:$0xff] }
 0x507   : > { %4405 = vpow2.f32 %v2446_v7  ;;  %v1809_v44 = vmul.f32 %v6164_v0, %v1793_v20 }
 0x508   : > { %1958 = vperm.xlu1 %4210, %v6743_v49   ;;  %4407 = vpow2.f32 %v2444_v25 }
 0x509   : > { %1953 = vperm.xlu0 %4209, %v6747_v60   ;;  %4409 = vpow2.f32 %v2450_v61  ;;  %v6180_v33 = vpop.eup %4399  ;;  %v2611_v60 = vld [vmem:[#allocation3 + $0x100] sm:$0xff] }
 0x50a   : > { %4411 = vpow2.f32 %v2448_v11  ;;  %v2627_v32 = vmul.f32 %v4396_v3, %v2611_v60  ;;  %v2629_v56 = vmul.f32 %v6180_v33, %v2613_v29  ;;  %v2615_v11 = vld [vmem:[#allocation3 + $0x120] sm:$0xff]  ;;  %v1878_v29 = vld [vmem:[#allocation4 + $0x98] sm:$0xff] }
 0x50b   : > { %v6182_v46 = vpop.eup %4401  ;;  %4413 = vpow2.f32 %v2454_v37  ;;  %v2616_v37 = vld [vmem:[#allocation3 + $0x128] sm:$0xff] }
 0x50c   : > { %1968 = vperm.xlu1 %4210, %v6164_v0   ;;  %4415 = vpow2.f32 %v2452_v26 }
 0x50d   : > { %1963 = vperm.xlu0 %4209, %v4394_v54   ;;  %4417 = vpow2.f32 %v2458_v50  ;;  %v2628_v54 = vmul.f32 %v6172_v15, %v2612_v43 }
 0x50e   : > { %4419 = vpow2.f32 %v2456_v39  ;;  %v2622_v39 = vld [vmem:[#allocation3 + $0x158] sm:$0xff] }
 0x50f   : > { %4421 = vpow2.f32 %v2462_v27 }
 0x510   : > { %2726 = vperm.xlu1 %4210, %v4396_v3   ;;  %v4404_v12 = vpop.eup %4403  ;;  %4423 = vpow2.f32 %v2460_v35  ;;  %v2614_v3 = vld [vmem:[#allocation3 + $0x118] sm:$0xff] }
 0x511   : > { %2731 = vperm.xlu0 %4209, %v6172_v15   ;;  %v6191_v58 = vpop.eup %4405  ;;  %4425 = vpow2.f32 %v2464_v55  ;;  %v2630_v13 = vmul.f32 %v4404_v12, %v2614_v3  ;;  %v2631_v15 = vmul.f32 %v6182_v46, %v2615_v11  ;;  %v6775_v3 = vld [vmem:[#allocation24_spill] sm:$0xff] }
 0x512   : > { %v4408_v59 = vpop.eup %4407 }
 0x513   : > { %v6197_v48 = vpop.eup %4409  ;;  %v2632_v34 = vmul.f32 %v4408_v59, %v2616_v37  ;;  %v1880_v37 = vld [vmem:[#allocation4 + $0xa8] sm:$0xff] }
 0x514   : > { %2736 = vperm.xlu1 %4210, %v6180_v33   ;;  %v4412_v31 = vpop.eup %4411  ;;  %v2635_v42 = vmul.f32 %v6197_v48, %v2619_v62 }
 0x515   : > { %2746 = vperm.xlu0 %4209, %v6182_v46   ;;  %v6203_v18 = vpop.eup %4413  ;;  %v2634_v26 = vmul.f32 %v4412_v31, %v2618_v2 }
 0x516   : > { %v4416_v19 = vpop.eup %4415 }
 0x517   : > { %v6209_v51 = vpop.eup %4417  ;;  %v2636_v46 = vmul.f32 %v4416_v19, %v2620_v5  ;;  %v6778_v5 = vld [vmem:[#allocation39_spill] sm:$0xff] }
 0x518   : > { %2741 = vperm.xlu1 %4210, %v4404_v12   ;;  %v6212_v14 = vpop.eup %4419  ;;  %v2633_v12 = vmul.f32 %v6191_v58, %v2617_v4  ;;  %v1881_v4 = vld [vmem:[#allocation4 + $0xb0] sm:$0xff] }
 0x519   : > { %2756 = vperm.xlu0 %4209, %v6191_v58   ;;  %v6214_v9 = vpop.eup %4421  ;;  %v2638_v24 = vmul.f32 %v6212_v14, %v2622_v39 }
 0x51a   : > { %v6218_v41 = vpop.eup %4423 }
 0x51b   : > { %v6221_v49 = vpop.eup %4425  ;;  %v2640_v55 = vmul.f32 %v6218_v41, %v2624_v22 }
 0x51c   : > { %2751 = vperm.xlu1 %4210, %v4408_v59  }
 0x51d   : > { %2766 = vperm.xlu0 %4209, %v6197_v48   ;;  %v2626_v48 = vld [vmem:[#allocation3 + $0x178] sm:$0xff] }
 0x51e   : > { %v2642_v60 = vmul.f32 %v6221_v49, %v2626_v48 }
 0x520   : > { %2761 = vperm.xlu1 %4210, %v4412_v31   ;;  %v2621_v31 = vld [vmem:[#allocation3 + $0x150] sm:$0xff] }
 0x521   : > { %2776 = vperm.xlu0 %4209, %v6203_v18   ;;  %v2637_v45 = vmul.f32 %v6203_v18, %v2621_v31 }
 0x524   : > { %2771 = vperm.xlu1 %4210, %v4416_v19  }
 0x525   : > { %2786 = vperm.xlu0 %4209, %v6209_v51  }
 0x528   : > { %2781 = vperm.xlu1 %4210, %v6212_v14  }
 0x529   : > { %2796 = vperm.xlu0 %4209, %v6214_v9  }
 0x52c   : > { %2791 = vperm.xlu1 %4210, %v6218_v41  }
 0x530   : > { %2801 = vperm.xlu1 %4210, %v6221_v49  }
 0x540   : > { %v1839_v21 = vpop.xlane.xlu0 %1838 }
 0x541   : > { %v1856_v8 = vadd.f32 %v1839_v21, %v1808_v36  ;;  %v2623_v36 = vld [vmem:[#allocation3 + $0x160] sm:$0xff] }
 0x542   : > { %v2639_v20 = vmul.f32 %v6209_v51, %v2623_v36  ;;  %v6783_v36 = vld [vmem:[#allocation44_spill] sm:$0xff] }
 0x543   : > { %1872 = vst.msk [vmem:[#allocation3 + $0xf0] sm:$0xff] %vm1025_vm1, %v1856_v8 }
 0x544   : > { %v1841_v7 = vpop.xlane.xlu1 %1840  ;;  %v2644_v47 = vpop.xlane.xlu0 %2643 }
 0x545   : > { %v1857_v63 = vadd.f32 %v1841_v7, %v1809_v44  ;;  %v2675_v25 = vadd.f32 %v2644_v47, %v2627_v32  ;;  %v2625_v32 = vld [vmem:[#allocation3 + $0x170] sm:$0xff] }
 0x546   : > { %v2641_v41 = vmul.f32 %v6214_v9, %v2625_v32  ;;  %v6785_v32 = vld [vmem:[#allocation41_spill] sm:$0xff] }
 0x547   : > { %1873 = vst.msk [vmem:[#allocation3 + $0xf8] sm:$0xff] %vm1025_vm1, %v1857_v63  ;;  %2691 = vst.msk [vmem:[#allocation3 + $0x100] sm:$0xff] %vm1025_vm1, %v2675_v25  ;;  %v1876_v63 = vld [vmem:[#allocation4 + $0x88] sm:$0xff]  ;;  %v1875_v25 = vld [vmem:[#allocation4 + $0x80] sm:$0xff] }
 0x548   : > { %v2646_v61 = vpop.xlane.xlu1 %2645 }
 0x549   : > { %v2676_v30 = vadd.f32 %v2646_v61, %v2628_v54 }
 0x54b   : > { %2692 = vst.msk [vmem:[#allocation3 + $0x108] sm:$0xff] %vm1025_vm1, %v2676_v30  ;;  %v1877_v30 = vld [vmem:[#allocation4 + $0x90] sm:$0xff] }
 0x54c   : > { %v2648_v0 = vpop.xlane.xlu0 %2647 }
 0x54d   : > { %v2677_v16 = vadd.f32 %v2648_v0, %v2629_v56  ;;  %v6774_v56 = vld [vmem:[#allocation31_spill] sm:$0xff] }
 0x54f   : > { %2693 = vst.msk [vmem:[#allocation3 + $0x110] sm:$0xff] %vm1025_vm1, %v2677_v16 }
 0x550   : > { %v2650_v57 = vpop.xlane.xlu0 %2649 }
 0x551   : > { %v2678_v53 = vadd.f32 %v2650_v57, %v2630_v13 }
 0x553   : > { %2694 = vst.msk [vmem:[#allocation3 + $0x118] sm:$0xff] %vm1025_vm1, %v2678_v53  ;;  %v1879_v53 = vld [vmem:[#allocation4 + $0xa0] sm:$0xff] }
 0x554   : > { %v2652_v52 = vpop.xlane.xlu1 %2651  ;;  %v2654_v28 = vpop.xlane.xlu0 %2653 }
 0x555   : > { %v2679_v1 = vadd.f32 %v2652_v52, %v2631_v15  ;;  %v2680_v33 = vadd.f32 %v2654_v28, %v2632_v34  ;;  %v6776_v15 = vld [vmem:[#allocation29_spill] sm:$0xff]  ;;  %v6777_v52 = vld [vmem:[#allocation43_spill] sm:$0xff] }
 0x557   : > { %2695 = vst.msk [vmem:[#allocation3 + $0x120] sm:$0xff] %vm1025_vm1, %v2679_v1  ;;  %2696 = vst.msk [vmem:[#allocation3 + $0x128] sm:$0xff] %vm1025_vm1, %v2680_v33 }
 0x558   : > { %v2658_v50 = vpop.xlane.xlu0 %2657 }
 0x559   : > { %v2682_v40 = vadd.f32 %v2658_v50, %v2634_v26  ;;  %v1882_v50 = vld [vmem:[#allocation4 + $0xb8] sm:$0xff] }
 0x55b   : > { %2698 = vst.msk [vmem:[#allocation3 + $0x138] sm:$0xff] %vm1025_vm1, %v2682_v40 }
 0x55c   : > { %v2656_v38 = vpop.xlane.xlu1 %2655  ;;  %v2662_v10 = vpop.xlane.xlu0 %2661 }
 0x55d   : > { %v2681_v27 = vadd.f32 %v2656_v38, %v2633_v12  ;;  %v2684_v59 = vadd.f32 %v2662_v10, %v2636_v46  ;;  %v6779_v12 = vld [vmem:[#allocation35_spill] sm:$0xff] }
 0x55f   : > { %2697 = vst.msk [vmem:[#allocation3 + $0x130] sm:$0xff] %vm1025_vm1, %v2681_v27  ;;  %2700 = vst.msk [vmem:[#allocation3 + $0x148] sm:$0xff] %vm1025_vm1, %v2684_v59  ;;  %v1884_v27 = vld [vmem:[#allocation4 + $0xc8] sm:$0xff]  ;;  %v1883_v59 = vld [vmem:[#allocation4 + $0xc0] sm:$0xff] }
 0x560   : > { %v2660_v17 = vpop.xlane.xlu1 %2659  ;;  %v2666_v35 = vpop.xlane.xlu0 %2665 }
 0x561   : > { %v2683_v58 = vadd.f32 %v2660_v17, %v2635_v42  ;;  %v2686_v6 = vadd.f32 %v2666_v35, %v2638_v24  ;;  %v6780_v42 = vld [vmem:[#allocation37_spill] sm:$0xff] }
 0x562   : > { %v6781_v17 = vld [vmem:[#allocation33_spill] sm:$0xff] }
 0x563   : > { %2699 = vst.msk [vmem:[#allocation3 + $0x140] sm:$0xff] %vm1025_vm1, %v2683_v58  ;;  %2702 = vst.msk [vmem:[#allocation3 + $0x158] sm:$0xff] %vm1025_vm1, %v2686_v6 }
 0x564   : > { %v2664_v19 = vpop.xlane.xlu1 %2663  ;;  %v2670_v23 = vpop.xlane.xlu0 %2669 }
 0x565   : > { %v2685_v21 = vadd.f32 %v2664_v19, %v2637_v45  ;;  %v2688_v14 = vadd.f32 %v2670_v23, %v2640_v55  ;;  %v1886_v45 = vld [vmem:[#allocation4 + $0xd8] sm:$0xff]  ;;  %v1885_v55 = vld [vmem:[#allocation4 + $0xd0] sm:$0xff]  ;;  %v6782_v19 = vld [vmem:[#allocation19_spill] sm:$0xff] }
 0x567   : > { %2701 = vst.msk [vmem:[#allocation3 + $0x150] sm:$0xff] %vm1025_vm1, %v2685_v21  ;;  %2704 = vst.msk [vmem:[#allocation3 + $0x168] sm:$0xff] %vm1025_vm1, %v2688_v14 }
 0x568   : > { %v2668_v8 = vpop.xlane.xlu1 %2667  ;;  %v2674_v44 = vpop.xlane.xlu0 %2673 }
 0x569   : > { %v2687_v18 = vadd.f32 %v2668_v8, %v2639_v20  ;;  %v2690_v7 = vadd.f32 %v2674_v44, %v2642_v60  ;;  %v6784_v8 = vld [vmem:[#allocation47_spill] sm:$0xff] }
 0x56b   : > { %2703 = vst.msk [vmem:[#allocation3 + $0x160] sm:$0xff] %vm1025_vm1, %v2687_v18  ;;  %2706 = vst.msk [vmem:[#allocation3 + $0x178] sm:$0xff] %vm1025_vm1, %v2690_v7 }
 0x56c   : > { %v2672_v47 = vpop.xlane.xlu1 %2671 }
 0x56d   : > { %v2689_v43 = vadd.f32 %v2672_v47, %v2641_v41  ;;  %v1887_v47 = vld [vmem:[#allocation4 + $0xe0] sm:$0xff] }
 0x56f   : > { %2705 = vst.msk [vmem:[#allocation3 + $0x170] sm:$0xff] %vm1025_vm1, %v2689_v43  ;;  %v1890_v43 = vld [vmem:[#allocation4 + $0xf8] sm:$0xff] }
 0x570   : > { %v1899_v51 = vpop.permute.xlu1 %1898  ;;  %v1894_v54 = vpop.permute.xlu0 %1893 }
 0x571   : > { %v1972_v49 = vmul.f32 %v1899_v51, %v1876_v63  ;;  %v1971_v61 = vmul.f32 %v1894_v54, %v1875_v25  ;;  %v1888_v63 = vld [vmem:[#allocation4 + $0xe8] sm:$0xff]  ;;  %v1889_v25 = vld [vmem:[#allocation4 + $0xf0] sm:$0xff] }
 0x573   : > { %v2157_v0 = vadd.f32 %v6774_v56, %v1972_v49  ;;  %v2156_v16 = vadd.f32 %v6775_v3, %v1971_v61 }
 0x574   : > { %v1909_v13 = vpop.permute.xlu1 %1908  ;;  %v1904_v57 = vpop.permute.xlu0 %1903 }
 0x575   : > { %2173 = vst [vmem:[#allocation4 + $0x88] sm:$0xff] %v2157_v0  ;;  %2172 = vst [vmem:[#allocation4 + $0x80] sm:$0xff] %v2156_v16  ;;  %v1974_v9 = vmul.f32 %v1909_v13, %v1878_v29  ;;  %v1973_v11 = vmul.f32 %v1904_v57, %v1877_v30 }
 0x577   : > { %v2159_v34 = vadd.f32 %v6776_v15, %v1974_v9  ;;  %v2158_v28 = vadd.f32 %v6777_v52, %v1973_v11  ;;  %v2709_v52 = vld [vmem:[#allocation4 + $0x108] sm:$0xff] }
 0x578   : > { %v1919_v2 = vpop.permute.xlu1 %1918  ;;  %v1914_v1 = vpop.permute.xlu0 %1913 }
 0x579   : > { %2175 = vst [vmem:[#allocation4 + $0x98] sm:$0xff] %v2159_v34  ;;  %2174 = vst [vmem:[#allocation4 + $0x90] sm:$0xff] %v2158_v28  ;;  %v1976_v33 = vmul.f32 %v1919_v2, %v1880_v37  ;;  %v1975_v26 = vmul.f32 %v1914_v1, %v1879_v53  ;;  %v2708_v53 = vld [vmem:[#allocation4 + $0x100] sm:$0xff]  ;;  %v2710_v34 = vld [vmem:[#allocation4 + $0x110] sm:$0xff] }
 0x57b   : > { %v2161_v40 = vadd.f32 %v6778_v5, %v1976_v33  ;;  %v2160_v46 = vadd.f32 %v6779_v12, %v1975_v26  ;;  %v2711_v12 = vld [vmem:[#allocation4 + $0x118] sm:$0xff] }
 0x57c   : > { %v1929_v38 = vpop.permute.xlu1 %1928  ;;  %v1924_v10 = vpop.permute.xlu0 %1923 }
 0x57d   : > { %2177 = vst [vmem:[#allocation4 + $0xa8] sm:$0xff] %v2161_v40  ;;  %2176 = vst [vmem:[#allocation4 + $0xa0] sm:$0xff] %v2160_v46  ;;  %v1978_v62 = vmul.f32 %v1929_v38, %v1882_v50  ;;  %v1977_v39 = vmul.f32 %v1924_v10, %v1881_v4 }
 0x57f   : > { %v2163_v24 = vadd.f32 %v6780_v42, %v1978_v62  ;;  %v2162_v35 = vadd.f32 %v6781_v17, %v1977_v39 }
 0x580   : > { %v1939_v31 = vpop.permute.xlu1 %1938  ;;  %v1934_v22 = vpop.permute.xlu0 %1933 }
 0x581   : > { %2179 = vst [vmem:[#allocation4 + $0xb8] sm:$0xff] %v2163_v24  ;;  %2178 = vst [vmem:[#allocation4 + $0xb0] sm:$0xff] %v2162_v35  ;;  %v1980_v58 = vmul.f32 %v1939_v31, %v1884_v27  ;;  %v1979_v6 = vmul.f32 %v1934_v22, %v1883_v59  ;;  %v2716_v31 = vld [vmem:[#allocation4 + $0x140] sm:$0xff] }
 0x583   : > { %v2165_v23 = vadd.f32 %v6782_v19, %v1980_v58  ;;  %v2164_v48 = vadd.f32 %v6783_v36, %v1979_v6  ;;  %v2712_v36 = vld [vmem:[#allocation4 + $0x120] sm:$0xff] }
 0x584   : > { %v1949_v21 = vpop.permute.xlu1 %1948  ;;  %v1944_v14 = vpop.permute.xlu0 %1943 }
 0x585   : > { %2181 = vst [vmem:[#allocation4 + $0xc8] sm:$0xff] %v2165_v23  ;;  %2180 = vst [vmem:[#allocation4 + $0xc0] sm:$0xff] %v2164_v48  ;;  %v1982_v20 = vmul.f32 %v1949_v21, %v1886_v45  ;;  %v1981_v60 = vmul.f32 %v1944_v14, %v1885_v55  ;;  %v2718_v45 = vld [vmem:[#allocation4 + $0x150] sm:$0xff]  ;;  %v2715_v21 = vld [vmem:[#allocation4 + $0x138] sm:$0xff] }
 0x586   : > { %v2714_v55 = vld [vmem:[#allocation4 + $0x130] sm:$0xff] }
 0x587   : > { %v2167_v44 = vadd.f32 %v6784_v8, %v1982_v20  ;;  %v2166_v18 = vadd.f32 %v6785_v32, %v1981_v60  ;;  %v2717_v20 = vld [vmem:[#allocation4 + $0x148] sm:$0xff] }
 0x588   : > { %v1959_v7 = vpop.permute.xlu1 %1958  ;;  %v1954_v41 = vpop.permute.xlu0 %1953  ;;  %v2713_v8 = vld [vmem:[#allocation4 + $0x128] sm:$0xff] }
 0x589   : > { %2183 = vst [vmem:[#allocation4 + $0xd8] sm:$0xff] %v2167_v44  ;;  %2182 = vst [vmem:[#allocation4 + $0xd0] sm:$0xff] %v2166_v18  ;;  %v1983_v51 = vmul.f32 %v1954_v41, %v1887_v47  ;;  %v1984_v56 = vmul.f32 %v1959_v7, %v1888_v63 }
 0x58c   : > { %v4087_v54 = vpop.f32.mrb[12].mxu1  ;;  %v1969_v49 = vpop.permute.xlu1 %1968 }
 0x58d   : > { %v1986_v61 = vmul.f32 %v1969_v49, %v1890_v43  ;;  %v1964_v29 = vpop.permute.xlu0 %1963  ;;  %v2141_v30 = vpop.f32.mrb[13].mxu1  ;;  %v2720_v43 = vld [vmem:[#allocation4 + $0x160] sm:$0xff] }
 0x58e   : > { %v1985_v0 = vmul.f32 %v1964_v29, %v1889_v25  ;;  %v2168_v3 = vadd.f32 %v2141_v30, %v1983_v51  ;;  %v4088_v16 = vpop.f32.mrb[14].mxu1  ;;  %v2719_v29 = vld [vmem:[#allocation4 + $0x158] sm:$0xff] }
 0x58f   : > { %v2171_v13 = vadd.f32 %v4088_v16, %v1986_v61  ;;  %v2144_v57 = vpop.f32.mrb[15].mxu1 }
 0x590   : > { %v2170_v9 = vadd.f32 %v4087_v54, %v1985_v0  ;;  %2184 = vst [vmem:[#allocation4 + $0xe0] sm:$0xff] %v2168_v3  ;;  %v2169_v11 = vadd.f32 %v2144_v57, %v1984_v56  ;;  %v2727_v37 = vpop.permute.xlu1 %2726  ;;  %v2722_v3 = vld [vmem:[#allocation4 + $0x170] sm:$0xff] }
 0x591   : > { %2187 = vst [vmem:[#allocation4 + $0xf8] sm:$0xff] %v2171_v13  ;;  %v2732_v15 = vpop.permute.xlu0 %2731  ;;  %v2804_v28 = vmul.f32 %v2727_v37, %v2708_v53 }
 0x592   : > { %2186 = vst [vmem:[#allocation4 + $0xf0] sm:$0xff] %v2170_v9  ;;  %2185 = vst [vmem:[#allocation4 + $0xe8] sm:$0xff] %v2169_v11  ;;  %v2805_v4 = vmul.f32 %v2732_v15, %v2709_v52 }
 0x594   : > { %v2737_v2 = vpop.permute.xlu1 %2736  ;;  %v4107_v1 = vpop.f32.mrb[16].mxu0 }
 0x595   : > { %v2806_v33 = vmul.f32 %v2737_v2, %v2710_v34  ;;  %v2747_v26 = vpop.permute.xlu0 %2746  ;;  %v2926_v50 = vpop.f32.mrb[17].mxu0 }
 0x596   : > { %v2989_v5 = vadd.f32 %v2926_v50, %v2804_v28  ;;  %v4108_v40 = vpop.f32.mrb[18].mxu0  ;;  %v2808_v44 = vmul.f32 %v2747_v26, %v2712_v36  ;;  %v2721_v28 = vld [vmem:[#allocation4 + $0x168] sm:$0xff] }
 0x597   : > { %v2991_v46 = vadd.f32 %v4107_v1, %v2806_v33  ;;  %v2929_v38 = vpop.f32.mrb[19].mxu0 }
 0x598   : > { %3005 = vst [vmem:[#allocation4 + $0x100] sm:$0xff] %v2989_v5  ;;  %v2990_v10 = vadd.f32 %v2929_v38, %v2805_v4  ;;  %v4115_v62 = vpop.f32.mrb[16].mxu1  ;;  %v2742_v39 = vpop.permute.xlu1 %2741  ;;  %v2723_v4 = vld [vmem:[#allocation4 + $0x178] sm:$0xff]  ;;  %v3059_v38 = vld [vmem:[#allocation3 + $0x10] sm:$0xff] (!%p3877_p0) }
 0x599   : > { %3007 = vst [vmem:[#allocation4 + $0x110] sm:$0xff] %v2991_v46  ;;  %v2807_v27 = vmul.f32 %v2742_v39, %v2711_v12  ;;  %v2757_v59 = vpop.permute.xlu0 %2756  ;;  %v2958_v42 = vpop.f32.mrb[17].mxu1  ;;  %v4619_v39 = vmov (!%p3877_p0), 0   ;;  %4429 = vrcp.f32 (!%p3877_p0), %v3059_v38 }
 0x59a   : > { %3006 = vst [vmem:[#allocation4 + $0x108] sm:$0xff] %v2990_v10  ;;  %v4116_v24 = vpop.f32.mrb[18].mxu1  ;;  %v2810_v60 = vmul.f32 %v2757_v59, %v2714_v55  ;;  %v3057_v10 = vld [vmem:[#allocation3] sm:$0xff] (!%p3877_p0)  ;;  %4428 = vset.pattern.permute.xlu1 (!%p3877_p0), %v4619_v39  ;;  %4427 = vset.pattern.permute.xlu0 (!%p3877_p0), %v4619_v39  ;;  %v3062_v59 = vld [vmem:[#allocation3 + $0x28] sm:$0xff] (!%p3877_p0)  ;;  %v3068_v55 = vld [vmem:[#allocation3 + $0x58] sm:$0xff] (!%p3877_p0) }
 0x59b   : > { %v2992_v17 = vadd.f32 %v4108_v40, %v2807_v27  ;;  %v2961_v35 = vpop.f32.mrb[19].mxu1  ;;  %v3058_v27 = vld [vmem:[#allocation3 + $0x8] sm:$0xff] (!%p3877_p0)  ;;  %4431 = vrcp.f32 (!%p3877_p0), %v3057_v10  ;;  %v3379_v10 = vld [vmem:[#allocation3 + $0x110] sm:$0xff] (!%p3877_p0) }
 0x59c   : > { %v2752_v22 = vpop.permute.xlu1 %2751  ;;  %v3382_v39 = vld [vmem:[#allocation3 + $0x128] sm:$0xff] (!%p3877_p0) }
 0x59d   : > { %3008 = vst [vmem:[#allocation4 + $0x118] sm:$0xff] %v2992_v17  ;;  %v2767_v58 = vpop.permute.xlu0 %2766  ;;  %v2809_v54 = vmul.f32 %v2752_v22, %v2713_v8  ;;  %v3063_v17 = vld [vmem:[#allocation3 + $0x30] sm:$0xff] (!%p3877_p0)  ;;  %v3066_v22 = vld [vmem:[#allocation3 + $0x48] sm:$0xff] (!%p3877_p0) }
 0x59e   : > { %v2812_v6 = vmul.f32 %v2767_v58, %v2716_v31 }
 0x5a0   : > { %v2997_v19 = vadd.f32 %v2958_v42, %v2812_v6  ;;  %v2762_v23 = vpop.permute.xlu1 %2761  ;;  %v3061_v42 = vld [vmem:[#allocation3 + $0x20] sm:$0xff] (!%p3877_p0) }
 0x5a1   : > { %v2777_v48 = vpop.permute.xlu0 %2776  ;;  %v2811_v41 = vmul.f32 %v2762_v23, %v2715_v21  ;;  %v3065_v6 = vld [vmem:[#allocation3 + $0x40] sm:$0xff] (!%p3877_p0)  ;;  %v3067_v23 = vld [vmem:[#allocation3 + $0x50] sm:$0xff] (!%p3877_p0) }
 0x5a2   : > { %3013 = vst [vmem:[#allocation4 + $0x140] sm:$0xff] %v2997_v19  ;;  %v2814_v14 = vmul.f32 %v2777_v48, %v2718_v45  ;;  %v3070_v48 = vld [vmem:[#allocation3 + $0x68] sm:$0xff] (!%p3877_p0) }
 0x5a4   : > { %v2999_v32 = vadd.f32 %v4115_v62, %v2814_v14  ;;  %v2772_v18 = vpop.permute.xlu1 %2771  ;;  %v4111_v7 = vpop.f32.mrb[20].mxu0  ;;  %v3060_v62 = vld [vmem:[#allocation3 + $0x18] sm:$0xff] (!%p3877_p0)  ;;  %v3069_v14 = vld [vmem:[#allocation3 + $0x60] sm:$0xff] (!%p3877_p0) }
 0x5a5   : > { %v2813_v47 = vmul.f32 %v2772_v18, %v2717_v20  ;;  %v2787_v63 = vpop.permute.xlu0 %2786  ;;  %v2995_v25 = vadd.f32 %v4111_v7, %v2810_v60  ;;  %v2942_v51 = vpop.f32.mrb[21].mxu0  ;;  %4433 = vrcp.f32 (!%p3877_p0), %v3060_v62  ;;  %v3072_v60 = vld [vmem:[#allocation3 + $0x78] sm:$0xff] (!%p3877_p0)  ;;  %v3218_v18 = vld [vmem:[#allocation3 + $0x88] sm:$0xff] (!%p3877_p0) }
 0x5a6   : > { %3015 = vst [vmem:[#allocation4 + $0x150] sm:$0xff] %v2999_v32  ;;  %v2993_v49 = vadd.f32 %v2942_v51, %v2808_v44  ;;  %v4112_v61 = vpop.f32.mrb[22].mxu0  ;;  %v2816_v16 = vmul.f32 %v2787_v63, %v2720_v43  ;;  %4435 = vrcp.f32 (!%p3877_p0), %v3058_v27  ;;  %v3071_v44 = vld [vmem:[#allocation3 + $0x70] sm:$0xff] (!%p3877_p0)  ;;  %v3220_v43 = vld [vmem:[#allocation3 + $0x98] sm:$0xff] (!%p3877_p0) }
 0x5a7   : > { %v2998_v30 = vadd.f32 %v2961_v35, %v2813_v47  ;;  %3011 = vst [vmem:[#allocation4 + $0x130] sm:$0xff] %v2995_v25  ;;  %v2996_v56 = vadd.f32 %v4112_v61, %v2811_v41  ;;  %v2945_v0 = vpop.f32.mrb[23].mxu0  ;;  %4437 = vrcp.f32 (!%p3877_p0), %v3062_v59  ;;  %v4430_v35 = vpop.eup (!%p3877_p0), %4429  ;;  %v3217_v41 = vld [vmem:[#allocation3 + $0x80] sm:$0xff] (!%p3877_p0)  ;;  %v3219_v25 = vld [vmem:[#allocation3 + $0x90] sm:$0xff] (!%p3877_p0) }
 0x5a8   : > { %3009 = vst [vmem:[#allocation4 + $0x120] sm:$0xff] %v2993_v49  ;;  %v2994_v13 = vadd.f32 %v2945_v0, %v2809_v54  ;;  %v2782_v57 = vpop.permute.xlu1 %2781  ;;  %v4119_v9 = vpop.f32.mrb[20].mxu1  ;;  %4439 = vrcp.f32 (!%p3877_p0), %v3061_v42  ;;  %3101 = vperm.xlu1 (!%p3877_p0), %4428, %v4430_v35   ;;  %v3222_v54 = vld [vmem:[#allocation3 + $0xa8] sm:$0xff] (!%p3877_p0)  ;;  %v3221_v61 = vld [vmem:[#allocation3 + $0xa0] sm:$0xff] (!%p3877_p0)  ;;  %v3223_v0 = vld [vmem:[#allocation3 + $0xb0] sm:$0xff] (!%p3877_p0) }
 0x5a9   : > { %3014 = vst [vmem:[#allocation4 + $0x148] sm:$0xff] %v2998_v30  ;;  %3012 = vst [vmem:[#allocation4 + $0x138] sm:$0xff] %v2996_v56  ;;  %v2815_v11 = vmul.f32 %v2782_v57, %v2719_v29  ;;  %v2797_v37 = vpop.permute.xlu0 %2796  ;;  %v2974_v53 = vpop.f32.mrb[21].mxu1  ;;  %v3224_v30 = vld [vmem:[#allocation3 + $0xb8] sm:$0xff] (!%p3877_p0)  ;;  %v3225_v57 = vld [vmem:[#allocation3 + $0xc0] sm:$0xff] (!%p3877_p0) }
 0x5aa   : > { %3010 = vst [vmem:[#allocation4 + $0x128] sm:$0xff] %v2994_v13  ;;  %v2818_v15 = vmul.f32 %v2797_v37, %v2722_v3  ;;  %v3001_v34 = vadd.f32 %v2974_v53, %v2816_v16  ;;  %v4120_v52 = vpop.f32.mrb[22].mxu1  ;;  %v4432_v31 = vpop.eup (!%p3877_p0), %4431  ;;  %v3226_v16 = vld [vmem:[#allocation3 + $0xc8] sm:$0xff] (!%p3877_p0)  ;;  %v3227_v53 = vld [vmem:[#allocation3 + $0xd0] sm:$0xff] (!%p3877_p0)  ;;  %v3381_v59 = vld [vmem:[#allocation3 + $0x120] sm:$0xff] (!%p3877_p0) }
 0x5ab   : > { %v3000_v2 = vadd.f32 %v4116_v24, %v2815_v11  ;;  %v2977_v1 = vpop.f32.mrb[23].mxu1  ;;  %v3064_v24 = vld [vmem:[#allocation3 + $0x38] sm:$0xff] (!%p3877_p0)  ;;  %3091 = vperm.xlu0 (!%p3877_p0), %4427, %v4432_v31   ;;  %v3383_v35 = vld [vmem:[#allocation3 + $0x130] sm:$0xff] (!%p3877_p0) }
 0x5ac   : > { %v3003_v33 = vadd.f32 %v4119_v9, %v2818_v15  ;;  %3017 = vst [vmem:[#allocation4 + $0x160] sm:$0xff] %v3001_v34  ;;  %v2792_v26 = vpop.permute.xlu1 %2791  ;;  %4441 = vrcp.f32 (!%p3877_p0), %v3064_v24  ;;  %v3228_v11 = vld [vmem:[#allocation3 + $0xd8] sm:$0xff] (!%p3877_p0)  ;;  %v3230_v34 = vld [vmem:[#allocation3 + $0xe8] sm:$0xff] (!%p3877_p0) }
 0x5ad   : > { %3016 = vst [vmem:[#allocation4 + $0x158] sm:$0xff] %v3000_v2  ;;  %v2817_v50 = vmul.f32 %v2792_v26, %v2721_v28  ;;  %4443 = vrcp.f32 (!%p3877_p0), %v3063_v17  ;;  %v3229_v28 = vld [vmem:[#allocation3 + $0xe0] sm:$0xff] (!%p3877_p0)  ;;  %v3231_v26 = vld [vmem:[#allocation3 + $0xf0] sm:$0xff] (!%p3877_p0)  ;;  %v3384_v24 = vld [vmem:[#allocation3 + $0x138] sm:$0xff] (!%p3877_p0) }
 0x5ae   : > { %3019 = vst [vmem:[#allocation4 + $0x170] sm:$0xff] %v3003_v33  ;;  %4445 = vrcp.f32 (!%p3877_p0), %v3066_v22  ;;  %v3386_v22 = vld [vmem:[#allocation3 + $0x148] sm:$0xff] (!%p3877_p0) }
 0x5af   : > { %v3002_v5 = vadd.f32 %v2977_v1, %v2817_v50  ;;  %3040 = sbr.rel (%p3877_p0) target bundleno = 1702 (0x6a6), region = 86  ;;  %v4434_v58 = vpop.eup (!%p3877_p0), %4433  ;;  %4447 = vrcp.f32 (!%p3877_p0), %v3065_v6  ;;  %v3232_v1 = vld [vmem:[#allocation3 + $0xf8] sm:$0xff] (!%p3877_p0)  ;;  %v3385_v6 = vld [vmem:[#allocation3 + $0x140] sm:$0xff] (!%p3877_p0) }
 0x5b0   : > { %v2802_v40 = vpop.permute.xlu1 %2801  ;;  %v4436_v45 = vpop.eup (!%p3877_p0), %4435  ;;  %3106 = vperm.xlu1 (!%p3877_p0), %4428, %v4434_v58   ;;  %4449 = vrcp.f32 (!%p3877_p0), %v3068_v55  ;;  %v3388_v55 = vld [vmem:[#allocation3 + $0x158] sm:$0xff] (!%p3877_p0) }
 0x5b1   : > { %3018 = vst [vmem:[#allocation4 + $0x168] sm:$0xff] %v3002_v5  ;;  %v2819_v12 = vmul.f32 %v2802_v40, %v2723_v4  ;;  %v4438_v19 = vpop.eup (!%p3877_p0), %4437  ;;  %3096 = vperm.xlu0 (!%p3877_p0), %4427, %v4436_v45   ;;  %4451 = vrcp.f32 (!%p3877_p0), %v3067_v23  ;;  %v3378_v4 = vld [vmem:[#allocation3 + $0x108] sm:$0xff] (!%p3877_p0)  ;;  %v3377_v40 = vld [vmem:[#allocation3 + $0x100] sm:$0xff] (!%p3877_p0)  ;;  %v3387_v23 = vld [vmem:[#allocation3 + $0x150] sm:$0xff] (!%p3877_p0) }
 0x5b2   : > { %v4440_v36 = vpop.eup (!%p3877_p0), %4439  ;;  %4453 = vrcp.f32 (!%p3877_p0), %v3070_v48  ;;  %v3390_v48 = vld [vmem:[#allocation3 + $0x168] sm:$0xff] (!%p3877_p0) }
 0x5b3   : > { %v3004_v46 = vadd.f32 %v4120_v52, %v2819_v12  ;;  %4455 = vrcp.f32 (!%p3877_p0), %v3069_v14  ;;  %v3389_v14 = vld [vmem:[#allocation3 + $0x160] sm:$0xff] (!%p3877_p0) }
 0x5b4   : > { %3116 = vperm.xlu1 (!%p3877_p0), %4428, %v4438_v19   ;;  %4457 = vrcp.f32 (!%p3877_p0), %v3072_v60  ;;  %v3392_v60 = vld [vmem:[#allocation3 + $0x178] sm:$0xff] (!%p3877_p0) }
 0x5b5   : > { %3020 = vst [vmem:[#allocation4 + $0x178] sm:$0xff] %v3004_v46  ;;  %3111 = vperm.xlu0 (!%p3877_p0), %4427, %v4440_v36   ;;  %4459 = vrcp.f32 (!%p3877_p0), %v3071_v44  ;;  %v3380_v46 = vld [vmem:[#allocation3 + $0x118] sm:$0xff] (!%p3877_p0)  ;;  %v3391_v44 = vld [vmem:[#allocation3 + $0x170] sm:$0xff] (!%p3877_p0) }
 0x5b6   : > { %v4442_v21 = vpop.eup %4441  ;;  %4461 = vrcp.f32 %v3218_v18 }
 0x5b7   : > { %v4444_v20 = vpop.eup %4443  ;;  %4463 = vrcp.f32 %v3217_v41 }
 0x5b8   : > { %3126 = vperm.xlu1 %4428, %v4442_v21   ;;  %v4446_v8 = vpop.eup %4445  ;;  %4465 = vrcp.f32 %v3220_v43 }
 0x5b9   : > { %3121 = vperm.xlu0 %4427, %v4444_v20   ;;  %v4448_v32 = vpop.eup %4447  ;;  %4467 = vrcp.f32 %v3219_v25 }
 0x5ba   : > { %v4450_v7 = vpop.eup %4449  ;;  %4469 = vrcp.f32 %v3222_v54 }
 0x5bb   : > { %v4452_v47 = vpop.eup %4451  ;;  %4471 = vrcp.f32 %v3221_v61 }
 0x5bc   : > { %3136 = vperm.xlu1 %4428, %v4446_v8   ;;  %v4454_v63 = vpop.eup %4453  ;;  %4473 = vrcp.f32 %v3224_v30 }
 0x5bd   : > { %3131 = vperm.xlu0 %4427, %v4448_v32   ;;  %v4456_v51 = vpop.eup %4455  ;;  %4475 = vrcp.f32 %v3223_v0 }
 0x5be   : > { %v4458_v49 = vpop.eup %4457  ;;  %4477 = vrcp.f32 %v3226_v16 }
 0x5bf   : > { %v4460_v29 = vpop.eup %4459  ;;  %4479 = vrcp.f32 %v3225_v57 }
 0x5c0   : > { %3146 = vperm.xlu1 %4428, %v4450_v7   ;;  %v4462_v56 = vpop.eup %4461  ;;  %4481 = vrcp.f32 %v3228_v11 }
 0x5c1   : > { %3141 = vperm.xlu0 %4427, %v4452_v47   ;;  %v4464_v3 = vpop.eup %4463  ;;  %4483 = vrcp.f32 %v3227_v53 }
 0x5c2   : > { %v4466_v13 = vpop.eup %4465  ;;  %4485 = vrcp.f32 %v3230_v34 }
 0x5c3   : > { %v4468_v9 = vpop.eup %4467  ;;  %4487 = vrcp.f32 %v3229_v28 }
 0x5c4   : > { %3156 = vperm.xlu1 %4428, %v4454_v63   ;;  %v4470_v37 = vpop.eup %4469  ;;  %4489 = vrcp.f32 %v3232_v1 }
 0x5c5   : > { %3151 = vperm.xlu0 %4427, %v4456_v51   ;;  %v4472_v15 = vpop.eup %4471  ;;  %4491 = vrcp.f32 %v3231_v26 }
 0x5c6   : > { %v4474_v52 = vpop.eup %4473  ;;  %4493 = vrcp.f32 %v3378_v4 }
 0x5c7   : > { %v4476_v2 = vpop.eup %4475  ;;  %4495 = vrcp.f32 %v3377_v40  ;;  %v3043_v40 = vld [vmem:[#allocation4 + $0x10] sm:$0xff] }
 0x5c8   : > { %3166 = vperm.xlu1 %4428, %v4458_v49   ;;  %v4478_v33 = vpop.eup %4477  ;;  %4497 = vrcp.f32 %v3380_v46  ;;  %v3041_v46 = vld [vmem:[#allocation4] sm:$0xff] }
 0x5c9   : > { %3161 = vperm.xlu0 %4427, %v4460_v29   ;;  %v4480_v50 = vpop.eup %4479  ;;  %4499 = vrcp.f32 %v3379_v10  ;;  %v3042_v10 = vld [vmem:[#allocation4 + $0x8] sm:$0xff] }
 0x5ca   : > { %v4482_v5 = vpop.eup %4481  ;;  %4501 = vrcp.f32 %v3382_v39  ;;  %v3046_v39 = vld [vmem:[#allocation4 + $0x28] sm:$0xff] }
 0x5cb   : > { %v4484_v12 = vpop.eup %4483  ;;  %4503 = vrcp.f32 %v3381_v59  ;;  %v3202_v59 = vld [vmem:[#allocation4 + $0x88] sm:$0xff] }
 0x5cc   : > { %3256 = vperm.xlu1 %4428, %v4462_v56   ;;  %v4486_v38 = vpop.eup %4485  ;;  %4505 = vrcp.f32 %v3384_v24  ;;  %v3047_v24 = vld [vmem:[#allocation4 + $0x30] sm:$0xff] }
 0x5cd   : > { %3251 = vperm.xlu0 %4427, %v4464_v3   ;;  %v4488_v62 = vpop.eup %4487  ;;  %4507 = vrcp.f32 %v3383_v35  ;;  %v3050_v35 = vld [vmem:[#allocation4 + $0x48] sm:$0xff] }
 0x5ce   : > { %v4490_v27 = vpop.eup %4489  ;;  %4509 = vrcp.f32 %v3386_v22  ;;  %v3052_v22 = vld [vmem:[#allocation4 + $0x58] sm:$0xff] }
 0x5cf   : > { %v4492_v42 = vpop.eup %4491  ;;  %4511 = vrcp.f32 %v3385_v6 }
 0x5d0   : > { %3266 = vperm.xlu1 %4428, %v4466_v13   ;;  %v4494_v17 = vpop.eup %4493  ;;  %4513 = vrcp.f32 %v3388_v55 }
 0x5d1   : > { %3261 = vperm.xlu0 %4427, %v4468_v9   ;;  %v4496_v31 = vpop.eup %4495  ;;  %4515 = vrcp.f32 %v3387_v23  ;;  %v3054_v23 = vld [vmem:[#allocation4 + $0x68] sm:$0xff] }
 0x5d2   : > { %v4498_v58 = vpop.eup %4497  ;;  %4517 = vrcp.f32 %v3390_v48  ;;  %v3204_v48 = vld [vmem:[#allocation4 + $0x98] sm:$0xff] }
 0x5d3   : > { %v4500_v45 = vpop.eup %4499  ;;  %4519 = vrcp.f32 %v3389_v14 }
 0x5d4   : > { %3276 = vperm.xlu1 %4428, %v4470_v37   ;;  %v4502_v19 = vpop.eup %4501  ;;  %4521 = vrcp.f32 %v3392_v60 }
 0x5d5   : > { %3271 = vperm.xlu0 %4427, %v4472_v15   ;;  %v4504_v36 = vpop.eup %4503  ;;  %4523 = vrcp.f32 %v3391_v44 }
 0x5d6   : > { %v4506_v21 = vpop.eup %4505 }
 0x5d7   : > { %v4508_v20 = vpop.eup %4507 }
 0x5d8   : > { %3286 = vperm.xlu1 %4428, %v4474_v52   ;;  %v4510_v8 = vpop.eup %4509 }
 0x5d9   : > { %3281 = vperm.xlu0 %4427, %v4476_v2   ;;  %v4512_v32 = vpop.eup %4511 }
 0x5da   : > { %v4514_v18 = vpop.eup %4513 }
 0x5db   : > { %v4516_v7 = vpop.eup %4515 }
 0x5dc   : > { %3296 = vperm.xlu1 %4428, %v4478_v33   ;;  %v4518_v41 = vpop.eup %4517 }
 0x5dd   : > { %3291 = vperm.xlu0 %4427, %v4480_v50   ;;  %v4520_v47 = vpop.eup %4519 }
 0x5de   : > { %v4522_v43 = vpop.eup %4521 }
 0x5df   : > { %v4524_v63 = vpop.eup %4523 }
 0x5e0   : > { %3306 = vperm.xlu1 %4428, %v4482_v5  }
 0x5e1   : > { %3301 = vperm.xlu0 %4427, %v4484_v12  }
 0x5e4   : > { %3316 = vperm.xlu1 %4428, %v4486_v38   ;;  %v3044_v38 = vld [vmem:[#allocation4 + $0x18] sm:$0xff] }
 0x5e5   : > { %3311 = vperm.xlu0 %4427, %v4488_v62  }
 0x5e8   : > { %3326 = vperm.xlu1 %4428, %v4490_v27   ;;  %v3045_v27 = vld [vmem:[#allocation4 + $0x20] sm:$0xff] }
 0x5e9   : > { %3321 = vperm.xlu0 %4427, %v4492_v42   ;;  %v3048_v42 = vld [vmem:[#allocation4 + $0x38] sm:$0xff] }
 0x5ec   : > { %3416 = vperm.xlu1 %4428, %v4494_v17   ;;  %v3201_v17 = vld [vmem:[#allocation4 + $0x80] sm:$0xff] }
 0x5ed   : > { %3411 = vperm.xlu0 %4427, %v4496_v31   ;;  %v3049_v31 = vld [vmem:[#allocation4 + $0x40] sm:$0xff] }
 0x5f0   : > { %3426 = vperm.xlu1 %4428, %v4498_v58  }
 0x5f1   : > { %3421 = vperm.xlu0 %4427, %v4500_v45  }
 0x5f4   : > { %3436 = vperm.xlu1 %4428, %v4502_v19   ;;  %v3051_v19 = vld [vmem:[#allocation4 + $0x50] sm:$0xff] }
 0x5f5   : > { %3431 = vperm.xlu0 %4427, %v4504_v36  }
 0x5f8   : > { %3446 = vperm.xlu1 %4428, %v4506_v21  }
 0x5f9   : > { %3441 = vperm.xlu0 %4427, %v4508_v20  }
 0x5fc   : > { %3456 = vperm.xlu1 %4428, %v4510_v8   ;;  %v3053_v8 = vld [vmem:[#allocation4 + $0x60] sm:$0xff] }
 0x5fd   : > { %3451 = vperm.xlu0 %4427, %v4512_v32   ;;  %v3203_v32 = vld [vmem:[#allocation4 + $0x90] sm:$0xff] }
 0x600   : > { %3466 = vperm.xlu1 %4428, %v4514_v18   ;;  %v3362_v18 = vld [vmem:[#allocation4 + $0x108] sm:$0xff] }
 0x601   : > { %3461 = vperm.xlu0 %4427, %v4516_v7  }
 0x604   : > { %3476 = vperm.xlu1 %4428, %v4518_v41  }
 0x605   : > { %3471 = vperm.xlu0 %4427, %v4520_v47  }
 0x608   : > { %3486 = vperm.xlu1 %4428, %v4522_v43  }
 0x609   : > { %3481 = vperm.xlu0 %4427, %v4524_v63   ;;  %v3206_v63 = vld [vmem:[#allocation4 + $0xa8] sm:$0xff] }
 0x627   : > { %v3102_v25 = vpop.permute.xlu1 %3101 }
 0x628   : > { %v3171_v6 = vmul.f32 %v3102_v25, %v3043_v40  ;;  %v3205_v25 = vld [vmem:[#allocation4 + $0xa0] sm:$0xff] }
 0x62a   : > { %v3092_v51 = vpop.permute.xlu0 %3091 }
 0x62b   : > { %v3169_v45 = vmul.f32 %v3092_v51, %v3041_v46  ;;  %v3361_v51 = vld [vmem:[#allocation4 + $0x100] sm:$0xff]  ;;  %v3208_v46 = vld [vmem:[#allocation4 + $0xb8] sm:$0xff] }
 0x62f   : > { %v3107_v54 = vpop.permute.xlu1 %3106 }
 0x630   : > { %v3097_v49 = vpop.permute.xlu0 %3096  ;;  %v3172_v55 = vmul.f32 %v3107_v54, %v3044_v38 }
 0x631   : > { %v3170_v14 = vmul.f32 %v3097_v49, %v3042_v10  ;;  %v3056_v49 = vld [vmem:[#allocation4 + $0x78] sm:$0xff] }
 0x633   : > { %v3117_v61 = vpop.permute.xlu1 %3116 }
 0x634   : > { %v3112_v29 = vpop.permute.xlu0 %3111  ;;  %v3174_v20 = vmul.f32 %v3117_v61, %v3046_v39  ;;  %v3055_v61 = vld [vmem:[#allocation4 + $0x70] sm:$0xff] }
 0x635   : > { %v3173_v60 = vmul.f32 %v3112_v29, %v3045_v27 }
 0x637   : > { %v3127_v30 = vpop.permute.xlu1 %3126 }
 0x638   : > { %v3122_v56 = vpop.permute.xlu0 %3121  ;;  %v3176_v7 = vmul.f32 %v3127_v30, %v3048_v42  ;;  %v3364_v42 = vld [vmem:[#allocation4 + $0x118] sm:$0xff] }
 0x639   : > { %v3175_v41 = vmul.f32 %v3122_v56, %v3047_v24 }
 0x63b   : > { %v3137_v0 = vpop.permute.xlu1 %3136 }
 0x63c   : > { %v3132_v3 = vpop.permute.xlu0 %3131  ;;  %v3178_v47 = vmul.f32 %v3137_v0, %v3050_v35  ;;  %v3207_v0 = vld [vmem:[#allocation4 + $0xb0] sm:$0xff] }
 0x63d   : > { %v3177_v43 = vmul.f32 %v3132_v3, %v3049_v31  ;;  %v3210_v3 = vld [vmem:[#allocation4 + $0xc8] sm:$0xff]  ;;  %v3363_v35 = vld [vmem:[#allocation4 + $0x110] sm:$0xff] }
 0x63f   : > { %v3147_v16 = vpop.permute.xlu1 %3146 }
 0x640   : > { %v3142_v13 = vpop.permute.xlu0 %3141  ;;  %v6291_v54 = vmul.f32 %v3147_v16, %v3052_v22  ;;  %v3212_v22 = vld [vmem:[#allocation4 + $0xd8] sm:$0xff] }
 0x643   : > { %v3157_v57 = vpop.permute.xlu1 %3156 }
 0x644   : > { %v3152_v9 = vpop.permute.xlu0 %3151  ;;  %v6295_v40 = vmul.f32 %v3157_v57, %v3054_v23  ;;  %v6302_v57 = vld [vmem:[%s6460_s4] ss:$0 sm:$0xff] }
 0x645   : > { %v6297_v38 = vmul.f32 %v3152_v9, %v3053_v8 }
 0x647   : > { %v6267_v11 = vpop.permute.xlu1 %3166 }
 0x648   : > { %v6269_v37 = vpop.permute.xlu0 %3161  ;;  %v6305_v9 = vmul.f32 %v6267_v11, %v3056_v49 }
 0x64b   : > { %v3257_v53 = vpop.permute.xlu1 %3256 }
 0x64c   : > { %v3252_v15 = vpop.permute.xlu0 %3251  ;;  %v3330_v36 = vmul.f32 %v3257_v53, %v3202_v59  ;;  %v6293_v53 = vmul.f32 %v3142_v13, %v3051_v19  ;;  %v3209_v13 = vld [vmem:[#allocation4 + $0xc0] sm:$0xff] }
 0x64d   : > { %v3329_v44 = vmul.f32 %v3252_v15, %v3201_v17 }
 0x64e   : > { %v3346_v30 = vadd.f32 %v3330_v36, %v3170_v14 }
 0x64f   : > { %v3267_v34 = vpop.permute.xlu1 %3266  ;;  %v3345_v27 = vadd.f32 %v3329_v44, %v3169_v45 }
 0x650   : > { %v3262_v52 = vpop.permute.xlu0 %3261  ;;  %v3332_v29 = vmul.f32 %v3267_v34, %v3204_v48 }
 0x651   : > { %v3331_v56 = vmul.f32 %v3262_v52, %v3203_v32  ;;  %v6308_v52 = vmul.f32 %v6269_v37, %v3055_v61  ;;  %v3211_v32 = vld [vmem:[#allocation4 + $0xd0] sm:$0xff]  ;;  %v3214_v61 = vld [vmem:[#allocation4 + $0xe8] sm:$0xff] }
 0x653   : > { %v3277_v28 = vpop.permute.xlu1 %3276  ;;  %v3347_v23 = vadd.f32 %v3331_v56, %v3171_v6 }
 0x654   : > { %v3272_v2 = vpop.permute.xlu0 %3271  ;;  %v3334_v16 = vmul.f32 %v3277_v28, %v3206_v63  ;;  %v3348_v28 = vadd.f32 %v3332_v29, %v3172_v55 }
 0x655   : > { %v3333_v59 = vmul.f32 %v3272_v2, %v3205_v25 }
 0x656   : > { %v3350_v14 = vadd.f32 %v3334_v16, %v3174_v20  ;;  %v3216_v16 = vld [vmem:[#allocation4 + $0xf8] sm:$0xff] }
 0x657   : > { %v6271_v1 = vpop.permute.xlu1 %3286 }
 0x658   : > { %v6273_v33 = vpop.permute.xlu0 %3281  ;;  %v3336_v24 = vmul.f32 %v6271_v1, %v3208_v46  ;;  %v3349_v1 = vadd.f32 %v3333_v59, %v3173_v60 }
 0x659   : > { %v3335_v2 = vmul.f32 %v6273_v33, %v3207_v0  ;;  %v3366_v33 = vld [vmem:[#allocation4 + $0x128] sm:$0xff] }
 0x65a   : > { %v3352_v44 = vadd.f32 %v3336_v24, %v3176_v7 }
 0x65b   : > { %v6275_v26 = vpop.permute.xlu1 %3296  ;;  %v3351_v63 = vadd.f32 %v3335_v2, %v3175_v41 }
 0x65c   : > { %v6277_v50 = vpop.permute.xlu0 %3291  ;;  %v3338_v31 = vmul.f32 %v6275_v26, %v3210_v3 }
 0x65d   : > { %v3337_v36 = vmul.f32 %v6277_v50, %v3209_v13  ;;  %v3365_v50 = vld [vmem:[#allocation4 + $0x120] sm:$0xff] }
 0x65e   : > { %v3354_v25 = vadd.f32 %v3338_v31, %v3178_v47  ;;  %v3368_v47 = vld [vmem:[#allocation4 + $0x138] sm:$0xff]  ;;  %v3370_v31 = vld [vmem:[#allocation4 + $0x148] sm:$0xff] }
 0x65f   : > { %v6279_v4 = vpop.permute.xlu1 %3306  ;;  %v3353_v60 = vadd.f32 %v3337_v36, %v3177_v43 }
 0x660   : > { %v6281_v5 = vpop.permute.xlu0 %3301  ;;  %v3340_v26 = vmul.f32 %v6279_v4, %v3212_v22 }
 0x661   : > { %v3339_v4 = vmul.f32 %v6281_v5, %v3211_v32 }
 0x662   : > { %v6331_v3 = vadd.f32 %v3340_v26, %v6291_v54 }
 0x663   : > { %v6283_v12 = vpop.permute.xlu1 %3316 }
 0x664   : > { %v6285_v62 = vpop.permute.xlu0 %3311 }
 0x667   : > { %v6287_v58 = vpop.permute.xlu1 %3326 }
 0x668   : > { %v6289_v21 = vpop.permute.xlu0 %3321  ;;  %v3344_v22 = vmul.f32 %v6287_v58, %v3216_v16 }
 0x66b   : > { %v3417_v15 = vpop.permute.xlu1 %3416 }
 0x66c   : > { %v3490_v10 = vmul.f32 %v3417_v15, %v3362_v18  ;;  %v3412_v39 = vpop.permute.xlu0 %3411 }
 0x66d   : > { %v3489_v34 = vmul.f32 %v3412_v39, %v3361_v51  ;;  %v3367_v39 = vld [vmem:[#allocation4 + $0x130] sm:$0xff] }
 0x66e   : > { %v3506_v17 = vadd.f32 %v3490_v10, %v3346_v30  ;;  %v3213_v30 = vld [vmem:[#allocation4 + $0xe0] sm:$0xff] }
 0x66f   : > { %v3505_v45 = vadd.f32 %v3489_v34, %v3345_v27  ;;  %v3427_v19 = vpop.permute.xlu1 %3426  ;;  %v3342_v27 = vmul.f32 %v6283_v12, %v3214_v61  ;;  %v3341_v34 = vmul.f32 %v6285_v62, %v3213_v30 }
 0x670   : > { %v6315_v11 = vadd.f32 %v6302_v57, %v3506_v17  ;;  %v3492_v37 = vmul.f32 %v3427_v19, %v3364_v42  ;;  %v3422_v48 = vpop.permute.xlu0 %3421 }
 0x671   : > { %v6318_v8 = vadd.f32 %v6302_v57, %v3505_v45  ;;  %v3491_v55 = vmul.f32 %v3422_v48, %v3363_v35  ;;  %v3355_v35 = vadd.f32 %v3339_v4, %v6293_v53  ;;  %v3215_v45 = vld [vmem:[#allocation4 + $0xf0] sm:$0xff]  ;;  %v6347_v36 = vadd.f32 %v3342_v27, %v6295_v40 }
 0x672   : > { %v3561_v6 = vmin.f32 %v6315_v11, 0.0  ;;  %v3508_v18 = vadd.f32 %v3492_v37, %v3348_v28  ;;  %vm3545_vm2 = vcmp.gt.f32.partialorder %v6315_v11, 0.0 }
 0x673   : > { %v3560_v51 = vmin.f32 %v6318_v8, 0.0  ;;  %v3507_v49 = vadd.f32 %v3491_v55, %v3347_v23  ;;  %v3437_v20 = vpop.permute.xlu1 %3436  ;;  %v3369_v23 = vld [vmem:[#allocation4 + $0x140] sm:$0xff]  ;;  %vm3544_vm3 = vcmp.gt.f32.partialorder %v6318_v8, 0.0 }
 0x674   : > { %v3578_v29 = vmul.f32 1.442695, %v3561_v6  ;;  %v6324_v46 = vadd.f32 %v6302_v57, %v3508_v18  ;;  %v3494_v7 = vmul.f32 %v3437_v20, %v3366_v33  ;;  %v3432_v15 = vpop.permute.xlu0 %3431  ;;  %v3372_v6 = vld [vmem:[#allocation4 + $0x158] sm:$0xff]  ;;  %v6361_v18 = vadd.f32 %v3344_v22, %v6305_v9 }
 0x675   : > { %v3576_v56 = vmul.f32 1.442695, %v3560_v51  ;;  %v6328_v0 = vadd.f32 %v6302_v57, %v3507_v49  ;;  %v3493_v41 = vmul.f32 %v3432_v15, %v3365_v50 }
 0x676   : > { %4525 = vpow2.f32 %v3578_v29  ;;  %v3563_v43 = vmin.f32 %v6324_v46, 0.0  ;;  %v3510_v10 = vadd.f32 %v3494_v7, %v3350_v14  ;;  %v6351_v14 = vadd.f32 %v3341_v34, %v6297_v38  ;;  %v3373_v34 = vld [vmem:[#allocation4 + $0x160] sm:$0xff] }
 0x677   : > { %4527 = vpow2.f32 %v3576_v56  ;;  %v3562_v5 = vmin.f32 %v6328_v0, 0.0  ;;  %v3509_v59 = vadd.f32 %v3493_v41, %v3349_v1  ;;  %v3447_v13 = vpop.permute.xlu1 %3446  ;;  %vm3547_vm4 = vcmp.gt.f32.partialorder %v6324_v46, 0.0 }
 0x678   : > { %v3582_v42 = vmul.f32 1.442695, %v3563_v43  ;;  %v6338_v24 = vadd.f32 %v6302_v57, %v3510_v10  ;;  %v3496_v54 = vmul.f32 %v3447_v13, %v3368_v47  ;;  %v3442_v17 = vpop.permute.xlu0 %3441  ;;  %v3374_v47 = vld [vmem:[#allocation4 + $0x168] sm:$0xff]  ;;  %vm3546_vm5 = vcmp.gt.f32.partialorder %v6328_v0, 0.0 }
 0x679   : > { %v3580_v28 = vmul.f32 1.442695, %v3562_v5  ;;  %v6342_v2 = vadd.f32 %v6302_v57, %v3509_v59  ;;  %v3495_v12 = vmul.f32 %v3442_v17, %v3367_v39 }
 0x67a   : > { %4529 = vpow2.f32 %v3582_v42  ;;  %v3565_v62 = vmin.f32 %v6338_v24, 0.0  ;;  %v3512_v19 = vadd.f32 %v3496_v54, %v3352_v44  ;;  %v3343_v44 = vmul.f32 %v6289_v21, %v3215_v45 }
 0x67b   : > { %4531 = vpow2.f32 %v3580_v28  ;;  %v3564_v53 = vmin.f32 %v6342_v2, 0.0  ;;  %v3511_v37 = vadd.f32 %v3495_v12, %v3351_v63  ;;  %v3457_v48 = vpop.permute.xlu1 %3456  ;;  %v3371_v63 = vld [vmem:[#allocation4 + $0x150] sm:$0xff]  ;;  %vm3549_vm6 = vcmp.gt.f32.partialorder %v6338_v24, 0.0 }
 0x67c   : > { %v3586_v1 = vmul.f32 1.442695, %v3565_v62  ;;  %v6354_v58 = vadd.f32 %v6302_v57, %v3512_v19  ;;  %v3498_v55 = vmul.f32 %v3457_v48, %v3370_v31  ;;  %v3452_v33 = vpop.permute.xlu0 %3451  ;;  %v3376_v62 = vld [vmem:[#allocation4 + $0x178] sm:$0xff]  ;;  %vm3548_vm7 = vcmp.gt.f32.partialorder %v6342_v2, 0.0 }
 0x67d   : > { %v3584_v26 = vmul.f32 1.442695, %v3564_v53  ;;  %v6358_v40 = vadd.f32 %v6302_v57, %v3511_v37  ;;  %v3497_v32 = vmul.f32 %v3452_v33, %v3369_v23  ;;  %v3359_v53 = vadd.f32 %v3343_v44, %v6308_v52 }
 0x67e   : > { %4533 = vpow2.f32 %v3586_v1  ;;  %v3567_v38 = vmin.f32 %v6354_v58, 0.0  ;;  %v3514_v50 = vadd.f32 %v3498_v55, %v3354_v25  ;;  %vm3551_vm8 = vcmp.gt.f32.partialorder %v6354_v58, 0.0 }
 0x67f   : > { %4535 = vpow2.f32 %v3584_v26  ;;  %v3566_v51 = vmin.f32 %v6358_v40, 0.0  ;;  %v3513_v21 = vadd.f32 %v3497_v32, %v3353_v60  ;;  %v3467_v49 = vpop.permute.xlu1 %3466  ;;  %vm3550_vm9 = vcmp.gt.f32.partialorder %v6358_v40, 0.0 }
 0x680   : > { %v4526_v20 = vpop.eup %4525  ;;  %v3590_v61 = vmul.f32 1.442695, %v3567_v38  ;;  %v6368_v29 = vadd.f32 %v6302_v57, %v3514_v50  ;;  %v3500_v9 = vmul.f32 %v3467_v49, %v3372_v6  ;;  %v3462_v7 = vpop.permute.xlu0 %3461  ;;  %v3375_v49 = vld [vmem:[#allocation4 + $0x170] sm:$0xff] }
 0x681   : > { %v4528_v15 = vpop.eup %4527  ;;  %v3880_v4 = vadd.f32 -1.0, %v4526_v20  ;;  %v3588_v25 = vmul.f32 1.442695, %v3566_v51  ;;  %v6371_v30 = vadd.f32 %v6302_v57, %v3513_v21  ;;  %v3499_v56 = vmul.f32 %v3462_v7, %v3371_v63 }
 0x682   : > { %v3879_v41 = vadd.f32 -1.0, %v4528_v15  ;;  %4537 = vpow2.f32 %v3590_v61  ;;  %v3569_v60 = vmin.f32 %v6368_v29, 0.0  ;;  %v3516_v59 = vadd.f32 %v3500_v9, %v6331_v3 }
 0x683   : > { %v3625_v43 = vsel %vm3545_vm2, %v6315_v11, %v3880_v4  ;;  %4539 = vpow2.f32 %v3588_v25  ;;  %v3568_v10 = vmin.f32 %v6371_v30, 0.0  ;;  %v3477_v39 = vpop.permute.xlu1 %3476  ;;  %v3515_v13 = vadd.f32 %v3499_v56, %v3355_v35 }
 0x684   : > { %v4530_v27 = vpop.eup %4529  ;;  %v3624_v16 = vsel %vm3544_vm3, %v6318_v8, %v3879_v41  ;;  %v3594_v5 = vmul.f32 1.442695, %v3569_v60  ;;  %v3472_v42 = vpop.permute.xlu0 %3471  ;;  %v3502_v12 = vmul.f32 %v3477_v39, %v3374_v47  ;;  %v6385_v22 = vadd.f32 %v6302_v57, %v3516_v59 }
 0x685   : > { %v4532_v54 = vpop.eup %4531  ;;  %v3933_v11 = vpack.c.bf16 %v3625_v43, %v3624_v16  ;;  %v3882_v17 = vadd.f32 -1.0, %v4530_v27  ;;  %v3592_v28 = vmul.f32 1.442695, %v3568_v10  ;;  %v6388_v45 = vadd.f32 %v6302_v57, %v3515_v13 }
 0x686   : > { %v3881_v31 = vadd.f32 -1.0, %v4532_v54  ;;  %4541 = vpow2.f32 %v3594_v5  ;;  %v3518_v3 = vadd.f32 %v3502_v12, %v6347_v36  ;;  %v3501_v35 = vmul.f32 %v3472_v42, %v3373_v34 }
 0x687   : > { %3934 = vst [vmem:[%s4730_s15] sm:$0xff] %v3933_v11   ;;  %v3627_v8 = vsel %vm3547_vm4, %v6324_v46, %v3882_v17  ;;  %4543 = vpow2.f32 %v3592_v28  ;;  %v3487_v19 = vpop.permute.xlu1 %3486  ;;  %v3571_v48 = vmin.f32 %v6385_v22, 0.0  ;;  %v3570_v36 = vmin.f32 %v6388_v45, 0.0 }
 0x688   : > { %v4534_v23 = vpop.eup %4533  ;;  %v3626_v37 = vsel %vm3546_vm5, %v6328_v0, %v3881_v31  ;;  %v6403_v33 = vadd.f32 %v6302_v57, %v3518_v3  ;;  %v3517_v52 = vadd.f32 %v3501_v35, %v6351_v14  ;;  %v3504_v44 = vmul.f32 %v3487_v19, %v3376_v62  ;;  %v3482_v14 = vpop.permute.xlu0 %3481 }
 0x689   : > { %v4536_v1 = vpop.eup %4535  ;;  %v3938_v46 = vpack.c.bf16 %v3627_v8, %v3626_v37  ;;  %v3884_v55 = vadd.f32 -1.0, %v4534_v23  ;;  %v3598_v32 = vmul.f32 1.442695, %v3571_v48  ;;  %v3596_v6 = vmul.f32 1.442695, %v3570_v36 }
 0x68a   : > { %v3883_v26 = vadd.f32 -1.0, %v4536_v1  ;;  %v3573_v38 = vmin.f32 %v6403_v33, 0.0  ;;  %v3540_v51 = vadd.f32 %v6302_v57, %v3517_v52  ;;  %v3520_v21 = vadd.f32 %v3504_v44, %v6361_v18 }
 0x68b   : > { %3970 = vst [vmem:[%s4730_s15 + $0x8] sm:$0xff] %v3938_v46   ;;  %v3629_v0 = vsel %vm3549_vm6, %v6338_v24, %v3884_v55  ;;  %4545 = vpow2.f32 %v3598_v32  ;;  %v3503_v18 = vmul.f32 %v3482_v14, %v3375_v49  ;;  %vm3553_vm10 = vcmp.gt.f32.partialorder %v6368_v29, 0.0 }
 0x68c   : > { %v4538_v50 = vpop.eup %4537  ;;  %v3628_v63 = vsel %vm3548_vm7, %v6342_v2, %v3883_v26  ;;  %4547 = vpow2.f32 %v3596_v6  ;;  %v3602_v24 = vmul.f32 1.442695, %v3573_v38  ;;  %v3572_v15 = vmin.f32 %v3540_v51, 0.0 }
 0x68d   : > { %v4540_v20 = vpop.eup %4539  ;;  %v3943_v61 = vpack.c.bf16 %v3629_v0, %v3628_v63  ;;  %v3886_v9 = vadd.f32 -1.0, %v4538_v50  ;;  %v3543_v4 = vadd.f32 %v6302_v57, %v3520_v21  ;;  %v3519_v39 = vadd.f32 %v3503_v18, %v3359_v53 }
 0x68e   : > { %v3885_v7 = vadd.f32 -1.0, %v4540_v20  ;;  %4549 = vpow2.f32 %v3602_v24  ;;  %v3600_v41 = vmul.f32 1.442695, %v3572_v15  ;;  %vm3552_vm11 = vcmp.gt.f32.partialorder %v6371_v30, 0.0 }
 0x68f   : > { %3971 = vst [vmem:[%s4730_s15 + $0x10] sm:$0xff] %v3943_v61   ;;  %v3631_v2 = vsel %vm3551_vm8, %v6354_v58, %v3886_v9  ;;  %v3575_v60 = vmin.f32 %v3543_v4, 0.0  ;;  %v3542_v5 = vadd.f32 %v6302_v57, %v3519_v39  ;;  %vm3555_vm12 = vcmp.gt.f32.partialorder %v6385_v22, 0.0 }
 0x690   : > { %v4542_v25 = vpop.eup %4541  ;;  %v3630_v56 = vsel %vm3550_vm9, %v6358_v40, %v3885_v7  ;;  %4551 = vpow2.f32 %v3600_v41  ;;  %vm3554_vm13 = vcmp.gt.f32.partialorder %v6388_v45, 0.0  ;;  %vm3557_vm14 = vcmp.gt.f32.partialorder %v6403_v33, 0.0 }
 0x691   : > { %v4544_v47 = vpop.eup %4543  ;;  %v3948_v43 = vpack.c.bf16 %v3631_v2, %v3630_v56  ;;  %v3888_v10 = vadd.f32 -1.0, %v4542_v25  ;;  %v3606_v58 = vmul.f32 1.442695, %v3575_v60  ;;  %v3574_v13 = vmin.f32 %v3542_v5, 0.0 }
 0x692   : > { %v3887_v27 = vadd.f32 -1.0, %v4544_v47  ;;  %vm3556_vm15 = vcmp.gt.f32.partialorder %v3540_v51, 0.0  ;;  %vm3559_vm0 = vcmp.gt.f32.partialorder %v3543_v4, 0.0  ;;  %vm3558_vm1 = vcmp.gt.f32.partialorder %v3542_v5, 0.0 }
 0x693   : > { %3972 = vst [vmem:[%s4730_s15 + $0x18] sm:$0xff] %v3948_v43   ;;  %v3633_v16 = vsel %vm3553_vm10, %v6368_v29, %v3888_v10  ;;  %4553 = vpow2.f32 %v3606_v58  ;;  %v3604_v11 = vmul.f32 1.442695, %v3574_v13 }
 0x694   : > { %v3632_v40 = vsel %vm3552_vm11, %v6371_v30, %v3887_v27 }
 0x695   : > { %v3953_v59 = vpack.c.bf16 %v3633_v16, %v3632_v40  ;;  %v4546_v34 = vpop.eup %4545  ;;  %4555 = vpow2.f32 %v3604_v11 }
 0x696   : > { %v4548_v42 = vpop.eup %4547  ;;  %v3890_v54 = vadd.f32 -1.0, %v4546_v34 }
 0x697   : > { %3973 = vst [vmem:[%s4730_s15 + $0x20] sm:$0xff] %v3953_v59   ;;  %v3889_v17 = vadd.f32 -1.0, %v4548_v42 }
 0x698   : > { %v4550_v28 = vpop.eup %4549  ;;  %v3635_v29 = vsel %vm3555_vm12, %v6385_v22, %v3890_v54 }
 0x699   : > { %v3634_v57 = vsel %vm3554_vm13, %v6388_v45, %v3889_v17  ;;  %v3892_v30 = vadd.f32 -1.0, %v4550_v28 }
 0x69a   : > { %v3958_v12 = vpack.c.bf16 %v3635_v29, %v3634_v57  ;;  %v4552_v31 = vpop.eup %4551 }
 0x69b   : > { %v3637_v8 = vsel %vm3557_vm14, %v6403_v33, %v3892_v30  ;;  %v3891_v3 = vadd.f32 -1.0, %v4552_v31 }
 0x69c   : > { %3974 = vst [vmem:[%s4730_s15 + $0x28] sm:$0xff] %v3958_v12  }
 0x69d   : > { %v4554_v35 = vpop.eup %4553  ;;  %v3636_v62 = vsel %vm3556_vm15, %v3540_v51, %v3891_v3 }
 0x69e   : > { %v3963_v22 = vpack.c.bf16 %v3637_v8, %v3636_v62  ;;  %v3894_v19 = vadd.f32 -1.0, %v4554_v35 }
 0x69f   : > { %v4556_v23 = vpop.eup %4555 }
 0x6a0   : > { %3975 = vst [vmem:[%s4730_s15 + $0x30] sm:$0xff] %v3963_v22   ;;  %v3639_v53 = vsel %vm3559_vm0, %v3543_v4, %v3894_v19  ;;  %v3893_v45 = vadd.f32 -1.0, %v4556_v23 }
 0x6a2   : > { %v3638_v37 = vsel %vm3558_vm1, %v3542_v5, %v3893_v45 }
 0x6a3   : > { %v3968_v48 = vpack.c.bf16 %v3639_v53, %v3638_v37 }
 0x6a5   : > { %3976 = vst [vmem:[%s4730_s15 + $0x38] sm:$0xff] %v3968_v48  }
 0x6a6 PF: > { %s15_s24 = sadd.s32 1, %s4611_s24   ;;  %s6786_s26 = sld [smem:[#allocation6_spill]] }
 0x6a7   : > { %p12_p1 = scmp.ge.s32.totalorder %s15_s24, 6   ;;  %s6787_s18 = smov %s4591_s19 }
 0x6a8   : > { %s6788_s19 = smov %s4701_s6  ;;  %s6789_s20 = smov %s4603_s22 }
 0x6a9   : > { %s6790_s21 = smov %s4607_s23  ;;  %s6791_s22 = smov %s6794_s25 }
 0x6aa   :  { %14 = sbr.rel (!%p12_p1) target bundleno = 6 (0x6), region = 136 }
 0x6ac   : > { %s6792_s23 = smov %s6786_s26 }

</bundles_post_ra>
